<compile_context>
chip_gen: v6e
topology: v6e:2x2x1
jax: 0.10.0
libtpu: 0.0.40
codegen_flags: <defaults>
</compile_context>

<pallas_src>
import functools
import numpy as np

import jax
import jax.numpy as jnp
from jax.experimental import pallas as pl
from jax.experimental.pallas import tpu as pltpu

VMEM_LIMIT_BYTES = 32 * 1024 * 1024   # safe scoped-VMEM request on v5e / v6e / v7x


def _pad_to_128(n):
    return ((n + 127) // 128) * 128


# ---------------------------------------------------------------------------
# Fused DialogueRNN recurrence kernel (single invocation, in-kernel time loop)
# ---------------------------------------------------------------------------
def _dialogue_rnn_kernel(feat_ref, spk_ref,
                         g_wf, g_ws, g_wh, g_bi, g_bh,      # global GRU cell
                         p_wf, p_wc, p_wh, p_bi, p_bh,      # party GRU cell
                         e_wi, e_wh, e_bi, e_bh,            # emotion GRU cell
                         attn_w,                            # 'general' attention transform
                         out_ref,
                         ss_ref, hist_ref, gprev_ref, eprev_ref,
                         *, T, B, P, G, Ps, E):
    f32 = jnp.float32
    dot = lambda a, b: jnp.dot(a, b, preferred_element_type=f32)

    def gru(gi, gh, h, H):
        # PyTorch nn.GRUCell: gate order (r, z, n); b_hn stays inside r * (.)
        r = jax.nn.sigmoid(gi[:, 0 * H:1 * H] + gh[:, 0 * H:1 * H])
        z = jax.nn.sigmoid(gi[:, 1 * H:2 * H] + gh[:, 1 * H:2 * H])
        n = jnp.tanh(gi[:, 2 * H:3 * H] + r * gh[:, 2 * H:3 * H])
        return n + z * (h - n)                                # == (1 - z) * n + z * h

    # zero initial state (matches the torch.zeros inits in DialogueRNN.forward)
    ss_ref[...] = jnp.zeros_like(ss_ref)
    hist_ref[...] = jnp.zeros_like(hist_ref)
    gprev_ref[...] = jnp.zeros_like(gprev_ref)
    eprev_ref[...] = jnp.zeros_like(eprev_ref)

    def step(t, carry):
        feat = feat_ref[t]                                    # (B, F)
        spk = spk_ref[t]                                      # (B, P) one-hot
        ss_prev = ss_ref[...]                                 # (P*B, Ps), party-major rows
        g_prev = gprev_ref[...]                               # (B, G)
        e_prev = eprev_ref[...]                               # (B, E)

        # selected last speaker state: one-hot blend (no gathers)
        sel_last = jnp.zeros((B, Ps), f32)
        for p in range(P):
            sel_last = sel_last + spk[:, p:p + 1] * ss_prev[p * B:(p + 1) * B]

        # -- 'general' attention over the global-state history (slots < t) --
        hist = hist_ref[...]                                  # (T, B, G); slots >= t are zero
        y = dot(feat, attn_w[...])                            # (B, G)
        scores = jnp.sum(hist * y[None, :, :], axis=-1)       # (T, B)
        s_idx = jax.lax.broadcasted_iota(jnp.int32, (T, B), 0)
        scores = jnp.where(s_idx < t, scores, -1e30)          # only existing history
        ex = jnp.exp(scores - jnp.max(scores, axis=0, keepdims=True))
        alpha = ex / jnp.sum(ex, axis=0, keepdims=True)       # exact softmax
        context = jnp.sum(alpha[:, :, None] * hist, axis=0)   # (B, G); exactly 0 at t == 0

        # -- global GRU cell (input concat replaced by two dots into fused gates) --
        gi_g = dot(feat, g_wf[...]) + dot(sel_last, g_ws[...]) + g_bi[...]
        gh_g = dot(g_prev, g_wh[...]) + g_bh[...]
        g_new = gru(gi_g, gh_g, g_prev, G)
        hist_ref[t] = g_new
        gprev_ref[...] = g_new

        # -- party GRU cell: shared input gates, hidden matmul batched over P*B rows --
        gi_p = dot(feat, p_wf[...]) + dot(context, p_wc[...]) + p_bi[...]   # (B, 3Ps pad)
        gi_all = jnp.concatenate([gi_p] * P, axis=0)                        # (P*B, 3Ps pad)
        gh_all = dot(ss_prev, p_wh[...]) + p_bh[...]                        # one MXU push
        upd_all = gru(gi_all, gh_all, ss_prev, Ps)                          # (P*B, Ps)

        # listener_state == False: non-speakers keep their previous state
        sel_ss = jnp.zeros((B, Ps), f32)
        new_rows = []
        for p in range(P):
            h_p = ss_prev[p * B:(p + 1) * B]
            u_p = upd_all[p * B:(p + 1) * B]
            spk_p = spk[:, p:p + 1]
            col = h_p + spk_p * (u_p - h_p)
            new_rows.append(col)
            sel_ss = sel_ss + spk_p * col
        ss_ref[...] = jnp.concatenate(new_rows, axis=0)

        # -- emotion GRU cell --
        gi_e = dot(sel_ss, e_wi[...]) + e_bi[...]
        gh_e = dot(e_prev, e_wh[...]) + e_bh[...]
        e_new = gru(gi_e, gh_e, e_prev, E)
        eprev_ref[...] = e_new
        out_ref[t] = e_new                                    # VMEM store; single HBM DMA at end
        return carry

    # fixed, short T -> fully unrolled in-kernel loop (LLO can overlap EUP/XLU/MXU
    # across adjacent steps; only the small recurrent state is truly serial)
    jax.lax.fori_loop(0, T, step, 0, unroll=True)


WEIGHT_NAMES = ('g_wf', 'g_ws', 'g_wh', 'g_bi', 'g_bh',
                'p_wf', 'p_wc', 'p_wh', 'p_bi', 'p_bh',
                'e_wi', 'e_wh', 'e_bi', 'e_bh',
                'attn_w')


def dialogue_rnn_forward(params, feature, speaker, args):
    """feature: (T, B, F), speaker: (T, B, P) one-hot -> emotions (T, B, E)."""
    T, B, F = feature.shape
    P = speaker.shape[-1]
    G, Ps, E = args['global_size'], args['party_size'], args['emotion_size']

    # pad batch to a sublane multiple so every matmul has >= 8 rows; padded
    # columns never interact with real ones (all mixing is per-batch-column)
    Bp = max(8, ((B + 7) // 8) * 8)
    feat_p = jnp.pad(feature, ((0, 0), (0, Bp - B), (0, 0)))
    spk_p = jnp.pad(speaker, ((0, 0), (0, Bp - B), (0, 0)))

    weights = [params[n] for n in WEIGHT_NAMES]

    full3 = lambda i: (0, 0, 0)
    full2 = lambda i: (0, 0)
    in_specs = ([pl.BlockSpec((T, Bp, F), full3),
                 pl.BlockSpec((T, Bp, P), full3)]
                + [pl.BlockSpec(w.shape, full2) for w in weights])

    kernel = functools.partial(_dialogue_rnn_kernel,
                               T=T, B=Bp, P=P, G=G, Ps=Ps, E=E)
    out = pl.pallas_call(
        kernel,
        out_shape=jax.ShapeDtypeStruct((T, Bp, E), jnp.float32),
        grid_spec=pltpu.PrefetchScalarGridSpec(
            num_scalar_prefetch=0,
            grid=(1,),                       # single invocation; recurrence is in-kernel
            in_specs=in_specs,
            out_specs=pl.BlockSpec((T, Bp, E), full3),
            scratch_shapes=[pltpu.VMEM((P * Bp, Ps), jnp.float32),   # speaker states
                            pltpu.VMEM((T, Bp, G), jnp.float32),     # global-state history
                            pltpu.VMEM((Bp, G), jnp.float32),        # g_{t-1}
                            pltpu.VMEM((Bp, E), jnp.float32)]),      # e_{t-1}
        compiler_params=pltpu.CompilerParams(
            dimension_semantics=("arbitrary",),
            vmem_limit_bytes=VMEM_LIMIT_BYTES),
    )(feat_p, spk_p, *weights)
    return out[:, :B, :]


# ---------------------------------------------------------------------------
# Pure-JAX reference (straight transcription of DialogueRNN.forward, eval mode)
# ---------------------------------------------------------------------------
def dialogue_rnn_reference(params, feature, speaker, args):
    T, B, F = feature.shape
    P = speaker.shape[-1]
    G, Ps, E = args['global_size'], args['party_size'], args['emotion_size']

    def gru(gi, gh, h, H):
        r = jax.nn.sigmoid(gi[:, 0 * H:1 * H] + gh[:, 0 * H:1 * H])
        z = jax.nn.sigmoid(gi[:, 1 * H:2 * H] + gh[:, 1 * H:2 * H])
        n = jnp.tanh(gi[:, 2 * H:3 * H] + r * gh[:, 2 * H:3 * H])
        return (1.0 - z) * n + z * h

    ss = jnp.zeros((B, P, Ps), jnp.float32)
    e_prev = jnp.zeros((B, E), jnp.float32)
    hist, emotions = [], []
    for t in range(T):
        feat, spk = feature[t], speaker[t]
        sel_last = jnp.einsum('bp,bph->bh', spk, ss)
        if t == 0:
            g_prev = jnp.zeros((B, G), jnp.float32)
            context = jnp.zeros((B, G), jnp.float32)
        else:
            h_arr = jnp.stack(hist, axis=0)                      # (t, B, G)
            g_prev = hist[-1]
            y = feat @ params['attn_w']                          # (B, G)
            scores = jnp.einsum('sbg,bg->bs', h_arr, y)          # (B, t)
            alpha = jax.nn.softmax(scores, axis=-1)
            context = jnp.einsum('bs,sbg->bg', alpha, h_arr)
        gi_g = feat @ params['g_wf'] + sel_last @ params['g_ws'] + params['g_bi']
        gh_g = g_prev @ params['g_wh'] + params['g_bh']
        g_new = gru(gi_g, gh_g, g_prev, G)
        hist.append(g_new)

        gi_p = feat @ params['p_wf'] + context @ params['p_wc'] + params['p_bi']
        upd = []
        for p in range(P):
            h_p = ss[:, p]
            gh_p = h_p @ params['p_wh'] + params['p_bh']
            upd.append(gru(gi_p, gh_p, h_p, Ps))
        upd = jnp.stack(upd, axis=1)                             # (B, P, Ps)
        ss = ss * (1.0 - spk[:, :, None]) + upd * spk[:, :, None]
        sel_ss = jnp.einsum('bp,bph->bh', spk, ss)

        gi_e = sel_ss @ params['e_wi'] + params['e_bi']
        gh_e = e_prev @ params['e_wh'] + params['e_bh']
        e_prev = gru(gi_e, gh_e, e_prev, E)
        emotions.append(e_prev)
    return jnp.stack(emotions, axis=0)


# ---------------------------------------------------------------------------
# Deterministic parameter initialization (shapes from the module's __init__)
# ---------------------------------------------------------------------------
def _pad_lanes(a, width):
    return jnp.pad(a, ((0, 0), (0, width - a.shape[1])))


def init_params(key, args):
    F, G, Ps, E = (args['feature_size'], args['global_size'],
                   args['party_size'], args['emotion_size'])
    scale = 0.1

    def gru_weights(k, in_splits, hidden):
        """Fused-gate (r|z|n) GRU weights, pre-transposed (in, 3H), lane-padded to 128.

        W_ih is row-split per input source so cat([a, b]) @ W == a @ W_a + b @ W_b
        (removes the per-step lane concatenation in the kernel)."""
        pad = _pad_to_128(3 * hidden)
        ks = jax.random.split(k, len(in_splits) + 3)
        wis = tuple(
            _pad_lanes(scale * jax.random.normal(ks[i], (d, 3 * hidden), jnp.float32), pad)
            for i, d in enumerate(in_splits))
        wh = _pad_lanes(scale * jax.random.normal(ks[-3], (hidden, 3 * hidden), jnp.float32), pad)
        bi = _pad_lanes(scale * jax.random.normal(ks[-2], (1, 3 * hidden), jnp.float32), pad)
        bh = _pad_lanes(scale * jax.random.normal(ks[-1], (1, 3 * hidden), jnp.float32), pad)
        return wis, wh, bi, bh

    kg, kp, ke, ka = jax.random.split(key, 4)
    (g_wf, g_ws), g_wh, g_bi, g_bh = gru_weights(kg, (F, Ps), G)   # global_cell(F+Ps -> G)
    (p_wf, p_wc), p_wh, p_bi, p_bh = gru_weights(kp, (F, G), Ps)   # party_cell(F+G -> Ps)
    (e_wi,), e_wh, e_bi, e_bh = gru_weights(ke, (Ps,), E)          # emotion_cell(Ps -> E)
    attn_w = scale * jax.random.normal(ka, (F, G), jnp.float32)    # 'general' transform (no bias)
    return dict(g_wf=g_wf, g_ws=g_ws, g_wh=g_wh, g_bi=g_bi, g_bh=g_bh,
                p_wf=p_wf, p_wc=p_wc, p_wh=p_wh, p_bi=p_bi, p_bh=p_bh,
                e_wi=e_wi, e_wh=e_wh, e_bi=e_bi, e_bh=e_bh,
                attn_w=attn_w)


# ---------------------------------------------------------------------------
# Main
# ---------------------------------------------------------------------------
if __name__ == "__main__":
    args = dict(feature_size=32, global_size=32, party_size=32,
                emotion_size=32, dropout_rate=0.1, listener_state=False)
    T, B, n_party = 8, 2, 2

    key = jax.random.PRNGKey(0)
    k_feat, k_spk, k_param = jax.random.split(key, 3)

    feature = jax.random.normal(k_feat, (T, B, args['feature_size']), jnp.float32)
    spk_idx = jax.random.randint(k_spk, (T, B), 0, n_party)
    speaker = jax.nn.one_hot(spk_idx, n_party, dtype=jnp.float32)       # (T, B, P)

    params = init_params(k_param, args)

    fwd = jax.jit(functools.partial(dialogue_rnn_forward, args=args))
    out = jax.block_until_ready(fwd(params, feature, speaker))

    ref = jax.jit(functools.partial(dialogue_rnn_reference, args=args))(
        params, feature, speaker)

    assert out.shape == (T, B, args['emotion_size'])
    assert bool(jnp.all(jnp.isfinite(out)))
    np.testing.assert_allclose(np.asarray(out), np.asarray(ref), rtol=2e-2, atol=2e-2)
    print("KERNEL_OK")
</pallas_src>

<mosaic_0001>
module attributes {stable_mosaic.version = 11 : i64} {
  func.func @_dialogue_rnn_kernel(%arg0: i32, %arg1: memref<8x8x32xf32, #tpu.memory_space<vmem>>, %arg2: memref<8x8x2xf32, #tpu.memory_space<vmem>>, %arg3: memref<32x128xf32, #tpu.memory_space<vmem>>, %arg4: memref<32x128xf32, #tpu.memory_space<vmem>>, %arg5: memref<32x128xf32, #tpu.memory_space<vmem>>, %arg6: memref<1x128xf32, #tpu.memory_space<vmem>>, %arg7: memref<1x128xf32, #tpu.memory_space<vmem>>, %arg8: memref<32x128xf32, #tpu.memory_space<vmem>>, %arg9: memref<32x128xf32, #tpu.memory_space<vmem>>, %arg10: memref<32x128xf32, #tpu.memory_space<vmem>>, %arg11: memref<1x128xf32, #tpu.memory_space<vmem>>, %arg12: memref<1x128xf32, #tpu.memory_space<vmem>>, %arg13: memref<32x128xf32, #tpu.memory_space<vmem>>, %arg14: memref<32x128xf32, #tpu.memory_space<vmem>>, %arg15: memref<1x128xf32, #tpu.memory_space<vmem>>, %arg16: memref<1x128xf32, #tpu.memory_space<vmem>>, %arg17: memref<32x32xf32, #tpu.memory_space<vmem>>, %arg18: memref<8x8x32xf32, #tpu.memory_space<vmem>>, %arg19: memref<16x32xf32, #tpu.memory_space<vmem>>, %arg20: memref<8x8x32xf32, #tpu.memory_space<vmem>>, %arg21: memref<8x32xf32, #tpu.memory_space<vmem>>, %arg22: memref<8x32xf32, #tpu.memory_space<vmem>>) attributes {dimension_semantics = [#tpu.dimension_semantics<arbitrary>], iteration_bounds = array<i64: 1>, scalar_prefetch = 0 : i64, scratch_operands = 4 : i64, tpu.core_type = #tpu.core_type<tc>, window_params = [{pipeline_mode = #tpu.pipeline_mode<synchronous>, transform_indices = @transform_0, window_bounds = array<i64: 8, 8, 32>}, {pipeline_mode = #tpu.pipeline_mode<synchronous>, transform_indices = @transform_1, window_bounds = array<i64: 8, 8, 2>}, {pipeline_mode = #tpu.pipeline_mode<synchronous>, transform_indices = @transform_2, window_bounds = array<i64: 32, 128>}, {pipeline_mode = #tpu.pipeline_mode<synchronous>, transform_indices = @transform_3, window_bounds = array<i64: 32, 128>}, {pipeline_mode = #tpu.pipeline_mode<synchronous>, transform_indices = @transform_4, window_bounds = array<i64: 32, 128>}, {pipeline_mode = #tpu.pipeline_mode<synchronous>, transform_indices = @transform_5, window_bounds = array<i64: 1, 128>}, {pipeline_mode = #tpu.pipeline_mode<synchronous>, transform_indices = @transform_6, window_bounds = array<i64: 1, 128>}, {pipeline_mode = #tpu.pipeline_mode<synchronous>, transform_indices = @transform_7, window_bounds = array<i64: 32, 128>}, {pipeline_mode = #tpu.pipeline_mode<synchronous>, transform_indices = @transform_8, window_bounds = array<i64: 32, 128>}, {pipeline_mode = #tpu.pipeline_mode<synchronous>, transform_indices = @transform_9, window_bounds = array<i64: 32, 128>}, {pipeline_mode = #tpu.pipeline_mode<synchronous>, transform_indices = @transform_10, window_bounds = array<i64: 1, 128>}, {pipeline_mode = #tpu.pipeline_mode<synchronous>, transform_indices = @transform_11, window_bounds = array<i64: 1, 128>}, {pipeline_mode = #tpu.pipeline_mode<synchronous>, transform_indices = @transform_12, window_bounds = array<i64: 32, 128>}, {pipeline_mode = #tpu.pipeline_mode<synchronous>, transform_indices = @transform_13, window_bounds = array<i64: 32, 128>}, {pipeline_mode = #tpu.pipeline_mode<synchronous>, transform_indices = @transform_14, window_bounds = array<i64: 1, 128>}, {pipeline_mode = #tpu.pipeline_mode<synchronous>, transform_indices = @transform_15, window_bounds = array<i64: 1, 128>}, {pipeline_mode = #tpu.pipeline_mode<synchronous>, transform_indices = @transform_16, window_bounds = array<i64: 32, 32>}, {pipeline_mode = #tpu.pipeline_mode<synchronous>, transform_indices = @transform_17, window_bounds = array<i64: 8, 8, 32>}]} {
    %cst = arith.constant 0.000000e+00 : f32
    %0 = vector.broadcast %cst : f32 to vector<16x32xf32>
    %c0 = arith.constant 0 : index
    %c0_0 = arith.constant 0 : index
    %1 = vector.load %arg19[%c0, %c0_0] : memref<16x32xf32, #tpu.memory_space<vmem>>, vector<16x32xf32>
    tpu.vector_store %arg19[%c0, %c0_0], %0 {strides = array<i32>} : memref<16x32xf32, #tpu.memory_space<vmem>>, vector<16x32xf32>,
    %cst_1 = arith.constant 0.000000e+00 : f32
    %2 = vector.broadcast %cst_1 : f32 to vector<8x8x32xf32>
    %c0_2 = arith.constant 0 : index
    %c0_3 = arith.constant 0 : index
    %c0_4 = arith.constant 0 : index
    %3 = vector.load %arg20[%c0_2, %c0_3, %c0_4] : memref<8x8x32xf32, #tpu.memory_space<vmem>>, vector<8x8x32xf32>
    tpu.vector_store %arg20[%c0_2, %c0_3, %c0_4], %2 {strides = array<i32>} : memref<8x8x32xf32, #tpu.memory_space<vmem>>, vector<8x8x32xf32>,
    %cst_5 = arith.constant 0.000000e+00 : f32
    %4 = vector.broadcast %cst_5 : f32 to vector<8x32xf32>
    %c0_6 = arith.constant 0 : index
    %c0_7 = arith.constant 0 : index
    %5 = vector.load %arg21[%c0_6, %c0_7] : memref<8x32xf32, #tpu.memory_space<vmem>>, vector<8x32xf32>
    tpu.vector_store %arg21[%c0_6, %c0_7], %4 {strides = array<i32>} : memref<8x32xf32, #tpu.memory_space<vmem>>, vector<8x32xf32>,
    %cst_8 = arith.constant 0.000000e+00 : f32
    %6 = vector.broadcast %cst_8 : f32 to vector<8x32xf32>
    %c0_9 = arith.constant 0 : index
    %c0_10 = arith.constant 0 : index
    %7 = vector.load %arg22[%c0_9, %c0_10] : memref<8x32xf32, #tpu.memory_space<vmem>>, vector<8x32xf32>
    tpu.vector_store %arg22[%c0_9, %c0_10], %6 {strides = array<i32>} : memref<8x32xf32, #tpu.memory_space<vmem>>, vector<8x32xf32>,
    %c0_i32 = arith.constant 0 : i32
    %8 = arith.index_cast %c0_i32 : i32 to index
    %c0_11 = arith.constant 0 : index
    %c0_12 = arith.constant 0 : index
    %9 = vector.load %arg1[%8, %c0_11, %c0_12] : memref<8x8x32xf32, #tpu.memory_space<vmem>>, vector<1x8x32xf32>
    %10 = vector.shape_cast %9 : vector<1x8x32xf32> to vector<8x32xf32>
    %11 = arith.index_cast %c0_i32 : i32 to index
    %c0_13 = arith.constant 0 : index
    %c0_14 = arith.constant 0 : index
    %12 = vector.load %arg2[%11, %c0_13, %c0_14] : memref<8x8x2xf32, #tpu.memory_space<vmem>>, vector<1x8x2xf32>
    %13 = vector.shape_cast %12 : vector<1x8x2xf32> to vector<8x2xf32>
    %c0_15 = arith.constant 0 : index
    %c0_16 = arith.constant 0 : index
    %14 = vector.load %arg19[%c0_15, %c0_16] : memref<16x32xf32, #tpu.memory_space<vmem>>, vector<16x32xf32>
    %c0_17 = arith.constant 0 : index
    %c0_18 = arith.constant 0 : index
    %15 = vector.load %arg21[%c0_17, %c0_18] : memref<8x32xf32, #tpu.memory_space<vmem>>, vector<8x32xf32>
    %c0_19 = arith.constant 0 : index
    %c0_20 = arith.constant 0 : index
    %16 = vector.load %arg22[%c0_19, %c0_20] : memref<8x32xf32, #tpu.memory_space<vmem>>, vector<8x32xf32>
    %cst_21 = arith.constant 0.000000e+00 : f32
    %17 = vector.broadcast %cst_21 : f32 to vector<8x32xf32>
    %18 = vector.extract_strided_slice %13 {offsets = [0, 0], sizes = [8, 1], strides = [1, 1]} : vector<8x2xf32> to vector<8x1xf32>
    %19 = vector.extract_strided_slice %14 {offsets = [0, 0], sizes = [8, 32], strides = [1, 1]} : vector<16x32xf32> to vector<8x32xf32>
    %20 = vector.broadcast %18 : vector<8x1xf32> to vector<8x32xf32>
    %21 = arith.mulf %20, %19 : vector<8x32xf32>
    %22 = arith.addf %17, %21 : vector<8x32xf32>
    %23 = vector.extract_strided_slice %13 {offsets = [0, 1], sizes = [8, 1], strides = [1, 1]} : vector<8x2xf32> to vector<8x1xf32>
    %24 = vector.extract_strided_slice %14 {offsets = [8, 0], sizes = [8, 32], strides = [1, 1]} : vector<16x32xf32> to vector<8x32xf32>
    %25 = vector.broadcast %23 : vector<8x1xf32> to vector<8x32xf32>
    %26 = arith.mulf %25, %24 : vector<8x32xf32>
    %27 = arith.addf %22, %26 : vector<8x32xf32>
    %c0_22 = arith.constant 0 : index
    %c0_23 = arith.constant 0 : index
    %c0_24 = arith.constant 0 : index
    %28 = vector.load %arg20[%c0_22, %c0_23, %c0_24] : memref<8x8x32xf32, #tpu.memory_space<vmem>>, vector<8x8x32xf32>
    %c0_25 = arith.constant 0 : index
    %c0_26 = arith.constant 0 : index
    %29 = vector.load %arg17[%c0_25, %c0_26] : memref<32x32xf32, #tpu.memory_space<vmem>>, vector<32x32xf32>
    %cst_27 = arith.constant dense<0.000000e+00> : vector<8x32xf32>
    %30 = tpu.matmul %10, %29, %cst_27 {dimension_numbers = #tpu.dot_dimension_numbers<[1], [0], [0], [1], [0, 0, 1, 1], [], []>} : vector<8x32xf32>, vector<32x32xf32>, vector<8x32xf32> -> vector<8x32xf32>
    %31 = vector.shape_cast %30 : vector<8x32xf32> to vector<1x8x32xf32>
    %32 = vector.broadcast %31 : vector<1x8x32xf32> to vector<8x8x32xf32>
    %33 = arith.mulf %28, %32 : vector<8x8x32xf32>
    %cst_28 = arith.constant dense<0.000000e+00> : vector<8x8xf32>
    %34 = vector.multi_reduction <add>, %33, %cst_28 [2] : vector<8x8x32xf32> to vector<8x8xf32>
    %35 = tpu.iota {dimensions = array<i32: 0>} : vector<8x8xi32>
    %36 = vector.broadcast %c0_i32 : i32 to vector<8x8xi32>
    %37 = arith.cmpi slt, %35, %36 : vector<8x8xi32>
    %cst_29 = arith.constant -1.000000e+30 : f32
    %38 = vector.broadcast %cst_29 : f32 to vector<8x8xf32>
    %39 = arith.select %37, %34, %38 : vector<8x8xi1>, vector<8x8xf32>
    %cst_30 = arith.constant dense<0xFF800000> : vector<8xf32>
    %40 = vector.multi_reduction <maximumf>, %39, %cst_30 [0] : vector<8x8xf32> to vector<8xf32>
    %41 = vector.shape_cast %40 : vector<8xf32> to vector<1x8xf32>
    %42 = vector.broadcast %41 : vector<1x8xf32> to vector<8x8xf32>
    %43 = arith.subf %39, %42 : vector<8x8xf32>
    %44 = math.exp %43 : vector<8x8xf32>
    %cst_31 = arith.constant dense<0.000000e+00> : vector<8xf32>
    %45 = vector.multi_reduction <add>, %44, %cst_31 [0] : vector<8x8xf32> to vector<8xf32>
    %46 = vector.shape_cast %45 : vector<8xf32> to vector<1x8xf32>
    %47 = vector.broadcast %46 : vector<1x8xf32> to vector<8x8xf32>
    %48 = arith.divf %44, %47 : vector<8x8xf32>
    %49 = vector.shape_cast %48 : vector<8x8xf32> to vector<8x8x1xf32>
    %50 = vector.broadcast %49 : vector<8x8x1xf32> to vector<8x8x32xf32>
    %51 = arith.mulf %50, %28 : vector<8x8x32xf32>
    %cst_32 = arith.constant dense<0.000000e+00> : vector<8x32xf32>
    %52 = vector.multi_reduction <add>, %51, %cst_32 [0] : vector<8x8x32xf32> to vector<8x32xf32>
    %c0_33 = arith.constant 0 : index
    %c0_34 = arith.constant 0 : index
    %53 = vector.load %arg3[%c0_33, %c0_34] : memref<32x128xf32, #tpu.memory_space<vmem>>, vector<32x128xf32>
    %cst_35 = arith.constant dense<0.000000e+00> : vector<8x128xf32>
    %54 = tpu.matmul %10, %53, %cst_35 {dimension_numbers = #tpu.dot_dimension_numbers<[1], [0], [0], [1], [0, 0, 1, 1], [], []>} : vector<8x32xf32>, vector<32x128xf32>, vector<8x128xf32> -> vector<8x128xf32>
    %c0_36 = arith.constant 0 : index
    %c0_37 = arith.constant 0 : index
    %55 = vector.load %arg4[%c0_36, %c0_37] : memref<32x128xf32, #tpu.memory_space<vmem>>, vector<32x128xf32>
    %cst_38 = arith.constant dense<0.000000e+00> : vector<8x128xf32>
    %56 = tpu.matmul %27, %55, %cst_38 {dimension_numbers = #tpu.dot_dimension_numbers<[1], [0], [0], [1], [0, 0, 1, 1], [], []>} : vector<8x32xf32>, vector<32x128xf32>, vector<8x128xf32> -> vector<8x128xf32>
    %57 = arith.addf %54, %56 : vector<8x128xf32>
    %c0_39 = arith.constant 0 : index
    %c0_40 = arith.constant 0 : index
    %58 = vector.load %arg6[%c0_39, %c0_40] : memref<1x128xf32, #tpu.memory_space<vmem>>, vector<1x128xf32>
    %59 = vector.broadcast %58 : vector<1x128xf32> to vector<8x128xf32>
    %60 = arith.addf %57, %59 : vector<8x128xf32>
    %c0_41 = arith.constant 0 : index
    %c0_42 = arith.constant 0 : index
    %61 = vector.load %arg5[%c0_41, %c0_42] : memref<32x128xf32, #tpu.memory_space<vmem>>, vector<32x128xf32>
    %cst_43 = arith.constant dense<0.000000e+00> : vector<8x128xf32>
    %62 = tpu.matmul %15, %61, %cst_43 {dimension_numbers = #tpu.dot_dimension_numbers<[1], [0], [0], [1], [0, 0, 1, 1], [], []>} : vector<8x32xf32>, vector<32x128xf32>, vector<8x128xf32> -> vector<8x128xf32>
    %c0_44 = arith.constant 0 : index
    %c0_45 = arith.constant 0 : index
    %63 = vector.load %arg7[%c0_44, %c0_45] : memref<1x128xf32, #tpu.memory_space<vmem>>, vector<1x128xf32>
    %64 = vector.broadcast %63 : vector<1x128xf32> to vector<8x128xf32>
    %65 = arith.addf %62, %64 : vector<8x128xf32>
    %66 = vector.extract_strided_slice %60 {offsets = [0, 0], sizes = [8, 32], strides = [1, 1]} : vector<8x128xf32> to vector<8x32xf32>
    %67 = vector.extract_strided_slice %65 {offsets = [0, 0], sizes = [8, 32], strides = [1, 1]} : vector<8x128xf32> to vector<8x32xf32>
    %68 = arith.addf %66, %67 : vector<8x32xf32>
    %69 = arith.negf %68 : vector<8x32xf32>
    %70 = math.exp %69 : vector<8x32xf32>
    %cst_46 = arith.constant 1.000000e+00 : f32
    %71 = vector.broadcast %cst_46 : f32 to vector<8x32xf32>
    %72 = arith.addf %71, %70 : vector<8x32xf32>
    %73 = arith.divf %71, %72 : vector<8x32xf32>
    %74 = vector.extract_strided_slice %60 {offsets = [0, 32], sizes = [8, 32], strides = [1, 1]} : vector<8x128xf32> to vector<8x32xf32>
    %75 = vector.extract_strided_slice %65 {offsets = [0, 32], sizes = [8, 32], strides = [1, 1]} : vector<8x128xf32> to vector<8x32xf32>
    %76 = arith.addf %74, %75 : vector<8x32xf32>
    %77 = arith.negf %76 : vector<8x32xf32>
    %78 = math.exp %77 : vector<8x32xf32>
    %cst_47 = arith.constant 1.000000e+00 : f32
    %79 = vector.broadcast %cst_47 : f32 to vector<8x32xf32>
    %80 = arith.addf %79, %78 : vector<8x32xf32>
    %81 = arith.divf %79, %80 : vector<8x32xf32>
    %82 = vector.extract_strided_slice %60 {offsets = [0, 64], sizes = [8, 32], strides = [1, 1]} : vector<8x128xf32> to vector<8x32xf32>
    %83 = vector.extract_strided_slice %65 {offsets = [0, 64], sizes = [8, 32], strides = [1, 1]} : vector<8x128xf32> to vector<8x32xf32>
    %84 = arith.mulf %73, %83 : vector<8x32xf32>
    %85 = arith.addf %82, %84 : vector<8x32xf32>
    %86 = math.tanh %85 : vector<8x32xf32>
    %87 = arith.subf %15, %86 : vector<8x32xf32>
    %88 = arith.mulf %81, %87 : vector<8x32xf32>
    %89 = arith.addf %86, %88 : vector<8x32xf32>
    %90 = arith.index_cast %c0_i32 : i32 to index
    %c0_48 = arith.constant 0 : index
    %c0_49 = arith.constant 0 : index
    %91 = vector.load %arg20[%90, %c0_48, %c0_49] : memref<8x8x32xf32, #tpu.memory_space<vmem>>, vector<1x8x32xf32>
    %92 = vector.shape_cast %91 : vector<1x8x32xf32> to vector<8x32xf32>
    %93 = vector.shape_cast %89 : vector<8x32xf32> to vector<1x8x32xf32>
    tpu.vector_store %arg20[%90, %c0_48, %c0_49], %93 {strides = array<i32>} : memref<8x8x32xf32, #tpu.memory_space<vmem>>, vector<1x8x32xf32>,
    %c0_50 = arith.constant 0 : index
    %c0_51 = arith.constant 0 : index
    %94 = vector.load %arg21[%c0_50, %c0_51] : memref<8x32xf32, #tpu.memory_space<vmem>>, vector<8x32xf32>
    tpu.vector_store %arg21[%c0_50, %c0_51], %89 {strides = array<i32>} : memref<8x32xf32, #tpu.memory_space<vmem>>, vector<8x32xf32>,
    %c0_52 = arith.constant 0 : index
    %c0_53 = arith.constant 0 : index
    %95 = vector.load %arg8[%c0_52, %c0_53] : memref<32x128xf32, #tpu.memory_space<vmem>>, vector<32x128xf32>
    %cst_54 = arith.constant dense<0.000000e+00> : vector<8x128xf32>
    %96 = tpu.matmul %10, %95, %cst_54 {dimension_numbers = #tpu.dot_dimension_numbers<[1], [0], [0], [1], [0, 0, 1, 1], [], []>} : vector<8x32xf32>, vector<32x128xf32>, vector<8x128xf32> -> vector<8x128xf32>
    %c0_55 = arith.constant 0 : index
    %c0_56 = arith.constant 0 : index
    %97 = vector.load %arg9[%c0_55, %c0_56] : memref<32x128xf32, #tpu.memory_space<vmem>>, vector<32x128xf32>
    %cst_57 = arith.constant dense<0.000000e+00> : vector<8x128xf32>
    %98 = tpu.matmul %52, %97, %cst_57 {dimension_numbers = #tpu.dot_dimension_numbers<[1], [0], [0], [1], [0, 0, 1, 1], [], []>} : vector<8x32xf32>, vector<32x128xf32>, vector<8x128xf32> -> vector<8x128xf32>
    %99 = arith.addf %96, %98 : vector<8x128xf32>
    %c0_58 = arith.constant 0 : index
    %c0_59 = arith.constant 0 : index
    %100 = vector.load %arg11[%c0_58, %c0_59] : memref<1x128xf32, #tpu.memory_space<vmem>>, vector<1x128xf32>
    %101 = vector.broadcast %100 : vector<1x128xf32> to vector<8x128xf32>
    %102 = arith.addf %99, %101 : vector<8x128xf32>
    %103 = tpu.concatenate %102, %102 in 0 : vector<8x128xf32>, vector<8x128xf32> -> vector<16x128xf32>
    %c0_60 = arith.constant 0 : index
    %c0_61 = arith.constant 0 : index
    %104 = vector.load %arg10[%c0_60, %c0_61] : memref<32x128xf32, #tpu.memory_space<vmem>>, vector<32x128xf32>
    %cst_62 = arith.constant dense<0.000000e+00> : vector<16x128xf32>
    %105 = tpu.matmul %14, %104, %cst_62 {dimension_numbers = #tpu.dot_dimension_numbers<[1], [0], [0], [1], [0, 0, 1, 1], [], []>} : vector<16x32xf32>, vector<32x128xf32>, vector<16x128xf32> -> vector<16x128xf32>
    %c0_63 = arith.constant 0 : index
    %c0_64 = arith.constant 0 : index
    %106 = vector.load %arg12[%c0_63, %c0_64] : memref<1x128xf32, #tpu.memory_space<vmem>>, vector<1x128xf32>
    %107 = vector.broadcast %106 : vector<1x128xf32> to vector<16x128xf32>
    %108 = arith.addf %105, %107 : vector<16x128xf32>
    %109 = vector.extract_strided_slice %103 {offsets = [0, 0], sizes = [16, 32], strides = [1, 1]} : vector<16x128xf32> to vector<16x32xf32>
    %110 = vector.extract_strided_slice %108 {offsets = [0, 0], sizes = [16, 32], strides = [1, 1]} : vector<16x128xf32> to vector<16x32xf32>
    %111 = arith.addf %109, %110 : vector<16x32xf32>
    %112 = arith.negf %111 : vector<16x32xf32>
    %113 = math.exp %112 : vector<16x32xf32>
    %cst_65 = arith.constant 1.000000e+00 : f32
    %114 = vector.broadcast %cst_65 : f32 to vector<16x32xf32>
    %115 = arith.addf %114, %113 : vector<16x32xf32>
    %116 = arith.divf %114, %115 : vector<16x32xf32>
    %117 = vector.extract_strided_slice %103 {offsets = [0, 32], sizes = [16, 32], strides = [1, 1]} : vector<16x128xf32> to vector<16x32xf32>
    %118 = vector.extract_strided_slice %108 {offsets = [0, 32], sizes = [16, 32], strides = [1, 1]} : vector<16x128xf32> to vector<16x32xf32>
    %119 = arith.addf %117, %118 : vector<16x32xf32>
    %120 = arith.negf %119 : vector<16x32xf32>
    %121 = math.exp %120 : vector<16x32xf32>
    %cst_66 = arith.constant 1.000000e+00 : f32
    %122 = vector.broadcast %cst_66 : f32 to vector<16x32xf32>
    %123 = arith.addf %122, %121 : vector<16x32xf32>
    %124 = arith.divf %122, %123 : vector<16x32xf32>
    %125 = vector.extract_strided_slice %103 {offsets = [0, 64], sizes = [16, 32], strides = [1, 1]} : vector<16x128xf32> to vector<16x32xf32>
    %126 = vector.extract_strided_slice %108 {offsets = [0, 64], sizes = [16, 32], strides = [1, 1]} : vector<16x128xf32> to vector<16x32xf32>
    %127 = arith.mulf %116, %126 : vector<16x32xf32>
    %128 = arith.addf %125, %127 : vector<16x32xf32>
    %129 = math.tanh %128 : vector<16x32xf32>
    %130 = arith.subf %14, %129 : vector<16x32xf32>
    %131 = arith.mulf %124, %130 : vector<16x32xf32>
    %132 = arith.addf %129, %131 : vector<16x32xf32>
    %cst_67 = arith.constant 0.000000e+00 : f32
    %133 = vector.broadcast %cst_67 : f32 to vector<8x32xf32>
    %134 = vector.extract_strided_slice %14 {offsets = [0, 0], sizes = [8, 32], strides = [1, 1]} : vector<16x32xf32> to vector<8x32xf32>
    %135 = vector.extract_strided_slice %132 {offsets = [0, 0], sizes = [8, 32], strides = [1, 1]} : vector<16x32xf32> to vector<8x32xf32>
    %136 = vector.extract_strided_slice %13 {offsets = [0, 0], sizes = [8, 1], strides = [1, 1]} : vector<8x2xf32> to vector<8x1xf32>
    %137 = arith.subf %135, %134 : vector<8x32xf32>
    %138 = vector.broadcast %136 : vector<8x1xf32> to vector<8x32xf32>
    %139 = arith.mulf %138, %137 : vector<8x32xf32>
    %140 = arith.addf %134, %139 : vector<8x32xf32>
    %141 = vector.broadcast %136 : vector<8x1xf32> to vector<8x32xf32>
    %142 = arith.mulf %141, %140 : vector<8x32xf32>
    %143 = arith.addf %133, %142 : vector<8x32xf32>
    %144 = vector.extract_strided_slice %14 {offsets = [8, 0], sizes = [8, 32], strides = [1, 1]} : vector<16x32xf32> to vector<8x32xf32>
    %145 = vector.extract_strided_slice %132 {offsets = [8, 0], sizes = [8, 32], strides = [1, 1]} : vector<16x32xf32> to vector<8x32xf32>
    %146 = vector.extract_strided_slice %13 {offsets = [0, 1], sizes = [8, 1], strides = [1, 1]} : vector<8x2xf32> to vector<8x1xf32>
    %147 = arith.subf %145, %144 : vector<8x32xf32>
    %148 = vector.broadcast %146 : vector<8x1xf32> to vector<8x32xf32>
    %149 = arith.mulf %148, %147 : vector<8x32xf32>
    %150 = arith.addf %144, %149 : vector<8x32xf32>
    %151 = vector.broadcast %146 : vector<8x1xf32> to vector<8x32xf32>
    %152 = arith.mulf %151, %150 : vector<8x32xf32>
    %153 = arith.addf %143, %152 : vector<8x32xf32>
    %154 = tpu.concatenate %140, %150 in 0 : vector<8x32xf32>, vector<8x32xf32> -> vector<16x32xf32>
    %c0_68 = arith.constant 0 : index
    %c0_69 = arith.constant 0 : index
    %155 = vector.load %arg19[%c0_68, %c0_69] : memref<16x32xf32, #tpu.memory_space<vmem>>, vector<16x32xf32>
    tpu.vector_store %arg19[%c0_68, %c0_69], %154 {strides = array<i32>} : memref<16x32xf32, #tpu.memory_space<vmem>>, vector<16x32xf32>,
    %c0_70 = arith.constant 0 : index
    %c0_71 = arith.constant 0 : index
    %156 = vector.load %arg13[%c0_70, %c0_71] : memref<32x128xf32, #tpu.memory_space<vmem>>, vector<32x128xf32>
    %cst_72 = arith.constant dense<0.000000e+00> : vector<8x128xf32>
    %157 = tpu.matmul %153, %156, %cst_72 {dimension_numbers = #tpu.dot_dimension_numbers<[1], [0], [0], [1], [0, 0, 1, 1], [], []>} : vector<8x32xf32>, vector<32x128xf32>, vector<8x128xf32> -> vector<8x128xf32>
    %c0_73 = arith.constant 0 : index
    %c0_74 = arith.constant 0 : index
    %158 = vector.load %arg15[%c0_73, %c0_74] : memref<1x128xf32, #tpu.memory_space<vmem>>, vector<1x128xf32>
    %159 = vector.broadcast %158 : vector<1x128xf32> to vector<8x128xf32>
    %160 = arith.addf %157, %159 : vector<8x128xf32>
    %c0_75 = arith.constant 0 : index
    %c0_76 = arith.constant 0 : index
    %161 = vector.load %arg14[%c0_75, %c0_76] : memref<32x128xf32, #tpu.memory_space<vmem>>, vector<32x128xf32>
    %cst_77 = arith.constant dense<0.000000e+00> : vector<8x128xf32>
    %162 = tpu.matmul %16, %161, %cst_77 {dimension_numbers = #tpu.dot_dimension_numbers<[1], [0], [0], [1], [0, 0, 1, 1], [], []>} : vector<8x32xf32>, vector<32x128xf32>, vector<8x128xf32> -> vector<8x128xf32>
    %c0_78 = arith.constant 0 : index
    %c0_79 = arith.constant 0 : index
    %163 = vector.load %arg16[%c0_78, %c0_79] : memref<1x128xf32, #tpu.memory_space<vmem>>, vector<1x128xf32>
    %164 = vector.broadcast %163 : vector<1x128xf32> to vector<8x128xf32>
    %165 = arith.addf %162, %164 : vector<8x128xf32>
    %166 = vector.extract_strided_slice %160 {offsets = [0, 0], sizes = [8, 32], strides = [1, 1]} : vector<8x128xf32> to vector<8x32xf32>
    %167 = vector.extract_strided_slice %165 {offsets = [0, 0], sizes = [8, 32], strides = [1, 1]} : vector<8x128xf32> to vector<8x32xf32>
    %168 = arith.addf %166, %167 : vector<8x32xf32>
    %169 = arith.negf %168 : vector<8x32xf32>
    %170 = math.exp %169 : vector<8x32xf32>
    %cst_80 = arith.constant 1.000000e+00 : f32
    %171 = vector.broadcast %cst_80 : f32 to vector<8x32xf32>
    %172 = arith.addf %171, %170 : vector<8x32xf32>
    %173 = arith.divf %171, %172 : vector<8x32xf32>
    %174 = vector.extract_strided_slice %160 {offsets = [0, 32], sizes = [8, 32], strides = [1, 1]} : vector<8x128xf32> to vector<8x32xf32>
    %175 = vector.extract_strided_slice %165 {offsets = [0, 32], sizes = [8, 32], strides = [1, 1]} : vector<8x128xf32> to vector<8x32xf32>
    %176 = arith.addf %174, %175 : vector<8x32xf32>
    %177 = arith.negf %176 : vector<8x32xf32>
    %178 = math.exp %177 : vector<8x32xf32>
    %cst_81 = arith.constant 1.000000e+00 : f32
    %179 = vector.broadcast %cst_81 : f32 to vector<8x32xf32>
    %180 = arith.addf %179, %178 : vector<8x32xf32>
    %181 = arith.divf %179, %180 : vector<8x32xf32>
    %182 = vector.extract_strided_slice %160 {offsets = [0, 64], sizes = [8, 32], strides = [1, 1]} : vector<8x128xf32> to vector<8x32xf32>
    %183 = vector.extract_strided_slice %165 {offsets = [0, 64], sizes = [8, 32], strides = [1, 1]} : vector<8x128xf32> to vector<8x32xf32>
    %184 = arith.mulf %173, %183 : vector<8x32xf32>
    %185 = arith.addf %182, %184 : vector<8x32xf32>
    %186 = math.tanh %185 : vector<8x32xf32>
    %187 = arith.subf %16, %186 : vector<8x32xf32>
    %188 = arith.mulf %181, %187 : vector<8x32xf32>
    %189 = arith.addf %186, %188 : vector<8x32xf32>
    %c0_82 = arith.constant 0 : index
    %c0_83 = arith.constant 0 : index
    %190 = vector.load %arg22[%c0_82, %c0_83] : memref<8x32xf32, #tpu.memory_space<vmem>>, vector<8x32xf32>
    tpu.vector_store %arg22[%c0_82, %c0_83], %189 {strides = array<i32>} : memref<8x32xf32, #tpu.memory_space<vmem>>, vector<8x32xf32>,
    %191 = arith.index_cast %c0_i32 : i32 to index
    %c0_84 = arith.constant 0 : index
    %c0_85 = arith.constant 0 : index
    %192 = vector.load %arg18[%191, %c0_84, %c0_85] : memref<8x8x32xf32, #tpu.memory_space<vmem>>, vector<1x8x32xf32>
    %193 = vector.shape_cast %192 : vector<1x8x32xf32> to vector<8x32xf32>
    %194 = vector.shape_cast %189 : vector<8x32xf32> to vector<1x8x32xf32>
    tpu.vector_store %arg18[%191, %c0_84, %c0_85], %194 {strides = array<i32>} : memref<8x8x32xf32, #tpu.memory_space<vmem>>, vector<1x8x32xf32>,
    %c1_i32 = arith.constant 1 : i32
    %195 = arith.index_cast %c1_i32 : i32 to index
    %c0_86 = arith.constant 0 : index
    %c0_87 = arith.constant 0 : index
    %196 = vector.load %arg1[%195, %c0_86, %c0_87] : memref<8x8x32xf32, #tpu.memory_space<vmem>>, vector<1x8x32xf32>
    %197 = vector.shape_cast %196 : vector<1x8x32xf32> to vector<8x32xf32>
    %198 = arith.index_cast %c1_i32 : i32 to index
    %c0_88 = arith.constant 0 : index
    %c0_89 = arith.constant 0 : index
    %199 = vector.load %arg2[%198, %c0_88, %c0_89] : memref<8x8x2xf32, #tpu.memory_space<vmem>>, vector<1x8x2xf32>
    %200 = vector.shape_cast %199 : vector<1x8x2xf32> to vector<8x2xf32>
    %c0_90 = arith.constant 0 : index
    %c0_91 = arith.constant 0 : index
    %201 = vector.load %arg19[%c0_90, %c0_91] : memref<16x32xf32, #tpu.memory_space<vmem>>, vector<16x32xf32>
    %c0_92 = arith.constant 0 : index
    %c0_93 = arith.constant 0 : index
    %202 = vector.load %arg21[%c0_92, %c0_93] : memref<8x32xf32, #tpu.memory_space<vmem>>, vector<8x32xf32>
    %c0_94 = arith.constant 0 : index
    %c0_95 = arith.constant 0 : index
    %203 = vector.load %arg22[%c0_94, %c0_95] : memref<8x32xf32, #tpu.memory_space<vmem>>, vector<8x32xf32>
    %cst_96 = arith.constant 0.000000e+00 : f32
    %204 = vector.broadcast %cst_96 : f32 to vector<8x32xf32>
    %205 = vector.extract_strided_slice %200 {offsets = [0, 0], sizes = [8, 1], strides = [1, 1]} : vector<8x2xf32> to vector<8x1xf32>
    %206 = vector.extract_strided_slice %201 {offsets = [0, 0], sizes = [8, 32], strides = [1, 1]} : vector<16x32xf32> to vector<8x32xf32>
    %207 = vector.broadcast %205 : vector<8x1xf32> to vector<8x32xf32>
    %208 = arith.mulf %207, %206 : vector<8x32xf32>
    %209 = arith.addf %204, %208 : vector<8x32xf32>
    %210 = vector.extract_strided_slice %200 {offsets = [0, 1], sizes = [8, 1], strides = [1, 1]} : vector<8x2xf32> to vector<8x1xf32>
    %211 = vector.extract_strided_slice %201 {offsets = [8, 0], sizes = [8, 32], strides = [1, 1]} : vector<16x32xf32> to vector<8x32xf32>
    %212 = vector.broadcast %210 : vector<8x1xf32> to vector<8x32xf32>
    %213 = arith.mulf %212, %211 : vector<8x32xf32>
    %214 = arith.addf %209, %213 : vector<8x32xf32>
    %c0_97 = arith.constant 0 : index
    %c0_98 = arith.constant 0 : index
    %c0_99 = arith.constant 0 : index
    %215 = vector.load %arg20[%c0_97, %c0_98, %c0_99] : memref<8x8x32xf32, #tpu.memory_space<vmem>>, vector<8x8x32xf32>
    %c0_100 = arith.constant 0 : index
    %c0_101 = arith.constant 0 : index
    %216 = vector.load %arg17[%c0_100, %c0_101] : memref<32x32xf32, #tpu.memory_space<vmem>>, vector<32x32xf32>
    %cst_102 = arith.constant dense<0.000000e+00> : vector<8x32xf32>
    %217 = tpu.matmul %197, %216, %cst_102 {dimension_numbers = #tpu.dot_dimension_numbers<[1], [0], [0], [1], [0, 0, 1, 1], [], []>} : vector<8x32xf32>, vector<32x32xf32>, vector<8x32xf32> -> vector<8x32xf32>
    %218 = vector.shape_cast %217 : vector<8x32xf32> to vector<1x8x32xf32>
    %219 = vector.broadcast %218 : vector<1x8x32xf32> to vector<8x8x32xf32>
    %220 = arith.mulf %215, %219 : vector<8x8x32xf32>
    %cst_103 = arith.constant dense<0.000000e+00> : vector<8x8xf32>
    %221 = vector.multi_reduction <add>, %220, %cst_103 [2] : vector<8x8x32xf32> to vector<8x8xf32>
    %222 = tpu.iota {dimensions = array<i32: 0>} : vector<8x8xi32>
    %223 = vector.broadcast %c1_i32 : i32 to vector<8x8xi32>
    %224 = arith.cmpi slt, %222, %223 : vector<8x8xi32>
    %cst_104 = arith.constant -1.000000e+30 : f32
    %225 = vector.broadcast %cst_104 : f32 to vector<8x8xf32>
    %226 = arith.select %224, %221, %225 : vector<8x8xi1>, vector<8x8xf32>
    %cst_105 = arith.constant dense<0xFF800000> : vector<8xf32>
    %227 = vector.multi_reduction <maximumf>, %226, %cst_105 [0] : vector<8x8xf32> to vector<8xf32>
    %228 = vector.shape_cast %227 : vector<8xf32> to vector<1x8xf32>
    %229 = vector.broadcast %228 : vector<1x8xf32> to vector<8x8xf32>
    %230 = arith.subf %226, %229 : vector<8x8xf32>
    %231 = math.exp %230 : vector<8x8xf32>
    %cst_106 = arith.constant dense<0.000000e+00> : vector<8xf32>
    %232 = vector.multi_reduction <add>, %231, %cst_106 [0] : vector<8x8xf32> to vector<8xf32>
    %233 = vector.shape_cast %232 : vector<8xf32> to vector<1x8xf32>
    %234 = vector.broadcast %233 : vector<1x8xf32> to vector<8x8xf32>
    %235 = arith.divf %231, %234 : vector<8x8xf32>
    %236 = vector.shape_cast %235 : vector<8x8xf32> to vector<8x8x1xf32>
    %237 = vector.broadcast %236 : vector<8x8x1xf32> to vector<8x8x32xf32>
    %238 = arith.mulf %237, %215 : vector<8x8x32xf32>
    %cst_107 = arith.constant dense<0.000000e+00> : vector<8x32xf32>
    %239 = vector.multi_reduction <add>, %238, %cst_107 [0] : vector<8x8x32xf32> to vector<8x32xf32>
    %c0_108 = arith.constant 0 : index
    %c0_109 = arith.constant 0 : index
    %240 = vector.load %arg3[%c0_108, %c0_109] : memref<32x128xf32, #tpu.memory_space<vmem>>, vector<32x128xf32>
    %cst_110 = arith.constant dense<0.000000e+00> : vector<8x128xf32>
    %241 = tpu.matmul %197, %240, %cst_110 {dimension_numbers = #tpu.dot_dimension_numbers<[1], [0], [0], [1], [0, 0, 1, 1], [], []>} : vector<8x32xf32>, vector<32x128xf32>, vector<8x128xf32> -> vector<8x128xf32>
    %c0_111 = arith.constant 0 : index
    %c0_112 = arith.constant 0 : index
    %242 = vector.load %arg4[%c0_111, %c0_112] : memref<32x128xf32, #tpu.memory_space<vmem>>, vector<32x128xf32>
    %cst_113 = arith.constant dense<0.000000e+00> : vector<8x128xf32>
    %243 = tpu.matmul %214, %242, %cst_113 {dimension_numbers = #tpu.dot_dimension_numbers<[1], [0], [0], [1], [0, 0, 1, 1], [], []>} : vector<8x32xf32>, vector<32x128xf32>, vector<8x128xf32> -> vector<8x128xf32>
    %244 = arith.addf %241, %243 : vector<8x128xf32>
    %c0_114 = arith.constant 0 : index
    %c0_115 = arith.constant 0 : index
    %245 = vector.load %arg6[%c0_114, %c0_115] : memref<1x128xf32, #tpu.memory_space<vmem>>, vector<1x128xf32>
    %246 = vector.broadcast %245 : vector<1x128xf32> to vector<8x128xf32>
    %247 = arith.addf %244, %246 : vector<8x128xf32>
    %c0_116 = arith.constant 0 : index
    %c0_117 = arith.constant 0 : index
    %248 = vector.load %arg5[%c0_116, %c0_117] : memref<32x128xf32, #tpu.memory_space<vmem>>, vector<32x128xf32>
    %cst_118 = arith.constant dense<0.000000e+00> : vector<8x128xf32>
    %249 = tpu.matmul %202, %248, %cst_118 {dimension_numbers = #tpu.dot_dimension_numbers<[1], [0], [0], [1], [0, 0, 1, 1], [], []>} : vector<8x32xf32>, vector<32x128xf32>, vector<8x128xf32> -> vector<8x128xf32>
    %c0_119 = arith.constant 0 : index
    %c0_120 = arith.constant 0 : index
    %250 = vector.load %arg7[%c0_119, %c0_120] : memref<1x128xf32, #tpu.memory_space<vmem>>, vector<1x128xf32>
    %251 = vector.broadcast %250 : vector<1x128xf32> to vector<8x128xf32>
    %252 = arith.addf %249, %251 : vector<8x128xf32>
    %253 = vector.extract_strided_slice %247 {offsets = [0, 0], sizes = [8, 32], strides = [1, 1]} : vector<8x128xf32> to vector<8x32xf32>
    %254 = vector.extract_strided_slice %252 {offsets = [0, 0], sizes = [8, 32], strides = [1, 1]} : vector<8x128xf32> to vector<8x32xf32>
    %255 = arith.addf %253, %254 : vector<8x32xf32>
    %256 = arith.negf %255 : vector<8x32xf32>
    %257 = math.exp %256 : vector<8x32xf32>
    %cst_121 = arith.constant 1.000000e+00 : f32
    %258 = vector.broadcast %cst_121 : f32 to vector<8x32xf32>
    %259 = arith.addf %258, %257 : vector<8x32xf32>
    %260 = arith.divf %258, %259 : vector<8x32xf32>
    %261 = vector.extract_strided_slice %247 {offsets = [0, 32], sizes = [8, 32], strides = [1, 1]} : vector<8x128xf32> to vector<8x32xf32>
    %262 = vector.extract_strided_slice %252 {offsets = [0, 32], sizes = [8, 32], strides = [1, 1]} : vector<8x128xf32> to vector<8x32xf32>
    %263 = arith.addf %261, %262 : vector<8x32xf32>
    %264 = arith.negf %263 : vector<8x32xf32>
    %265 = math.exp %264 : vector<8x32xf32>
    %cst_122 = arith.constant 1.000000e+00 : f32
    %266 = vector.broadcast %cst_122 : f32 to vector<8x32xf32>
    %267 = arith.addf %266, %265 : vector<8x32xf32>
    %268 = arith.divf %266, %267 : vector<8x32xf32>
    %269 = vector.extract_strided_slice %247 {offsets = [0, 64], sizes = [8, 32], strides = [1, 1]} : vector<8x128xf32> to vector<8x32xf32>
    %270 = vector.extract_strided_slice %252 {offsets = [0, 64], sizes = [8, 32], strides = [1, 1]} : vector<8x128xf32> to vector<8x32xf32>
    %271 = arith.mulf %260, %270 : vector<8x32xf32>
    %272 = arith.addf %269, %271 : vector<8x32xf32>
    %273 = math.tanh %272 : vector<8x32xf32>
    %274 = arith.subf %202, %273 : vector<8x32xf32>
    %275 = arith.mulf %268, %274 : vector<8x32xf32>
    %276 = arith.addf %273, %275 : vector<8x32xf32>
    %277 = arith.index_cast %c1_i32 : i32 to index
    %c0_123 = arith.constant 0 : index
    %c0_124 = arith.constant 0 : index
    %278 = vector.load %arg20[%277, %c0_123, %c0_124] : memref<8x8x32xf32, #tpu.memory_space<vmem>>, vector<1x8x32xf32>
    %279 = vector.shape_cast %278 : vector<1x8x32xf32> to vector<8x32xf32>
    %280 = vector.shape_cast %276 : vector<8x32xf32> to vector<1x8x32xf32>
    tpu.vector_store %arg20[%277, %c0_123, %c0_124], %280 {strides = array<i32>} : memref<8x8x32xf32, #tpu.memory_space<vmem>>, vector<1x8x32xf32>,
    %c0_125 = arith.constant 0 : index
    %c0_126 = arith.constant 0 : index
    %281 = vector.load %arg21[%c0_125, %c0_126] : memref<8x32xf32, #tpu.memory_space<vmem>>, vector<8x32xf32>
    tpu.vector_store %arg21[%c0_125, %c0_126], %276 {strides = array<i32>} : memref<8x32xf32, #tpu.memory_space<vmem>>, vector<8x32xf32>,
    %c0_127 = arith.constant 0 : index
    %c0_128 = arith.constant 0 : index
    %282 = vector.load %arg8[%c0_127, %c0_128] : memref<32x128xf32, #tpu.memory_space<vmem>>, vector<32x128xf32>
    %cst_129 = arith.constant dense<0.000000e+00> : vector<8x128xf32>
    %283 = tpu.matmul %197, %282, %cst_129 {dimension_numbers = #tpu.dot_dimension_numbers<[1], [0], [0], [1], [0, 0, 1, 1], [], []>} : vector<8x32xf32>, vector<32x128xf32>, vector<8x128xf32> -> vector<8x128xf32>
    %c0_130 = arith.constant 0 : index
    %c0_131 = arith.constant 0 : index
    %284 = vector.load %arg9[%c0_130, %c0_131] : memref<32x128xf32, #tpu.memory_space<vmem>>, vector<32x128xf32>
    %cst_132 = arith.constant dense<0.000000e+00> : vector<8x128xf32>
    %285 = tpu.matmul %239, %284, %cst_132 {dimension_numbers = #tpu.dot_dimension_numbers<[1], [0], [0], [1], [0, 0, 1, 1], [], []>} : vector<8x32xf32>, vector<32x128xf32>, vector<8x128xf32> -> vector<8x128xf32>
    %286 = arith.addf %283, %285 : vector<8x128xf32>
    %c0_133 = arith.constant 0 : index
    %c0_134 = arith.constant 0 : index
    %287 = vector.load %arg11[%c0_133, %c0_134] : memref<1x128xf32, #tpu.memory_space<vmem>>, vector<1x128xf32>
    %288 = vector.broadcast %287 : vector<1x128xf32> to vector<8x128xf32>
    %289 = arith.addf %286, %288 : vector<8x128xf32>
    %290 = tpu.concatenate %289, %289 in 0 : vector<8x128xf32>, vector<8x128xf32> -> vector<16x128xf32>
    %c0_135 = arith.constant 0 : index
    %c0_136 = arith.constant 0 : index
    %291 = vector.load %arg10[%c0_135, %c0_136] : memref<32x128xf32, #tpu.memory_space<vmem>>, vector<32x128xf32>
    %cst_137 = arith.constant dense<0.000000e+00> : vector<16x128xf32>
    %292 = tpu.matmul %201, %291, %cst_137 {dimension_numbers = #tpu.dot_dimension_numbers<[1], [0], [0], [1], [0, 0, 1, 1], [], []>} : vector<16x32xf32>, vector<32x128xf32>, vector<16x128xf32> -> vector<16x128xf32>
    %c0_138 = arith.constant 0 : index
    %c0_139 = arith.constant 0 : index
    %293 = vector.load %arg12[%c0_138, %c0_139] : memref<1x128xf32, #tpu.memory_space<vmem>>, vector<1x128xf32>
    %294 = vector.broadcast %293 : vector<1x128xf32> to vector<16x128xf32>
    %295 = arith.addf %292, %294 : vector<16x128xf32>
    %296 = vector.extract_strided_slice %290 {offsets = [0, 0], sizes = [16, 32], strides = [1, 1]} : vector<16x128xf32> to vector<16x32xf32>
    %297 = vector.extract_strided_slice %295 {offsets = [0, 0], sizes = [16, 32], strides = [1, 1]} : vector<16x128xf32> to vector<16x32xf32>
    %298 = arith.addf %296, %297 : vector<16x32xf32>
    %299 = arith.negf %298 : vector<16x32xf32>
    %300 = math.exp %299 : vector<16x32xf32>
    %cst_140 = arith.constant 1.000000e+00 : f32
    %301 = vector.broadcast %cst_140 : f32 to vector<16x32xf32>
    %302 = arith.addf %301, %300 : vector<16x32xf32>
    %303 = arith.divf %301, %302 : vector<16x32xf32>
    %304 = vector.extract_strided_slice %290 {offsets = [0, 32], sizes = [16, 32], strides = [1, 1]} : vector<16x128xf32> to vector<16x32xf32>
    %305 = vector.extract_strided_slice %295 {offsets = [0, 32], sizes = [16, 32], strides = [1, 1]} : vector<16x128xf32> to vector<16x32xf32>
    %306 = arith.addf %304, %305 : vector<16x32xf32>
    %307 = arith.negf %306 : vector<16x32xf32>
    %308 = math.exp %307 : vector<16x32xf32>
    %cst_141 = arith.constant 1.000000e+00 : f32
    %309 = vector.broadcast %cst_141 : f32 to vector<16x32xf32>
    %310 = arith.addf %309, %308 : vector<16x32xf32>
    %311 = arith.divf %309, %310 : vector<16x32xf32>
    %312 = vector.extract_strided_slice %290 {offsets = [0, 64], sizes = [16, 32], strides = [1, 1]} : vector<16x128xf32> to vector<16x32xf32>
    %313 = vector.extract_strided_slice %295 {offsets = [0, 64], sizes = [16, 32], strides = [1, 1]} : vector<16x128xf32> to vector<16x32xf32>
    %314 = arith.mulf %303, %313 : vector<16x32xf32>
    %315 = arith.addf %312, %314 : vector<16x32xf32>
    %316 = math.tanh %315 : vector<16x32xf32>
    %317 = arith.subf %201, %316 : vector<16x32xf32>
    %318 = arith.mulf %311, %317 : vector<16x32xf32>
    %319 = arith.addf %316, %318 : vector<16x32xf32>
    %cst_142 = arith.constant 0.000000e+00 : f32
    %320 = vector.broadcast %cst_142 : f32 to vector<8x32xf32>
    %321 = vector.extract_strided_slice %201 {offsets = [0, 0], sizes = [8, 32], strides = [1, 1]} : vector<16x32xf32> to vector<8x32xf32>
    %322 = vector.extract_strided_slice %319 {offsets = [0, 0], sizes = [8, 32], strides = [1, 1]} : vector<16x32xf32> to vector<8x32xf32>
    %323 = vector.extract_strided_slice %200 {offsets = [0, 0], sizes = [8, 1], strides = [1, 1]} : vector<8x2xf32> to vector<8x1xf32>
    %324 = arith.subf %322, %321 : vector<8x32xf32>
    %325 = vector.broadcast %323 : vector<8x1xf32> to vector<8x32xf32>
    %326 = arith.mulf %325, %324 : vector<8x32xf32>
    %327 = arith.addf %321, %326 : vector<8x32xf32>
    %328 = vector.broadcast %323 : vector<8x1xf32> to vector<8x32xf32>
    %329 = arith.mulf %328, %327 : vector<8x32xf32>
    %330 = arith.addf %320, %329 : vector<8x32xf32>
    %331 = vector.extract_strided_slice %201 {offsets = [8, 0], sizes = [8, 32], strides = [1, 1]} : vector<16x32xf32> to vector<8x32xf32>
    %332 = vector.extract_strided_slice %319 {offsets = [8, 0], sizes = [8, 32], strides = [1, 1]} : vector<16x32xf32> to vector<8x32xf32>
    %333 = vector.extract_strided_slice %200 {offsets = [0, 1], sizes = [8, 1], strides = [1, 1]} : vector<8x2xf32> to vector<8x1xf32>
    %334 = arith.subf %332, %331 : vector<8x32xf32>
    %335 = vector.broadcast %333 : vector<8x1xf32> to vector<8x32xf32>
    %336 = arith.mulf %335, %334 : vector<8x32xf32>
    %337 = arith.addf %331, %336 : vector<8x32xf32>
    %338 = vector.broadcast %333 : vector<8x1xf32> to vector<8x32xf32>
    %339 = arith.mulf %338, %337 : vector<8x32xf32>
    %340 = arith.addf %330, %339 : vector<8x32xf32>
    %341 = tpu.concatenate %327, %337 in 0 : vector<8x32xf32>, vector<8x32xf32> -> vector<16x32xf32>
    %c0_143 = arith.constant 0 : index
    %c0_144 = arith.constant 0 : index
    %342 = vector.load %arg19[%c0_143, %c0_144] : memref<16x32xf32, #tpu.memory_space<vmem>>, vector<16x32xf32>
    tpu.vector_store %arg19[%c0_143, %c0_144], %341 {strides = array<i32>} : memref<16x32xf32, #tpu.memory_space<vmem>>, vector<16x32xf32>,
    %c0_145 = arith.constant 0 : index
    %c0_146 = arith.constant 0 : index
    %343 = vector.load %arg13[%c0_145, %c0_146] : memref<32x128xf32, #tpu.memory_space<vmem>>, vector<32x128xf32>
    %cst_147 = arith.constant dense<0.000000e+00> : vector<8x128xf32>
    %344 = tpu.matmul %340, %343, %cst_147 {dimension_numbers = #tpu.dot_dimension_numbers<[1], [0], [0], [1], [0, 0, 1, 1], [], []>} : vector<8x32xf32>, vector<32x128xf32>, vector<8x128xf32> -> vector<8x128xf32>
    %c0_148 = arith.constant 0 : index
    %c0_149 = arith.constant 0 : index
    %345 = vector.load %arg15[%c0_148, %c0_149] : memref<1x128xf32, #tpu.memory_space<vmem>>, vector<1x128xf32>
    %346 = vector.broadcast %345 : vector<1x128xf32> to vector<8x128xf32>
    %347 = arith.addf %344, %346 : vector<8x128xf32>
    %c0_150 = arith.constant 0 : index
    %c0_151 = arith.constant 0 : index
    %348 = vector.load %arg14[%c0_150, %c0_151] : memref<32x128xf32, #tpu.memory_space<vmem>>, vector<32x128xf32>
    %cst_152 = arith.constant dense<0.000000e+00> : vector<8x128xf32>
    %349 = tpu.matmul %203, %348, %cst_152 {dimension_numbers = #tpu.dot_dimension_numbers<[1], [0], [0], [1], [0, 0, 1, 1], [], []>} : vector<8x32xf32>, vector<32x128xf32>, vector<8x128xf32> -> vector<8x128xf32>
    %c0_153 = arith.constant 0 : index
    %c0_154 = arith.constant 0 : index
    %350 = vector.load %arg16[%c0_153, %c0_154] : memref<1x128xf32, #tpu.memory_space<vmem>>, vector<1x128xf32>
    %351 = vector.broadcast %350 : vector<1x128xf32> to vector<8x128xf32>
    %352 = arith.addf %349, %351 : vector<8x128xf32>
    %353 = vector.extract_strided_slice %347 {offsets = [0, 0], sizes = [8, 32], strides = [1, 1]} : vector<8x128xf32> to vector<8x32xf32>
    %354 = vector.extract_strided_slice %352 {offsets = [0, 0], sizes = [8, 32], strides = [1, 1]} : vector<8x128xf32> to vector<8x32xf32>
    %355 = arith.addf %353, %354 : vector<8x32xf32>
    %356 = arith.negf %355 : vector<8x32xf32>
    %357 = math.exp %356 : vector<8x32xf32>
    %cst_155 = arith.constant 1.000000e+00 : f32
    %358 = vector.broadcast %cst_155 : f32 to vector<8x32xf32>
    %359 = arith.addf %358, %357 : vector<8x32xf32>
    %360 = arith.divf %358, %359 : vector<8x32xf32>
    %361 = vector.extract_strided_slice %347 {offsets = [0, 32], sizes = [8, 32], strides = [1, 1]} : vector<8x128xf32> to vector<8x32xf32>
    %362 = vector.extract_strided_slice %352 {offsets = [0, 32], sizes = [8, 32], strides = [1, 1]} : vector<8x128xf32> to vector<8x32xf32>
    %363 = arith.addf %361, %362 : vector<8x32xf32>
    %364 = arith.negf %363 : vector<8x32xf32>
    %365 = math.exp %364 : vector<8x32xf32>
    %cst_156 = arith.constant 1.000000e+00 : f32
    %366 = vector.broadcast %cst_156 : f32 to vector<8x32xf32>
    %367 = arith.addf %366, %365 : vector<8x32xf32>
    %368 = arith.divf %366, %367 : vector<8x32xf32>
    %369 = vector.extract_strided_slice %347 {offsets = [0, 64], sizes = [8, 32], strides = [1, 1]} : vector<8x128xf32> to vector<8x32xf32>
    %370 = vector.extract_strided_slice %352 {offsets = [0, 64], sizes = [8, 32], strides = [1, 1]} : vector<8x128xf32> to vector<8x32xf32>
    %371 = arith.mulf %360, %370 : vector<8x32xf32>
    %372 = arith.addf %369, %371 : vector<8x32xf32>
    %373 = math.tanh %372 : vector<8x32xf32>
    %374 = arith.subf %203, %373 : vector<8x32xf32>
    %375 = arith.mulf %368, %374 : vector<8x32xf32>
    %376 = arith.addf %373, %375 : vector<8x32xf32>
    %c0_157 = arith.constant 0 : index
    %c0_158 = arith.constant 0 : index
    %377 = vector.load %arg22[%c0_157, %c0_158] : memref<8x32xf32, #tpu.memory_space<vmem>>, vector<8x32xf32>
    tpu.vector_store %arg22[%c0_157, %c0_158], %376 {strides = array<i32>} : memref<8x32xf32, #tpu.memory_space<vmem>>, vector<8x32xf32>,
    %378 = arith.index_cast %c1_i32 : i32 to index
    %c0_159 = arith.constant 0 : index
    %c0_160 = arith.constant 0 : index
    %379 = vector.load %arg18[%378, %c0_159, %c0_160] : memref<8x8x32xf32, #tpu.memory_space<vmem>>, vector<1x8x32xf32>
    %380 = vector.shape_cast %379 : vector<1x8x32xf32> to vector<8x32xf32>
    %381 = vector.shape_cast %376 : vector<8x32xf32> to vector<1x8x32xf32>
    tpu.vector_store %arg18[%378, %c0_159, %c0_160], %381 {strides = array<i32>} : memref<8x8x32xf32, #tpu.memory_space<vmem>>, vector<1x8x32xf32>,
    %c2_i32 = arith.constant 2 : i32
    %382 = arith.index_cast %c2_i32 : i32 to index
    %c0_161 = arith.constant 0 : index
    %c0_162 = arith.constant 0 : index
    %383 = vector.load %arg1[%382, %c0_161, %c0_162] : memref<8x8x32xf32, #tpu.memory_space<vmem>>, vector<1x8x32xf32>
    %384 = vector.shape_cast %383 : vector<1x8x32xf32> to vector<8x32xf32>
    %385 = arith.index_cast %c2_i32 : i32 to index
    %c0_163 = arith.constant 0 : index
    %c0_164 = arith.constant 0 : index
    %386 = vector.load %arg2[%385, %c0_163, %c0_164] : memref<8x8x2xf32, #tpu.memory_space<vmem>>, vector<1x8x2xf32>
    %387 = vector.shape_cast %386 : vector<1x8x2xf32> to vector<8x2xf32>
    %c0_165 = arith.constant 0 : index
    %c0_166 = arith.constant 0 : index
    %388 = vector.load %arg19[%c0_165, %c0_166] : memref<16x32xf32, #tpu.memory_space<vmem>>, vector<16x32xf32>
    %c0_167 = arith.constant 0 : index
    %c0_168 = arith.constant 0 : index
    %389 = vector.load %arg21[%c0_167, %c0_168] : memref<8x32xf32, #tpu.memory_space<vmem>>, vector<8x32xf32>
    %c0_169 = arith.constant 0 : index
    %c0_170 = arith.constant 0 : index
    %390 = vector.load %arg22[%c0_169, %c0_170] : memref<8x32xf32, #tpu.memory_space<vmem>>, vector<8x32xf32>
    %cst_171 = arith.constant 0.000000e+00 : f32
    %391 = vector.broadcast %cst_171 : f32 to vector<8x32xf32>
    %392 = vector.extract_strided_slice %387 {offsets = [0, 0], sizes = [8, 1], strides = [1, 1]} : vector<8x2xf32> to vector<8x1xf32>
    %393 = vector.extract_strided_slice %388 {offsets = [0, 0], sizes = [8, 32], strides = [1, 1]} : vector<16x32xf32> to vector<8x32xf32>
    %394 = vector.broadcast %392 : vector<8x1xf32> to vector<8x32xf32>
    %395 = arith.mulf %394, %393 : vector<8x32xf32>
    %396 = arith.addf %391, %395 : vector<8x32xf32>
    %397 = vector.extract_strided_slice %387 {offsets = [0, 1], sizes = [8, 1], strides = [1, 1]} : vector<8x2xf32> to vector<8x1xf32>
    %398 = vector.extract_strided_slice %388 {offsets = [8, 0], sizes = [8, 32], strides = [1, 1]} : vector<16x32xf32> to vector<8x32xf32>
    %399 = vector.broadcast %397 : vector<8x1xf32> to vector<8x32xf32>
    %400 = arith.mulf %399, %398 : vector<8x32xf32>
    %401 = arith.addf %396, %400 : vector<8x32xf32>
    %c0_172 = arith.constant 0 : index
    %c0_173 = arith.constant 0 : index
    %c0_174 = arith.constant 0 : index
    %402 = vector.load %arg20[%c0_172, %c0_173, %c0_174] : memref<8x8x32xf32, #tpu.memory_space<vmem>>, vector<8x8x32xf32>
    %c0_175 = arith.constant 0 : index
    %c0_176 = arith.constant 0 : index
    %403 = vector.load %arg17[%c0_175, %c0_176] : memref<32x32xf32, #tpu.memory_space<vmem>>, vector<32x32xf32>
    %cst_177 = arith.constant dense<0.000000e+00> : vector<8x32xf32>
    %404 = tpu.matmul %384, %403, %cst_177 {dimension_numbers = #tpu.dot_dimension_numbers<[1], [0], [0], [1], [0, 0, 1, 1], [], []>} : vector<8x32xf32>, vector<32x32xf32>, vector<8x32xf32> -> vector<8x32xf32>
    %405 = vector.shape_cast %404 : vector<8x32xf32> to vector<1x8x32xf32>
    %406 = vector.broadcast %405 : vector<1x8x32xf32> to vector<8x8x32xf32>
    %407 = arith.mulf %402, %406 : vector<8x8x32xf32>
    %cst_178 = arith.constant dense<0.000000e+00> : vector<8x8xf32>
    %408 = vector.multi_reduction <add>, %407, %cst_178 [2] : vector<8x8x32xf32> to vector<8x8xf32>
    %409 = tpu.iota {dimensions = array<i32: 0>} : vector<8x8xi32>
    %410 = vector.broadcast %c2_i32 : i32 to vector<8x8xi32>
    %411 = arith.cmpi slt, %409, %410 : vector<8x8xi32>
    %cst_179 = arith.constant -1.000000e+30 : f32
    %412 = vector.broadcast %cst_179 : f32 to vector<8x8xf32>
    %413 = arith.select %411, %408, %412 : vector<8x8xi1>, vector<8x8xf32>
    %cst_180 = arith.constant dense<0xFF800000> : vector<8xf32>
    %414 = vector.multi_reduction <maximumf>, %413, %cst_180 [0] : vector<8x8xf32> to vector<8xf32>
    %415 = vector.shape_cast %414 : vector<8xf32> to vector<1x8xf32>
    %416 = vector.broadcast %415 : vector<1x8xf32> to vector<8x8xf32>
    %417 = arith.subf %413, %416 : vector<8x8xf32>
    %418 = math.exp %417 : vector<8x8xf32>
    %cst_181 = arith.constant dense<0.000000e+00> : vector<8xf32>
    %419 = vector.multi_reduction <add>, %418, %cst_181 [0] : vector<8x8xf32> to vector<8xf32>
    %420 = vector.shape_cast %419 : vector<8xf32> to vector<1x8xf32>
    %421 = vector.broadcast %420 : vector<1x8xf32> to vector<8x8xf32>
    %422 = arith.divf %418, %421 : vector<8x8xf32>
    %423 = vector.shape_cast %422 : vector<8x8xf32> to vector<8x8x1xf32>
    %424 = vector.broadcast %423 : vector<8x8x1xf32> to vector<8x8x32xf32>
    %425 = arith.mulf %424, %402 : vector<8x8x32xf32>
    %cst_182 = arith.constant dense<0.000000e+00> : vector<8x32xf32>
    %426 = vector.multi_reduction <add>, %425, %cst_182 [0] : vector<8x8x32xf32> to vector<8x32xf32>
    %c0_183 = arith.constant 0 : index
    %c0_184 = arith.constant 0 : index
    %427 = vector.load %arg3[%c0_183, %c0_184] : memref<32x128xf32, #tpu.memory_space<vmem>>, vector<32x128xf32>
    %cst_185 = arith.constant dense<0.000000e+00> : vector<8x128xf32>
    %428 = tpu.matmul %384, %427, %cst_185 {dimension_numbers = #tpu.dot_dimension_numbers<[1], [0], [0], [1], [0, 0, 1, 1], [], []>} : vector<8x32xf32>, vector<32x128xf32>, vector<8x128xf32> -> vector<8x128xf32>
    %c0_186 = arith.constant 0 : index
    %c0_187 = arith.constant 0 : index
    %429 = vector.load %arg4[%c0_186, %c0_187] : memref<32x128xf32, #tpu.memory_space<vmem>>, vector<32x128xf32>
    %cst_188 = arith.constant dense<0.000000e+00> : vector<8x128xf32>
    %430 = tpu.matmul %401, %429, %cst_188 {dimension_numbers = #tpu.dot_dimension_numbers<[1], [0], [0], [1], [0, 0, 1, 1], [], []>} : vector<8x32xf32>, vector<32x128xf32>, vector<8x128xf32> -> vector<8x128xf32>
    %431 = arith.addf %428, %430 : vector<8x128xf32>
    %c0_189 = arith.constant 0 : index
    %c0_190 = arith.constant 0 : index
    %432 = vector.load %arg6[%c0_189, %c0_190] : memref<1x128xf32, #tpu.memory_space<vmem>>, vector<1x128xf32>
    %433 = vector.broadcast %432 : vector<1x128xf32> to vector<8x128xf32>
    %434 = arith.addf %431, %433 : vector<8x128xf32>
    %c0_191 = arith.constant 0 : index
    %c0_192 = arith.constant 0 : index
    %435 = vector.load %arg5[%c0_191, %c0_192] : memref<32x128xf32, #tpu.memory_space<vmem>>, vector<32x128xf32>
    %cst_193 = arith.constant dense<0.000000e+00> : vector<8x128xf32>
    %436 = tpu.matmul %389, %435, %cst_193 {dimension_numbers = #tpu.dot_dimension_numbers<[1], [0], [0], [1], [0, 0, 1, 1], [], []>} : vector<8x32xf32>, vector<32x128xf32>, vector<8x128xf32> -> vector<8x128xf32>
    %c0_194 = arith.constant 0 : index
    %c0_195 = arith.constant 0 : index
    %437 = vector.load %arg7[%c0_194, %c0_195] : memref<1x128xf32, #tpu.memory_space<vmem>>, vector<1x128xf32>
    %438 = vector.broadcast %437 : vector<1x128xf32> to vector<8x128xf32>
    %439 = arith.addf %436, %438 : vector<8x128xf32>
    %440 = vector.extract_strided_slice %434 {offsets = [0, 0], sizes = [8, 32], strides = [1, 1]} : vector<8x128xf32> to vector<8x32xf32>
    %441 = vector.extract_strided_slice %439 {offsets = [0, 0], sizes = [8, 32], strides = [1, 1]} : vector<8x128xf32> to vector<8x32xf32>
    %442 = arith.addf %440, %441 : vector<8x32xf32>
    %443 = arith.negf %442 : vector<8x32xf32>
    %444 = math.exp %443 : vector<8x32xf32>
    %cst_196 = arith.constant 1.000000e+00 : f32
    %445 = vector.broadcast %cst_196 : f32 to vector<8x32xf32>
    %446 = arith.addf %445, %444 : vector<8x32xf32>
    %447 = arith.divf %445, %446 : vector<8x32xf32>
    %448 = vector.extract_strided_slice %434 {offsets = [0, 32], sizes = [8, 32], strides = [1, 1]} : vector<8x128xf32> to vector<8x32xf32>
    %449 = vector.extract_strided_slice %439 {offsets = [0, 32], sizes = [8, 32], strides = [1, 1]} : vector<8x128xf32> to vector<8x32xf32>
    %450 = arith.addf %448, %449 : vector<8x32xf32>
    %451 = arith.negf %450 : vector<8x32xf32>
    %452 = math.exp %451 : vector<8x32xf32>
    %cst_197 = arith.constant 1.000000e+00 : f32
    %453 = vector.broadcast %cst_197 : f32 to vector<8x32xf32>
    %454 = arith.addf %453, %452 : vector<8x32xf32>
    %455 = arith.divf %453, %454 : vector<8x32xf32>
    %456 = vector.extract_strided_slice %434 {offsets = [0, 64], sizes = [8, 32], strides = [1, 1]} : vector<8x128xf32> to vector<8x32xf32>
    %457 = vector.extract_strided_slice %439 {offsets = [0, 64], sizes = [8, 32], strides = [1, 1]} : vector<8x128xf32> to vector<8x32xf32>
    %458 = arith.mulf %447, %457 : vector<8x32xf32>
    %459 = arith.addf %456, %458 : vector<8x32xf32>
    %460 = math.tanh %459 : vector<8x32xf32>
    %461 = arith.subf %389, %460 : vector<8x32xf32>
    %462 = arith.mulf %455, %461 : vector<8x32xf32>
    %463 = arith.addf %460, %462 : vector<8x32xf32>
    %464 = arith.index_cast %c2_i32 : i32 to index
    %c0_198 = arith.constant 0 : index
    %c0_199 = arith.constant 0 : index
    %465 = vector.load %arg20[%464, %c0_198, %c0_199] : memref<8x8x32xf32, #tpu.memory_space<vmem>>, vector<1x8x32xf32>
    %466 = vector.shape_cast %465 : vector<1x8x32xf32> to vector<8x32xf32>
    %467 = vector.shape_cast %463 : vector<8x32xf32> to vector<1x8x32xf32>
    tpu.vector_store %arg20[%464, %c0_198, %c0_199], %467 {strides = array<i32>} : memref<8x8x32xf32, #tpu.memory_space<vmem>>, vector<1x8x32xf32>,
    %c0_200 = arith.constant 0 : index
    %c0_201 = arith.constant 0 : index
    %468 = vector.load %arg21[%c0_200, %c0_201] : memref<8x32xf32, #tpu.memory_space<vmem>>, vector<8x32xf32>
    tpu.vector_store %arg21[%c0_200, %c0_201], %463 {strides = array<i32>} : memref<8x32xf32, #tpu.memory_space<vmem>>, vector<8x32xf32>,
    %c0_202 = arith.constant 0 : index
    %c0_203 = arith.constant 0 : index
    %469 = vector.load %arg8[%c0_202, %c0_203] : memref<32x128xf32, #tpu.memory_space<vmem>>, vector<32x128xf32>
    %cst_204 = arith.constant dense<0.000000e+00> : vector<8x128xf32>
    %470 = tpu.matmul %384, %469, %cst_204 {dimension_numbers = #tpu.dot_dimension_numbers<[1], [0], [0], [1], [0, 0, 1, 1], [], []>} : vector<8x32xf32>, vector<32x128xf32>, vector<8x128xf32> -> vector<8x128xf32>
    %c0_205 = arith.constant 0 : index
    %c0_206 = arith.constant 0 : index
    %471 = vector.load %arg9[%c0_205, %c0_206] : memref<32x128xf32, #tpu.memory_space<vmem>>, vector<32x128xf32>
    %cst_207 = arith.constant dense<0.000000e+00> : vector<8x128xf32>
    %472 = tpu.matmul %426, %471, %cst_207 {dimension_numbers = #tpu.dot_dimension_numbers<[1], [0], [0], [1], [0, 0, 1, 1], [], []>} : vector<8x32xf32>, vector<32x128xf32>, vector<8x128xf32> -> vector<8x128xf32>
    %473 = arith.addf %470, %472 : vector<8x128xf32>
    %c0_208 = arith.constant 0 : index
    %c0_209 = arith.constant 0 : index
    %474 = vector.load %arg11[%c0_208, %c0_209] : memref<1x128xf32, #tpu.memory_space<vmem>>, vector<1x128xf32>
    %475 = vector.broadcast %474 : vector<1x128xf32> to vector<8x128xf32>
    %476 = arith.addf %473, %475 : vector<8x128xf32>
    %477 = tpu.concatenate %476, %476 in 0 : vector<8x128xf32>, vector<8x128xf32> -> vector<16x128xf32>
    %c0_210 = arith.constant 0 : index
    %c0_211 = arith.constant 0 : index
    %478 = vector.load %arg10[%c0_210, %c0_211] : memref<32x128xf32, #tpu.memory_space<vmem>>, vector<32x128xf32>
    %cst_212 = arith.constant dense<0.000000e+00> : vector<16x128xf32>
    %479 = tpu.matmul %388, %478, %cst_212 {dimension_numbers = #tpu.dot_dimension_numbers<[1], [0], [0], [1], [0, 0, 1, 1], [], []>} : vector<16x32xf32>, vector<32x128xf32>, vector<16x128xf32> -> vector<16x128xf32>
    %c0_213 = arith.constant 0 : index
    %c0_214 = arith.constant 0 : index
    %480 = vector.load %arg12[%c0_213, %c0_214] : memref<1x128xf32, #tpu.memory_space<vmem>>, vector<1x128xf32>
    %481 = vector.broadcast %480 : vector<1x128xf32> to vector<16x128xf32>
    %482 = arith.addf %479, %481 : vector<16x128xf32>
    %483 = vector.extract_strided_slice %477 {offsets = [0, 0], sizes = [16, 32], strides = [1, 1]} : vector<16x128xf32> to vector<16x32xf32>
    %484 = vector.extract_strided_slice %482 {offsets = [0, 0], sizes = [16, 32], strides = [1, 1]} : vector<16x128xf32> to vector<16x32xf32>
    %485 = arith.addf %483, %484 : vector<16x32xf32>
    %486 = arith.negf %485 : vector<16x32xf32>
    %487 = math.exp %486 : vector<16x32xf32>
    %cst_215 = arith.constant 1.000000e+00 : f32
    %488 = vector.broadcast %cst_215 : f32 to vector<16x32xf32>
    %489 = arith.addf %488, %487 : vector<16x32xf32>
    %490 = arith.divf %488, %489 : vector<16x32xf32>
    %491 = vector.extract_strided_slice %477 {offsets = [0, 32], sizes = [16, 32], strides = [1, 1]} : vector<16x128xf32> to vector<16x32xf32>
    %492 = vector.extract_strided_slice %482 {offsets = [0, 32], sizes = [16, 32], strides = [1, 1]} : vector<16x128xf32> to vector<16x32xf32>
    %493 = arith.addf %491, %492 : vector<16x32xf32>
    %494 = arith.negf %493 : vector<16x32xf32>
    %495 = math.exp %494 : vector<16x32xf32>
    %cst_216 = arith.constant 1.000000e+00 : f32
    %496 = vector.broadcast %cst_216 : f32 to vector<16x32xf32>
    %497 = arith.addf %496, %495 : vector<16x32xf32>
    %498 = arith.divf %496, %497 : vector<16x32xf32>
    %499 = vector.extract_strided_slice %477 {offsets = [0, 64], sizes = [16, 32], strides = [1, 1]} : vector<16x128xf32> to vector<16x32xf32>
    %500 = vector.extract_strided_slice %482 {offsets = [0, 64], sizes = [16, 32], strides = [1, 1]} : vector<16x128xf32> to vector<16x32xf32>
    %501 = arith.mulf %490, %500 : vector<16x32xf32>
    %502 = arith.addf %499, %501 : vector<16x32xf32>
    %503 = math.tanh %502 : vector<16x32xf32>
    %504 = arith.subf %388, %503 : vector<16x32xf32>
    %505 = arith.mulf %498, %504 : vector<16x32xf32>
    %506 = arith.addf %503, %505 : vector<16x32xf32>
    %cst_217 = arith.constant 0.000000e+00 : f32
    %507 = vector.broadcast %cst_217 : f32 to vector<8x32xf32>
    %508 = vector.extract_strided_slice %388 {offsets = [0, 0], sizes = [8, 32], strides = [1, 1]} : vector<16x32xf32> to vector<8x32xf32>
    %509 = vector.extract_strided_slice %506 {offsets = [0, 0], sizes = [8, 32], strides = [1, 1]} : vector<16x32xf32> to vector<8x32xf32>
    %510 = vector.extract_strided_slice %387 {offsets = [0, 0], sizes = [8, 1], strides = [1, 1]} : vector<8x2xf32> to vector<8x1xf32>
    %511 = arith.subf %509, %508 : vector<8x32xf32>
    %512 = vector.broadcast %510 : vector<8x1xf32> to vector<8x32xf32>
    %513 = arith.mulf %512, %511 : vector<8x32xf32>
    %514 = arith.addf %508, %513 : vector<8x32xf32>
    %515 = vector.broadcast %510 : vector<8x1xf32> to vector<8x32xf32>
    %516 = arith.mulf %515, %514 : vector<8x32xf32>
    %517 = arith.addf %507, %516 : vector<8x32xf32>
    %518 = vector.extract_strided_slice %388 {offsets = [8, 0], sizes = [8, 32], strides = [1, 1]} : vector<16x32xf32> to vector<8x32xf32>
    %519 = vector.extract_strided_slice %506 {offsets = [8, 0], sizes = [8, 32], strides = [1, 1]} : vector<16x32xf32> to vector<8x32xf32>
    %520 = vector.extract_strided_slice %387 {offsets = [0, 1], sizes = [8, 1], strides = [1, 1]} : vector<8x2xf32> to vector<8x1xf32>
    %521 = arith.subf %519, %518 : vector<8x32xf32>
    %522 = vector.broadcast %520 : vector<8x1xf32> to vector<8x32xf32>
    %523 = arith.mulf %522, %521 : vector<8x32xf32>
    %524 = arith.addf %518, %523 : vector<8x32xf32>
    %525 = vector.broadcast %520 : vector<8x1xf32> to vector<8x32xf32>
    %526 = arith.mulf %525, %524 : vector<8x32xf32>
    %527 = arith.addf %517, %526 : vector<8x32xf32>
    %528 = tpu.concatenate %514, %524 in 0 : vector<8x32xf32>, vector<8x32xf32> -> vector<16x32xf32>
    %c0_218 = arith.constant 0 : index
    %c0_219 = arith.constant 0 : index
    %529 = vector.load %arg19[%c0_218, %c0_219] : memref<16x32xf32, #tpu.memory_space<vmem>>, vector<16x32xf32>
    tpu.vector_store %arg19[%c0_218, %c0_219], %528 {strides = array<i32>} : memref<16x32xf32, #tpu.memory_space<vmem>>, vector<16x32xf32>,
    %c0_220 = arith.constant 0 : index
    %c0_221 = arith.constant 0 : index
    %530 = vector.load %arg13[%c0_220, %c0_221] : memref<32x128xf32, #tpu.memory_space<vmem>>, vector<32x128xf32>
    %cst_222 = arith.constant dense<0.000000e+00> : vector<8x128xf32>
    %531 = tpu.matmul %527, %530, %cst_222 {dimension_numbers = #tpu.dot_dimension_numbers<[1], [0], [0], [1], [0, 0, 1, 1], [], []>} : vector<8x32xf32>, vector<32x128xf32>, vector<8x128xf32> -> vector<8x128xf32>
    %c0_223 = arith.constant 0 : index
    %c0_224 = arith.constant 0 : index
    %532 = vector.load %arg15[%c0_223, %c0_224] : memref<1x128xf32, #tpu.memory_space<vmem>>, vector<1x128xf32>
    %533 = vector.broadcast %532 : vector<1x128xf32> to vector<8x128xf32>
    %534 = arith.addf %531, %533 : vector<8x128xf32>
    %c0_225 = arith.constant 0 : index
    %c0_226 = arith.constant 0 : index
    %535 = vector.load %arg14[%c0_225, %c0_226] : memref<32x128xf32, #tpu.memory_space<vmem>>, vector<32x128xf32>
    %cst_227 = arith.constant dense<0.000000e+00> : vector<8x128xf32>
    %536 = tpu.matmul %390, %535, %cst_227 {dimension_numbers = #tpu.dot_dimension_numbers<[1], [0], [0], [1], [0, 0, 1, 1], [], []>} : vector<8x32xf32>, vector<32x128xf32>, vector<8x128xf32> -> vector<8x128xf32>
    %c0_228 = arith.constant 0 : index
    %c0_229 = arith.constant 0 : index
    %537 = vector.load %arg16[%c0_228, %c0_229] : memref<1x128xf32, #tpu.memory_space<vmem>>, vector<1x128xf32>
    %538 = vector.broadcast %537 : vector<1x128xf32> to vector<8x128xf32>
    %539 = arith.addf %536, %538 : vector<8x128xf32>
    %540 = vector.extract_strided_slice %534 {offsets = [0, 0], sizes = [8, 32], strides = [1, 1]} : vector<8x128xf32> to vector<8x32xf32>
    %541 = vector.extract_strided_slice %539 {offsets = [0, 0], sizes = [8, 32], strides = [1, 1]} : vector<8x128xf32> to vector<8x32xf32>
    %542 = arith.addf %540, %541 : vector<8x32xf32>
    %543 = arith.negf %542 : vector<8x32xf32>
    %544 = math.exp %543 : vector<8x32xf32>
    %cst_230 = arith.constant 1.000000e+00 : f32
    %545 = vector.broadcast %cst_230 : f32 to vector<8x32xf32>
    %546 = arith.addf %545, %544 : vector<8x32xf32>
    %547 = arith.divf %545, %546 : vector<8x32xf32>
    %548 = vector.extract_strided_slice %534 {offsets = [0, 32], sizes = [8, 32], strides = [1, 1]} : vector<8x128xf32> to vector<8x32xf32>
    %549 = vector.extract_strided_slice %539 {offsets = [0, 32], sizes = [8, 32], strides = [1, 1]} : vector<8x128xf32> to vector<8x32xf32>
    %550 = arith.addf %548, %549 : vector<8x32xf32>
    %551 = arith.negf %550 : vector<8x32xf32>
    %552 = math.exp %551 : vector<8x32xf32>
    %cst_231 = arith.constant 1.000000e+00 : f32
    %553 = vector.broadcast %cst_231 : f32 to vector<8x32xf32>
    %554 = arith.addf %553, %552 : vector<8x32xf32>
    %555 = arith.divf %553, %554 : vector<8x32xf32>
    %556 = vector.extract_strided_slice %534 {offsets = [0, 64], sizes = [8, 32], strides = [1, 1]} : vector<8x128xf32> to vector<8x32xf32>
    %557 = vector.extract_strided_slice %539 {offsets = [0, 64], sizes = [8, 32], strides = [1, 1]} : vector<8x128xf32> to vector<8x32xf32>
    %558 = arith.mulf %547, %557 : vector<8x32xf32>
    %559 = arith.addf %556, %558 : vector<8x32xf32>
    %560 = math.tanh %559 : vector<8x32xf32>
    %561 = arith.subf %390, %560 : vector<8x32xf32>
    %562 = arith.mulf %555, %561 : vector<8x32xf32>
    %563 = arith.addf %560, %562 : vector<8x32xf32>
    %c0_232 = arith.constant 0 : index
    %c0_233 = arith.constant 0 : index
    %564 = vector.load %arg22[%c0_232, %c0_233] : memref<8x32xf32, #tpu.memory_space<vmem>>, vector<8x32xf32>
    tpu.vector_store %arg22[%c0_232, %c0_233], %563 {strides = array<i32>} : memref<8x32xf32, #tpu.memory_space<vmem>>, vector<8x32xf32>,
    %565 = arith.index_cast %c2_i32 : i32 to index
    %c0_234 = arith.constant 0 : index
    %c0_235 = arith.constant 0 : index
    %566 = vector.load %arg18[%565, %c0_234, %c0_235] : memref<8x8x32xf32, #tpu.memory_space<vmem>>, vector<1x8x32xf32>
    %567 = vector.shape_cast %566 : vector<1x8x32xf32> to vector<8x32xf32>
    %568 = vector.shape_cast %563 : vector<8x32xf32> to vector<1x8x32xf32>
    tpu.vector_store %arg18[%565, %c0_234, %c0_235], %568 {strides = array<i32>} : memref<8x8x32xf32, #tpu.memory_space<vmem>>, vector<1x8x32xf32>,
    %c3_i32 = arith.constant 3 : i32
    %569 = arith.index_cast %c3_i32 : i32 to index
    %c0_236 = arith.constant 0 : index
    %c0_237 = arith.constant 0 : index
    %570 = vector.load %arg1[%569, %c0_236, %c0_237] : memref<8x8x32xf32, #tpu.memory_space<vmem>>, vector<1x8x32xf32>
    %571 = vector.shape_cast %570 : vector<1x8x32xf32> to vector<8x32xf32>
    %572 = arith.index_cast %c3_i32 : i32 to index
    %c0_238 = arith.constant 0 : index
    %c0_239 = arith.constant 0 : index
    %573 = vector.load %arg2[%572, %c0_238, %c0_239] : memref<8x8x2xf32, #tpu.memory_space<vmem>>, vector<1x8x2xf32>
    %574 = vector.shape_cast %573 : vector<1x8x2xf32> to vector<8x2xf32>
    %c0_240 = arith.constant 0 : index
    %c0_241 = arith.constant 0 : index
    %575 = vector.load %arg19[%c0_240, %c0_241] : memref<16x32xf32, #tpu.memory_space<vmem>>, vector<16x32xf32>
    %c0_242 = arith.constant 0 : index
    %c0_243 = arith.constant 0 : index
    %576 = vector.load %arg21[%c0_242, %c0_243] : memref<8x32xf32, #tpu.memory_space<vmem>>, vector<8x32xf32>
    %c0_244 = arith.constant 0 : index
    %c0_245 = arith.constant 0 : index
    %577 = vector.load %arg22[%c0_244, %c0_245] : memref<8x32xf32, #tpu.memory_space<vmem>>, vector<8x32xf32>
    %cst_246 = arith.constant 0.000000e+00 : f32
    %578 = vector.broadcast %cst_246 : f32 to vector<8x32xf32>
    %579 = vector.extract_strided_slice %574 {offsets = [0, 0], sizes = [8, 1], strides = [1, 1]} : vector<8x2xf32> to vector<8x1xf32>
    %580 = vector.extract_strided_slice %575 {offsets = [0, 0], sizes = [8, 32], strides = [1, 1]} : vector<16x32xf32> to vector<8x32xf32>
    %581 = vector.broadcast %579 : vector<8x1xf32> to vector<8x32xf32>
    %582 = arith.mulf %581, %580 : vector<8x32xf32>
    %583 = arith.addf %578, %582 : vector<8x32xf32>
    %584 = vector.extract_strided_slice %574 {offsets = [0, 1], sizes = [8, 1], strides = [1, 1]} : vector<8x2xf32> to vector<8x1xf32>
    %585 = vector.extract_strided_slice %575 {offsets = [8, 0], sizes = [8, 32], strides = [1, 1]} : vector<16x32xf32> to vector<8x32xf32>
    %586 = vector.broadcast %584 : vector<8x1xf32> to vector<8x32xf32>
    %587 = arith.mulf %586, %585 : vector<8x32xf32>
    %588 = arith.addf %583, %587 : vector<8x32xf32>
    %c0_247 = arith.constant 0 : index
    %c0_248 = arith.constant 0 : index
    %c0_249 = arith.constant 0 : index
    %589 = vector.load %arg20[%c0_247, %c0_248, %c0_249] : memref<8x8x32xf32, #tpu.memory_space<vmem>>, vector<8x8x32xf32>
    %c0_250 = arith.constant 0 : index
    %c0_251 = arith.constant 0 : index
    %590 = vector.load %arg17[%c0_250, %c0_251] : memref<32x32xf32, #tpu.memory_space<vmem>>, vector<32x32xf32>
    %cst_252 = arith.constant dense<0.000000e+00> : vector<8x32xf32>
    %591 = tpu.matmul %571, %590, %cst_252 {dimension_numbers = #tpu.dot_dimension_numbers<[1], [0], [0], [1], [0, 0, 1, 1], [], []>} : vector<8x32xf32>, vector<32x32xf32>, vector<8x32xf32> -> vector<8x32xf32>
    %592 = vector.shape_cast %591 : vector<8x32xf32> to vector<1x8x32xf32>
    %593 = vector.broadcast %592 : vector<1x8x32xf32> to vector<8x8x32xf32>
    %594 = arith.mulf %589, %593 : vector<8x8x32xf32>
    %cst_253 = arith.constant dense<0.000000e+00> : vector<8x8xf32>
    %595 = vector.multi_reduction <add>, %594, %cst_253 [2] : vector<8x8x32xf32> to vector<8x8xf32>
    %596 = tpu.iota {dimensions = array<i32: 0>} : vector<8x8xi32>
    %597 = vector.broadcast %c3_i32 : i32 to vector<8x8xi32>
    %598 = arith.cmpi slt, %596, %597 : vector<8x8xi32>
    %cst_254 = arith.constant -1.000000e+30 : f32
    %599 = vector.broadcast %cst_254 : f32 to vector<8x8xf32>
    %600 = arith.select %598, %595, %599 : vector<8x8xi1>, vector<8x8xf32>
    %cst_255 = arith.constant dense<0xFF800000> : vector<8xf32>
    %601 = vector.multi_reduction <maximumf>, %600, %cst_255 [0] : vector<8x8xf32> to vector<8xf32>
    %602 = vector.shape_cast %601 : vector<8xf32> to vector<1x8xf32>
    %603 = vector.broadcast %602 : vector<1x8xf32> to vector<8x8xf32>
    %604 = arith.subf %600, %603 : vector<8x8xf32>
    %605 = math.exp %604 : vector<8x8xf32>
    %cst_256 = arith.constant dense<0.000000e+00> : vector<8xf32>
    %606 = vector.multi_reduction <add>, %605, %cst_256 [0] : vector<8x8xf32> to vector<8xf32>
    %607 = vector.shape_cast %606 : vector<8xf32> to vector<1x8xf32>
    %608 = vector.broadcast %607 : vector<1x8xf32> to vector<8x8xf32>
    %609 = arith.divf %605, %608 : vector<8x8xf32>
    %610 = vector.shape_cast %609 : vector<8x8xf32> to vector<8x8x1xf32>
    %611 = vector.broadcast %610 : vector<8x8x1xf32> to vector<8x8x32xf32>
    %612 = arith.mulf %611, %589 : vector<8x8x32xf32>
    %cst_257 = arith.constant dense<0.000000e+00> : vector<8x32xf32>
    %613 = vector.multi_reduction <add>, %612, %cst_257 [0] : vector<8x8x32xf32> to vector<8x32xf32>
    %c0_258 = arith.constant 0 : index
    %c0_259 = arith.constant 0 : index
    %614 = vector.load %arg3[%c0_258, %c0_259] : memref<32x128xf32, #tpu.memory_space<vmem>>, vector<32x128xf32>
    %cst_260 = arith.constant dense<0.000000e+00> : vector<8x128xf32>
    %615 = tpu.matmul %571, %614, %cst_260 {dimension_numbers = #tpu.dot_dimension_numbers<[1], [0], [0], [1], [0, 0, 1, 1], [], []>} : vector<8x32xf32>, vector<32x128xf32>, vector<8x128xf32> -> vector<8x128xf32>
    %c0_261 = arith.constant 0 : index
    %c0_262 = arith.constant 0 : index
    %616 = vector.load %arg4[%c0_261, %c0_262] : memref<32x128xf32, #tpu.memory_space<vmem>>, vector<32x128xf32>
    %cst_263 = arith.constant dense<0.000000e+00> : vector<8x128xf32>
    %617 = tpu.matmul %588, %616, %cst_263 {dimension_numbers = #tpu.dot_dimension_numbers<[1], [0], [0], [1], [0, 0, 1, 1], [], []>} : vector<8x32xf32>, vector<32x128xf32>, vector<8x128xf32> -> vector<8x128xf32>
    %618 = arith.addf %615, %617 : vector<8x128xf32>
    %c0_264 = arith.constant 0 : index
    %c0_265 = arith.constant 0 : index
    %619 = vector.load %arg6[%c0_264, %c0_265] : memref<1x128xf32, #tpu.memory_space<vmem>>, vector<1x128xf32>
    %620 = vector.broadcast %619 : vector<1x128xf32> to vector<8x128xf32>
    %621 = arith.addf %618, %620 : vector<8x128xf32>
    %c0_266 = arith.constant 0 : index
    %c0_267 = arith.constant 0 : index
    %622 = vector.load %arg5[%c0_266, %c0_267] : memref<32x128xf32, #tpu.memory_space<vmem>>, vector<32x128xf32>
    %cst_268 = arith.constant dense<0.000000e+00> : vector<8x128xf32>
    %623 = tpu.matmul %576, %622, %cst_268 {dimension_numbers = #tpu.dot_dimension_numbers<[1], [0], [0], [1], [0, 0, 1, 1], [], []>} : vector<8x32xf32>, vector<32x128xf32>, vector<8x128xf32> -> vector<8x128xf32>
    %c0_269 = arith.constant 0 : index
    %c0_270 = arith.constant 0 : index
    %624 = vector.load %arg7[%c0_269, %c0_270] : memref<1x128xf32, #tpu.memory_space<vmem>>, vector<1x128xf32>
    %625 = vector.broadcast %624 : vector<1x128xf32> to vector<8x128xf32>
    %626 = arith.addf %623, %625 : vector<8x128xf32>
    %627 = vector.extract_strided_slice %621 {offsets = [0, 0], sizes = [8, 32], strides = [1, 1]} : vector<8x128xf32> to vector<8x32xf32>
    %628 = vector.extract_strided_slice %626 {offsets = [0, 0], sizes = [8, 32], strides = [1, 1]} : vector<8x128xf32> to vector<8x32xf32>
    %629 = arith.addf %627, %628 : vector<8x32xf32>
    %630 = arith.negf %629 : vector<8x32xf32>
    %631 = math.exp %630 : vector<8x32xf32>
    %cst_271 = arith.constant 1.000000e+00 : f32
    %632 = vector.broadcast %cst_271 : f32 to vector<8x32xf32>
    %633 = arith.addf %632, %631 : vector<8x32xf32>
    %634 = arith.divf %632, %633 : vector<8x32xf32>
    %635 = vector.extract_strided_slice %621 {offsets = [0, 32], sizes = [8, 32], strides = [1, 1]} : vector<8x128xf32> to vector<8x32xf32>
    %636 = vector.extract_strided_slice %626 {offsets = [0, 32], sizes = [8, 32], strides = [1, 1]} : vector<8x128xf32> to vector<8x32xf32>
    %637 = arith.addf %635, %636 : vector<8x32xf32>
    %638 = arith.negf %637 : vector<8x32xf32>
    %639 = math.exp %638 : vector<8x32xf32>
    %cst_272 = arith.constant 1.000000e+00 : f32
    %640 = vector.broadcast %cst_272 : f32 to vector<8x32xf32>
    %641 = arith.addf %640, %639 : vector<8x32xf32>
    %642 = arith.divf %640, %641 : vector<8x32xf32>
    %643 = vector.extract_strided_slice %621 {offsets = [0, 64], sizes = [8, 32], strides = [1, 1]} : vector<8x128xf32> to vector<8x32xf32>
    %644 = vector.extract_strided_slice %626 {offsets = [0, 64], sizes = [8, 32], strides = [1, 1]} : vector<8x128xf32> to vector<8x32xf32>
    %645 = arith.mulf %634, %644 : vector<8x32xf32>
    %646 = arith.addf %643, %645 : vector<8x32xf32>
    %647 = math.tanh %646 : vector<8x32xf32>
    %648 = arith.subf %576, %647 : vector<8x32xf32>
    %649 = arith.mulf %642, %648 : vector<8x32xf32>
    %650 = arith.addf %647, %649 : vector<8x32xf32>
    %651 = arith.index_cast %c3_i32 : i32 to index
    %c0_273 = arith.constant 0 : index
    %c0_274 = arith.constant 0 : index
    %652 = vector.load %arg20[%651, %c0_273, %c0_274] : memref<8x8x32xf32, #tpu.memory_space<vmem>>, vector<1x8x32xf32>
    %653 = vector.shape_cast %652 : vector<1x8x32xf32> to vector<8x32xf32>
    %654 = vector.shape_cast %650 : vector<8x32xf32> to vector<1x8x32xf32>
    tpu.vector_store %arg20[%651, %c0_273, %c0_274], %654 {strides = array<i32>} : memref<8x8x32xf32, #tpu.memory_space<vmem>>, vector<1x8x32xf32>,
    %c0_275 = arith.constant 0 : index
    %c0_276 = arith.constant 0 : index
    %655 = vector.load %arg21[%c0_275, %c0_276] : memref<8x32xf32, #tpu.memory_space<vmem>>, vector<8x32xf32>
    tpu.vector_store %arg21[%c0_275, %c0_276], %650 {strides = array<i32>} : memref<8x32xf32, #tpu.memory_space<vmem>>, vector<8x32xf32>,
    %c0_277 = arith.constant 0 : index
    %c0_278 = arith.constant 0 : index
    %656 = vector.load %arg8[%c0_277, %c0_278] : memref<32x128xf32, #tpu.memory_space<vmem>>, vector<32x128xf32>
    %cst_279 = arith.constant dense<0.000000e+00> : vector<8x128xf32>
    %657 = tpu.matmul %571, %656, %cst_279 {dimension_numbers = #tpu.dot_dimension_numbers<[1], [0], [0], [1], [0, 0, 1, 1], [], []>} : vector<8x32xf32>, vector<32x128xf32>, vector<8x128xf32> -> vector<8x128xf32>
    %c0_280 = arith.constant 0 : index
    %c0_281 = arith.constant 0 : index
    %658 = vector.load %arg9[%c0_280, %c0_281] : memref<32x128xf32, #tpu.memory_space<vmem>>, vector<32x128xf32>
    %cst_282 = arith.constant dense<0.000000e+00> : vector<8x128xf32>
    %659 = tpu.matmul %613, %658, %cst_282 {dimension_numbers = #tpu.dot_dimension_numbers<[1], [0], [0], [1], [0, 0, 1, 1], [], []>} : vector<8x32xf32>, vector<32x128xf32>, vector<8x128xf32> -> vector<8x128xf32>
    %660 = arith.addf %657, %659 : vector<8x128xf32>
    %c0_283 = arith.constant 0 : index
    %c0_284 = arith.constant 0 : index
    %661 = vector.load %arg11[%c0_283, %c0_284] : memref<1x128xf32, #tpu.memory_space<vmem>>, vector<1x128xf32>
    %662 = vector.broadcast %661 : vector<1x128xf32> to vector<8x128xf32>
    %663 = arith.addf %660, %662 : vector<8x128xf32>
    %664 = tpu.concatenate %663, %663 in 0 : vector<8x128xf32>, vector<8x128xf32> -> vector<16x128xf32>
    %c0_285 = arith.constant 0 : index
    %c0_286 = arith.constant 0 : index
    %665 = vector.load %arg10[%c0_285, %c0_286] : memref<32x128xf32, #tpu.memory_space<vmem>>, vector<32x128xf32>
    %cst_287 = arith.constant dense<0.000000e+00> : vector<16x128xf32>
    %666 = tpu.matmul %575, %665, %cst_287 {dimension_numbers = #tpu.dot_dimension_numbers<[1], [0], [0], [1], [0, 0, 1, 1], [], []>} : vector<16x32xf32>, vector<32x128xf32>, vector<16x128xf32> -> vector<16x128xf32>
    %c0_288 = arith.constant 0 : index
    %c0_289 = arith.constant 0 : index
    %667 = vector.load %arg12[%c0_288, %c0_289] : memref<1x128xf32, #tpu.memory_space<vmem>>, vector<1x128xf32>
    %668 = vector.broadcast %667 : vector<1x128xf32> to vector<16x128xf32>
    %669 = arith.addf %666, %668 : vector<16x128xf32>
    %670 = vector.extract_strided_slice %664 {offsets = [0, 0], sizes = [16, 32], strides = [1, 1]} : vector<16x128xf32> to vector<16x32xf32>
    %671 = vector.extract_strided_slice %669 {offsets = [0, 0], sizes = [16, 32], strides = [1, 1]} : vector<16x128xf32> to vector<16x32xf32>
    %672 = arith.addf %670, %671 : vector<16x32xf32>
    %673 = arith.negf %672 : vector<16x32xf32>
    %674 = math.exp %673 : vector<16x32xf32>
    %cst_290 = arith.constant 1.000000e+00 : f32
    %675 = vector.broadcast %cst_290 : f32 to vector<16x32xf32>
    %676 = arith.addf %675, %674 : vector<16x32xf32>
    %677 = arith.divf %675, %676 : vector<16x32xf32>
    %678 = vector.extract_strided_slice %664 {offsets = [0, 32], sizes = [16, 32], strides = [1, 1]} : vector<16x128xf32> to vector<16x32xf32>
    %679 = vector.extract_strided_slice %669 {offsets = [0, 32], sizes = [16, 32], strides = [1, 1]} : vector<16x128xf32> to vector<16x32xf32>
    %680 = arith.addf %678, %679 : vector<16x32xf32>
    %681 = arith.negf %680 : vector<16x32xf32>
    %682 = math.exp %681 : vector<16x32xf32>
    %cst_291 = arith.constant 1.000000e+00 : f32
    %683 = vector.broadcast %cst_291 : f32 to vector<16x32xf32>
    %684 = arith.addf %683, %682 : vector<16x32xf32>
    %685 = arith.divf %683, %684 : vector<16x32xf32>
    %686 = vector.extract_strided_slice %664 {offsets = [0, 64], sizes = [16, 32], strides = [1, 1]} : vector<16x128xf32> to vector<16x32xf32>
    %687 = vector.extract_strided_slice %669 {offsets = [0, 64], sizes = [16, 32], strides = [1, 1]} : vector<16x128xf32> to vector<16x32xf32>
    %688 = arith.mulf %677, %687 : vector<16x32xf32>
    %689 = arith.addf %686, %688 : vector<16x32xf32>
    %690 = math.tanh %689 : vector<16x32xf32>
    %691 = arith.subf %575, %690 : vector<16x32xf32>
    %692 = arith.mulf %685, %691 : vector<16x32xf32>
    %693 = arith.addf %690, %692 : vector<16x32xf32>
    %cst_292 = arith.constant 0.000000e+00 : f32
    %694 = vector.broadcast %cst_292 : f32 to vector<8x32xf32>
    %695 = vector.extract_strided_slice %575 {offsets = [0, 0], sizes = [8, 32], strides = [1, 1]} : vector<16x32xf32> to vector<8x32xf32>
    %696 = vector.extract_strided_slice %693 {offsets = [0, 0], sizes = [8, 32], strides = [1, 1]} : vector<16x32xf32> to vector<8x32xf32>
    %697 = vector.extract_strided_slice %574 {offsets = [0, 0], sizes = [8, 1], strides = [1, 1]} : vector<8x2xf32> to vector<8x1xf32>
    %698 = arith.subf %696, %695 : vector<8x32xf32>
    %699 = vector.broadcast %697 : vector<8x1xf32> to vector<8x32xf32>
    %700 = arith.mulf %699, %698 : vector<8x32xf32>
    %701 = arith.addf %695, %700 : vector<8x32xf32>
    %702 = vector.broadcast %697 : vector<8x1xf32> to vector<8x32xf32>
    %703 = arith.mulf %702, %701 : vector<8x32xf32>
    %704 = arith.addf %694, %703 : vector<8x32xf32>
    %705 = vector.extract_strided_slice %575 {offsets = [8, 0], sizes = [8, 32], strides = [1, 1]} : vector<16x32xf32> to vector<8x32xf32>
    %706 = vector.extract_strided_slice %693 {offsets = [8, 0], sizes = [8, 32], strides = [1, 1]} : vector<16x32xf32> to vector<8x32xf32>
    %707 = vector.extract_strided_slice %574 {offsets = [0, 1], sizes = [8, 1], strides = [1, 1]} : vector<8x2xf32> to vector<8x1xf32>
    %708 = arith.subf %706, %705 : vector<8x32xf32>
    %709 = vector.broadcast %707 : vector<8x1xf32> to vector<8x32xf32>
    %710 = arith.mulf %709, %708 : vector<8x32xf32>
    %711 = arith.addf %705, %710 : vector<8x32xf32>
    %712 = vector.broadcast %707 : vector<8x1xf32> to vector<8x32xf32>
    %713 = arith.mulf %712, %711 : vector<8x32xf32>
    %714 = arith.addf %704, %713 : vector<8x32xf32>
    %715 = tpu.concatenate %701, %711 in 0 : vector<8x32xf32>, vector<8x32xf32> -> vector<16x32xf32>
    %c0_293 = arith.constant 0 : index
    %c0_294 = arith.constant 0 : index
    %716 = vector.load %arg19[%c0_293, %c0_294] : memref<16x32xf32, #tpu.memory_space<vmem>>, vector<16x32xf32>
    tpu.vector_store %arg19[%c0_293, %c0_294], %715 {strides = array<i32>} : memref<16x32xf32, #tpu.memory_space<vmem>>, vector<16x32xf32>,
    %c0_295 = arith.constant 0 : index
    %c0_296 = arith.constant 0 : index
    %717 = vector.load %arg13[%c0_295, %c0_296] : memref<32x128xf32, #tpu.memory_space<vmem>>, vector<32x128xf32>
    %cst_297 = arith.constant dense<0.000000e+00> : vector<8x128xf32>
    %718 = tpu.matmul %714, %717, %cst_297 {dimension_numbers = #tpu.dot_dimension_numbers<[1], [0], [0], [1], [0, 0, 1, 1], [], []>} : vector<8x32xf32>, vector<32x128xf32>, vector<8x128xf32> -> vector<8x128xf32>
    %c0_298 = arith.constant 0 : index
    %c0_299 = arith.constant 0 : index
    %719 = vector.load %arg15[%c0_298, %c0_299] : memref<1x128xf32, #tpu.memory_space<vmem>>, vector<1x128xf32>
    %720 = vector.broadcast %719 : vector<1x128xf32> to vector<8x128xf32>
    %721 = arith.addf %718, %720 : vector<8x128xf32>
    %c0_300 = arith.constant 0 : index
    %c0_301 = arith.constant 0 : index
    %722 = vector.load %arg14[%c0_300, %c0_301] : memref<32x128xf32, #tpu.memory_space<vmem>>, vector<32x128xf32>
    %cst_302 = arith.constant dense<0.000000e+00> : vector<8x128xf32>
    %723 = tpu.matmul %577, %722, %cst_302 {dimension_numbers = #tpu.dot_dimension_numbers<[1], [0], [0], [1], [0, 0, 1, 1], [], []>} : vector<8x32xf32>, vector<32x128xf32>, vector<8x128xf32> -> vector<8x128xf32>
    %c0_303 = arith.constant 0 : index
    %c0_304 = arith.constant 0 : index
    %724 = vector.load %arg16[%c0_303, %c0_304] : memref<1x128xf32, #tpu.memory_space<vmem>>, vector<1x128xf32>
    %725 = vector.broadcast %724 : vector<1x128xf32> to vector<8x128xf32>
    %726 = arith.addf %723, %725 : vector<8x128xf32>
    %727 = vector.extract_strided_slice %721 {offsets = [0, 0], sizes = [8, 32], strides = [1, 1]} : vector<8x128xf32> to vector<8x32xf32>
    %728 = vector.extract_strided_slice %726 {offsets = [0, 0], sizes = [8, 32], strides = [1, 1]} : vector<8x128xf32> to vector<8x32xf32>
    %729 = arith.addf %727, %728 : vector<8x32xf32>
    %730 = arith.negf %729 : vector<8x32xf32>
    %731 = math.exp %730 : vector<8x32xf32>
    %cst_305 = arith.constant 1.000000e+00 : f32
    %732 = vector.broadcast %cst_305 : f32 to vector<8x32xf32>
    %733 = arith.addf %732, %731 : vector<8x32xf32>
    %734 = arith.divf %732, %733 : vector<8x32xf32>
    %735 = vector.extract_strided_slice %721 {offsets = [0, 32], sizes = [8, 32], strides = [1, 1]} : vector<8x128xf32> to vector<8x32xf32>
    %736 = vector.extract_strided_slice %726 {offsets = [0, 32], sizes = [8, 32], strides = [1, 1]} : vector<8x128xf32> to vector<8x32xf32>
    %737 = arith.addf %735, %736 : vector<8x32xf32>
    %738 = arith.negf %737 : vector<8x32xf32>
    %739 = math.exp %738 : vector<8x32xf32>
    %cst_306 = arith.constant 1.000000e+00 : f32
    %740 = vector.broadcast %cst_306 : f32 to vector<8x32xf32>
    %741 = arith.addf %740, %739 : vector<8x32xf32>
    %742 = arith.divf %740, %741 : vector<8x32xf32>
    %743 = vector.extract_strided_slice %721 {offsets = [0, 64], sizes = [8, 32], strides = [1, 1]} : vector<8x128xf32> to vector<8x32xf32>
    %744 = vector.extract_strided_slice %726 {offsets = [0, 64], sizes = [8, 32], strides = [1, 1]} : vector<8x128xf32> to vector<8x32xf32>
    %745 = arith.mulf %734, %744 : vector<8x32xf32>
    %746 = arith.addf %743, %745 : vector<8x32xf32>
    %747 = math.tanh %746 : vector<8x32xf32>
    %748 = arith.subf %577, %747 : vector<8x32xf32>
    %749 = arith.mulf %742, %748 : vector<8x32xf32>
    %750 = arith.addf %747, %749 : vector<8x32xf32>
    %c0_307 = arith.constant 0 : index
    %c0_308 = arith.constant 0 : index
    %751 = vector.load %arg22[%c0_307, %c0_308] : memref<8x32xf32, #tpu.memory_space<vmem>>, vector<8x32xf32>
    tpu.vector_store %arg22[%c0_307, %c0_308], %750 {strides = array<i32>} : memref<8x32xf32, #tpu.memory_space<vmem>>, vector<8x32xf32>,
    %752 = arith.index_cast %c3_i32 : i32 to index
    %c0_309 = arith.constant 0 : index
    %c0_310 = arith.constant 0 : index
    %753 = vector.load %arg18[%752, %c0_309, %c0_310] : memref<8x8x32xf32, #tpu.memory_space<vmem>>, vector<1x8x32xf32>
    %754 = vector.shape_cast %753 : vector<1x8x32xf32> to vector<8x32xf32>
    %755 = vector.shape_cast %750 : vector<8x32xf32> to vector<1x8x32xf32>
    tpu.vector_store %arg18[%752, %c0_309, %c0_310], %755 {strides = array<i32>} : memref<8x8x32xf32, #tpu.memory_space<vmem>>, vector<1x8x32xf32>,
    %c4_i32 = arith.constant 4 : i32
    %756 = arith.index_cast %c4_i32 : i32 to index
    %c0_311 = arith.constant 0 : index
    %c0_312 = arith.constant 0 : index
    %757 = vector.load %arg1[%756, %c0_311, %c0_312] : memref<8x8x32xf32, #tpu.memory_space<vmem>>, vector<1x8x32xf32>
    %758 = vector.shape_cast %757 : vector<1x8x32xf32> to vector<8x32xf32>
    %759 = arith.index_cast %c4_i32 : i32 to index
    %c0_313 = arith.constant 0 : index
    %c0_314 = arith.constant 0 : index
    %760 = vector.load %arg2[%759, %c0_313, %c0_314] : memref<8x8x2xf32, #tpu.memory_space<vmem>>, vector<1x8x2xf32>
    %761 = vector.shape_cast %760 : vector<1x8x2xf32> to vector<8x2xf32>
    %c0_315 = arith.constant 0 : index
    %c0_316 = arith.constant 0 : index
    %762 = vector.load %arg19[%c0_315, %c0_316] : memref<16x32xf32, #tpu.memory_space<vmem>>, vector<16x32xf32>
    %c0_317 = arith.constant 0 : index
    %c0_318 = arith.constant 0 : index
    %763 = vector.load %arg21[%c0_317, %c0_318] : memref<8x32xf32, #tpu.memory_space<vmem>>, vector<8x32xf32>
    %c0_319 = arith.constant 0 : index
    %c0_320 = arith.constant 0 : index
    %764 = vector.load %arg22[%c0_319, %c0_320] : memref<8x32xf32, #tpu.memory_space<vmem>>, vector<8x32xf32>
    %cst_321 = arith.constant 0.000000e+00 : f32
    %765 = vector.broadcast %cst_321 : f32 to vector<8x32xf32>
    %766 = vector.extract_strided_slice %761 {offsets = [0, 0], sizes = [8, 1], strides = [1, 1]} : vector<8x2xf32> to vector<8x1xf32>
    %767 = vector.extract_strided_slice %762 {offsets = [0, 0], sizes = [8, 32], strides = [1, 1]} : vector<16x32xf32> to vector<8x32xf32>
    %768 = vector.broadcast %766 : vector<8x1xf32> to vector<8x32xf32>
    %769 = arith.mulf %768, %767 : vector<8x32xf32>
    %770 = arith.addf %765, %769 : vector<8x32xf32>
    %771 = vector.extract_strided_slice %761 {offsets = [0, 1], sizes = [8, 1], strides = [1, 1]} : vector<8x2xf32> to vector<8x1xf32>
    %772 = vector.extract_strided_slice %762 {offsets = [8, 0], sizes = [8, 32], strides = [1, 1]} : vector<16x32xf32> to vector<8x32xf32>
    %773 = vector.broadcast %771 : vector<8x1xf32> to vector<8x32xf32>
    %774 = arith.mulf %773, %772 : vector<8x32xf32>
    %775 = arith.addf %770, %774 : vector<8x32xf32>
    %c0_322 = arith.constant 0 : index
    %c0_323 = arith.constant 0 : index
    %c0_324 = arith.constant 0 : index
    %776 = vector.load %arg20[%c0_322, %c0_323, %c0_324] : memref<8x8x32xf32, #tpu.memory_space<vmem>>, vector<8x8x32xf32>
    %c0_325 = arith.constant 0 : index
    %c0_326 = arith.constant 0 : index
    %777 = vector.load %arg17[%c0_325, %c0_326] : memref<32x32xf32, #tpu.memory_space<vmem>>, vector<32x32xf32>
    %cst_327 = arith.constant dense<0.000000e+00> : vector<8x32xf32>
    %778 = tpu.matmul %758, %777, %cst_327 {dimension_numbers = #tpu.dot_dimension_numbers<[1], [0], [0], [1], [0, 0, 1, 1], [], []>} : vector<8x32xf32>, vector<32x32xf32>, vector<8x32xf32> -> vector<8x32xf32>
    %779 = vector.shape_cast %778 : vector<8x32xf32> to vector<1x8x32xf32>
    %780 = vector.broadcast %779 : vector<1x8x32xf32> to vector<8x8x32xf32>
    %781 = arith.mulf %776, %780 : vector<8x8x32xf32>
    %cst_328 = arith.constant dense<0.000000e+00> : vector<8x8xf32>
    %782 = vector.multi_reduction <add>, %781, %cst_328 [2] : vector<8x8x32xf32> to vector<8x8xf32>
    %783 = tpu.iota {dimensions = array<i32: 0>} : vector<8x8xi32>
    %784 = vector.broadcast %c4_i32 : i32 to vector<8x8xi32>
    %785 = arith.cmpi slt, %783, %784 : vector<8x8xi32>
    %cst_329 = arith.constant -1.000000e+30 : f32
    %786 = vector.broadcast %cst_329 : f32 to vector<8x8xf32>
    %787 = arith.select %785, %782, %786 : vector<8x8xi1>, vector<8x8xf32>
    %cst_330 = arith.constant dense<0xFF800000> : vector<8xf32>
    %788 = vector.multi_reduction <maximumf>, %787, %cst_330 [0] : vector<8x8xf32> to vector<8xf32>
    %789 = vector.shape_cast %788 : vector<8xf32> to vector<1x8xf32>
    %790 = vector.broadcast %789 : vector<1x8xf32> to vector<8x8xf32>
    %791 = arith.subf %787, %790 : vector<8x8xf32>
    %792 = math.exp %791 : vector<8x8xf32>
    %cst_331 = arith.constant dense<0.000000e+00> : vector<8xf32>
    %793 = vector.multi_reduction <add>, %792, %cst_331 [0] : vector<8x8xf32> to vector<8xf32>
    %794 = vector.shape_cast %793 : vector<8xf32> to vector<1x8xf32>
    %795 = vector.broadcast %794 : vector<1x8xf32> to vector<8x8xf32>
    %796 = arith.divf %792, %795 : vector<8x8xf32>
    %797 = vector.shape_cast %796 : vector<8x8xf32> to vector<8x8x1xf32>
    %798 = vector.broadcast %797 : vector<8x8x1xf32> to vector<8x8x32xf32>
    %799 = arith.mulf %798, %776 : vector<8x8x32xf32>
    %cst_332 = arith.constant dense<0.000000e+00> : vector<8x32xf32>
    %800 = vector.multi_reduction <add>, %799, %cst_332 [0] : vector<8x8x32xf32> to vector<8x32xf32>
    %c0_333 = arith.constant 0 : index
    %c0_334 = arith.constant 0 : index
    %801 = vector.load %arg3[%c0_333, %c0_334] : memref<32x128xf32, #tpu.memory_space<vmem>>, vector<32x128xf32>
    %cst_335 = arith.constant dense<0.000000e+00> : vector<8x128xf32>
    %802 = tpu.matmul %758, %801, %cst_335 {dimension_numbers = #tpu.dot_dimension_numbers<[1], [0], [0], [1], [0, 0, 1, 1], [], []>} : vector<8x32xf32>, vector<32x128xf32>, vector<8x128xf32> -> vector<8x128xf32>
    %c0_336 = arith.constant 0 : index
    %c0_337 = arith.constant 0 : index
    %803 = vector.load %arg4[%c0_336, %c0_337] : memref<32x128xf32, #tpu.memory_space<vmem>>, vector<32x128xf32>
    %cst_338 = arith.constant dense<0.000000e+00> : vector<8x128xf32>
    %804 = tpu.matmul %775, %803, %cst_338 {dimension_numbers = #tpu.dot_dimension_numbers<[1], [0], [0], [1], [0, 0, 1, 1], [], []>} : vector<8x32xf32>, vector<32x128xf32>, vector<8x128xf32> -> vector<8x128xf32>
    %805 = arith.addf %802, %804 : vector<8x128xf32>
    %c0_339 = arith.constant 0 : index
    %c0_340 = arith.constant 0 : index
    %806 = vector.load %arg6[%c0_339, %c0_340] : memref<1x128xf32, #tpu.memory_space<vmem>>, vector<1x128xf32>
    %807 = vector.broadcast %806 : vector<1x128xf32> to vector<8x128xf32>
    %808 = arith.addf %805, %807 : vector<8x128xf32>
    %c0_341 = arith.constant 0 : index
    %c0_342 = arith.constant 0 : index
    %809 = vector.load %arg5[%c0_341, %c0_342] : memref<32x128xf32, #tpu.memory_space<vmem>>, vector<32x128xf32>
    %cst_343 = arith.constant dense<0.000000e+00> : vector<8x128xf32>
    %810 = tpu.matmul %763, %809, %cst_343 {dimension_numbers = #tpu.dot_dimension_numbers<[1], [0], [0], [1], [0, 0, 1, 1], [], []>} : vector<8x32xf32>, vector<32x128xf32>, vector<8x128xf32> -> vector<8x128xf32>
    %c0_344 = arith.constant 0 : index
    %c0_345 = arith.constant 0 : index
    %811 = vector.load %arg7[%c0_344, %c0_345] : memref<1x128xf32, #tpu.memory_space<vmem>>, vector<1x128xf32>
    %812 = vector.broadcast %811 : vector<1x128xf32> to vector<8x128xf32>
    %813 = arith.addf %810, %812 : vector<8x128xf32>
    %814 = vector.extract_strided_slice %808 {offsets = [0, 0], sizes = [8, 32], strides = [1, 1]} : vector<8x128xf32> to vector<8x32xf32>
    %815 = vector.extract_strided_slice %813 {offsets = [0, 0], sizes = [8, 32], strides = [1, 1]} : vector<8x128xf32> to vector<8x32xf32>
    %816 = arith.addf %814, %815 : vector<8x32xf32>
    %817 = arith.negf %816 : vector<8x32xf32>
    %818 = math.exp %817 : vector<8x32xf32>
    %cst_346 = arith.constant 1.000000e+00 : f32
    %819 = vector.broadcast %cst_346 : f32 to vector<8x32xf32>
    %820 = arith.addf %819, %818 : vector<8x32xf32>
    %821 = arith.divf %819, %820 : vector<8x32xf32>
    %822 = vector.extract_strided_slice %808 {offsets = [0, 32], sizes = [8, 32], strides = [1, 1]} : vector<8x128xf32> to vector<8x32xf32>
    %823 = vector.extract_strided_slice %813 {offsets = [0, 32], sizes = [8, 32], strides = [1, 1]} : vector<8x128xf32> to vector<8x32xf32>
    %824 = arith.addf %822, %823 : vector<8x32xf32>
    %825 = arith.negf %824 : vector<8x32xf32>
    %826 = math.exp %825 : vector<8x32xf32>
    %cst_347 = arith.constant 1.000000e+00 : f32
    %827 = vector.broadcast %cst_347 : f32 to vector<8x32xf32>
    %828 = arith.addf %827, %826 : vector<8x32xf32>
    %829 = arith.divf %827, %828 : vector<8x32xf32>
    %830 = vector.extract_strided_slice %808 {offsets = [0, 64], sizes = [8, 32], strides = [1, 1]} : vector<8x128xf32> to vector<8x32xf32>
    %831 = vector.extract_strided_slice %813 {offsets = [0, 64], sizes = [8, 32], strides = [1, 1]} : vector<8x128xf32> to vector<8x32xf32>
    %832 = arith.mulf %821, %831 : vector<8x32xf32>
    %833 = arith.addf %830, %832 : vector<8x32xf32>
    %834 = math.tanh %833 : vector<8x32xf32>
    %835 = arith.subf %763, %834 : vector<8x32xf32>
    %836 = arith.mulf %829, %835 : vector<8x32xf32>
    %837 = arith.addf %834, %836 : vector<8x32xf32>
    %838 = arith.index_cast %c4_i32 : i32 to index
    %c0_348 = arith.constant 0 : index
    %c0_349 = arith.constant 0 : index
    %839 = vector.load %arg20[%838, %c0_348, %c0_349] : memref<8x8x32xf32, #tpu.memory_space<vmem>>, vector<1x8x32xf32>
    %840 = vector.shape_cast %839 : vector<1x8x32xf32> to vector<8x32xf32>
    %841 = vector.shape_cast %837 : vector<8x32xf32> to vector<1x8x32xf32>
    tpu.vector_store %arg20[%838, %c0_348, %c0_349], %841 {strides = array<i32>} : memref<8x8x32xf32, #tpu.memory_space<vmem>>, vector<1x8x32xf32>,
    %c0_350 = arith.constant 0 : index
    %c0_351 = arith.constant 0 : index
    %842 = vector.load %arg21[%c0_350, %c0_351] : memref<8x32xf32, #tpu.memory_space<vmem>>, vector<8x32xf32>
    tpu.vector_store %arg21[%c0_350, %c0_351], %837 {strides = array<i32>} : memref<8x32xf32, #tpu.memory_space<vmem>>, vector<8x32xf32>,
    %c0_352 = arith.constant 0 : index
    %c0_353 = arith.constant 0 : index
    %843 = vector.load %arg8[%c0_352, %c0_353] : memref<32x128xf32, #tpu.memory_space<vmem>>, vector<32x128xf32>
    %cst_354 = arith.constant dense<0.000000e+00> : vector<8x128xf32>
    %844 = tpu.matmul %758, %843, %cst_354 {dimension_numbers = #tpu.dot_dimension_numbers<[1], [0], [0], [1], [0, 0, 1, 1], [], []>} : vector<8x32xf32>, vector<32x128xf32>, vector<8x128xf32> -> vector<8x128xf32>
    %c0_355 = arith.constant 0 : index
    %c0_356 = arith.constant 0 : index
    %845 = vector.load %arg9[%c0_355, %c0_356] : memref<32x128xf32, #tpu.memory_space<vmem>>, vector<32x128xf32>
    %cst_357 = arith.constant dense<0.000000e+00> : vector<8x128xf32>
    %846 = tpu.matmul %800, %845, %cst_357 {dimension_numbers = #tpu.dot_dimension_numbers<[1], [0], [0], [1], [0, 0, 1, 1], [], []>} : vector<8x32xf32>, vector<32x128xf32>, vector<8x128xf32> -> vector<8x128xf32>
    %847 = arith.addf %844, %846 : vector<8x128xf32>
    %c0_358 = arith.constant 0 : index
    %c0_359 = arith.constant 0 : index
    %848 = vector.load %arg11[%c0_358, %c0_359] : memref<1x128xf32, #tpu.memory_space<vmem>>, vector<1x128xf32>
    %849 = vector.broadcast %848 : vector<1x128xf32> to vector<8x128xf32>
    %850 = arith.addf %847, %849 : vector<8x128xf32>
    %851 = tpu.concatenate %850, %850 in 0 : vector<8x128xf32>, vector<8x128xf32> -> vector<16x128xf32>
    %c0_360 = arith.constant 0 : index
    %c0_361 = arith.constant 0 : index
    %852 = vector.load %arg10[%c0_360, %c0_361] : memref<32x128xf32, #tpu.memory_space<vmem>>, vector<32x128xf32>
    %cst_362 = arith.constant dense<0.000000e+00> : vector<16x128xf32>
    %853 = tpu.matmul %762, %852, %cst_362 {dimension_numbers = #tpu.dot_dimension_numbers<[1], [0], [0], [1], [0, 0, 1, 1], [], []>} : vector<16x32xf32>, vector<32x128xf32>, vector<16x128xf32> -> vector<16x128xf32>
    %c0_363 = arith.constant 0 : index
    %c0_364 = arith.constant 0 : index
    %854 = vector.load %arg12[%c0_363, %c0_364] : memref<1x128xf32, #tpu.memory_space<vmem>>, vector<1x128xf32>
    %855 = vector.broadcast %854 : vector<1x128xf32> to vector<16x128xf32>
    %856 = arith.addf %853, %855 : vector<16x128xf32>
    %857 = vector.extract_strided_slice %851 {offsets = [0, 0], sizes = [16, 32], strides = [1, 1]} : vector<16x128xf32> to vector<16x32xf32>
    %858 = vector.extract_strided_slice %856 {offsets = [0, 0], sizes = [16, 32], strides = [1, 1]} : vector<16x128xf32> to vector<16x32xf32>
    %859 = arith.addf %857, %858 : vector<16x32xf32>
    %860 = arith.negf %859 : vector<16x32xf32>
    %861 = math.exp %860 : vector<16x32xf32>
    %cst_365 = arith.constant 1.000000e+00 : f32
    %862 = vector.broadcast %cst_365 : f32 to vector<16x32xf32>
    %863 = arith.addf %862, %861 : vector<16x32xf32>
    %864 = arith.divf %862, %863 : vector<16x32xf32>
    %865 = vector.extract_strided_slice %851 {offsets = [0, 32], sizes = [16, 32], strides = [1, 1]} : vector<16x128xf32> to vector<16x32xf32>
    %866 = vector.extract_strided_slice %856 {offsets = [0, 32], sizes = [16, 32], strides = [1, 1]} : vector<16x128xf32> to vector<16x32xf32>
    %867 = arith.addf %865, %866 : vector<16x32xf32>
    %868 = arith.negf %867 : vector<16x32xf32>
    %869 = math.exp %868 : vector<16x32xf32>
    %cst_366 = arith.constant 1.000000e+00 : f32
    %870 = vector.broadcast %cst_366 : f32 to vector<16x32xf32>
    %871 = arith.addf %870, %869 : vector<16x32xf32>
    %872 = arith.divf %870, %871 : vector<16x32xf32>
    %873 = vector.extract_strided_slice %851 {offsets = [0, 64], sizes = [16, 32], strides = [1, 1]} : vector<16x128xf32> to vector<16x32xf32>
    %874 = vector.extract_strided_slice %856 {offsets = [0, 64], sizes = [16, 32], strides = [1, 1]} : vector<16x128xf32> to vector<16x32xf32>
    %875 = arith.mulf %864, %874 : vector<16x32xf32>
    %876 = arith.addf %873, %875 : vector<16x32xf32>
    %877 = math.tanh %876 : vector<16x32xf32>
    %878 = arith.subf %762, %877 : vector<16x32xf32>
    %879 = arith.mulf %872, %878 : vector<16x32xf32>
    %880 = arith.addf %877, %879 : vector<16x32xf32>
    %cst_367 = arith.constant 0.000000e+00 : f32
    %881 = vector.broadcast %cst_367 : f32 to vector<8x32xf32>
    %882 = vector.extract_strided_slice %762 {offsets = [0, 0], sizes = [8, 32], strides = [1, 1]} : vector<16x32xf32> to vector<8x32xf32>
    %883 = vector.extract_strided_slice %880 {offsets = [0, 0], sizes = [8, 32], strides = [1, 1]} : vector<16x32xf32> to vector<8x32xf32>
    %884 = vector.extract_strided_slice %761 {offsets = [0, 0], sizes = [8, 1], strides = [1, 1]} : vector<8x2xf32> to vector<8x1xf32>
    %885 = arith.subf %883, %882 : vector<8x32xf32>
    %886 = vector.broadcast %884 : vector<8x1xf32> to vector<8x32xf32>
    %887 = arith.mulf %886, %885 : vector<8x32xf32>
    %888 = arith.addf %882, %887 : vector<8x32xf32>
    %889 = vector.broadcast %884 : vector<8x1xf32> to vector<8x32xf32>
    %890 = arith.mulf %889, %888 : vector<8x32xf32>
    %891 = arith.addf %881, %890 : vector<8x32xf32>
    %892 = vector.extract_strided_slice %762 {offsets = [8, 0], sizes = [8, 32], strides = [1, 1]} : vector<16x32xf32> to vector<8x32xf32>
    %893 = vector.extract_strided_slice %880 {offsets = [8, 0], sizes = [8, 32], strides = [1, 1]} : vector<16x32xf32> to vector<8x32xf32>
    %894 = vector.extract_strided_slice %761 {offsets = [0, 1], sizes = [8, 1], strides = [1, 1]} : vector<8x2xf32> to vector<8x1xf32>
    %895 = arith.subf %893, %892 : vector<8x32xf32>
    %896 = vector.broadcast %894 : vector<8x1xf32> to vector<8x32xf32>
    %897 = arith.mulf %896, %895 : vector<8x32xf32>
    %898 = arith.addf %892, %897 : vector<8x32xf32>
    %899 = vector.broadcast %894 : vector<8x1xf32> to vector<8x32xf32>
    %900 = arith.mulf %899, %898 : vector<8x32xf32>
    %901 = arith.addf %891, %900 : vector<8x32xf32>
    %902 = tpu.concatenate %888, %898 in 0 : vector<8x32xf32>, vector<8x32xf32> -> vector<16x32xf32>
    %c0_368 = arith.constant 0 : index
    %c0_369 = arith.constant 0 : index
    %903 = vector.load %arg19[%c0_368, %c0_369] : memref<16x32xf32, #tpu.memory_space<vmem>>, vector<16x32xf32>
    tpu.vector_store %arg19[%c0_368, %c0_369], %902 {strides = array<i32>} : memref<16x32xf32, #tpu.memory_space<vmem>>, vector<16x32xf32>,
    %c0_370 = arith.constant 0 : index
    %c0_371 = arith.constant 0 : index
    %904 = vector.load %arg13[%c0_370, %c0_371] : memref<32x128xf32, #tpu.memory_space<vmem>>, vector<32x128xf32>
    %cst_372 = arith.constant dense<0.000000e+00> : vector<8x128xf32>
    %905 = tpu.matmul %901, %904, %cst_372 {dimension_numbers = #tpu.dot_dimension_numbers<[1], [0], [0], [1], [0, 0, 1, 1], [], []>} : vector<8x32xf32>, vector<32x128xf32>, vector<8x128xf32> -> vector<8x128xf32>
    %c0_373 = arith.constant 0 : index
    %c0_374 = arith.constant 0 : index
    %906 = vector.load %arg15[%c0_373, %c0_374] : memref<1x128xf32, #tpu.memory_space<vmem>>, vector<1x128xf32>
    %907 = vector.broadcast %906 : vector<1x128xf32> to vector<8x128xf32>
    %908 = arith.addf %905, %907 : vector<8x128xf32>
    %c0_375 = arith.constant 0 : index
    %c0_376 = arith.constant 0 : index
    %909 = vector.load %arg14[%c0_375, %c0_376] : memref<32x128xf32, #tpu.memory_space<vmem>>, vector<32x128xf32>
    %cst_377 = arith.constant dense<0.000000e+00> : vector<8x128xf32>
    %910 = tpu.matmul %764, %909, %cst_377 {dimension_numbers = #tpu.dot_dimension_numbers<[1], [0], [0], [1], [0, 0, 1, 1], [], []>} : vector<8x32xf32>, vector<32x128xf32>, vector<8x128xf32> -> vector<8x128xf32>
    %c0_378 = arith.constant 0 : index
    %c0_379 = arith.constant 0 : index
    %911 = vector.load %arg16[%c0_378, %c0_379] : memref<1x128xf32, #tpu.memory_space<vmem>>, vector<1x128xf32>
    %912 = vector.broadcast %911 : vector<1x128xf32> to vector<8x128xf32>
    %913 = arith.addf %910, %912 : vector<8x128xf32>
    %914 = vector.extract_strided_slice %908 {offsets = [0, 0], sizes = [8, 32], strides = [1, 1]} : vector<8x128xf32> to vector<8x32xf32>
    %915 = vector.extract_strided_slice %913 {offsets = [0, 0], sizes = [8, 32], strides = [1, 1]} : vector<8x128xf32> to vector<8x32xf32>
    %916 = arith.addf %914, %915 : vector<8x32xf32>
    %917 = arith.negf %916 : vector<8x32xf32>
    %918 = math.exp %917 : vector<8x32xf32>
    %cst_380 = arith.constant 1.000000e+00 : f32
    %919 = vector.broadcast %cst_380 : f32 to vector<8x32xf32>
    %920 = arith.addf %919, %918 : vector<8x32xf32>
    %921 = arith.divf %919, %920 : vector<8x32xf32>
    %922 = vector.extract_strided_slice %908 {offsets = [0, 32], sizes = [8, 32], strides = [1, 1]} : vector<8x128xf32> to vector<8x32xf32>
    %923 = vector.extract_strided_slice %913 {offsets = [0, 32], sizes = [8, 32], strides = [1, 1]} : vector<8x128xf32> to vector<8x32xf32>
    %924 = arith.addf %922, %923 : vector<8x32xf32>
    %925 = arith.negf %924 : vector<8x32xf32>
    %926 = math.exp %925 : vector<8x32xf32>
    %cst_381 = arith.constant 1.000000e+00 : f32
    %927 = vector.broadcast %cst_381 : f32 to vector<8x32xf32>
    %928 = arith.addf %927, %926 : vector<8x32xf32>
    %929 = arith.divf %927, %928 : vector<8x32xf32>
    %930 = vector.extract_strided_slice %908 {offsets = [0, 64], sizes = [8, 32], strides = [1, 1]} : vector<8x128xf32> to vector<8x32xf32>
    %931 = vector.extract_strided_slice %913 {offsets = [0, 64], sizes = [8, 32], strides = [1, 1]} : vector<8x128xf32> to vector<8x32xf32>
    %932 = arith.mulf %921, %931 : vector<8x32xf32>
    %933 = arith.addf %930, %932 : vector<8x32xf32>
    %934 = math.tanh %933 : vector<8x32xf32>
    %935 = arith.subf %764, %934 : vector<8x32xf32>
    %936 = arith.mulf %929, %935 : vector<8x32xf32>
    %937 = arith.addf %934, %936 : vector<8x32xf32>
    %c0_382 = arith.constant 0 : index
    %c0_383 = arith.constant 0 : index
    %938 = vector.load %arg22[%c0_382, %c0_383] : memref<8x32xf32, #tpu.memory_space<vmem>>, vector<8x32xf32>
    tpu.vector_store %arg22[%c0_382, %c0_383], %937 {strides = array<i32>} : memref<8x32xf32, #tpu.memory_space<vmem>>, vector<8x32xf32>,
    %939 = arith.index_cast %c4_i32 : i32 to index
    %c0_384 = arith.constant 0 : index
    %c0_385 = arith.constant 0 : index
    %940 = vector.load %arg18[%939, %c0_384, %c0_385] : memref<8x8x32xf32, #tpu.memory_space<vmem>>, vector<1x8x32xf32>
    %941 = vector.shape_cast %940 : vector<1x8x32xf32> to vector<8x32xf32>
    %942 = vector.shape_cast %937 : vector<8x32xf32> to vector<1x8x32xf32>
    tpu.vector_store %arg18[%939, %c0_384, %c0_385], %942 {strides = array<i32>} : memref<8x8x32xf32, #tpu.memory_space<vmem>>, vector<1x8x32xf32>,
    %c5_i32 = arith.constant 5 : i32
    %943 = arith.index_cast %c5_i32 : i32 to index
    %c0_386 = arith.constant 0 : index
    %c0_387 = arith.constant 0 : index
    %944 = vector.load %arg1[%943, %c0_386, %c0_387] : memref<8x8x32xf32, #tpu.memory_space<vmem>>, vector<1x8x32xf32>
    %945 = vector.shape_cast %944 : vector<1x8x32xf32> to vector<8x32xf32>
    %946 = arith.index_cast %c5_i32 : i32 to index
    %c0_388 = arith.constant 0 : index
    %c0_389 = arith.constant 0 : index
    %947 = vector.load %arg2[%946, %c0_388, %c0_389] : memref<8x8x2xf32, #tpu.memory_space<vmem>>, vector<1x8x2xf32>
    %948 = vector.shape_cast %947 : vector<1x8x2xf32> to vector<8x2xf32>
    %c0_390 = arith.constant 0 : index
    %c0_391 = arith.constant 0 : index
    %949 = vector.load %arg19[%c0_390, %c0_391] : memref<16x32xf32, #tpu.memory_space<vmem>>, vector<16x32xf32>
    %c0_392 = arith.constant 0 : index
    %c0_393 = arith.constant 0 : index
    %950 = vector.load %arg21[%c0_392, %c0_393] : memref<8x32xf32, #tpu.memory_space<vmem>>, vector<8x32xf32>
    %c0_394 = arith.constant 0 : index
    %c0_395 = arith.constant 0 : index
    %951 = vector.load %arg22[%c0_394, %c0_395] : memref<8x32xf32, #tpu.memory_space<vmem>>, vector<8x32xf32>
    %cst_396 = arith.constant 0.000000e+00 : f32
    %952 = vector.broadcast %cst_396 : f32 to vector<8x32xf32>
    %953 = vector.extract_strided_slice %948 {offsets = [0, 0], sizes = [8, 1], strides = [1, 1]} : vector<8x2xf32> to vector<8x1xf32>
    %954 = vector.extract_strided_slice %949 {offsets = [0, 0], sizes = [8, 32], strides = [1, 1]} : vector<16x32xf32> to vector<8x32xf32>
    %955 = vector.broadcast %953 : vector<8x1xf32> to vector<8x32xf32>
    %956 = arith.mulf %955, %954 : vector<8x32xf32>
    %957 = arith.addf %952, %956 : vector<8x32xf32>
    %958 = vector.extract_strided_slice %948 {offsets = [0, 1], sizes = [8, 1], strides = [1, 1]} : vector<8x2xf32> to vector<8x1xf32>
    %959 = vector.extract_strided_slice %949 {offsets = [8, 0], sizes = [8, 32], strides = [1, 1]} : vector<16x32xf32> to vector<8x32xf32>
    %960 = vector.broadcast %958 : vector<8x1xf32> to vector<8x32xf32>
    %961 = arith.mulf %960, %959 : vector<8x32xf32>
    %962 = arith.addf %957, %961 : vector<8x32xf32>
    %c0_397 = arith.constant 0 : index
    %c0_398 = arith.constant 0 : index
    %c0_399 = arith.constant 0 : index
    %963 = vector.load %arg20[%c0_397, %c0_398, %c0_399] : memref<8x8x32xf32, #tpu.memory_space<vmem>>, vector<8x8x32xf32>
    %c0_400 = arith.constant 0 : index
    %c0_401 = arith.constant 0 : index
    %964 = vector.load %arg17[%c0_400, %c0_401] : memref<32x32xf32, #tpu.memory_space<vmem>>, vector<32x32xf32>
    %cst_402 = arith.constant dense<0.000000e+00> : vector<8x32xf32>
    %965 = tpu.matmul %945, %964, %cst_402 {dimension_numbers = #tpu.dot_dimension_numbers<[1], [0], [0], [1], [0, 0, 1, 1], [], []>} : vector<8x32xf32>, vector<32x32xf32>, vector<8x32xf32> -> vector<8x32xf32>
    %966 = vector.shape_cast %965 : vector<8x32xf32> to vector<1x8x32xf32>
    %967 = vector.broadcast %966 : vector<1x8x32xf32> to vector<8x8x32xf32>
    %968 = arith.mulf %963, %967 : vector<8x8x32xf32>
    %cst_403 = arith.constant dense<0.000000e+00> : vector<8x8xf32>
    %969 = vector.multi_reduction <add>, %968, %cst_403 [2] : vector<8x8x32xf32> to vector<8x8xf32>
    %970 = tpu.iota {dimensions = array<i32: 0>} : vector<8x8xi32>
    %971 = vector.broadcast %c5_i32 : i32 to vector<8x8xi32>
    %972 = arith.cmpi slt, %970, %971 : vector<8x8xi32>
    %cst_404 = arith.constant -1.000000e+30 : f32
    %973 = vector.broadcast %cst_404 : f32 to vector<8x8xf32>
    %974 = arith.select %972, %969, %973 : vector<8x8xi1>, vector<8x8xf32>
    %cst_405 = arith.constant dense<0xFF800000> : vector<8xf32>
    %975 = vector.multi_reduction <maximumf>, %974, %cst_405 [0] : vector<8x8xf32> to vector<8xf32>
    %976 = vector.shape_cast %975 : vector<8xf32> to vector<1x8xf32>
    %977 = vector.broadcast %976 : vector<1x8xf32> to vector<8x8xf32>
    %978 = arith.subf %974, %977 : vector<8x8xf32>
    %979 = math.exp %978 : vector<8x8xf32>
    %cst_406 = arith.constant dense<0.000000e+00> : vector<8xf32>
    %980 = vector.multi_reduction <add>, %979, %cst_406 [0] : vector<8x8xf32> to vector<8xf32>
    %981 = vector.shape_cast %980 : vector<8xf32> to vector<1x8xf32>
    %982 = vector.broadcast %981 : vector<1x8xf32> to vector<8x8xf32>
    %983 = arith.divf %979, %982 : vector<8x8xf32>
    %984 = vector.shape_cast %983 : vector<8x8xf32> to vector<8x8x1xf32>
    %985 = vector.broadcast %984 : vector<8x8x1xf32> to vector<8x8x32xf32>
    %986 = arith.mulf %985, %963 : vector<8x8x32xf32>
    %cst_407 = arith.constant dense<0.000000e+00> : vector<8x32xf32>
    %987 = vector.multi_reduction <add>, %986, %cst_407 [0] : vector<8x8x32xf32> to vector<8x32xf32>
    %c0_408 = arith.constant 0 : index
    %c0_409 = arith.constant 0 : index
    %988 = vector.load %arg3[%c0_408, %c0_409] : memref<32x128xf32, #tpu.memory_space<vmem>>, vector<32x128xf32>
    %cst_410 = arith.constant dense<0.000000e+00> : vector<8x128xf32>
    %989 = tpu.matmul %945, %988, %cst_410 {dimension_numbers = #tpu.dot_dimension_numbers<[1], [0], [0], [1], [0, 0, 1, 1], [], []>} : vector<8x32xf32>, vector<32x128xf32>, vector<8x128xf32> -> vector<8x128xf32>
    %c0_411 = arith.constant 0 : index
    %c0_412 = arith.constant 0 : index
    %990 = vector.load %arg4[%c0_411, %c0_412] : memref<32x128xf32, #tpu.memory_space<vmem>>, vector<32x128xf32>
    %cst_413 = arith.constant dense<0.000000e+00> : vector<8x128xf32>
    %991 = tpu.matmul %962, %990, %cst_413 {dimension_numbers = #tpu.dot_dimension_numbers<[1], [0], [0], [1], [0, 0, 1, 1], [], []>} : vector<8x32xf32>, vector<32x128xf32>, vector<8x128xf32> -> vector<8x128xf32>
    %992 = arith.addf %989, %991 : vector<8x128xf32>
    %c0_414 = arith.constant 0 : index
    %c0_415 = arith.constant 0 : index
    %993 = vector.load %arg6[%c0_414, %c0_415] : memref<1x128xf32, #tpu.memory_space<vmem>>, vector<1x128xf32>
    %994 = vector.broadcast %993 : vector<1x128xf32> to vector<8x128xf32>
    %995 = arith.addf %992, %994 : vector<8x128xf32>
    %c0_416 = arith.constant 0 : index
    %c0_417 = arith.constant 0 : index
    %996 = vector.load %arg5[%c0_416, %c0_417] : memref<32x128xf32, #tpu.memory_space<vmem>>, vector<32x128xf32>
    %cst_418 = arith.constant dense<0.000000e+00> : vector<8x128xf32>
    %997 = tpu.matmul %950, %996, %cst_418 {dimension_numbers = #tpu.dot_dimension_numbers<[1], [0], [0], [1], [0, 0, 1, 1], [], []>} : vector<8x32xf32>, vector<32x128xf32>, vector<8x128xf32> -> vector<8x128xf32>
    %c0_419 = arith.constant 0 : index
    %c0_420 = arith.constant 0 : index
    %998 = vector.load %arg7[%c0_419, %c0_420] : memref<1x128xf32, #tpu.memory_space<vmem>>, vector<1x128xf32>
    %999 = vector.broadcast %998 : vector<1x128xf32> to vector<8x128xf32>
    %1000 = arith.addf %997, %999 : vector<8x128xf32>
    %1001 = vector.extract_strided_slice %995 {offsets = [0, 0], sizes = [8, 32], strides = [1, 1]} : vector<8x128xf32> to vector<8x32xf32>
    %1002 = vector.extract_strided_slice %1000 {offsets = [0, 0], sizes = [8, 32], strides = [1, 1]} : vector<8x128xf32> to vector<8x32xf32>
    %1003 = arith.addf %1001, %1002 : vector<8x32xf32>
    %1004 = arith.negf %1003 : vector<8x32xf32>
    %1005 = math.exp %1004 : vector<8x32xf32>
    %cst_421 = arith.constant 1.000000e+00 : f32
    %1006 = vector.broadcast %cst_421 : f32 to vector<8x32xf32>
    %1007 = arith.addf %1006, %1005 : vector<8x32xf32>
    %1008 = arith.divf %1006, %1007 : vector<8x32xf32>
    %1009 = vector.extract_strided_slice %995 {offsets = [0, 32], sizes = [8, 32], strides = [1, 1]} : vector<8x128xf32> to vector<8x32xf32>
    %1010 = vector.extract_strided_slice %1000 {offsets = [0, 32], sizes = [8, 32], strides = [1, 1]} : vector<8x128xf32> to vector<8x32xf32>
    %1011 = arith.addf %1009, %1010 : vector<8x32xf32>
    %1012 = arith.negf %1011 : vector<8x32xf32>
    %1013 = math.exp %1012 : vector<8x32xf32>
    %cst_422 = arith.constant 1.000000e+00 : f32
    %1014 = vector.broadcast %cst_422 : f32 to vector<8x32xf32>
    %1015 = arith.addf %1014, %1013 : vector<8x32xf32>
    %1016 = arith.divf %1014, %1015 : vector<8x32xf32>
    %1017 = vector.extract_strided_slice %995 {offsets = [0, 64], sizes = [8, 32], strides = [1, 1]} : vector<8x128xf32> to vector<8x32xf32>
    %1018 = vector.extract_strided_slice %1000 {offsets = [0, 64], sizes = [8, 32], strides = [1, 1]} : vector<8x128xf32> to vector<8x32xf32>
    %1019 = arith.mulf %1008, %1018 : vector<8x32xf32>
    %1020 = arith.addf %1017, %1019 : vector<8x32xf32>
    %1021 = math.tanh %1020 : vector<8x32xf32>
    %1022 = arith.subf %950, %1021 : vector<8x32xf32>
    %1023 = arith.mulf %1016, %1022 : vector<8x32xf32>
    %1024 = arith.addf %1021, %1023 : vector<8x32xf32>
    %1025 = arith.index_cast %c5_i32 : i32 to index
    %c0_423 = arith.constant 0 : index
    %c0_424 = arith.constant 0 : index
    %1026 = vector.load %arg20[%1025, %c0_423, %c0_424] : memref<8x8x32xf32, #tpu.memory_space<vmem>>, vector<1x8x32xf32>
    %1027 = vector.shape_cast %1026 : vector<1x8x32xf32> to vector<8x32xf32>
    %1028 = vector.shape_cast %1024 : vector<8x32xf32> to vector<1x8x32xf32>
    tpu.vector_store %arg20[%1025, %c0_423, %c0_424], %1028 {strides = array<i32>} : memref<8x8x32xf32, #tpu.memory_space<vmem>>, vector<1x8x32xf32>,
    %c0_425 = arith.constant 0 : index
    %c0_426 = arith.constant 0 : index
    %1029 = vector.load %arg21[%c0_425, %c0_426] : memref<8x32xf32, #tpu.memory_space<vmem>>, vector<8x32xf32>
    tpu.vector_store %arg21[%c0_425, %c0_426], %1024 {strides = array<i32>} : memref<8x32xf32, #tpu.memory_space<vmem>>, vector<8x32xf32>,
    %c0_427 = arith.constant 0 : index
    %c0_428 = arith.constant 0 : index
    %1030 = vector.load %arg8[%c0_427, %c0_428] : memref<32x128xf32, #tpu.memory_space<vmem>>, vector<32x128xf32>
    %cst_429 = arith.constant dense<0.000000e+00> : vector<8x128xf32>
    %1031 = tpu.matmul %945, %1030, %cst_429 {dimension_numbers = #tpu.dot_dimension_numbers<[1], [0], [0], [1], [0, 0, 1, 1], [], []>} : vector<8x32xf32>, vector<32x128xf32>, vector<8x128xf32> -> vector<8x128xf32>
    %c0_430 = arith.constant 0 : index
    %c0_431 = arith.constant 0 : index
    %1032 = vector.load %arg9[%c0_430, %c0_431] : memref<32x128xf32, #tpu.memory_space<vmem>>, vector<32x128xf32>
    %cst_432 = arith.constant dense<0.000000e+00> : vector<8x128xf32>
    %1033 = tpu.matmul %987, %1032, %cst_432 {dimension_numbers = #tpu.dot_dimension_numbers<[1], [0], [0], [1], [0, 0, 1, 1], [], []>} : vector<8x32xf32>, vector<32x128xf32>, vector<8x128xf32> -> vector<8x128xf32>
    %1034 = arith.addf %1031, %1033 : vector<8x128xf32>
    %c0_433 = arith.constant 0 : index
    %c0_434 = arith.constant 0 : index
    %1035 = vector.load %arg11[%c0_433, %c0_434] : memref<1x128xf32, #tpu.memory_space<vmem>>, vector<1x128xf32>
    %1036 = vector.broadcast %1035 : vector<1x128xf32> to vector<8x128xf32>
    %1037 = arith.addf %1034, %1036 : vector<8x128xf32>
    %1038 = tpu.concatenate %1037, %1037 in 0 : vector<8x128xf32>, vector<8x128xf32> -> vector<16x128xf32>
    %c0_435 = arith.constant 0 : index
    %c0_436 = arith.constant 0 : index
    %1039 = vector.load %arg10[%c0_435, %c0_436] : memref<32x128xf32, #tpu.memory_space<vmem>>, vector<32x128xf32>
    %cst_437 = arith.constant dense<0.000000e+00> : vector<16x128xf32>
    %1040 = tpu.matmul %949, %1039, %cst_437 {dimension_numbers = #tpu.dot_dimension_numbers<[1], [0], [0], [1], [0, 0, 1, 1], [], []>} : vector<16x32xf32>, vector<32x128xf32>, vector<16x128xf32> -> vector<16x128xf32>
    %c0_438 = arith.constant 0 : index
    %c0_439 = arith.constant 0 : index
    %1041 = vector.load %arg12[%c0_438, %c0_439] : memref<1x128xf32, #tpu.memory_space<vmem>>, vector<1x128xf32>
    %1042 = vector.broadcast %1041 : vector<1x128xf32> to vector<16x128xf32>
    %1043 = arith.addf %1040, %1042 : vector<16x128xf32>
    %1044 = vector.extract_strided_slice %1038 {offsets = [0, 0], sizes = [16, 32], strides = [1, 1]} : vector<16x128xf32> to vector<16x32xf32>
    %1045 = vector.extract_strided_slice %1043 {offsets = [0, 0], sizes = [16, 32], strides = [1, 1]} : vector<16x128xf32> to vector<16x32xf32>
    %1046 = arith.addf %1044, %1045 : vector<16x32xf32>
    %1047 = arith.negf %1046 : vector<16x32xf32>
    %1048 = math.exp %1047 : vector<16x32xf32>
    %cst_440 = arith.constant 1.000000e+00 : f32
    %1049 = vector.broadcast %cst_440 : f32 to vector<16x32xf32>
    %1050 = arith.addf %1049, %1048 : vector<16x32xf32>
    %1051 = arith.divf %1049, %1050 : vector<16x32xf32>
    %1052 = vector.extract_strided_slice %1038 {offsets = [0, 32], sizes = [16, 32], strides = [1, 1]} : vector<16x128xf32> to vector<16x32xf32>
    %1053 = vector.extract_strided_slice %1043 {offsets = [0, 32], sizes = [16, 32], strides = [1, 1]} : vector<16x128xf32> to vector<16x32xf32>
    %1054 = arith.addf %1052, %1053 : vector<16x32xf32>
    %1055 = arith.negf %1054 : vector<16x32xf32>
    %1056 = math.exp %1055 : vector<16x32xf32>
    %cst_441 = arith.constant 1.000000e+00 : f32
    %1057 = vector.broadcast %cst_441 : f32 to vector<16x32xf32>
    %1058 = arith.addf %1057, %1056 : vector<16x32xf32>
    %1059 = arith.divf %1057, %1058 : vector<16x32xf32>
    %1060 = vector.extract_strided_slice %1038 {offsets = [0, 64], sizes = [16, 32], strides = [1, 1]} : vector<16x128xf32> to vector<16x32xf32>
    %1061 = vector.extract_strided_slice %1043 {offsets = [0, 64], sizes = [16, 32], strides = [1, 1]} : vector<16x128xf32> to vector<16x32xf32>
    %1062 = arith.mulf %1051, %1061 : vector<16x32xf32>
    %1063 = arith.addf %1060, %1062 : vector<16x32xf32>
    %1064 = math.tanh %1063 : vector<16x32xf32>
    %1065 = arith.subf %949, %1064 : vector<16x32xf32>
    %1066 = arith.mulf %1059, %1065 : vector<16x32xf32>
    %1067 = arith.addf %1064, %1066 : vector<16x32xf32>
    %cst_442 = arith.constant 0.000000e+00 : f32
    %1068 = vector.broadcast %cst_442 : f32 to vector<8x32xf32>
    %1069 = vector.extract_strided_slice %949 {offsets = [0, 0], sizes = [8, 32], strides = [1, 1]} : vector<16x32xf32> to vector<8x32xf32>
    %1070 = vector.extract_strided_slice %1067 {offsets = [0, 0], sizes = [8, 32], strides = [1, 1]} : vector<16x32xf32> to vector<8x32xf32>
    %1071 = vector.extract_strided_slice %948 {offsets = [0, 0], sizes = [8, 1], strides = [1, 1]} : vector<8x2xf32> to vector<8x1xf32>
    %1072 = arith.subf %1070, %1069 : vector<8x32xf32>
    %1073 = vector.broadcast %1071 : vector<8x1xf32> to vector<8x32xf32>
    %1074 = arith.mulf %1073, %1072 : vector<8x32xf32>
    %1075 = arith.addf %1069, %1074 : vector<8x32xf32>
    %1076 = vector.broadcast %1071 : vector<8x1xf32> to vector<8x32xf32>
    %1077 = arith.mulf %1076, %1075 : vector<8x32xf32>
    %1078 = arith.addf %1068, %1077 : vector<8x32xf32>
    %1079 = vector.extract_strided_slice %949 {offsets = [8, 0], sizes = [8, 32], strides = [1, 1]} : vector<16x32xf32> to vector<8x32xf32>
    %1080 = vector.extract_strided_slice %1067 {offsets = [8, 0], sizes = [8, 32], strides = [1, 1]} : vector<16x32xf32> to vector<8x32xf32>
    %1081 = vector.extract_strided_slice %948 {offsets = [0, 1], sizes = [8, 1], strides = [1, 1]} : vector<8x2xf32> to vector<8x1xf32>
    %1082 = arith.subf %1080, %1079 : vector<8x32xf32>
    %1083 = vector.broadcast %1081 : vector<8x1xf32> to vector<8x32xf32>
    %1084 = arith.mulf %1083, %1082 : vector<8x32xf32>
    %1085 = arith.addf %1079, %1084 : vector<8x32xf32>
    %1086 = vector.broadcast %1081 : vector<8x1xf32> to vector<8x32xf32>
    %1087 = arith.mulf %1086, %1085 : vector<8x32xf32>
    %1088 = arith.addf %1078, %1087 : vector<8x32xf32>
    %1089 = tpu.concatenate %1075, %1085 in 0 : vector<8x32xf32>, vector<8x32xf32> -> vector<16x32xf32>
    %c0_443 = arith.constant 0 : index
    %c0_444 = arith.constant 0 : index
    %1090 = vector.load %arg19[%c0_443, %c0_444] : memref<16x32xf32, #tpu.memory_space<vmem>>, vector<16x32xf32>
    tpu.vector_store %arg19[%c0_443, %c0_444], %1089 {strides = array<i32>} : memref<16x32xf32, #tpu.memory_space<vmem>>, vector<16x32xf32>,
    %c0_445 = arith.constant 0 : index
    %c0_446 = arith.constant 0 : index
    %1091 = vector.load %arg13[%c0_445, %c0_446] : memref<32x128xf32, #tpu.memory_space<vmem>>, vector<32x128xf32>
    %cst_447 = arith.constant dense<0.000000e+00> : vector<8x128xf32>
    %1092 = tpu.matmul %1088, %1091, %cst_447 {dimension_numbers = #tpu.dot_dimension_numbers<[1], [0], [0], [1], [0, 0, 1, 1], [], []>} : vector<8x32xf32>, vector<32x128xf32>, vector<8x128xf32> -> vector<8x128xf32>
    %c0_448 = arith.constant 0 : index
    %c0_449 = arith.constant 0 : index
    %1093 = vector.load %arg15[%c0_448, %c0_449] : memref<1x128xf32, #tpu.memory_space<vmem>>, vector<1x128xf32>
    %1094 = vector.broadcast %1093 : vector<1x128xf32> to vector<8x128xf32>
    %1095 = arith.addf %1092, %1094 : vector<8x128xf32>
    %c0_450 = arith.constant 0 : index
    %c0_451 = arith.constant 0 : index
    %1096 = vector.load %arg14[%c0_450, %c0_451] : memref<32x128xf32, #tpu.memory_space<vmem>>, vector<32x128xf32>
    %cst_452 = arith.constant dense<0.000000e+00> : vector<8x128xf32>
    %1097 = tpu.matmul %951, %1096, %cst_452 {dimension_numbers = #tpu.dot_dimension_numbers<[1], [0], [0], [1], [0, 0, 1, 1], [], []>} : vector<8x32xf32>, vector<32x128xf32>, vector<8x128xf32> -> vector<8x128xf32>
    %c0_453 = arith.constant 0 : index
    %c0_454 = arith.constant 0 : index
    %1098 = vector.load %arg16[%c0_453, %c0_454] : memref<1x128xf32, #tpu.memory_space<vmem>>, vector<1x128xf32>
    %1099 = vector.broadcast %1098 : vector<1x128xf32> to vector<8x128xf32>
    %1100 = arith.addf %1097, %1099 : vector<8x128xf32>
    %1101 = vector.extract_strided_slice %1095 {offsets = [0, 0], sizes = [8, 32], strides = [1, 1]} : vector<8x128xf32> to vector<8x32xf32>
    %1102 = vector.extract_strided_slice %1100 {offsets = [0, 0], sizes = [8, 32], strides = [1, 1]} : vector<8x128xf32> to vector<8x32xf32>
    %1103 = arith.addf %1101, %1102 : vector<8x32xf32>
    %1104 = arith.negf %1103 : vector<8x32xf32>
    %1105 = math.exp %1104 : vector<8x32xf32>
    %cst_455 = arith.constant 1.000000e+00 : f32
    %1106 = vector.broadcast %cst_455 : f32 to vector<8x32xf32>
    %1107 = arith.addf %1106, %1105 : vector<8x32xf32>
    %1108 = arith.divf %1106, %1107 : vector<8x32xf32>
    %1109 = vector.extract_strided_slice %1095 {offsets = [0, 32], sizes = [8, 32], strides = [1, 1]} : vector<8x128xf32> to vector<8x32xf32>
    %1110 = vector.extract_strided_slice %1100 {offsets = [0, 32], sizes = [8, 32], strides = [1, 1]} : vector<8x128xf32> to vector<8x32xf32>
    %1111 = arith.addf %1109, %1110 : vector<8x32xf32>
    %1112 = arith.negf %1111 : vector<8x32xf32>
    %1113 = math.exp %1112 : vector<8x32xf32>
    %cst_456 = arith.constant 1.000000e+00 : f32
    %1114 = vector.broadcast %cst_456 : f32 to vector<8x32xf32>
    %1115 = arith.addf %1114, %1113 : vector<8x32xf32>
    %1116 = arith.divf %1114, %1115 : vector<8x32xf32>
    %1117 = vector.extract_strided_slice %1095 {offsets = [0, 64], sizes = [8, 32], strides = [1, 1]} : vector<8x128xf32> to vector<8x32xf32>
    %1118 = vector.extract_strided_slice %1100 {offsets = [0, 64], sizes = [8, 32], strides = [1, 1]} : vector<8x128xf32> to vector<8x32xf32>
    %1119 = arith.mulf %1108, %1118 : vector<8x32xf32>
    %1120 = arith.addf %1117, %1119 : vector<8x32xf32>
    %1121 = math.tanh %1120 : vector<8x32xf32>
    %1122 = arith.subf %951, %1121 : vector<8x32xf32>
    %1123 = arith.mulf %1116, %1122 : vector<8x32xf32>
    %1124 = arith.addf %1121, %1123 : vector<8x32xf32>
    %c0_457 = arith.constant 0 : index
    %c0_458 = arith.constant 0 : index
    %1125 = vector.load %arg22[%c0_457, %c0_458] : memref<8x32xf32, #tpu.memory_space<vmem>>, vector<8x32xf32>
    tpu.vector_store %arg22[%c0_457, %c0_458], %1124 {strides = array<i32>} : memref<8x32xf32, #tpu.memory_space<vmem>>, vector<8x32xf32>,
    %1126 = arith.index_cast %c5_i32 : i32 to index
    %c0_459 = arith.constant 0 : index
    %c0_460 = arith.constant 0 : index
    %1127 = vector.load %arg18[%1126, %c0_459, %c0_460] : memref<8x8x32xf32, #tpu.memory_space<vmem>>, vector<1x8x32xf32>
    %1128 = vector.shape_cast %1127 : vector<1x8x32xf32> to vector<8x32xf32>
    %1129 = vector.shape_cast %1124 : vector<8x32xf32> to vector<1x8x32xf32>
    tpu.vector_store %arg18[%1126, %c0_459, %c0_460], %1129 {strides = array<i32>} : memref<8x8x32xf32, #tpu.memory_space<vmem>>, vector<1x8x32xf32>,
    %c6_i32 = arith.constant 6 : i32
    %1130 = arith.index_cast %c6_i32 : i32 to index
    %c0_461 = arith.constant 0 : index
    %c0_462 = arith.constant 0 : index
    %1131 = vector.load %arg1[%1130, %c0_461, %c0_462] : memref<8x8x32xf32, #tpu.memory_space<vmem>>, vector<1x8x32xf32>
    %1132 = vector.shape_cast %1131 : vector<1x8x32xf32> to vector<8x32xf32>
    %1133 = arith.index_cast %c6_i32 : i32 to index
    %c0_463 = arith.constant 0 : index
    %c0_464 = arith.constant 0 : index
    %1134 = vector.load %arg2[%1133, %c0_463, %c0_464] : memref<8x8x2xf32, #tpu.memory_space<vmem>>, vector<1x8x2xf32>
    %1135 = vector.shape_cast %1134 : vector<1x8x2xf32> to vector<8x2xf32>
    %c0_465 = arith.constant 0 : index
    %c0_466 = arith.constant 0 : index
    %1136 = vector.load %arg19[%c0_465, %c0_466] : memref<16x32xf32, #tpu.memory_space<vmem>>, vector<16x32xf32>
    %c0_467 = arith.constant 0 : index
    %c0_468 = arith.constant 0 : index
    %1137 = vector.load %arg21[%c0_467, %c0_468] : memref<8x32xf32, #tpu.memory_space<vmem>>, vector<8x32xf32>
    %c0_469 = arith.constant 0 : index
    %c0_470 = arith.constant 0 : index
    %1138 = vector.load %arg22[%c0_469, %c0_470] : memref<8x32xf32, #tpu.memory_space<vmem>>, vector<8x32xf32>
    %cst_471 = arith.constant 0.000000e+00 : f32
    %1139 = vector.broadcast %cst_471 : f32 to vector<8x32xf32>
    %1140 = vector.extract_strided_slice %1135 {offsets = [0, 0], sizes = [8, 1], strides = [1, 1]} : vector<8x2xf32> to vector<8x1xf32>
    %1141 = vector.extract_strided_slice %1136 {offsets = [0, 0], sizes = [8, 32], strides = [1, 1]} : vector<16x32xf32> to vector<8x32xf32>
    %1142 = vector.broadcast %1140 : vector<8x1xf32> to vector<8x32xf32>
    %1143 = arith.mulf %1142, %1141 : vector<8x32xf32>
    %1144 = arith.addf %1139, %1143 : vector<8x32xf32>
    %1145 = vector.extract_strided_slice %1135 {offsets = [0, 1], sizes = [8, 1], strides = [1, 1]} : vector<8x2xf32> to vector<8x1xf32>
    %1146 = vector.extract_strided_slice %1136 {offsets = [8, 0], sizes = [8, 32], strides = [1, 1]} : vector<16x32xf32> to vector<8x32xf32>
    %1147 = vector.broadcast %1145 : vector<8x1xf32> to vector<8x32xf32>
    %1148 = arith.mulf %1147, %1146 : vector<8x32xf32>
    %1149 = arith.addf %1144, %1148 : vector<8x32xf32>
    %c0_472 = arith.constant 0 : index
    %c0_473 = arith.constant 0 : index
    %c0_474 = arith.constant 0 : index
    %1150 = vector.load %arg20[%c0_472, %c0_473, %c0_474] : memref<8x8x32xf32, #tpu.memory_space<vmem>>, vector<8x8x32xf32>
    %c0_475 = arith.constant 0 : index
    %c0_476 = arith.constant 0 : index
    %1151 = vector.load %arg17[%c0_475, %c0_476] : memref<32x32xf32, #tpu.memory_space<vmem>>, vector<32x32xf32>
    %cst_477 = arith.constant dense<0.000000e+00> : vector<8x32xf32>
    %1152 = tpu.matmul %1132, %1151, %cst_477 {dimension_numbers = #tpu.dot_dimension_numbers<[1], [0], [0], [1], [0, 0, 1, 1], [], []>} : vector<8x32xf32>, vector<32x32xf32>, vector<8x32xf32> -> vector<8x32xf32>
    %1153 = vector.shape_cast %1152 : vector<8x32xf32> to vector<1x8x32xf32>
    %1154 = vector.broadcast %1153 : vector<1x8x32xf32> to vector<8x8x32xf32>
    %1155 = arith.mulf %1150, %1154 : vector<8x8x32xf32>
    %cst_478 = arith.constant dense<0.000000e+00> : vector<8x8xf32>
    %1156 = vector.multi_reduction <add>, %1155, %cst_478 [2] : vector<8x8x32xf32> to vector<8x8xf32>
    %1157 = tpu.iota {dimensions = array<i32: 0>} : vector<8x8xi32>
    %1158 = vector.broadcast %c6_i32 : i32 to vector<8x8xi32>
    %1159 = arith.cmpi slt, %1157, %1158 : vector<8x8xi32>
    %cst_479 = arith.constant -1.000000e+30 : f32
    %1160 = vector.broadcast %cst_479 : f32 to vector<8x8xf32>
    %1161 = arith.select %1159, %1156, %1160 : vector<8x8xi1>, vector<8x8xf32>
    %cst_480 = arith.constant dense<0xFF800000> : vector<8xf32>
    %1162 = vector.multi_reduction <maximumf>, %1161, %cst_480 [0] : vector<8x8xf32> to vector<8xf32>
    %1163 = vector.shape_cast %1162 : vector<8xf32> to vector<1x8xf32>
    %1164 = vector.broadcast %1163 : vector<1x8xf32> to vector<8x8xf32>
    %1165 = arith.subf %1161, %1164 : vector<8x8xf32>
    %1166 = math.exp %1165 : vector<8x8xf32>
    %cst_481 = arith.constant dense<0.000000e+00> : vector<8xf32>
    %1167 = vector.multi_reduction <add>, %1166, %cst_481 [0] : vector<8x8xf32> to vector<8xf32>
    %1168 = vector.shape_cast %1167 : vector<8xf32> to vector<1x8xf32>
    %1169 = vector.broadcast %1168 : vector<1x8xf32> to vector<8x8xf32>
    %1170 = arith.divf %1166, %1169 : vector<8x8xf32>
    %1171 = vector.shape_cast %1170 : vector<8x8xf32> to vector<8x8x1xf32>
    %1172 = vector.broadcast %1171 : vector<8x8x1xf32> to vector<8x8x32xf32>
    %1173 = arith.mulf %1172, %1150 : vector<8x8x32xf32>
    %cst_482 = arith.constant dense<0.000000e+00> : vector<8x32xf32>
    %1174 = vector.multi_reduction <add>, %1173, %cst_482 [0] : vector<8x8x32xf32> to vector<8x32xf32>
    %c0_483 = arith.constant 0 : index
    %c0_484 = arith.constant 0 : index
    %1175 = vector.load %arg3[%c0_483, %c0_484] : memref<32x128xf32, #tpu.memory_space<vmem>>, vector<32x128xf32>
    %cst_485 = arith.constant dense<0.000000e+00> : vector<8x128xf32>
    %1176 = tpu.matmul %1132, %1175, %cst_485 {dimension_numbers = #tpu.dot_dimension_numbers<[1], [0], [0], [1], [0, 0, 1, 1], [], []>} : vector<8x32xf32>, vector<32x128xf32>, vector<8x128xf32> -> vector<8x128xf32>
    %c0_486 = arith.constant 0 : index
    %c0_487 = arith.constant 0 : index
    %1177 = vector.load %arg4[%c0_486, %c0_487] : memref<32x128xf32, #tpu.memory_space<vmem>>, vector<32x128xf32>
    %cst_488 = arith.constant dense<0.000000e+00> : vector<8x128xf32>
    %1178 = tpu.matmul %1149, %1177, %cst_488 {dimension_numbers = #tpu.dot_dimension_numbers<[1], [0], [0], [1], [0, 0, 1, 1], [], []>} : vector<8x32xf32>, vector<32x128xf32>, vector<8x128xf32> -> vector<8x128xf32>
    %1179 = arith.addf %1176, %1178 : vector<8x128xf32>
    %c0_489 = arith.constant 0 : index
    %c0_490 = arith.constant 0 : index
    %1180 = vector.load %arg6[%c0_489, %c0_490] : memref<1x128xf32, #tpu.memory_space<vmem>>, vector<1x128xf32>
    %1181 = vector.broadcast %1180 : vector<1x128xf32> to vector<8x128xf32>
    %1182 = arith.addf %1179, %1181 : vector<8x128xf32>
    %c0_491 = arith.constant 0 : index
    %c0_492 = arith.constant 0 : index
    %1183 = vector.load %arg5[%c0_491, %c0_492] : memref<32x128xf32, #tpu.memory_space<vmem>>, vector<32x128xf32>
    %cst_493 = arith.constant dense<0.000000e+00> : vector<8x128xf32>
    %1184 = tpu.matmul %1137, %1183, %cst_493 {dimension_numbers = #tpu.dot_dimension_numbers<[1], [0], [0], [1], [0, 0, 1, 1], [], []>} : vector<8x32xf32>, vector<32x128xf32>, vector<8x128xf32> -> vector<8x128xf32>
    %c0_494 = arith.constant 0 : index
    %c0_495 = arith.constant 0 : index
    %1185 = vector.load %arg7[%c0_494, %c0_495] : memref<1x128xf32, #tpu.memory_space<vmem>>, vector<1x128xf32>
    %1186 = vector.broadcast %1185 : vector<1x128xf32> to vector<8x128xf32>
    %1187 = arith.addf %1184, %1186 : vector<8x128xf32>
    %1188 = vector.extract_strided_slice %1182 {offsets = [0, 0], sizes = [8, 32], strides = [1, 1]} : vector<8x128xf32> to vector<8x32xf32>
    %1189 = vector.extract_strided_slice %1187 {offsets = [0, 0], sizes = [8, 32], strides = [1, 1]} : vector<8x128xf32> to vector<8x32xf32>
    %1190 = arith.addf %1188, %1189 : vector<8x32xf32>
    %1191 = arith.negf %1190 : vector<8x32xf32>
    %1192 = math.exp %1191 : vector<8x32xf32>
    %cst_496 = arith.constant 1.000000e+00 : f32
    %1193 = vector.broadcast %cst_496 : f32 to vector<8x32xf32>
    %1194 = arith.addf %1193, %1192 : vector<8x32xf32>
    %1195 = arith.divf %1193, %1194 : vector<8x32xf32>
    %1196 = vector.extract_strided_slice %1182 {offsets = [0, 32], sizes = [8, 32], strides = [1, 1]} : vector<8x128xf32> to vector<8x32xf32>
    %1197 = vector.extract_strided_slice %1187 {offsets = [0, 32], sizes = [8, 32], strides = [1, 1]} : vector<8x128xf32> to vector<8x32xf32>
    %1198 = arith.addf %1196, %1197 : vector<8x32xf32>
    %1199 = arith.negf %1198 : vector<8x32xf32>
    %1200 = math.exp %1199 : vector<8x32xf32>
    %cst_497 = arith.constant 1.000000e+00 : f32
    %1201 = vector.broadcast %cst_497 : f32 to vector<8x32xf32>
    %1202 = arith.addf %1201, %1200 : vector<8x32xf32>
    %1203 = arith.divf %1201, %1202 : vector<8x32xf32>
    %1204 = vector.extract_strided_slice %1182 {offsets = [0, 64], sizes = [8, 32], strides = [1, 1]} : vector<8x128xf32> to vector<8x32xf32>
    %1205 = vector.extract_strided_slice %1187 {offsets = [0, 64], sizes = [8, 32], strides = [1, 1]} : vector<8x128xf32> to vector<8x32xf32>
    %1206 = arith.mulf %1195, %1205 : vector<8x32xf32>
    %1207 = arith.addf %1204, %1206 : vector<8x32xf32>
    %1208 = math.tanh %1207 : vector<8x32xf32>
    %1209 = arith.subf %1137, %1208 : vector<8x32xf32>
    %1210 = arith.mulf %1203, %1209 : vector<8x32xf32>
    %1211 = arith.addf %1208, %1210 : vector<8x32xf32>
    %1212 = arith.index_cast %c6_i32 : i32 to index
    %c0_498 = arith.constant 0 : index
    %c0_499 = arith.constant 0 : index
    %1213 = vector.load %arg20[%1212, %c0_498, %c0_499] : memref<8x8x32xf32, #tpu.memory_space<vmem>>, vector<1x8x32xf32>
    %1214 = vector.shape_cast %1213 : vector<1x8x32xf32> to vector<8x32xf32>
    %1215 = vector.shape_cast %1211 : vector<8x32xf32> to vector<1x8x32xf32>
    tpu.vector_store %arg20[%1212, %c0_498, %c0_499], %1215 {strides = array<i32>} : memref<8x8x32xf32, #tpu.memory_space<vmem>>, vector<1x8x32xf32>,
    %c0_500 = arith.constant 0 : index
    %c0_501 = arith.constant 0 : index
    %1216 = vector.load %arg21[%c0_500, %c0_501] : memref<8x32xf32, #tpu.memory_space<vmem>>, vector<8x32xf32>
    tpu.vector_store %arg21[%c0_500, %c0_501], %1211 {strides = array<i32>} : memref<8x32xf32, #tpu.memory_space<vmem>>, vector<8x32xf32>,
    %c0_502 = arith.constant 0 : index
    %c0_503 = arith.constant 0 : index
    %1217 = vector.load %arg8[%c0_502, %c0_503] : memref<32x128xf32, #tpu.memory_space<vmem>>, vector<32x128xf32>
    %cst_504 = arith.constant dense<0.000000e+00> : vector<8x128xf32>
    %1218 = tpu.matmul %1132, %1217, %cst_504 {dimension_numbers = #tpu.dot_dimension_numbers<[1], [0], [0], [1], [0, 0, 1, 1], [], []>} : vector<8x32xf32>, vector<32x128xf32>, vector<8x128xf32> -> vector<8x128xf32>
    %c0_505 = arith.constant 0 : index
    %c0_506 = arith.constant 0 : index
    %1219 = vector.load %arg9[%c0_505, %c0_506] : memref<32x128xf32, #tpu.memory_space<vmem>>, vector<32x128xf32>
    %cst_507 = arith.constant dense<0.000000e+00> : vector<8x128xf32>
    %1220 = tpu.matmul %1174, %1219, %cst_507 {dimension_numbers = #tpu.dot_dimension_numbers<[1], [0], [0], [1], [0, 0, 1, 1], [], []>} : vector<8x32xf32>, vector<32x128xf32>, vector<8x128xf32> -> vector<8x128xf32>
    %1221 = arith.addf %1218, %1220 : vector<8x128xf32>
    %c0_508 = arith.constant 0 : index
    %c0_509 = arith.constant 0 : index
    %1222 = vector.load %arg11[%c0_508, %c0_509] : memref<1x128xf32, #tpu.memory_space<vmem>>, vector<1x128xf32>
    %1223 = vector.broadcast %1222 : vector<1x128xf32> to vector<8x128xf32>
    %1224 = arith.addf %1221, %1223 : vector<8x128xf32>
    %1225 = tpu.concatenate %1224, %1224 in 0 : vector<8x128xf32>, vector<8x128xf32> -> vector<16x128xf32>
    %c0_510 = arith.constant 0 : index
    %c0_511 = arith.constant 0 : index
    %1226 = vector.load %arg10[%c0_510, %c0_511] : memref<32x128xf32, #tpu.memory_space<vmem>>, vector<32x128xf32>
    %cst_512 = arith.constant dense<0.000000e+00> : vector<16x128xf32>
    %1227 = tpu.matmul %1136, %1226, %cst_512 {dimension_numbers = #tpu.dot_dimension_numbers<[1], [0], [0], [1], [0, 0, 1, 1], [], []>} : vector<16x32xf32>, vector<32x128xf32>, vector<16x128xf32> -> vector<16x128xf32>
    %c0_513 = arith.constant 0 : index
    %c0_514 = arith.constant 0 : index
    %1228 = vector.load %arg12[%c0_513, %c0_514] : memref<1x128xf32, #tpu.memory_space<vmem>>, vector<1x128xf32>
    %1229 = vector.broadcast %1228 : vector<1x128xf32> to vector<16x128xf32>
    %1230 = arith.addf %1227, %1229 : vector<16x128xf32>
    %1231 = vector.extract_strided_slice %1225 {offsets = [0, 0], sizes = [16, 32], strides = [1, 1]} : vector<16x128xf32> to vector<16x32xf32>
    %1232 = vector.extract_strided_slice %1230 {offsets = [0, 0], sizes = [16, 32], strides = [1, 1]} : vector<16x128xf32> to vector<16x32xf32>
    %1233 = arith.addf %1231, %1232 : vector<16x32xf32>
    %1234 = arith.negf %1233 : vector<16x32xf32>
    %1235 = math.exp %1234 : vector<16x32xf32>
    %cst_515 = arith.constant 1.000000e+00 : f32
    %1236 = vector.broadcast %cst_515 : f32 to vector<16x32xf32>
    %1237 = arith.addf %1236, %1235 : vector<16x32xf32>
    %1238 = arith.divf %1236, %1237 : vector<16x32xf32>
    %1239 = vector.extract_strided_slice %1225 {offsets = [0, 32], sizes = [16, 32], strides = [1, 1]} : vector<16x128xf32> to vector<16x32xf32>
    %1240 = vector.extract_strided_slice %1230 {offsets = [0, 32], sizes = [16, 32], strides = [1, 1]} : vector<16x128xf32> to vector<16x32xf32>
    %1241 = arith.addf %1239, %1240 : vector<16x32xf32>
    %1242 = arith.negf %1241 : vector<16x32xf32>
    %1243 = math.exp %1242 : vector<16x32xf32>
    %cst_516 = arith.constant 1.000000e+00 : f32
    %1244 = vector.broadcast %cst_516 : f32 to vector<16x32xf32>
    %1245 = arith.addf %1244, %1243 : vector<16x32xf32>
    %1246 = arith.divf %1244, %1245 : vector<16x32xf32>
    %1247 = vector.extract_strided_slice %1225 {offsets = [0, 64], sizes = [16, 32], strides = [1, 1]} : vector<16x128xf32> to vector<16x32xf32>
    %1248 = vector.extract_strided_slice %1230 {offsets = [0, 64], sizes = [16, 32], strides = [1, 1]} : vector<16x128xf32> to vector<16x32xf32>
    %1249 = arith.mulf %1238, %1248 : vector<16x32xf32>
    %1250 = arith.addf %1247, %1249 : vector<16x32xf32>
    %1251 = math.tanh %1250 : vector<16x32xf32>
    %1252 = arith.subf %1136, %1251 : vector<16x32xf32>
    %1253 = arith.mulf %1246, %1252 : vector<16x32xf32>
    %1254 = arith.addf %1251, %1253 : vector<16x32xf32>
    %cst_517 = arith.constant 0.000000e+00 : f32
    %1255 = vector.broadcast %cst_517 : f32 to vector<8x32xf32>
    %1256 = vector.extract_strided_slice %1136 {offsets = [0, 0], sizes = [8, 32], strides = [1, 1]} : vector<16x32xf32> to vector<8x32xf32>
    %1257 = vector.extract_strided_slice %1254 {offsets = [0, 0], sizes = [8, 32], strides = [1, 1]} : vector<16x32xf32> to vector<8x32xf32>
    %1258 = vector.extract_strided_slice %1135 {offsets = [0, 0], sizes = [8, 1], strides = [1, 1]} : vector<8x2xf32> to vector<8x1xf32>
    %1259 = arith.subf %1257, %1256 : vector<8x32xf32>
    %1260 = vector.broadcast %1258 : vector<8x1xf32> to vector<8x32xf32>
    %1261 = arith.mulf %1260, %1259 : vector<8x32xf32>
    %1262 = arith.addf %1256, %1261 : vector<8x32xf32>
    %1263 = vector.broadcast %1258 : vector<8x1xf32> to vector<8x32xf32>
    %1264 = arith.mulf %1263, %1262 : vector<8x32xf32>
    %1265 = arith.addf %1255, %1264 : vector<8x32xf32>
    %1266 = vector.extract_strided_slice %1136 {offsets = [8, 0], sizes = [8, 32], strides = [1, 1]} : vector<16x32xf32> to vector<8x32xf32>
    %1267 = vector.extract_strided_slice %1254 {offsets = [8, 0], sizes = [8, 32], strides = [1, 1]} : vector<16x32xf32> to vector<8x32xf32>
    %1268 = vector.extract_strided_slice %1135 {offsets = [0, 1], sizes = [8, 1], strides = [1, 1]} : vector<8x2xf32> to vector<8x1xf32>
    %1269 = arith.subf %1267, %1266 : vector<8x32xf32>
    %1270 = vector.broadcast %1268 : vector<8x1xf32> to vector<8x32xf32>
    %1271 = arith.mulf %1270, %1269 : vector<8x32xf32>
    %1272 = arith.addf %1266, %1271 : vector<8x32xf32>
    %1273 = vector.broadcast %1268 : vector<8x1xf32> to vector<8x32xf32>
    %1274 = arith.mulf %1273, %1272 : vector<8x32xf32>
    %1275 = arith.addf %1265, %1274 : vector<8x32xf32>
    %1276 = tpu.concatenate %1262, %1272 in 0 : vector<8x32xf32>, vector<8x32xf32> -> vector<16x32xf32>
    %c0_518 = arith.constant 0 : index
    %c0_519 = arith.constant 0 : index
    %1277 = vector.load %arg19[%c0_518, %c0_519] : memref<16x32xf32, #tpu.memory_space<vmem>>, vector<16x32xf32>
    tpu.vector_store %arg19[%c0_518, %c0_519], %1276 {strides = array<i32>} : memref<16x32xf32, #tpu.memory_space<vmem>>, vector<16x32xf32>,
    %c0_520 = arith.constant 0 : index
    %c0_521 = arith.constant 0 : index
    %1278 = vector.load %arg13[%c0_520, %c0_521] : memref<32x128xf32, #tpu.memory_space<vmem>>, vector<32x128xf32>
    %cst_522 = arith.constant dense<0.000000e+00> : vector<8x128xf32>
    %1279 = tpu.matmul %1275, %1278, %cst_522 {dimension_numbers = #tpu.dot_dimension_numbers<[1], [0], [0], [1], [0, 0, 1, 1], [], []>} : vector<8x32xf32>, vector<32x128xf32>, vector<8x128xf32> -> vector<8x128xf32>
    %c0_523 = arith.constant 0 : index
    %c0_524 = arith.constant 0 : index
    %1280 = vector.load %arg15[%c0_523, %c0_524] : memref<1x128xf32, #tpu.memory_space<vmem>>, vector<1x128xf32>
    %1281 = vector.broadcast %1280 : vector<1x128xf32> to vector<8x128xf32>
    %1282 = arith.addf %1279, %1281 : vector<8x128xf32>
    %c0_525 = arith.constant 0 : index
    %c0_526 = arith.constant 0 : index
    %1283 = vector.load %arg14[%c0_525, %c0_526] : memref<32x128xf32, #tpu.memory_space<vmem>>, vector<32x128xf32>
    %cst_527 = arith.constant dense<0.000000e+00> : vector<8x128xf32>
    %1284 = tpu.matmul %1138, %1283, %cst_527 {dimension_numbers = #tpu.dot_dimension_numbers<[1], [0], [0], [1], [0, 0, 1, 1], [], []>} : vector<8x32xf32>, vector<32x128xf32>, vector<8x128xf32> -> vector<8x128xf32>
    %c0_528 = arith.constant 0 : index
    %c0_529 = arith.constant 0 : index
    %1285 = vector.load %arg16[%c0_528, %c0_529] : memref<1x128xf32, #tpu.memory_space<vmem>>, vector<1x128xf32>
    %1286 = vector.broadcast %1285 : vector<1x128xf32> to vector<8x128xf32>
    %1287 = arith.addf %1284, %1286 : vector<8x128xf32>
    %1288 = vector.extract_strided_slice %1282 {offsets = [0, 0], sizes = [8, 32], strides = [1, 1]} : vector<8x128xf32> to vector<8x32xf32>
    %1289 = vector.extract_strided_slice %1287 {offsets = [0, 0], sizes = [8, 32], strides = [1, 1]} : vector<8x128xf32> to vector<8x32xf32>
    %1290 = arith.addf %1288, %1289 : vector<8x32xf32>
    %1291 = arith.negf %1290 : vector<8x32xf32>
    %1292 = math.exp %1291 : vector<8x32xf32>
    %cst_530 = arith.constant 1.000000e+00 : f32
    %1293 = vector.broadcast %cst_530 : f32 to vector<8x32xf32>
    %1294 = arith.addf %1293, %1292 : vector<8x32xf32>
    %1295 = arith.divf %1293, %1294 : vector<8x32xf32>
    %1296 = vector.extract_strided_slice %1282 {offsets = [0, 32], sizes = [8, 32], strides = [1, 1]} : vector<8x128xf32> to vector<8x32xf32>
    %1297 = vector.extract_strided_slice %1287 {offsets = [0, 32], sizes = [8, 32], strides = [1, 1]} : vector<8x128xf32> to vector<8x32xf32>
    %1298 = arith.addf %1296, %1297 : vector<8x32xf32>
    %1299 = arith.negf %1298 : vector<8x32xf32>
    %1300 = math.exp %1299 : vector<8x32xf32>
    %cst_531 = arith.constant 1.000000e+00 : f32
    %1301 = vector.broadcast %cst_531 : f32 to vector<8x32xf32>
    %1302 = arith.addf %1301, %1300 : vector<8x32xf32>
    %1303 = arith.divf %1301, %1302 : vector<8x32xf32>
    %1304 = vector.extract_strided_slice %1282 {offsets = [0, 64], sizes = [8, 32], strides = [1, 1]} : vector<8x128xf32> to vector<8x32xf32>
    %1305 = vector.extract_strided_slice %1287 {offsets = [0, 64], sizes = [8, 32], strides = [1, 1]} : vector<8x128xf32> to vector<8x32xf32>
    %1306 = arith.mulf %1295, %1305 : vector<8x32xf32>
    %1307 = arith.addf %1304, %1306 : vector<8x32xf32>
    %1308 = math.tanh %1307 : vector<8x32xf32>
    %1309 = arith.subf %1138, %1308 : vector<8x32xf32>
    %1310 = arith.mulf %1303, %1309 : vector<8x32xf32>
    %1311 = arith.addf %1308, %1310 : vector<8x32xf32>
    %c0_532 = arith.constant 0 : index
    %c0_533 = arith.constant 0 : index
    %1312 = vector.load %arg22[%c0_532, %c0_533] : memref<8x32xf32, #tpu.memory_space<vmem>>, vector<8x32xf32>
    tpu.vector_store %arg22[%c0_532, %c0_533], %1311 {strides = array<i32>} : memref<8x32xf32, #tpu.memory_space<vmem>>, vector<8x32xf32>,
    %1313 = arith.index_cast %c6_i32 : i32 to index
    %c0_534 = arith.constant 0 : index
    %c0_535 = arith.constant 0 : index
    %1314 = vector.load %arg18[%1313, %c0_534, %c0_535] : memref<8x8x32xf32, #tpu.memory_space<vmem>>, vector<1x8x32xf32>
    %1315 = vector.shape_cast %1314 : vector<1x8x32xf32> to vector<8x32xf32>
    %1316 = vector.shape_cast %1311 : vector<8x32xf32> to vector<1x8x32xf32>
    tpu.vector_store %arg18[%1313, %c0_534, %c0_535], %1316 {strides = array<i32>} : memref<8x8x32xf32, #tpu.memory_space<vmem>>, vector<1x8x32xf32>,
    %c7_i32 = arith.constant 7 : i32
    %1317 = arith.index_cast %c7_i32 : i32 to index
    %c0_536 = arith.constant 0 : index
    %c0_537 = arith.constant 0 : index
    %1318 = vector.load %arg1[%1317, %c0_536, %c0_537] : memref<8x8x32xf32, #tpu.memory_space<vmem>>, vector<1x8x32xf32>
    %1319 = vector.shape_cast %1318 : vector<1x8x32xf32> to vector<8x32xf32>
    %1320 = arith.index_cast %c7_i32 : i32 to index
    %c0_538 = arith.constant 0 : index
    %c0_539 = arith.constant 0 : index
    %1321 = vector.load %arg2[%1320, %c0_538, %c0_539] : memref<8x8x2xf32, #tpu.memory_space<vmem>>, vector<1x8x2xf32>
    %1322 = vector.shape_cast %1321 : vector<1x8x2xf32> to vector<8x2xf32>
    %c0_540 = arith.constant 0 : index
    %c0_541 = arith.constant 0 : index
    %1323 = vector.load %arg19[%c0_540, %c0_541] : memref<16x32xf32, #tpu.memory_space<vmem>>, vector<16x32xf32>
    %c0_542 = arith.constant 0 : index
    %c0_543 = arith.constant 0 : index
    %1324 = vector.load %arg21[%c0_542, %c0_543] : memref<8x32xf32, #tpu.memory_space<vmem>>, vector<8x32xf32>
    %c0_544 = arith.constant 0 : index
    %c0_545 = arith.constant 0 : index
    %1325 = vector.load %arg22[%c0_544, %c0_545] : memref<8x32xf32, #tpu.memory_space<vmem>>, vector<8x32xf32>
    %cst_546 = arith.constant 0.000000e+00 : f32
    %1326 = vector.broadcast %cst_546 : f32 to vector<8x32xf32>
    %1327 = vector.extract_strided_slice %1322 {offsets = [0, 0], sizes = [8, 1], strides = [1, 1]} : vector<8x2xf32> to vector<8x1xf32>
    %1328 = vector.extract_strided_slice %1323 {offsets = [0, 0], sizes = [8, 32], strides = [1, 1]} : vector<16x32xf32> to vector<8x32xf32>
    %1329 = vector.broadcast %1327 : vector<8x1xf32> to vector<8x32xf32>
    %1330 = arith.mulf %1329, %1328 : vector<8x32xf32>
    %1331 = arith.addf %1326, %1330 : vector<8x32xf32>
    %1332 = vector.extract_strided_slice %1322 {offsets = [0, 1], sizes = [8, 1], strides = [1, 1]} : vector<8x2xf32> to vector<8x1xf32>
    %1333 = vector.extract_strided_slice %1323 {offsets = [8, 0], sizes = [8, 32], strides = [1, 1]} : vector<16x32xf32> to vector<8x32xf32>
    %1334 = vector.broadcast %1332 : vector<8x1xf32> to vector<8x32xf32>
    %1335 = arith.mulf %1334, %1333 : vector<8x32xf32>
    %1336 = arith.addf %1331, %1335 : vector<8x32xf32>
    %c0_547 = arith.constant 0 : index
    %c0_548 = arith.constant 0 : index
    %c0_549 = arith.constant 0 : index
    %1337 = vector.load %arg20[%c0_547, %c0_548, %c0_549] : memref<8x8x32xf32, #tpu.memory_space<vmem>>, vector<8x8x32xf32>
    %c0_550 = arith.constant 0 : index
    %c0_551 = arith.constant 0 : index
    %1338 = vector.load %arg17[%c0_550, %c0_551] : memref<32x32xf32, #tpu.memory_space<vmem>>, vector<32x32xf32>
    %cst_552 = arith.constant dense<0.000000e+00> : vector<8x32xf32>
    %1339 = tpu.matmul %1319, %1338, %cst_552 {dimension_numbers = #tpu.dot_dimension_numbers<[1], [0], [0], [1], [0, 0, 1, 1], [], []>} : vector<8x32xf32>, vector<32x32xf32>, vector<8x32xf32> -> vector<8x32xf32>
    %1340 = vector.shape_cast %1339 : vector<8x32xf32> to vector<1x8x32xf32>
    %1341 = vector.broadcast %1340 : vector<1x8x32xf32> to vector<8x8x32xf32>
    %1342 = arith.mulf %1337, %1341 : vector<8x8x32xf32>
    %cst_553 = arith.constant dense<0.000000e+00> : vector<8x8xf32>
    %1343 = vector.multi_reduction <add>, %1342, %cst_553 [2] : vector<8x8x32xf32> to vector<8x8xf32>
    %1344 = tpu.iota {dimensions = array<i32: 0>} : vector<8x8xi32>
    %1345 = vector.broadcast %c7_i32 : i32 to vector<8x8xi32>
    %1346 = arith.cmpi slt, %1344, %1345 : vector<8x8xi32>
    %cst_554 = arith.constant -1.000000e+30 : f32
    %1347 = vector.broadcast %cst_554 : f32 to vector<8x8xf32>
    %1348 = arith.select %1346, %1343, %1347 : vector<8x8xi1>, vector<8x8xf32>
    %cst_555 = arith.constant dense<0xFF800000> : vector<8xf32>
    %1349 = vector.multi_reduction <maximumf>, %1348, %cst_555 [0] : vector<8x8xf32> to vector<8xf32>
    %1350 = vector.shape_cast %1349 : vector<8xf32> to vector<1x8xf32>
    %1351 = vector.broadcast %1350 : vector<1x8xf32> to vector<8x8xf32>
    %1352 = arith.subf %1348, %1351 : vector<8x8xf32>
    %1353 = math.exp %1352 : vector<8x8xf32>
    %cst_556 = arith.constant dense<0.000000e+00> : vector<8xf32>
    %1354 = vector.multi_reduction <add>, %1353, %cst_556 [0] : vector<8x8xf32> to vector<8xf32>
    %1355 = vector.shape_cast %1354 : vector<8xf32> to vector<1x8xf32>
    %1356 = vector.broadcast %1355 : vector<1x8xf32> to vector<8x8xf32>
    %1357 = arith.divf %1353, %1356 : vector<8x8xf32>
    %1358 = vector.shape_cast %1357 : vector<8x8xf32> to vector<8x8x1xf32>
    %1359 = vector.broadcast %1358 : vector<8x8x1xf32> to vector<8x8x32xf32>
    %1360 = arith.mulf %1359, %1337 : vector<8x8x32xf32>
    %cst_557 = arith.constant dense<0.000000e+00> : vector<8x32xf32>
    %1361 = vector.multi_reduction <add>, %1360, %cst_557 [0] : vector<8x8x32xf32> to vector<8x32xf32>
    %c0_558 = arith.constant 0 : index
    %c0_559 = arith.constant 0 : index
    %1362 = vector.load %arg3[%c0_558, %c0_559] : memref<32x128xf32, #tpu.memory_space<vmem>>, vector<32x128xf32>
    %cst_560 = arith.constant dense<0.000000e+00> : vector<8x128xf32>
    %1363 = tpu.matmul %1319, %1362, %cst_560 {dimension_numbers = #tpu.dot_dimension_numbers<[1], [0], [0], [1], [0, 0, 1, 1], [], []>} : vector<8x32xf32>, vector<32x128xf32>, vector<8x128xf32> -> vector<8x128xf32>
    %c0_561 = arith.constant 0 : index
    %c0_562 = arith.constant 0 : index
    %1364 = vector.load %arg4[%c0_561, %c0_562] : memref<32x128xf32, #tpu.memory_space<vmem>>, vector<32x128xf32>
    %cst_563 = arith.constant dense<0.000000e+00> : vector<8x128xf32>
    %1365 = tpu.matmul %1336, %1364, %cst_563 {dimension_numbers = #tpu.dot_dimension_numbers<[1], [0], [0], [1], [0, 0, 1, 1], [], []>} : vector<8x32xf32>, vector<32x128xf32>, vector<8x128xf32> -> vector<8x128xf32>
    %1366 = arith.addf %1363, %1365 : vector<8x128xf32>
    %c0_564 = arith.constant 0 : index
    %c0_565 = arith.constant 0 : index
    %1367 = vector.load %arg6[%c0_564, %c0_565] : memref<1x128xf32, #tpu.memory_space<vmem>>, vector<1x128xf32>
    %1368 = vector.broadcast %1367 : vector<1x128xf32> to vector<8x128xf32>
    %1369 = arith.addf %1366, %1368 : vector<8x128xf32>
    %c0_566 = arith.constant 0 : index
    %c0_567 = arith.constant 0 : index
    %1370 = vector.load %arg5[%c0_566, %c0_567] : memref<32x128xf32, #tpu.memory_space<vmem>>, vector<32x128xf32>
    %cst_568 = arith.constant dense<0.000000e+00> : vector<8x128xf32>
    %1371 = tpu.matmul %1324, %1370, %cst_568 {dimension_numbers = #tpu.dot_dimension_numbers<[1], [0], [0], [1], [0, 0, 1, 1], [], []>} : vector<8x32xf32>, vector<32x128xf32>, vector<8x128xf32> -> vector<8x128xf32>
    %c0_569 = arith.constant 0 : index
    %c0_570 = arith.constant 0 : index
    %1372 = vector.load %arg7[%c0_569, %c0_570] : memref<1x128xf32, #tpu.memory_space<vmem>>, vector<1x128xf32>
    %1373 = vector.broadcast %1372 : vector<1x128xf32> to vector<8x128xf32>
    %1374 = arith.addf %1371, %1373 : vector<8x128xf32>
    %1375 = vector.extract_strided_slice %1369 {offsets = [0, 0], sizes = [8, 32], strides = [1, 1]} : vector<8x128xf32> to vector<8x32xf32>
    %1376 = vector.extract_strided_slice %1374 {offsets = [0, 0], sizes = [8, 32], strides = [1, 1]} : vector<8x128xf32> to vector<8x32xf32>
    %1377 = arith.addf %1375, %1376 : vector<8x32xf32>
    %1378 = arith.negf %1377 : vector<8x32xf32>
    %1379 = math.exp %1378 : vector<8x32xf32>
    %cst_571 = arith.constant 1.000000e+00 : f32
    %1380 = vector.broadcast %cst_571 : f32 to vector<8x32xf32>
    %1381 = arith.addf %1380, %1379 : vector<8x32xf32>
    %1382 = arith.divf %1380, %1381 : vector<8x32xf32>
    %1383 = vector.extract_strided_slice %1369 {offsets = [0, 32], sizes = [8, 32], strides = [1, 1]} : vector<8x128xf32> to vector<8x32xf32>
    %1384 = vector.extract_strided_slice %1374 {offsets = [0, 32], sizes = [8, 32], strides = [1, 1]} : vector<8x128xf32> to vector<8x32xf32>
    %1385 = arith.addf %1383, %1384 : vector<8x32xf32>
    %1386 = arith.negf %1385 : vector<8x32xf32>
    %1387 = math.exp %1386 : vector<8x32xf32>
    %cst_572 = arith.constant 1.000000e+00 : f32
    %1388 = vector.broadcast %cst_572 : f32 to vector<8x32xf32>
    %1389 = arith.addf %1388, %1387 : vector<8x32xf32>
    %1390 = arith.divf %1388, %1389 : vector<8x32xf32>
    %1391 = vector.extract_strided_slice %1369 {offsets = [0, 64], sizes = [8, 32], strides = [1, 1]} : vector<8x128xf32> to vector<8x32xf32>
    %1392 = vector.extract_strided_slice %1374 {offsets = [0, 64], sizes = [8, 32], strides = [1, 1]} : vector<8x128xf32> to vector<8x32xf32>
    %1393 = arith.mulf %1382, %1392 : vector<8x32xf32>
    %1394 = arith.addf %1391, %1393 : vector<8x32xf32>
    %1395 = math.tanh %1394 : vector<8x32xf32>
    %1396 = arith.subf %1324, %1395 : vector<8x32xf32>
    %1397 = arith.mulf %1390, %1396 : vector<8x32xf32>
    %1398 = arith.addf %1395, %1397 : vector<8x32xf32>
    %1399 = arith.index_cast %c7_i32 : i32 to index
    %c0_573 = arith.constant 0 : index
    %c0_574 = arith.constant 0 : index
    %1400 = vector.load %arg20[%1399, %c0_573, %c0_574] : memref<8x8x32xf32, #tpu.memory_space<vmem>>, vector<1x8x32xf32>
    %1401 = vector.shape_cast %1400 : vector<1x8x32xf32> to vector<8x32xf32>
    %1402 = vector.shape_cast %1398 : vector<8x32xf32> to vector<1x8x32xf32>
    tpu.vector_store %arg20[%1399, %c0_573, %c0_574], %1402 {strides = array<i32>} : memref<8x8x32xf32, #tpu.memory_space<vmem>>, vector<1x8x32xf32>,
    %c0_575 = arith.constant 0 : index
    %c0_576 = arith.constant 0 : index
    %1403 = vector.load %arg21[%c0_575, %c0_576] : memref<8x32xf32, #tpu.memory_space<vmem>>, vector<8x32xf32>
    tpu.vector_store %arg21[%c0_575, %c0_576], %1398 {strides = array<i32>} : memref<8x32xf32, #tpu.memory_space<vmem>>, vector<8x32xf32>,
    %c0_577 = arith.constant 0 : index
    %c0_578 = arith.constant 0 : index
    %1404 = vector.load %arg8[%c0_577, %c0_578] : memref<32x128xf32, #tpu.memory_space<vmem>>, vector<32x128xf32>
    %cst_579 = arith.constant dense<0.000000e+00> : vector<8x128xf32>
    %1405 = tpu.matmul %1319, %1404, %cst_579 {dimension_numbers = #tpu.dot_dimension_numbers<[1], [0], [0], [1], [0, 0, 1, 1], [], []>} : vector<8x32xf32>, vector<32x128xf32>, vector<8x128xf32> -> vector<8x128xf32>
    %c0_580 = arith.constant 0 : index
    %c0_581 = arith.constant 0 : index
    %1406 = vector.load %arg9[%c0_580, %c0_581] : memref<32x128xf32, #tpu.memory_space<vmem>>, vector<32x128xf32>
    %cst_582 = arith.constant dense<0.000000e+00> : vector<8x128xf32>
    %1407 = tpu.matmul %1361, %1406, %cst_582 {dimension_numbers = #tpu.dot_dimension_numbers<[1], [0], [0], [1], [0, 0, 1, 1], [], []>} : vector<8x32xf32>, vector<32x128xf32>, vector<8x128xf32> -> vector<8x128xf32>
    %1408 = arith.addf %1405, %1407 : vector<8x128xf32>
    %c0_583 = arith.constant 0 : index
    %c0_584 = arith.constant 0 : index
    %1409 = vector.load %arg11[%c0_583, %c0_584] : memref<1x128xf32, #tpu.memory_space<vmem>>, vector<1x128xf32>
    %1410 = vector.broadcast %1409 : vector<1x128xf32> to vector<8x128xf32>
    %1411 = arith.addf %1408, %1410 : vector<8x128xf32>
    %1412 = tpu.concatenate %1411, %1411 in 0 : vector<8x128xf32>, vector<8x128xf32> -> vector<16x128xf32>
    %c0_585 = arith.constant 0 : index
    %c0_586 = arith.constant 0 : index
    %1413 = vector.load %arg10[%c0_585, %c0_586] : memref<32x128xf32, #tpu.memory_space<vmem>>, vector<32x128xf32>
    %cst_587 = arith.constant dense<0.000000e+00> : vector<16x128xf32>
    %1414 = tpu.matmul %1323, %1413, %cst_587 {dimension_numbers = #tpu.dot_dimension_numbers<[1], [0], [0], [1], [0, 0, 1, 1], [], []>} : vector<16x32xf32>, vector<32x128xf32>, vector<16x128xf32> -> vector<16x128xf32>
    %c0_588 = arith.constant 0 : index
    %c0_589 = arith.constant 0 : index
    %1415 = vector.load %arg12[%c0_588, %c0_589] : memref<1x128xf32, #tpu.memory_space<vmem>>, vector<1x128xf32>
    %1416 = vector.broadcast %1415 : vector<1x128xf32> to vector<16x128xf32>
    %1417 = arith.addf %1414, %1416 : vector<16x128xf32>
    %1418 = vector.extract_strided_slice %1412 {offsets = [0, 0], sizes = [16, 32], strides = [1, 1]} : vector<16x128xf32> to vector<16x32xf32>
    %1419 = vector.extract_strided_slice %1417 {offsets = [0, 0], sizes = [16, 32], strides = [1, 1]} : vector<16x128xf32> to vector<16x32xf32>
    %1420 = arith.addf %1418, %1419 : vector<16x32xf32>
    %1421 = arith.negf %1420 : vector<16x32xf32>
    %1422 = math.exp %1421 : vector<16x32xf32>
    %cst_590 = arith.constant 1.000000e+00 : f32
    %1423 = vector.broadcast %cst_590 : f32 to vector<16x32xf32>
    %1424 = arith.addf %1423, %1422 : vector<16x32xf32>
    %1425 = arith.divf %1423, %1424 : vector<16x32xf32>
    %1426 = vector.extract_strided_slice %1412 {offsets = [0, 32], sizes = [16, 32], strides = [1, 1]} : vector<16x128xf32> to vector<16x32xf32>
    %1427 = vector.extract_strided_slice %1417 {offsets = [0, 32], sizes = [16, 32], strides = [1, 1]} : vector<16x128xf32> to vector<16x32xf32>
    %1428 = arith.addf %1426, %1427 : vector<16x32xf32>
    %1429 = arith.negf %1428 : vector<16x32xf32>
    %1430 = math.exp %1429 : vector<16x32xf32>
    %cst_591 = arith.constant 1.000000e+00 : f32
    %1431 = vector.broadcast %cst_591 : f32 to vector<16x32xf32>
    %1432 = arith.addf %1431, %1430 : vector<16x32xf32>
    %1433 = arith.divf %1431, %1432 : vector<16x32xf32>
    %1434 = vector.extract_strided_slice %1412 {offsets = [0, 64], sizes = [16, 32], strides = [1, 1]} : vector<16x128xf32> to vector<16x32xf32>
    %1435 = vector.extract_strided_slice %1417 {offsets = [0, 64], sizes = [16, 32], strides = [1, 1]} : vector<16x128xf32> to vector<16x32xf32>
    %1436 = arith.mulf %1425, %1435 : vector<16x32xf32>
    %1437 = arith.addf %1434, %1436 : vector<16x32xf32>
    %1438 = math.tanh %1437 : vector<16x32xf32>
    %1439 = arith.subf %1323, %1438 : vector<16x32xf32>
    %1440 = arith.mulf %1433, %1439 : vector<16x32xf32>
    %1441 = arith.addf %1438, %1440 : vector<16x32xf32>
    %cst_592 = arith.constant 0.000000e+00 : f32
    %1442 = vector.broadcast %cst_592 : f32 to vector<8x32xf32>
    %1443 = vector.extract_strided_slice %1323 {offsets = [0, 0], sizes = [8, 32], strides = [1, 1]} : vector<16x32xf32> to vector<8x32xf32>
    %1444 = vector.extract_strided_slice %1441 {offsets = [0, 0], sizes = [8, 32], strides = [1, 1]} : vector<16x32xf32> to vector<8x32xf32>
    %1445 = vector.extract_strided_slice %1322 {offsets = [0, 0], sizes = [8, 1], strides = [1, 1]} : vector<8x2xf32> to vector<8x1xf32>
    %1446 = arith.subf %1444, %1443 : vector<8x32xf32>
    %1447 = vector.broadcast %1445 : vector<8x1xf32> to vector<8x32xf32>
    %1448 = arith.mulf %1447, %1446 : vector<8x32xf32>
    %1449 = arith.addf %1443, %1448 : vector<8x32xf32>
    %1450 = vector.broadcast %1445 : vector<8x1xf32> to vector<8x32xf32>
    %1451 = arith.mulf %1450, %1449 : vector<8x32xf32>
    %1452 = arith.addf %1442, %1451 : vector<8x32xf32>
    %1453 = vector.extract_strided_slice %1323 {offsets = [8, 0], sizes = [8, 32], strides = [1, 1]} : vector<16x32xf32> to vector<8x32xf32>
    %1454 = vector.extract_strided_slice %1441 {offsets = [8, 0], sizes = [8, 32], strides = [1, 1]} : vector<16x32xf32> to vector<8x32xf32>
    %1455 = vector.extract_strided_slice %1322 {offsets = [0, 1], sizes = [8, 1], strides = [1, 1]} : vector<8x2xf32> to vector<8x1xf32>
    %1456 = arith.subf %1454, %1453 : vector<8x32xf32>
    %1457 = vector.broadcast %1455 : vector<8x1xf32> to vector<8x32xf32>
    %1458 = arith.mulf %1457, %1456 : vector<8x32xf32>
    %1459 = arith.addf %1453, %1458 : vector<8x32xf32>
    %1460 = vector.broadcast %1455 : vector<8x1xf32> to vector<8x32xf32>
    %1461 = arith.mulf %1460, %1459 : vector<8x32xf32>
    %1462 = arith.addf %1452, %1461 : vector<8x32xf32>
    %1463 = tpu.concatenate %1449, %1459 in 0 : vector<8x32xf32>, vector<8x32xf32> -> vector<16x32xf32>
    %c0_593 = arith.constant 0 : index
    %c0_594 = arith.constant 0 : index
    %1464 = vector.load %arg19[%c0_593, %c0_594] : memref<16x32xf32, #tpu.memory_space<vmem>>, vector<16x32xf32>
    tpu.vector_store %arg19[%c0_593, %c0_594], %1463 {strides = array<i32>} : memref<16x32xf32, #tpu.memory_space<vmem>>, vector<16x32xf32>,
    %c0_595 = arith.constant 0 : index
    %c0_596 = arith.constant 0 : index
    %1465 = vector.load %arg13[%c0_595, %c0_596] : memref<32x128xf32, #tpu.memory_space<vmem>>, vector<32x128xf32>
    %cst_597 = arith.constant dense<0.000000e+00> : vector<8x128xf32>
    %1466 = tpu.matmul %1462, %1465, %cst_597 {dimension_numbers = #tpu.dot_dimension_numbers<[1], [0], [0], [1], [0, 0, 1, 1], [], []>} : vector<8x32xf32>, vector<32x128xf32>, vector<8x128xf32> -> vector<8x128xf32>
    %c0_598 = arith.constant 0 : index
    %c0_599 = arith.constant 0 : index
    %1467 = vector.load %arg15[%c0_598, %c0_599] : memref<1x128xf32, #tpu.memory_space<vmem>>, vector<1x128xf32>
    %1468 = vector.broadcast %1467 : vector<1x128xf32> to vector<8x128xf32>
    %1469 = arith.addf %1466, %1468 : vector<8x128xf32>
    %c0_600 = arith.constant 0 : index
    %c0_601 = arith.constant 0 : index
    %1470 = vector.load %arg14[%c0_600, %c0_601] : memref<32x128xf32, #tpu.memory_space<vmem>>, vector<32x128xf32>
    %cst_602 = arith.constant dense<0.000000e+00> : vector<8x128xf32>
    %1471 = tpu.matmul %1325, %1470, %cst_602 {dimension_numbers = #tpu.dot_dimension_numbers<[1], [0], [0], [1], [0, 0, 1, 1], [], []>} : vector<8x32xf32>, vector<32x128xf32>, vector<8x128xf32> -> vector<8x128xf32>
    %c0_603 = arith.constant 0 : index
    %c0_604 = arith.constant 0 : index
    %1472 = vector.load %arg16[%c0_603, %c0_604] : memref<1x128xf32, #tpu.memory_space<vmem>>, vector<1x128xf32>
    %1473 = vector.broadcast %1472 : vector<1x128xf32> to vector<8x128xf32>
    %1474 = arith.addf %1471, %1473 : vector<8x128xf32>
    %1475 = vector.extract_strided_slice %1469 {offsets = [0, 0], sizes = [8, 32], strides = [1, 1]} : vector<8x128xf32> to vector<8x32xf32>
    %1476 = vector.extract_strided_slice %1474 {offsets = [0, 0], sizes = [8, 32], strides = [1, 1]} : vector<8x128xf32> to vector<8x32xf32>
    %1477 = arith.addf %1475, %1476 : vector<8x32xf32>
    %1478 = arith.negf %1477 : vector<8x32xf32>
    %1479 = math.exp %1478 : vector<8x32xf32>
    %cst_605 = arith.constant 1.000000e+00 : f32
    %1480 = vector.broadcast %cst_605 : f32 to vector<8x32xf32>
    %1481 = arith.addf %1480, %1479 : vector<8x32xf32>
    %1482 = arith.divf %1480, %1481 : vector<8x32xf32>
    %1483 = vector.extract_strided_slice %1469 {offsets = [0, 32], sizes = [8, 32], strides = [1, 1]} : vector<8x128xf32> to vector<8x32xf32>
    %1484 = vector.extract_strided_slice %1474 {offsets = [0, 32], sizes = [8, 32], strides = [1, 1]} : vector<8x128xf32> to vector<8x32xf32>
    %1485 = arith.addf %1483, %1484 : vector<8x32xf32>
    %1486 = arith.negf %1485 : vector<8x32xf32>
    %1487 = math.exp %1486 : vector<8x32xf32>
    %cst_606 = arith.constant 1.000000e+00 : f32
    %1488 = vector.broadcast %cst_606 : f32 to vector<8x32xf32>
    %1489 = arith.addf %1488, %1487 : vector<8x32xf32>
    %1490 = arith.divf %1488, %1489 : vector<8x32xf32>
    %1491 = vector.extract_strided_slice %1469 {offsets = [0, 64], sizes = [8, 32], strides = [1, 1]} : vector<8x128xf32> to vector<8x32xf32>
    %1492 = vector.extract_strided_slice %1474 {offsets = [0, 64], sizes = [8, 32], strides = [1, 1]} : vector<8x128xf32> to vector<8x32xf32>
    %1493 = arith.mulf %1482, %1492 : vector<8x32xf32>
    %1494 = arith.addf %1491, %1493 : vector<8x32xf32>
    %1495 = math.tanh %1494 : vector<8x32xf32>
    %1496 = arith.subf %1325, %1495 : vector<8x32xf32>
    %1497 = arith.mulf %1490, %1496 : vector<8x32xf32>
    %1498 = arith.addf %1495, %1497 : vector<8x32xf32>
    %c0_607 = arith.constant 0 : index
    %c0_608 = arith.constant 0 : index
    %1499 = vector.load %arg22[%c0_607, %c0_608] : memref<8x32xf32, #tpu.memory_space<vmem>>, vector<8x32xf32>
    tpu.vector_store %arg22[%c0_607, %c0_608], %1498 {strides = array<i32>} : memref<8x32xf32, #tpu.memory_space<vmem>>, vector<8x32xf32>,
    %1500 = arith.index_cast %c7_i32 : i32 to index
    %c0_609 = arith.constant 0 : index
    %c0_610 = arith.constant 0 : index
    %1501 = vector.load %arg18[%1500, %c0_609, %c0_610] : memref<8x8x32xf32, #tpu.memory_space<vmem>>, vector<1x8x32xf32>
    %1502 = vector.shape_cast %1501 : vector<1x8x32xf32> to vector<8x32xf32>
    %1503 = vector.shape_cast %1498 : vector<8x32xf32> to vector<1x8x32xf32>
    tpu.vector_store %arg18[%1500, %c0_609, %c0_610], %1503 {strides = array<i32>} : memref<8x8x32xf32, #tpu.memory_space<vmem>>, vector<1x8x32xf32>,
    %c8_i32 = arith.constant 8 : i32
    return
  }
  func.func @transform_0(%arg0: i32) -> (i32, i32, i32) {
    %c0_i32 = arith.constant 0 : i32
    %c0_i32_0 = arith.constant 0 : i32
    %c0_i32_1 = arith.constant 0 : i32
    %c0_i32_2 = arith.constant 0 : i32
    return %c0_i32, %c0_i32_0, %c0_i32_1 : i32, i32, i32
  }
  func.func @transform_1(%arg0: i32) -> (i32, i32, i32) {
    %c0_i32 = arith.constant 0 : i32
    %c0_i32_0 = arith.constant 0 : i32
    %c0_i32_1 = arith.constant 0 : i32
    %c0_i32_2 = arith.constant 0 : i32
    return %c0_i32, %c0_i32_0, %c0_i32_1 : i32, i32, i32
  }
  func.func @transform_2(%arg0: i32) -> (i32, i32) {
    %c0_i32 = arith.constant 0 : i32
    %c0_i32_0 = arith.constant 0 : i32
    %c0_i32_1 = arith.constant 0 : i32
    return %c0_i32, %c0_i32_0 : i32, i32
  }
  func.func @transform_3(%arg0: i32) -> (i32, i32) {
    %c0_i32 = arith.constant 0 : i32
    %c0_i32_0 = arith.constant 0 : i32
    %c0_i32_1 = arith.constant 0 : i32
    return %c0_i32, %c0_i32_0 : i32, i32
  }
  func.func @transform_4(%arg0: i32) -> (i32, i32) {
    %c0_i32 = arith.constant 0 : i32
    %c0_i32_0 = arith.constant 0 : i32
    %c0_i32_1 = arith.constant 0 : i32
    return %c0_i32, %c0_i32_0 : i32, i32
  }
  func.func @transform_5(%arg0: i32) -> (i32, i32) {
    %c0_i32 = arith.constant 0 : i32
    %c0_i32_0 = arith.constant 0 : i32
    %c0_i32_1 = arith.constant 0 : i32
    return %c0_i32, %c0_i32_0 : i32, i32
  }
  func.func @transform_6(%arg0: i32) -> (i32, i32) {
    %c0_i32 = arith.constant 0 : i32
    %c0_i32_0 = arith.constant 0 : i32
    %c0_i32_1 = arith.constant 0 : i32
    return %c0_i32, %c0_i32_0 : i32, i32
  }
  func.func @transform_7(%arg0: i32) -> (i32, i32) {
    %c0_i32 = arith.constant 0 : i32
    %c0_i32_0 = arith.constant 0 : i32
    %c0_i32_1 = arith.constant 0 : i32
    return %c0_i32, %c0_i32_0 : i32, i32
  }
  func.func @transform_8(%arg0: i32) -> (i32, i32) {
    %c0_i32 = arith.constant 0 : i32
    %c0_i32_0 = arith.constant 0 : i32
    %c0_i32_1 = arith.constant 0 : i32
    return %c0_i32, %c0_i32_0 : i32, i32
  }
  func.func @transform_9(%arg0: i32) -> (i32, i32) {
    %c0_i32 = arith.constant 0 : i32
    %c0_i32_0 = arith.constant 0 : i32
    %c0_i32_1 = arith.constant 0 : i32
    return %c0_i32, %c0_i32_0 : i32, i32
  }
  func.func @transform_10(%arg0: i32) -> (i32, i32) {
    %c0_i32 = arith.constant 0 : i32
    %c0_i32_0 = arith.constant 0 : i32
    %c0_i32_1 = arith.constant 0 : i32
    return %c0_i32, %c0_i32_0 : i32, i32
  }
  func.func @transform_11(%arg0: i32) -> (i32, i32) {
    %c0_i32 = arith.constant 0 : i32
    %c0_i32_0 = arith.constant 0 : i32
    %c0_i32_1 = arith.constant 0 : i32
    return %c0_i32, %c0_i32_0 : i32, i32
  }
  func.func @transform_12(%arg0: i32) -> (i32, i32) {
    %c0_i32 = arith.constant 0 : i32
    %c0_i32_0 = arith.constant 0 : i32
    %c0_i32_1 = arith.constant 0 : i32
    return %c0_i32, %c0_i32_0 : i32, i32
  }
  func.func @transform_13(%arg0: i32) -> (i32, i32) {
    %c0_i32 = arith.constant 0 : i32
    %c0_i32_0 = arith.constant 0 : i32
    %c0_i32_1 = arith.constant 0 : i32
    return %c0_i32, %c0_i32_0 : i32, i32
  }
  func.func @transform_14(%arg0: i32) -> (i32, i32) {
    %c0_i32 = arith.constant 0 : i32
    %c0_i32_0 = arith.constant 0 : i32
    %c0_i32_1 = arith.constant 0 : i32
    return %c0_i32, %c0_i32_0 : i32, i32
  }
  func.func @transform_15(%arg0: i32) -> (i32, i32) {
    %c0_i32 = arith.constant 0 : i32
    %c0_i32_0 = arith.constant 0 : i32
    %c0_i32_1 = arith.constant 0 : i32
    return %c0_i32, %c0_i32_0 : i32, i32
  }
  func.func @transform_16(%arg0: i32) -> (i32, i32) {
    %c0_i32 = arith.constant 0 : i32
    %c0_i32_0 = arith.constant 0 : i32
    %c0_i32_1 = arith.constant 0 : i32
    return %c0_i32, %c0_i32_0 : i32, i32
  }
  func.func @transform_17(%arg0: i32) -> (i32, i32, i32) {
    %c0_i32 = arith.constant 0 : i32
    %c0_i32_0 = arith.constant 0 : i32
    %c0_i32_1 = arith.constant 0 : i32
    %c0_i32_2 = arith.constant 0 : i32
    return %c0_i32, %c0_i32_0, %c0_i32_1 : i32, i32, i32
  }
}

</mosaic_0001>

<bundles_post_ra>
// kernel: dialogue_rnn_forward.1
= control target key start
LH: loop header
LB: loop body
LE: loop exit
PB: predicated region body
PF: predicated region fallthrough
CT: control target
= control target key end

     0   :  { %s13849_s0 = inlined_call_operand.vmem [shape: f32[8,8,32], index: 0, kind: input, shape index: {}]   ;;  %s13850_s1 = inlined_call_operand.vmem [shape: f32[8,8,2], index: 1, kind: input, shape index: {}]   ;;  %s13851_s2 = inlined_call_operand.vmem [shape: f32[32,128], index: 2, kind: input, shape index: {}]   ;;  %s13852_s3 = inlined_call_operand.vmem [shape: f32[32,128], index: 3, kind: input, shape index: {}]   ;;  %s13853_s4 = inlined_call_operand.vmem [shape: f32[32,128], index: 4, kind: input, shape index: {}]   ;;  %s13854_s5 = inlined_call_operand.hbm [shape: f32[1,128], index: 5, kind: input, shape index: {}]   ;;  %s13855_s6 = inlined_call_operand.hbm [shape: f32[1,128], index: 6, kind: input, shape index: {}]   ;;  %s13856_s7 = inlined_call_operand.vmem [shape: f32[32,128], index: 7, kind: input, shape index: {}]   ;;  %s13857_s8 = inlined_call_operand.vmem [shape: f32[32,128], index: 8, kind: input, shape index: {}]   ;;  %s13858_s9 = inlined_call_operand.vmem [shape: f32[32,128], index: 9, kind: input, shape index: {}]   ;;  %s13859_s10 = inlined_call_operand.vmem [shape: f32[1,128], index: 10, kind: input, shape index: {}]   ;;  %s13860_s11 = inlined_call_operand.hbm [shape: f32[1,128], index: 11, kind: input, shape index: {}]   ;;  %s13861_s12 = inlined_call_operand.hbm [shape: f32[32,128], index: 12, kind: input, shape index: {}]   ;;  %s13862_s13 = inlined_call_operand.hbm [shape: f32[32,128], index: 13, kind: input, shape index: {}]   ;;  %s13863_s14 = inlined_call_operand.hbm [shape: f32[1,128], index: 14, kind: input, shape index: {}]   ;;  %s13864_s15 = inlined_call_operand.hbm [shape: f32[1,128], index: 15, kind: input, shape index: {}]   ;;  %s13865_s16 = inlined_call_operand.hbm [shape: f32[32,32], index: 16, kind: input, shape index: {}]   ;;  %s13866_s17 = inlined_call_operand.vmem [shape: f32[8,8,32], index: 17, kind: output, shape index: {}]  }
   0x1   :  { %13937 = sst [smem:[#allocation40_spill]] %s13849_s0 }
   0x2   :  { %13938 = sst [smem:[#allocation41_spill]] %s13850_s1 }
   0x3   :  { %22 = vsyncpa [#allocation7], 0 }
   0x4   :  { %23 = vsyncpa [#allocation9], 0 }
   0x5   :  { %24 = vsyncpa [#allocation12], 0 }
   0x6   :  { %25 = vsyncpa [#allocation15], 0 }
   0x7   :  { %26 = vsyncpa [#allocation18], 0  ;;  %s10928_s24 = smov [#allocation8]   ;;  %s10929_s26 = smov [#allocation11]  }
   0x8   :  { %s53_s25 = sshll.u32 %s10928_s24, 4  ;;  %s80_s27 = sshll.u32 %s10929_s26, 4  ;;  %s54_s25 = int_to_ptr.vmem [resolvable:$true] %s53_s25  ;;  %s81_s27 = int_to_ptr.vmem [resolvable:$true] %s80_s27 }
   0x9   :  { %s10766_s28 = scalar_lea.vmem %s54_s25, 16  ;;  %s10770_s29 = scalar_lea.vmem %s54_s25, 32 }
   0xa   :  { %p10767_p0 = scmp.ne.s32.totalorder %s54_s25, %s10766_s28  ;;  %p10771_p1 = scmp.lt.s32.totalorder %s54_s25, %s54_s25 }
   0xb   :  { %p10772_p2 = scmp.lt.s32.totalorder %s10770_s29, %s10766_s28 }
   0xd   :  { %p10773_p3 = por %p10772_p2, %p10771_p1 }
   0xf   :  { %p10774_p4 = pnand %p10773_p3, %p10767_p0 }
  0x11   :  { %10777 = shalt.err (!%p10774_p4)
}
  0x12   :  { %56 = dma.hbm_to_vmem [thread:$0]  %s13855_s6, 16, %s54_s25, [#allocation9]  }
  0x13   :  { %s10786_s18 = scalar_lea.vmem %s81_s27, 512  ;;  %p10791_p6 = scmp.lt.s32.totalorder %s81_s27, %s81_s27 }
  0x14   :  { %p10787_p5 = scmp.ne.s32.totalorder %s81_s27, %s10786_s18  ;;  %p10792_p7 = scmp.lt.s32.totalorder %s10786_s18, %s10786_s18 }
  0x16   :  { %p10793_p8 = por %p10792_p7, %p10791_p6 }
  0x18   :  { %p10794_p9 = pnand %p10793_p8, %p10787_p5 }
  0x1a   :  { %10797 = shalt.err (!%p10794_p9)
}
  0x1b   :  { %s10930_s19 = smov 128   ;;  %s10931_s1 = smov 8  }
  0x1c   :  { %86 = dma.hbm_to_vmem [thread:$0]  %s13861_s12, 512, %s81_s27, [#allocation12], %s10930_s19, %s10930_s19, %s10931_s1  }
  0x1d   :  { %s10932_s22 = smov [#allocation14]   ;;  %s10933_s24 = smov [#allocation6]  }
  0x1e   :  { %s105_s23 = sshll.u32 %s10932_s22, 4  ;;  %s43_s6 = sshll.u32 %s10933_s24, 4  ;;  %s106_s23 = int_to_ptr.vmem [resolvable:$true] %s105_s23  ;;  %s44_s6 = int_to_ptr.vmem [resolvable:$true] %s43_s6 }
  0x1f   :  { %s10806_s25 = scalar_lea.vmem %s106_s23, 16  ;;  %s10810_s26 = scalar_lea.vmem %s106_s23, 32 }
  0x20   :  { %p10807_p10 = scmp.ne.s32.totalorder %s106_s23, %s10806_s25  ;;  %p10811_p11 = scmp.lt.s32.totalorder %s106_s23, %s106_s23 }
  0x21   :  { %p10812_p12 = scmp.lt.s32.totalorder %s10810_s26, %s10806_s25 }
  0x23   :  { %p10813_p13 = por %p10812_p12, %p10811_p11 }
  0x25   :  { %p10814_p0 = pnand %p10813_p13, %p10807_p10 }
  0x27   :  { %10817 = shalt.err (!%p10814_p0)
}
  0x28   :  { %108 = dma.hbm_to_vmem [thread:$0]  %s13863_s14, 16, %s106_s23, [#allocation15]  }
  0x29   :  { %s10826_s0 = scalar_lea.vmem %s44_s6, 16  ;;  %s10830_s12 = scalar_lea.vmem %s44_s6, 32 }
  0x2a   :  { %p10827_p1 = scmp.ne.s32.totalorder %s44_s6, %s10826_s0  ;;  %p10831_p2 = scmp.lt.s32.totalorder %s44_s6, %s44_s6 }
  0x2b   :  { %p10832_p3 = scmp.lt.s32.totalorder %s10830_s12, %s10826_s0 }
  0x2d   :  { %p10833_p4 = por %p10832_p3, %p10831_p2 }
  0x2f   :  { %p10834_p5 = pnand %p10833_p4, %p10827_p1 }
  0x31   :  { %10837 = shalt.err (!%p10834_p5)
}
  0x32   :  { %46 = dma.hbm_to_vmem [thread:$0]  %s13854_s5, 16, %s44_s6, [#allocation7]  }
  0x33   :  { %s10934_s18 = smov [#allocation10]   ;;  %s10935_s21 = smov [#allocation13]  }
  0x34   :  { %s71_s20 = sshll.u32 %s10934_s18, 4  ;;  %s92_s22 = sshll.u32 %s10935_s21, 4  ;;  %s72_s20 = int_to_ptr.vmem [resolvable:$true] %s71_s20  ;;  %s93_s22 = int_to_ptr.vmem [resolvable:$true] %s92_s22 }
  0x35   :  { %s10846_s24 = scalar_lea.vmem %s72_s20, 16  ;;  %s10850_s14 = scalar_lea.vmem %s72_s20, 32 }
  0x36   :  { %p10847_p6 = scmp.ne.s32.totalorder %s72_s20, %s10846_s24  ;;  %p10851_p7 = scmp.lt.s32.totalorder %s72_s20, %s72_s20 }
  0x37   :  { %p10852_p8 = scmp.lt.s32.totalorder %s10850_s14, %s10846_s24 }
  0x39   :  { %p10853_p9 = por %p10852_p8, %p10851_p7 }
  0x3b   :  { %p10854_p10 = pnand %p10853_p9, %p10847_p6 }
  0x3d   :  { %10857 = shalt.err (!%p10854_p10)
}
  0x3e   :  { %74 = dma.hbm_to_vmem [thread:$0]  %s13860_s11, 16, %s72_s20, [#allocation9]  }
  0x3f   :  { %s10866_s26 = scalar_lea.vmem %s93_s22, 512  ;;  %p10871_p12 = scmp.lt.s32.totalorder %s93_s22, %s93_s22 }
  0x40   :  { %p10867_p11 = scmp.ne.s32.totalorder %s93_s22, %s10866_s26  ;;  %p10872_p13 = scmp.lt.s32.totalorder %s10866_s26, %s10866_s26 }
  0x42   :  { %p10873_p0 = por %p10872_p13, %p10871_p12 }
  0x44   :  { %p10874_p1 = pnand %p10873_p0, %p10867_p11 }
  0x46   :  { %10877 = shalt.err (!%p10874_p1)
}
  0x47   :  { %98 = dma.hbm_to_vmem [thread:$0]  %s13862_s13, 512, %s93_s22, [#allocation12], %s10930_s19, %s10930_s19, %s10931_s1  }
  0x48   :  { %s10936_s28 = smov [#allocation16]   ;;  %s10937_s0 = smov [#allocation17]  }
  0x49   :  { %s115_s29 = sshll.u32 %s10936_s28, 4  ;;  %s124_s12 = sshll.u32 %s10937_s0, 4  ;;  %s116_s29 = int_to_ptr.vmem [resolvable:$true] %s115_s29  ;;  %s125_s12 = int_to_ptr.vmem [resolvable:$true] %s124_s12 }
  0x4a   :  { %s10886_s11 = scalar_lea.vmem %s116_s29, 16  ;;  %s10890_s27 = scalar_lea.vmem %s116_s29, 32 }
  0x4b   :  { %p10887_p2 = scmp.ne.s32.totalorder %s116_s29, %s10886_s11  ;;  %p10891_p3 = scmp.lt.s32.totalorder %s116_s29, %s116_s29 }
  0x4c   :  { %p10892_p4 = scmp.lt.s32.totalorder %s10890_s27, %s10886_s11 }
  0x4e   :  { %p10893_p5 = por %p10892_p4, %p10891_p3 }
  0x50   :  { %p10894_p6 = pnand %p10893_p5, %p10887_p2 }
  0x52   :  { %10897 = shalt.err (!%p10894_p6)
}
  0x53   :  { %118 = dma.hbm_to_vmem [thread:$0]  %s13864_s15, 16, %s116_s29, [#allocation15]  }
  0x54   :  { %s10906_s20 = scalar_lea.vmem %s125_s12, 512  ;;  %p10911_p8 = scmp.lt.s32.totalorder %s125_s12, %s125_s12 }
  0x55   :  { %p10907_p7 = scmp.ne.s32.totalorder %s125_s12, %s10906_s20  ;;  %p10912_p9 = scmp.lt.s32.totalorder %s10906_s20, %s10906_s20 }
  0x57   :  { %p10913_p10 = por %p10912_p9, %p10911_p8 }
  0x59   :  { %p10914_p11 = pnand %p10913_p10, %p10907_p7 }
  0x5b   :  { %10917 = shalt.err (!%p10914_p11)
}
  0x5c   :  { %130 = dma.hbm_to_vmem [thread:$0]  %s13865_s16, 512, %s125_s12, [#allocation18], %s10930_s19, %s10930_s19, %s10931_s1  }
  0x5d   :  { %10918 = dma.done.wait [#allocation7], 16  }
  0x5e   :  { %10919 = vsyncadd [#allocation7], 4294967280 }
  0x5f   :  { %10920 = dma.done.wait [#allocation9], 32  }
  0x60   :  { %10921 = vsyncadd [#allocation9], 4294967264 }
  0x61   :  { %10922 = dma.done.wait [#allocation12], 1024  }
  0x62   :  { %10923 = vsyncadd [#allocation12], 4294966272 }
  0x63   :  { %10924 = dma.done.wait [#allocation15], 32  }
  0x64   :  { %10925 = vsyncadd [#allocation15], 4294967264  ;;  %vm365_vm0 = vcmask 64512  }
  0x65   :  { %10926 = dma.done.wait [#allocation18], 512  }
  0x66   :  { %10927 = vsyncadd [#allocation18], 4294966784  ;;  %v10938_v0 = vmov -inf   ;;  %v13869_v2 = vmov 1   ;;  %v13871_v4 = vmov 0   ;;  %v13874_v5 = vmov 0.0  }
  0x67   :  { %v366_v1 = vsel %vm365_vm0, -1e+30, %v10938_v0  ;;  %10504 = vset.pattern.permute.xlu1 %v13869_v2  ;;  %10503 = vset.pattern.permute.xlu0 %v13871_v4  ;;  %v11073_v8 = vld [vmem:[#allocation17 + $0x18] sm:$0xff]  ;;  %v11075_v9 = vld [vmem:[#allocation17 + $0x10] sm:$0xff]  ;;  %vm155_vm1 = vcmask 261120   ;;  %v13873_v23 = vlaneseq  ;;  %v11106_v24 = vld [vmem:[#allocation17 + $0x8] sm:$0xff] }
  0x68   :  { %v367_v3 = vrot.slane %v366_v1, 4  ;;  %9694 = vmatprep.subr.mxu0 %v13874_v5  ;;  %9705 = vmatprep.subr.mxu1 %v13874_v5  ;;  %158 = vst.msk [vmem:[#allocation3] sm:$0xff] %vm155_vm1, %v13874_v5  ;;  %156 = vst.msk [vmem:[#allocation2] sm:$0xff] %vm155_vm1, %v13874_v5  ;;  %v11110_v25 = vld [vmem:[#allocation17] sm:$0xff]  ;;  %vm10942_vm2 = vmmov 0   ;;  %s13939_s19 = sld [smem:[#allocation40_spill]] }
  0x69   :  { %9695 = vmatpush3.msra.mxu0 %v11073_v8  ;;  %157 = vst.msk [vmem:[#allocation2 + $0x8] sm:$0xff] %vm155_vm1, %v13874_v5  ;;  %159 = vst.msk [vmem:[#allocation3 + $0x8] sm:$0xff] %vm155_vm1, %v13874_v5  ;;  %9702 = vmatprep.mubr.msk.f32.mxu0 %vm10942_vm2, %v13874_v5  ;;  %v11121_v27 = vshrl.u32 %v13873_v23, 7  ;;  %v11129_v28 = vld [vmem:[%s13851_s2 + $0x18] sm:$0xff]  ;;  %v11138_v29 = vld [vmem:[%s13851_s2 + $0x10] sm:$0xff]  ;;  %s13940_s23 = sld [smem:[#allocation41_spill]] }
  0x6a   :  { %v368_v6 = vmax.f32 %v366_v1, %v367_v3  ;;  %9696 = vmatprep.subr.mxu0 %v13874_v5  ;;  %160 = vst.msk [vmem:[#allocation3 + $0x10] sm:$0xff] %vm155_vm1, %v13874_v5  ;;  %161 = vst.msk [vmem:[#allocation3 + $0x18] sm:$0xff] %vm155_vm1, %v13874_v5  ;;  %9713 = vmatprep.mubr.msk.f32.mxu1 %vm10942_vm2, %v13874_v5  ;;  %v11153_v32 = vld [vmem:[%s13851_s2 + $0x8] sm:$0xff]  ;;  %v11166_v37 = vld [vmem:[%s13851_s2] sm:$0xff]  ;;  %s10943_s6 = smov 64   ;;  %s10944_s0 = smov 32  }
  0x6b   :  { %9697 = vmatpush3.msra.mxu0 %v11075_v9  ;;  %162 = vst.msk [vmem:[#allocation3 + $0x20] sm:$0xff] %vm155_vm1, %v13874_v5  ;;  %163 = vst.msk [vmem:[#allocation3 + $0x28] sm:$0xff] %vm155_vm1, %v13874_v5  ;;  %v11144_v30 = vsub.s32 2, %v11121_v27  ;;  %v11147_v31 = vsub.s32 0, %v11121_v27  ;;  %v11157_v35 = vsub.s32 3, %v11121_v27  ;;  %v11160_v36 = vsub.s32 1, %v11121_v27 }
  0x6c   :  { %v369_v7 = vrot.slane %v368_v6, 2  ;;  %9698 = vmatprep.subr.mxu0 %v13874_v5  ;;  %164 = vst.msk [vmem:[#allocation3 + $0x30] sm:$0xff] %vm155_vm1, %v13874_v5  ;;  %165 = vst.msk [vmem:[#allocation3 + $0x38] sm:$0xff] %vm155_vm1, %v13874_v5  ;;  %v11177_v40 = vld [vmem:[%s13857_s8 + $0x18] sm:$0xff]  ;;  %v11182_v43 = vsub.s32 5, %v11121_v27  ;;  %v11185_v44 = vsub.s32 4, %v11121_v27 }
  0x6d   :  { %166 = vst.msk [vmem:[#allocation4] sm:$0xff] %vm155_vm1, %v13874_v5  ;;  %167 = vst.msk [vmem:[#allocation5] sm:$0xff] %vm155_vm1, %v13874_v5  ;;  %9699 = vmatpush3.msra.mxu0 %v11106_v24  ;;  %v11191_v45 = vld [vmem:[%s13857_s8 + $0x10] sm:$0xff]  ;;  %v11200_v46 = vld [vmem:[%s13857_s8 + $0x8] sm:$0xff]  ;;  %v11205_v49 = vsub.s32 7, %v11121_v27  ;;  %v11208_v50 = vsub.s32 6, %v11121_v27 }
  0x6e   :  { %v370_v10 = vmax.f32 %v368_v6, %v369_v7  ;;  %9700 = vmatprep.subr.mxu0 %v13874_v5  ;;  %v11118_v26 = vld [vmem:[%s13939_s19] sm:$0xff]  ;;  %v11220_v52 = vld [vmem:[%s13852_s3 + $0x18] sm:$0xff]  ;;  %v11237_v56 = vld [vmem:[%s13852_s3 + $0x10] sm:$0xff]  ;;  %vm349_vm3 = vcmask 1041409   ;;  %vm351_vm4 = vcmask 1042434   ;;  %vm353_vm5 = vcmask 1043459  }
  0x6f   :  { %9701 = vmatpush3.msra.mxu0 %v11110_v25  ;;  %v11215_v51 = vld [vmem:[%s13857_s8] sm:$0xff]  ;;  %v11226_v53 = vld [vmem:[%s13858_s9 + $0x18] sm:$0xff]  ;;  %9706 = vmatpush3.msra.mxu1 %v11220_v52  ;;  %v11243_v57 = vld [vmem:[%s13852_s3 + $0x8] sm:$0xff]  ;;  %vm355_vm6 = vcmask 1044484   ;;  %vm357_vm7 = vcmask 1045509   ;;  %vm359_vm8 = vcmask 1046534  }
  0x70   :  { %v371_v11 = vrot.slane %v370_v10, 1  ;;  %9703 = vmatmul.mubr.msk.f32.vlgmr.msra.gmra.mxu0 %vm155_vm1, %v11118_v26  ;;  %9716 = vmatprep.subr.mxu0 %v13874_v5  ;;  %v169_v58 = vld [vmem:[%s13940_s23] sm:$0xff]  ;;  %v187_v61 = vld [vmem:[#allocation3] sm:$0xff]  ;;  %v11262_v0 = vld [vmem:[#allocation3 + $0x8] sm:$0xff]  ;;  %vm361_vm9 = vcmask 1047559   ;;  %vm1434_vm10 = vcmp.lt.s32.totalorder %v11121_v27, 1 }
  0x71   :  { %9717 = vmatpush3.msra.mxu0 %v11129_v28  ;;  %9724 = vmatprep.mubr.msk.f32.mxu0 %vm10942_vm2, %v13874_v5  ;;  %v11253_v59 = vld [vmem:[%s13852_s3] sm:$0xff]  ;;  %v11264_v1 = vld [vmem:[#allocation3 + $0x18] sm:$0xff]  ;;  %vm2554_vm11 = vcmp.lt.s32.totalorder %v11121_v27, 2  ;;  %vm3674_vm12 = vcmp.lt.s32.totalorder %v11121_v27, 3  ;;  %vm4794_vm13 = vcmp.lt.s32.totalorder %v11121_v27, 4  ;;  %vm5914_vm14 = vcmp.lt.s32.totalorder %v11121_v27, 5 }
  0x72   :  { %v372_v12 = vmax.f32 %v370_v10, %v371_v11  ;;  %9718 = vmatprep.subr.mxu0 %v13874_v5  ;;  %9707 = vmatprep.subr.mxu1 %v13874_v5  ;;  %v11260_v63 = vld [vmem:[#allocation3 + $0x10] sm:$0xff]  ;;  %vm7034_vm15 = vcmp.lt.s32.totalorder %v11121_v27, 6 }
  0x73   :  { %9719 = vmatpush3.msra.mxu0 %v11138_v29  ;;  %9708 = vmatpush3.msra.mxu1 %v11237_v56 }
  0x74   :  { %v373_v13 = vsub.f32 -1e+30, %v372_v12  ;;  %9720 = vmatprep.subr.mxu0 %v13874_v5  ;;  %9709 = vmatprep.subr.mxu1 %v13874_v5 }
  0x75   :  { %9721 = vmatpush3.msra.mxu0 %v11153_v32  ;;  %9710 = vmatpush3.msra.mxu1 %v11243_v57 }
  0x76   :  { %v374_v14 = vmul.f32 1.442695, %v373_v13  ;;  %9722 = vmatprep.subr.mxu0 %v13874_v5  ;;  %9711 = vmatprep.subr.mxu1 %v13874_v5  ;;  %v11269_v13 = vld [vmem:[#allocation3 + $0x20] sm:$0xff] }
  0x77   :  { %9723 = vmatpush3.msra.mxu0 %v11166_v37  ;;  %9712 = vmatpush3.msra.mxu1 %v11253_v59 }
  0x78   :  { %10519 = vpow2.f32 %v374_v14  ;;  %9725 = vmatmul.mubr.msk.f32.vlgmr.msra.gmra.mxu0 %vm155_vm1, %v11118_v26  ;;  %9738 = vmatprep.subr.mxu0 %v13874_v5  ;;  %v11271_v14 = vld [vmem:[#allocation3 + $0x28] sm:$0xff] }
  0x79   :  { %9739 = vmatpush3.msra.mxu0 %v11177_v40  ;;  %9746 = vmatprep.mubr.msk.f32.mxu0 %vm10942_vm2, %v13874_v5 }
  0x7a   :  { %9740 = vmatprep.subr.mxu0 %v13874_v5  ;;  %9727 = vmatprep.subr.mxu1 %v13874_v5 }
  0x7b   :  { %9741 = vmatpush3.msra.mxu0 %v11191_v45 }
  0x7c   :  { %9742 = vmatprep.subr.mxu0 %v13874_v5 }
  0x7d   :  { %9743 = vmatpush3.msra.mxu0 %v11200_v46 }
  0x7e   :  { %9744 = vmatprep.subr.mxu0 %v13874_v5 }
  0x7f   :  { %9745 = vmatpush3.msra.mxu0 %v11215_v51 }
  0x80   :  { %9760 = vmatprep.subr.mxu0 %v11226_v53 }
  0x85   :  { %v10520_v15 = vpop.eup %10519 }
  0x86   :  { %v376_v16 = vsel %vm365_vm0, %v10520_v15, 0.0 }
  0x87   :  { %v377_v17 = vrot.slane %v376_v16, 4 }
  0x89   :  { %v378_v18 = vadd.f32 %v377_v17, %v376_v16 }
  0x8b   :  { %v379_v19 = vrot.slane %v378_v18, 2 }
  0x8d   :  { %v380_v20 = vadd.f32 %v379_v19, %v378_v18 }
  0x8f   :  { %v381_v21 = vrot.slane %v380_v20, 1 }
  0x91   :  { %v382_v22 = vadd.f32 %v381_v21, %v380_v20 }
  0x93   :  { %10521 = vrcp.f32 %v382_v22 }
  0xa0   :  { %v10522_v33 = vpop.eup %10521 }
  0xa1   :  { %v384_v34 = vmul.f32 %v10522_v33, %v10520_v15 }
  0xa3   :  { %v402_v38 = vrot.slane %v384_v34, %v11144_v30  ;;  %v388_v39 = vrot.slane %v384_v34, %v11147_v31  ;;  %v409_v41 = vrot.slane %v384_v34, %v11157_v35  ;;  %v395_v42 = vrot.slane %v384_v34, %v11160_v36 }
  0xa4   :  { %v423_v47 = vrot.slane %v384_v34, %v11182_v43  ;;  %v416_v48 = vrot.slane %v384_v34, %v11185_v44  ;;  %v437_v54 = vrot.slane %v384_v34, %v11205_v49  ;;  %v430_v55 = vrot.slane %v384_v34, %v11208_v50 }
  0xa5   :  { %404 = vbcast.lane.b32.xlu1 %v402_v38, 256  ;;  %390 = vbcast.lane.b32.xlu0 %v388_v39, 256  ;;  %v11279_v38 = vld [vmem:[#allocation3 + $0x30] sm:$0xff]  ;;  %v11281_v39 = vld [vmem:[#allocation3 + $0x38] sm:$0xff] }
  0xa9   :  { %411 = vbcast.lane.b32.xlu1 %v409_v41, 256  ;;  %397 = vbcast.lane.b32.xlu0 %v395_v42, 256 }
  0xad   :  { %425 = vbcast.lane.b32.xlu1 %v423_v47, 256  ;;  %418 = vbcast.lane.b32.xlu0 %v416_v48, 256 }
  0xb1   :  { %439 = vbcast.lane.b32.xlu1 %v437_v54, 256  ;;  %432 = vbcast.lane.b32.xlu0 %v430_v55, 256 }
  0xb5   :  { %182 = vperm.xlu1 %10504, %v169_v58   ;;  %176 = vperm.xlu0 %10503, %v169_v58  }
  0xb9   :  { %10505 = vset.pattern.permute.xlu1 %v13871_v4  ;;  %10506 = vset.pattern.permute.xlu0 %v13869_v2 }
 0x117   :  { %v391_v60 = vpop.permute.xlu0 %390  ;;  %v405_v62 = vpop.permute.xlu1 %404 }
 0x118   :  { %v441_v3 = vmul.f32 %v391_v60, %v187_v61  ;;  %v443_v10 = vmul.f32 %v405_v62, %v11260_v63 }
 0x11a   :  { %v449_v15 = vsel %vm155_vm1, %v441_v3, 0.0  ;;  %v452_v20 = vsel %vm155_vm1, %v443_v10, 0.0  ;;  %v11292_v10 = vld [vmem:[%s13858_s9 + $0x10] sm:$0xff] }
 0x11b   :  { %v398_v6 = vpop.permute.xlu0 %397  ;;  %v412_v7 = vpop.permute.xlu1 %411 }
 0x11c   :  { %v442_v11 = vmul.f32 %v398_v6, %v11262_v0  ;;  %v444_v12 = vmul.f32 %v412_v7, %v11264_v1 }
 0x11e   :  { %v450_v16 = vsel %vm155_vm1, %v442_v11, 0.0  ;;  %v454_v21 = vsel %vm155_vm1, %v444_v12, 0.0  ;;  %v11295_v11 = vld [vmem:[#allocation2] sm:$0xff]  ;;  %v11298_v12 = vld [vmem:[#allocation2 + $0x8] sm:$0xff] }
 0x11f   :  { %v451_v17 = vadd.f32 %v450_v16, %v449_v15  ;;  %v419_v18 = vpop.permute.xlu0 %418  ;;  %v426_v19 = vpop.permute.xlu1 %425  ;;  %v11303_v15 = vld [vmem:[%s13858_s9 + $0x8] sm:$0xff] }
 0x120   :  { %v445_v22 = vmul.f32 %v419_v18, %v11269_v13  ;;  %v446_v33 = vmul.f32 %v426_v19, %v11271_v14  ;;  %v11316_v18 = vld [vmem:[%s13858_s9] sm:$0xff] }
 0x121   :  { %v453_v34 = vadd.f32 %v452_v20, %v451_v17 }
 0x122   :  { %v456_v41 = vsel %vm155_vm1, %v445_v22, 0.0  ;;  %v458_v54 = vsel %vm155_vm1, %v446_v33, 0.0  ;;  %v11328_v22 = vld [vmem:[%s13853_s4 + $0x18] sm:$0xff]  ;;  %v11337_v33 = vld [vmem:[%s13853_s4 + $0x10] sm:$0xff] }
 0x123   :  { %v455_v42 = vadd.f32 %v454_v21, %v453_v34  ;;  %v433_v47 = vpop.permute.xlu0 %432  ;;  %v440_v48 = vpop.permute.xlu1 %439  ;;  %13941 = vst [vmem:[#allocation24_spill] sm:$0xff] %v11337_v33  ;;  %v11346_v34 = vld [vmem:[%s13853_s4 + $0x8] sm:$0xff] }
 0x124   :  { %v447_v55 = vmul.f32 %v433_v47, %v11279_v38  ;;  %v448_v58 = vmul.f32 %v440_v48, %v11281_v39  ;;  %13942 = vst [vmem:[#allocation25_spill] sm:$0xff] %v11346_v34  ;;  %v11365_v47 = vld [vmem:[%s13856_s7 + $0x18] sm:$0xff]  ;;  %v11374_v48 = vld [vmem:[%s13856_s7 + $0x10] sm:$0xff] }
 0x125   :  { %v457_v60 = vadd.f32 %v456_v41, %v455_v42  ;;  %v11356_v41 = vld [vmem:[%s13853_s4] sm:$0xff]  ;;  %v11359_v42 = vld [vmem:[#allocation4] sm:$0xff]  ;;  %13944 = vst [vmem:[#allocation27_spill] sm:$0xff] %v11365_v47  ;;  %13945 = vst [vmem:[#allocation28_spill] sm:$0xff] %v11374_v48 }
 0x126   :  { %v460_v61 = vsel %vm155_vm1, %v447_v55, 0.0  ;;  %v462_v3 = vsel %vm155_vm1, %v448_v58, 0.0  ;;  %13943 = vst [vmem:[#allocation26_spill] sm:$0xff] %v11356_v41  ;;  %v11390_v55 = vld [vmem:[%s13856_s7] sm:$0xff] }
 0x127   :  { %v459_v62 = vadd.f32 %v458_v54, %v457_v60  ;;  %v11383_v54 = vld [vmem:[%s13856_s7 + $0x8] sm:$0xff]  ;;  %13947 = vst [vmem:[#allocation30_spill] sm:$0xff] %v11390_v55 }
 0x128   :  { %13946 = vst [vmem:[#allocation29_spill] sm:$0xff] %v11383_v54 }
 0x129   :  { %v461_v6 = vadd.f32 %v460_v61, %v459_v62 }
 0x12b   :  { %v463_v7 = vadd.f32 %v462_v3, %v461_v6 }
 0x12d   :  { %9747 = vmatmul.mubr.msk.f32.vlgmr.msra.gmra.mxu0 %vm155_vm1, %v463_v7  ;;  %v11400_v7 = vld [vmem:[#allocation10] ss:$0 sm:$0xff] }
 0x12e   :  { %9761 = vmatpush3.msra.mxu0 %v11226_v53  ;;  %9768 = vmatprep.mubr.msk.f32.mxu0 %vm155_vm1, %v11295_v11  ;;  %13948 = vst [vmem:[#allocation31_spill] sm:$0xff] %v11400_v7 }
 0x12f   :  { %9762 = vmatprep.subr.mxu0 %v11292_v10 }
 0x130   :  { %9763 = vmatpush3.msra.mxu0 %v11292_v10  ;;  %v11309_v16 = vpop.permute.xlu1 %182  ;;  %v11311_v17 = vpop.permute.xlu0 %176 }
 0x131   :  { %v185_v19 = vmul.f32 %v11309_v16, %v11298_v12  ;;  %v179_v20 = vmul.f32 %v11311_v17, %v11295_v11  ;;  %9764 = vmatprep.subr.mxu0 %v11303_v15  ;;  %v268_v58 = vpop.f32.mrf.mxu0 }
 0x132   :  { %9765 = vmatpush3.msra.mxu0 %v11303_v15 }
 0x133   :  { %9766 = vmatprep.subr.mxu0 %v11316_v18  ;;  %v186_v21 = vadd.f32 %v185_v19, %v179_v20  ;;  %v9704_v60 = vpop.f32.mrf.mxu0 }
 0x134   :  { %9767 = vmatpush3.msra.mxu0 %v11316_v18 }
 0x135   :  { %9769 = vmatmul.mubr.msk.f32.vlgmr.msra.gmra.mxu0 %vm155_vm1, %v11298_v12  ;;  %9714 = vmatmul.mubr.msk.f32.vlgmr.msra.gmra.mxu1 %vm155_vm1, %v186_v21 }
 0x136   :  { %9728 = vmatpush3.msra.mxu1 %v11328_v22  ;;  %9735 = vmatprep.mubr.msk.f32.mxu1 %vm10942_vm2, %v13874_v5 }
 0x137   :  { %9729 = vmatprep.subr.mxu1 %v13874_v5  ;;  %9782 = vmatprep.subr.mxu0 %v13874_v5 }
 0x138   :  { %9730 = vmatpush3.msra.mxu1 %v11337_v33  ;;  %9790 = vmatprep.mubr.msk.f32.mxu0 %vm10942_vm2, %v13874_v5  ;;  %v611_v61 = vpop.f32.mrf.mxu0 }
 0x139   :  { %9731 = vmatprep.subr.mxu1 %v13874_v5 }
 0x13a   :  { %9732 = vmatpush3.msra.mxu1 %v11346_v34  ;;  %v9726_v62 = vpop.f32.mrf.mxu0 }
 0x13b   :  { %9733 = vmatprep.subr.mxu1 %v13874_v5 }
 0x13c   :  { %9734 = vmatpush3.msra.mxu1 %v11356_v41 }
 0x13d   :  { %9736 = vmatmul.mubr.msk.f32.vlgmr.msra.gmra.mxu1 %vm155_vm1, %v11359_v42  ;;  %9749 = vmatprep.subr.mxu1 %v13874_v5 }
 0x13e   :  { %9750 = vmatpush3.msra.mxu1 %v11365_v47  ;;  %9757 = vmatprep.mubr.msk.f32.mxu1 %vm10942_vm2, %v13874_v5 }
 0x13f   :  { %9751 = vmatprep.subr.mxu1 %v13874_v5 }
 0x140   :  { %9752 = vmatpush3.msra.mxu1 %v11374_v48 }
 0x141   :  { %9753 = vmatprep.subr.mxu1 %v13874_v5 }
 0x142   :  { %9754 = vmatpush3.msra.mxu1 %v11383_v54 }
 0x143   :  { %9755 = vmatprep.subr.mxu1 %v13874_v5 }
 0x144   :  { %9756 = vmatpush3.msra.mxu1 %v11390_v55 }
 0x145   :  { %9758 = vmatmul.mubr.msk.f32.vlgmr.msra.gmra.mxu1 %vm155_vm1, %v11118_v26  ;;  %9771 = vmatprep.subr.mxu1 %v13874_v5 }
 0x146   :  { %9779 = vmatprep.mubr.msk.f32.mxu1 %vm10942_vm2, %v13874_v5  ;;  %v11409_v5 = vld [vmem:[%s13859_s10] ss:$0 sm:$0xff] }
 0x1ed   :  { %v823_v3 = vpop.f32.mrf.mxu0 }
 0x1ef   :  { %v9748_v6 = vpop.f32.mrf.mxu0 }
 0x1f5   :  { %v9770_v19 = vpop.f32.mrf.mxu0  ;;  %v541_v20 = vpop.f32.mrf.mxu1 }
 0x1f6   :  { %v994_v21 = vadd.f32 %v9770_v19, %v11400_v7 }
 0x1f7   :  { %v988_v2 = vpop.f32.mrf.mxu0  ;;  %v9715_v4 = vpop.f32.mrf.mxu1 }
 0x1f8   :  { %v989_v26 = vadd.f32 %v11400_v7, %v988_v2  ;;  %1015 = vrot.lane.b32.xlu0 %v994_v21, %s10943_s6 }
 0x1fa   :  { %1013 = vrot.lane.b32.xlu1 %v989_v26, %s10943_s6 }
 0x1fd   :  { %v703_v58 = vpop.f32.mrf.mxu1 }
 0x1ff   :  { %v9737_v60 = vpop.f32.mrf.mxu1 }
 0x205   :  { %v893_v62 = vpop.f32.mrf.mxu1 }
 0x206   :  { %v894_v6 = vadd.f32 %v893_v62, %v823_v3 }
 0x207   :  { %v9759_v23 = vpop.f32.mrf.mxu1 }
 0x208   :  { %v904_v19 = vadd.f32 %v11409_v5, %v894_v6 }
 0x20a   :  { %v998_v4 = vadd.f32 %v994_v21, %v904_v19  ;;  %v997_v55 = vadd.f32 %v989_v26, %v904_v19 }
 0x20c   :  { %v9159_v2 = vmul.f32 -1.442695, %v998_v4  ;;  %v9158_v7 = vmul.f32 -1.442695, %v997_v55 }
 0x20e   :  { %10523 = vpow2.f32 %v9159_v2  ;;  %v612_v2 = vadd.f32 %v611_v61, %v541_v20 }
 0x20f   :  { %10525 = vpow2.f32 %v9158_v7 }
 0x21b   :  { %v10524_v54 = vpop.eup %10523 }
 0x21c   :  { %v10526_v48 = vpop.eup %10525  ;;  %v1006_v47 = vadd.f32 1.0, %v10524_v54 }
 0x21d   :  { %v1005_v60 = vadd.f32 1.0, %v10526_v48 }
 0x21e   :  { %10527 = vrcp.f32 %v1006_v47 }
 0x21f   :  { %10529 = vrcp.f32 %v1005_v60  ;;  %v11424_v60 = vld [vmem:[#allocation6] ss:$0 sm:$0xff] }
 0x22b   :  { %v10528_v23 = vpop.eup %10527 }
 0x22c   :  { %v10530_v41 = vpop.eup %10529 }
 0x26a   :  { %v1016_v3 = vpop.permute.xlu0 %1015 }
 0x26b   :  { %v1020_v62 = vmul.f32 %v10528_v23, %v1016_v3  ;;  %v622_v3 = vadd.f32 %v11424_v60, %v612_v2  ;;  %v1175_v2 = vld [vmem:[#allocation13 + $0x10] sm:$0xff] }
 0x26c   :  { %v1014_v34 = vpop.permute.xlu1 %1013 }
 0x26d   :  { %v1019_v33 = vmul.f32 %v10530_v41, %v1014_v34  ;;  %1025 = vrot.lane.b32.xlu0 %v1020_v62, %s10943_s6 }
 0x26f   :  { %1023 = vrot.lane.b32.xlu1 %v1019_v33, %s10943_s6  ;;  %v11419_v33 = vld [vmem:[#allocation8] ss:$0 sm:$0xff] }
 0x2df   :  { %v1026_v21 = vpop.permute.xlu0 %1025 }
 0x2e0   :  { %v1030_v55 = vadd.f32 %v1026_v21, %v904_v19 }
 0x2e1   :  { %v1024_v26 = vpop.permute.xlu1 %1023 }
 0x2e2   :  { %10531 = vtanh.f32 %v1030_v55  ;;  %v1029_v7 = vadd.f32 %v1024_v26, %v904_v19  ;;  %v704_v19 = vadd.f32 %v11419_v33, %v703_v58 }
 0x2e4   :  { %10533 = vtanh.f32 %v1029_v7  ;;  %v707_v62 = vadd.f32 %v704_v19, %v622_v3 }
 0x2e6   :  { %v9151_v21 = vmul.f32 -1.442695, %v707_v62 }
 0x2e8   :  { %10535 = vpow2.f32 %v9151_v21  ;;  %v11447_v21 = vld [vmem:[#allocation11 + $0x8] sm:$0xff] }
 0x2ef   :  { %v10532_v54 = vpop.eup %10531 }
 0x2f0   :  { %1037 = vrot.lane.b32.xlu0 %v10532_v54, %s10943_s6 }
 0x2f1   :  { %v10534_v47 = vpop.eup %10533 }
 0x2f2   :  { %1035 = vrot.lane.b32.xlu1 %v10534_v47, %s10943_s6 }
 0x2f5   :  { %v10536_v55 = vpop.eup %10535 }
 0x2f6   :  { %v711_v26 = vadd.f32 1.0, %v10536_v55  ;;  %v1174_v55 = vld [vmem:[#allocation13 + $0x8] sm:$0xff] }
 0x2f8   :  { %10537 = vrcp.f32 %v711_v26 }
 0x305   :  { %v11433_v20 = vpop.eup %10537 }
 0x362   :  { %v1038_v48 = vpop.permute.xlu0 %1037 }
 0x363   :  { %v1042_v6 = vsub.f32 %v11298_v12, %v1038_v48 }
 0x364   :  { %v1036_v34 = vpop.permute.xlu1 %1035 }
 0x365   :  { %v1041_v4 = vsub.f32 %v11295_v11, %v1036_v34  ;;  %1047 = vrot.lane.b32.xlu0 %v1042_v6, %s10944_s0 }
 0x367   :  { %1045 = vrot.lane.b32.xlu1 %v1041_v4, %s10944_s0  ;;  %v13949_v4 = vmov 0.0  }
 0x36b   :  { %715 = vrot.lane.b32.xlu1 %v704_v19, %s10943_s6  ;;  %v11442_v19 = vld [vmem:[#allocation11 + $0x10] sm:$0xff] }
 0x3d7   :  { %v1048_v7 = vpop.permute.xlu0 %1047 }
 0x3d8   :  { %v1052_v48 = vmul.f32 %v10528_v23, %v1048_v7  ;;  %v11437_v23 = vld [vmem:[#allocation11 + $0x18] sm:$0xff]  ;;  %v11450_v7 = vld [vmem:[#allocation11] sm:$0xff] }
 0x3d9   :  { %v1046_v6 = vpop.permute.xlu1 %1045  ;;  %9772 = vmatpush3.msra.mxu1 %v11437_v23 }
 0x3da   :  { %v1051_v34 = vmul.f32 %v10530_v41, %v1046_v6  ;;  %1057 = vrot.lane.b32.xlu1 %v1052_v48, %s10944_s0  ;;  %v1176_v41 = vld [vmem:[#allocation13 + $0x18] sm:$0xff]  ;;  %9773 = vmatprep.subr.mxu1 %v13949_v4  ;;  %v1173_v48 = vld [vmem:[#allocation13] sm:$0xff] }
 0x3db   :  { %9783 = vmatpush3.msra.mxu0 %v1176_v41  ;;  %9774 = vmatpush3.msra.mxu1 %v11442_v19 }
 0x3dc   :  { %1055 = vrot.lane.b32.xlu0 %v1051_v34, %s10944_s0  ;;  %9784 = vmatprep.subr.mxu0 %v13949_v4 }
 0x3dd   :  { %v716_v61 = vpop.permute.xlu1 %715  ;;  %9785 = vmatpush3.msra.mxu0 %v1175_v2  ;;  %9775 = vmatprep.subr.mxu1 %v13949_v4 }
 0x3de   :  { %1075 = vrot.lane.b32.xlu1 %v11298_v12, %s10943_s6  ;;  %v718_v58 = vmul.f32 %v11433_v20, %v716_v61  ;;  %9786 = vmatprep.subr.mxu0 %v13949_v4  ;;  %v11455_v61 = vld [vmem:[#allocation5] sm:$0xff] }
 0x3df   :  { %9776 = vmatpush3.msra.mxu1 %v11447_v21  ;;  %9787 = vmatpush3.msra.mxu0 %v1174_v55 }
 0x3e0   :  { %1063 = vrot.lane.b32.xlu0 %v11295_v11, %s10943_s6  ;;  %9777 = vmatprep.subr.mxu1 %v13949_v4 }
 0x3e1   :  { %9788 = vmatprep.subr.mxu0 %v13949_v4  ;;  %9778 = vmatpush3.msra.mxu1 %v11450_v7 }
 0x3e2   :  { %9789 = vmatpush3.msra.mxu0 %v1173_v48  ;;  %9793 = vmatprep.subr.mxu1 %v13949_v4 }
 0x3e3   :  { %9791 = vmatmul.mubr.msk.f32.vlgmr.msra.gmra.mxu0 %vm155_vm1, %v11455_v61  ;;  %9804 = vmatprep.subr.mxu0 %v13949_v4 }
 0x3e4   :  { %720 = vrot.lane.b32.xlu0 %v718_v58, %s10943_s6  ;;  %9812 = vmatprep.mubr.msk.f32.mxu0 %vm10942_vm2, %v13949_v4 }
 0x3e5   :  { %9805 = vmatpush3.msra.mxu0 %v11220_v52 }
 0x3e6   :  { %9806 = vmatprep.subr.mxu0 %v13949_v4 }
 0x3e7   :  { %9807 = vmatpush3.msra.mxu0 %v11237_v56 }
 0x3e8   :  { %9808 = vmatprep.subr.mxu0 %v13949_v4 }
 0x3e9   :  { %9809 = vmatpush3.msra.mxu0 %v11243_v57 }
 0x3ea   :  { %9810 = vmatprep.subr.mxu0 %v13949_v4 }
 0x3eb   :  { %9811 = vmatpush3.msra.mxu0 %v11253_v59 }
 0x3ec   :  { %9826 = vmatprep.subr.mxu0 %v13949_v4 }
 0x44c   :  { %v1058_v62 = vpop.permute.xlu1 %1057 }
 0x44d   :  { %v1062_v6 = vadd.f32 %v10532_v54, %v1058_v62 }
 0x44e   :  { %v1056_v26 = vpop.permute.xlu0 %1055 }
 0x44f   :  { %v1061_v58 = vadd.f32 %v10534_v47, %v1056_v26 }
 0x450   :  { %v1076_v34 = vpop.permute.xlu1 %1075 }
 0x451   :  { %v1078_v41 = vsub.f32 %v1062_v6, %v1076_v34 }
 0x452   :  { %v1064_v2 = vpop.permute.xlu0 %1063 }
 0x453   :  { %v1079_v54 = vmul.f32 %v1078_v41, %v11309_v16  ;;  %v1066_v62 = vsub.f32 %v1061_v58, %v1064_v2 }
 0x455   :  { %v1067_v47 = vmul.f32 %v1066_v62, %v11311_v17  ;;  %1081 = vrot.lane.b32.xlu0 %v1079_v54, %s10943_s6 }
 0x456   :  { %v721_v55 = vpop.permute.xlu0 %720 }
 0x457   :  { %v723_v26 = vadd.f32 %v721_v55, %v622_v3  ;;  %1069 = vrot.lane.b32.xlu1 %v1067_v47, %s10943_s6 }
 0x459   :  { %10539 = vtanh.f32 %v723_v26 }
 0x466   :  { %v10540_v52 = vpop.eup %10539 }
 0x467   :  { %726 = vrot.lane.b32.xlu1 %v10540_v52, %s10943_s6 }
 0x4c7   :  { %v1082_v48 = vpop.permute.xlu0 %1081 }
 0x4c8   :  { %v1084_v56 = vadd.f32 %v1082_v48, %v11298_v12 }
 0x4c9   :  { %v1070_v6 = vpop.permute.xlu1 %1069 }
 0x4ca   :  { %1088 = vst.msk [vmem:[#allocation2 + $0x8] sm:$0xff] %vm155_vm1, %v1084_v56  ;;  %v1072_v3 = vadd.f32 %v1070_v6, %v11295_v11  ;;  %v1085_v57 = vmul.f32 %v1084_v56, %v11309_v16  ;;  %v11493_v11 = vld [vmem:[%s13939_s19 + $0x8] sm:$0xff] }
 0x4cc   :  { %v1073_v34 = vmul.f32 %v1072_v3, %v11311_v17  ;;  %1087 = vst.msk [vmem:[#allocation2] sm:$0xff] %vm155_vm1, %v1072_v3 }
 0x4ce   :  { %v1086_v59 = vadd.f32 %v1085_v57, %v1073_v34  ;;  %v13950_v57 = vlaneseq }
 0x4d0   :  { %9780 = vmatmul.mubr.msk.f32.vlgmr.msra.gmra.mxu1 %vm155_vm1, %v1086_v59  ;;  %v316_v34 = vand.u32 127, %v13950_v57 }
 0x4d1   :  { %9794 = vmatpush3.msra.mxu1 %v11073_v8  ;;  %9801 = vmatprep.mubr.msk.f32.mxu1 %vm10942_vm2, %v13949_v4 }
 0x4d2   :  { %9795 = vmatprep.subr.mxu1 %v13949_v4 }
 0x4d3   :  { %9796 = vmatpush3.msra.mxu1 %v11075_v9 }
 0x4d4   :  { %9797 = vmatprep.subr.mxu1 %v13949_v4 }
 0x4d5   :  { %9798 = vmatpush3.msra.mxu1 %v11106_v24  ;;  %v11524_v24 = vpop.f32.mrf.mxu0 }
 0x4d6   :  { %9799 = vmatprep.subr.mxu1 %v13949_v4 }
 0x4d7   :  { %9800 = vmatpush3.msra.mxu1 %v11110_v25  ;;  %v9792_v25 = vpop.f32.mrf.mxu0 }
 0x4d8   :  { %9802 = vmatmul.mubr.msk.f32.vlgmr.msra.gmra.mxu1 %vm155_vm1, %v11493_v11  ;;  %9815 = vmatprep.subr.mxu1 %v13949_v4 }
 0x4d9   :  { %v727_v8 = vpop.permute.xlu1 %726  ;;  %9816 = vmatpush3.msra.mxu1 %v11129_v28  ;;  %9823 = vmatprep.mubr.msk.f32.mxu1 %vm10942_vm2, %v13949_v4 }
 0x4da   :  { %v729_v9 = vsub.f32 %v11359_v42, %v727_v8  ;;  %9817 = vmatprep.subr.mxu1 %v13949_v4  ;;  %v11553_v8 = vsub.s32 %v316_v34, %v11121_v27 }
 0x4db   :  { %9818 = vmatpush3.msra.mxu1 %v11138_v29 }
 0x4dc   :  { %731 = vrot.lane.b32.xlu0 %v729_v9, %s10944_s0  ;;  %9819 = vmatprep.subr.mxu1 %v13949_v4 }
 0x4dd   :  { %9820 = vmatpush3.msra.mxu1 %v11153_v32 }
 0x4de   :  { %9821 = vmatprep.subr.mxu1 %v13949_v4 }
 0x4df   :  { %9822 = vmatpush3.msra.mxu1 %v11166_v37 }
 0x4e0   :  { %9824 = vmatmul.mubr.msk.f32.vlgmr.msra.gmra.mxu1 %vm155_vm1, %v11493_v11  ;;  %9837 = vmatprep.subr.mxu1 %v13949_v4 }
 0x4e1   :  { %9838 = vmatpush3.msra.mxu1 %v11177_v40  ;;  %9845 = vmatprep.mubr.msk.f32.mxu1 %vm10942_vm2, %v13949_v4 }
 0x4e2   :  { %9839 = vmatprep.subr.mxu1 %v13949_v4 }
 0x4e3   :  { %9840 = vmatpush3.msra.mxu1 %v11191_v45 }
 0x4e4   :  { %9841 = vmatprep.subr.mxu1 %v13949_v4 }
 0x4e5   :  { %9842 = vmatpush3.msra.mxu1 %v11200_v46 }
 0x4e6   :  { %9843 = vmatprep.subr.mxu1 %v13949_v4 }
 0x4e7   :  { %9844 = vmatpush3.msra.mxu1 %v11215_v51 }
 0x4e8   :  { %9859 = vmatprep.subr.mxu1 %v11226_v53 }
 0x54e   :  { %v732_v28 = vpop.permute.xlu0 %731 }
 0x54f   :  { %v734_v29 = vmul.f32 %v11433_v20, %v732_v28 }
 0x551   :  { %736 = vrot.lane.b32.xlu1 %v734_v29, %s10944_s0 }
 0x590   :  { %v11528_v32 = vpop.f32.mrf.mxu1 }
 0x592   :  { %v9781_v37 = vpop.f32.mrf.mxu1 }
 0x598   :  { %v1398_v40 = vpop.f32.mrf.mxu1 }
 0x599   :  { %v1403_v51 = vmul.f32 %v1398_v40, %v11262_v0  ;;  %v1404_v17 = vmul.f32 %v1398_v40, %v11260_v63  ;;  %v1406_v20 = vmul.f32 %v1398_v40, %v11269_v13  ;;  %v1408_v41 = vmul.f32 %v1398_v40, %v11279_v38 }
 0x59a   :  { %v9803_v45 = vpop.f32.mrf.mxu1  ;;  %v1405_v26 = vmul.f32 %v1398_v40, %v11264_v1  ;;  %v1407_v48 = vmul.f32 %v1398_v40, %v11271_v14  ;;  %v1409_v6 = vmul.f32 %v1398_v40, %v11281_v39 }
 0x59b   :  { %v1413_v16 = vsel %vm155_vm1, %v1403_v51, 0.0  ;;  %v1416_v42 = vsel %vm155_vm1, %v1404_v17, 0.0  ;;  %v1422_v58 = vsel %vm155_vm1, %v1406_v20, 0.0  ;;  %v1428_v2 = vsel %vm155_vm1, %v1408_v41, 0.0 }
 0x59c   :  { %v1425_v56 = vsel %vm155_vm1, %v1407_v48, 0.0  ;;  %v1431_v3 = vsel %vm155_vm1, %v1409_v6, 0.0 }
 0x5c3   :  { %v737_v46 = vpop.permute.xlu1 %736 }
 0x5c4   :  { %v739_v12 = vadd.f32 %v10540_v52, %v737_v46  ;;  %v1419_v52 = vsel %vm155_vm1, %v1405_v26, 0.0 }
 0x5c6   :  { %741 = vrot.lane.b32.xlu0 %v739_v12, %s10943_s6 }
 0x5e5   :  { %1414 = vadd.xlane.f32.xlu0 %v1413_v16 }
 0x5e9   :  { %1417 = vadd.xlane.f32.xlu0 %v1416_v42 }
 0x5ed   :  { %1423 = vadd.xlane.f32.xlu0 %v1422_v58 }
 0x5f1   :  { %1429 = vadd.xlane.f32.xlu0 %v1428_v2 }
 0x638   :  { %v742_v54 = vpop.permute.xlu0 %741 }
 0x639   :  { %744 = vst.msk [vmem:[#allocation3] sm:$0xff] %vm155_vm1, %v742_v54  ;;  %745 = vst.msk [vmem:[#allocation4] sm:$0xff] %vm155_vm1, %v742_v54 }
 0x640   :  { %v11541_v62 = vld [vmem:[#allocation3] sm:$0xff] }
 0x641   :  { %v1402_v47 = vmul.f32 %v1398_v40, %v11541_v62 }
 0x643   :  { %v1410_v55 = vsel %vm155_vm1, %v1402_v47, 0.0 }
 0x644   :  { %1411 = vadd.xlane.f32.xlu1 %v1410_v55 }
 0x648   :  { %1420 = vadd.xlane.f32.xlu1 %v1419_v52 }
 0x64c   :  { %1426 = vadd.xlane.f32.xlu1 %v1425_v56 }
 0x650   :  { %1432 = vadd.xlane.f32.xlu1 %v1431_v3 }
 0x66e   :  { %v1415_v59 = vpop.xlane.xlu0 %1414 }
 0x66f   :  { %v1450_v25 = vrot.slane %v1415_v59, %v11553_v8 }
 0x672   :  { %v1418_v9 = vpop.xlane.xlu0 %1417 }
 0x673   :  { %v1454_v45 = vrot.slane %v1418_v9, %v11553_v8 }
 0x676   :  { %v1424_v37 = vpop.xlane.xlu0 %1423 }
 0x677   :  { %v1462_v17 = vrot.slane %v1424_v37, %v11553_v8 }
 0x67a   :  { %v1430_v20 = vpop.xlane.xlu0 %1429 }
 0x67b   :  { %v1470_v54 = vrot.slane %v1430_v20, %v11553_v8 }
 0x6cd   :  { %v1412_v28 = vpop.xlane.xlu1 %1411 }
 0x6ce   :  { %v1446_v29 = vrot.slane %v1412_v28, %v11553_v8 }
 0x6d0   :  { %v1475_v40 = vsel %vm349_vm3, %v1450_v25, %v1446_v29 }
 0x6d1   :  { %v1421_v46 = vpop.xlane.xlu1 %1420  ;;  %v1476_v51 = vsel %vm351_vm4, %v1454_v45, %v1475_v40 }
 0x6d2   :  { %v1458_v12 = vrot.slane %v1421_v46, %v11553_v8 }
 0x6d4   :  { %v1477_v16 = vsel %vm353_vm5, %v1458_v12, %v1476_v51 }
 0x6d5   :  { %v1427_v42 = vpop.xlane.xlu1 %1426  ;;  %v1478_v41 = vsel %vm355_vm6, %v1462_v17, %v1477_v16 }
 0x6d6   :  { %v1466_v58 = vrot.slane %v1427_v42, %v11553_v8 }
 0x6d8   :  { %v1479_v2 = vsel %vm357_vm7, %v1466_v58, %v1478_v41 }
 0x6d9   :  { %v1433_v47 = vpop.xlane.xlu1 %1432  ;;  %v1480_v26 = vsel %vm359_vm8, %v1470_v54, %v1479_v2 }
 0x6da   :  { %v1474_v55 = vrot.slane %v1433_v47, %v11553_v8 }
 0x6dc   :  { %v1481_v52 = vsel %vm361_vm9, %v1474_v55, %v1480_v26 }
 0x6dd   :  { %v1483_v48 = vsel %vm1434_vm10, %v1481_v52, -1e+30  ;;  %v9166_v52 = vld [vmem:[%s13940_s23 + $0x8] sm:$0xff] }
 0x6de   :  { %v1484_v56 = vsel %vm365_vm0, %v1483_v48, -inf }
 0x6df   :  { %v1485_v6 = vrot.slane %v1484_v56, 4 }
 0x6e1   :  { %v1486_v3 = vmax.f32 %v1484_v56, %v1485_v6  ;;  %v13952_v56 = vmov 1   ;;  %v11586_v6 = vpop.f32.mrf.mxu1 }
 0x6e3   :  { %v1487_v57 = vrot.slane %v1486_v3, 2 }
 0x6e5   :  { %v1488_v34 = vmax.f32 %v1486_v3, %v1487_v57  ;;  %v9825_v3 = vpop.f32.mrf.mxu1 }
 0x6e7   :  { %v1489_v59 = vrot.slane %v1488_v34, 1 }
 0x6e9   :  { %v1490_v9 = vmax.f32 %v1488_v34, %v1489_v59 }
 0x6eb   :  { %v1491_v25 = vsub.f32 %v1483_v48, %v1490_v9  ;;  %v13951_v48 = vmov 0  }
 0x6ed   :  { %v1492_v28 = vmul.f32 1.442695, %v1491_v25 }
 0x6ef   :  { %10541 = vpow2.f32 %v1492_v28 }
 0x6fc   :  { %v10542_v29 = vpop.eup %10541 }
 0x6fd   :  { %v1494_v37 = vsel %vm365_vm0, %v10542_v29, 0.0 }
 0x6fe   :  { %v1495_v40 = vrot.slane %v1494_v37, 4 }
 0x700   :  { %v1496_v45 = vadd.f32 %v1495_v40, %v1494_v37 }
 0x702   :  { %v1497_v46 = vrot.slane %v1496_v45, 2 }
 0x704   :  { %v1498_v12 = vadd.f32 %v1497_v46, %v1496_v45 }
 0x706   :  { %v1499_v51 = vrot.slane %v1498_v12, 1 }
 0x708   :  { %v1500_v16 = vadd.f32 %v1499_v51, %v1498_v12 }
 0x70a   :  { %10543 = vrcp.f32 %v1500_v16 }
 0x717   :  { %v10544_v17 = vpop.eup %10543 }
 0x718   :  { %v1502_v42 = vmul.f32 %v10544_v17, %v10542_v29 }
 0x71a   :  { %v1513_v20 = vrot.slane %v1502_v42, %v11160_v36  ;;  %v1506_v58 = vrot.slane %v1502_v42, %v11147_v31  ;;  %v1520_v41 = vrot.slane %v1502_v42, %v11144_v30  ;;  %v1527_v2 = vrot.slane %v1502_v42, %v11157_v35 }
 0x71b   :  { %v1534_v54 = vrot.slane %v1502_v42, %v11185_v44  ;;  %v1541_v47 = vrot.slane %v1502_v42, %v11182_v43  ;;  %v1548_v55 = vrot.slane %v1502_v42, %v11208_v50  ;;  %v1555_v26 = vrot.slane %v1502_v42, %v11205_v49 }
 0x71c   :  { %1515 = vbcast.lane.b32.xlu1 %v1513_v20, 256  ;;  %1508 = vbcast.lane.b32.xlu0 %v1506_v58, 256 }
 0x720   :  { %1522 = vbcast.lane.b32.xlu1 %v1520_v41, 256  ;;  %1529 = vbcast.lane.b32.xlu0 %v1527_v2, 256 }
 0x724   :  { %1536 = vbcast.lane.b32.xlu1 %v1534_v54, 256  ;;  %1543 = vbcast.lane.b32.xlu0 %v1541_v47, 256 }
 0x728   :  { %1550 = vbcast.lane.b32.xlu1 %v1548_v55, 256  ;;  %1557 = vbcast.lane.b32.xlu0 %v1555_v26, 256 }
 0x72c   :  { %1306 = vperm.xlu1 %10505, %v9166_v52   ;;  %1312 = vperm.xlu0 %10506, %v9166_v52  }
 0x730   :  { %10507 = vset.pattern.permute.xlu0 %v13951_v48  ;;  %10508 = vset.pattern.permute.xlu1 %v13952_v56 }
 0x78e   :  { %v1516_v57 = vpop.permute.xlu1 %1515  ;;  %v1509_v34 = vpop.permute.xlu0 %1508 }
 0x78f   :  { %v1560_v59 = vmul.f32 %v1516_v57, %v11262_v0  ;;  %v1559_v9 = vmul.f32 %v1509_v34, %v11541_v62 }
 0x791   :  { %v1568_v25 = vsel %vm155_vm1, %v1560_v59, 0.0  ;;  %v1567_v28 = vsel %vm155_vm1, %v1559_v9, 0.0  ;;  %v13955_v9 = vld [vmem:[#allocation26_spill] sm:$0xff] }
 0x792   :  { %v1523_v29 = vpop.permute.xlu1 %1522  ;;  %v1530_v37 = vpop.permute.xlu0 %1529  ;;  %v1569_v46 = vadd.f32 %v1568_v25, %v1567_v28  ;;  %v11641_v25 = vld [vmem:[#allocation4] sm:$0xff] }
 0x793   :  { %v1561_v40 = vmul.f32 %v1523_v29, %v11260_v63  ;;  %v1562_v45 = vmul.f32 %v1530_v37, %v11264_v1  ;;  %v13957_v28 = vld [vmem:[#allocation28_spill] sm:$0xff]  ;;  %v13958_v29 = vld [vmem:[#allocation29_spill] sm:$0xff]  ;;  %v13959_v37 = vld [vmem:[#allocation30_spill] sm:$0xff] }
 0x795   :  { %v1570_v12 = vsel %vm155_vm1, %v1561_v40, 0.0  ;;  %v1572_v0 = vsel %vm155_vm1, %v1562_v45, 0.0 }
 0x796   :  { %v1571_v51 = vadd.f32 %v1570_v12, %v1569_v46  ;;  %v1537_v16 = vpop.permute.xlu1 %1536  ;;  %v1544_v17 = vpop.permute.xlu0 %1543  ;;  %v13960_v12 = vld [vmem:[#allocation31_spill] sm:$0xff] }
 0x797   :  { %v1563_v42 = vmul.f32 %v1537_v16, %v11269_v13  ;;  %v1564_v20 = vmul.f32 %v1544_v17, %v11271_v14  ;;  %v11605_v14 = vld [vmem:[#allocation2] sm:$0xff] }
 0x798   :  { %v1573_v58 = vadd.f32 %v1572_v0, %v1571_v51 }
 0x799   :  { %v1574_v41 = vsel %vm155_vm1, %v1563_v42, 0.0  ;;  %v1576_v1 = vsel %vm155_vm1, %v1564_v20, 0.0 }
 0x79a   :  { %v1575_v2 = vadd.f32 %v1574_v41, %v1573_v58  ;;  %v1551_v54 = vpop.permute.xlu1 %1550  ;;  %v1558_v63 = vpop.permute.xlu0 %1557 }
 0x79b   :  { %v1565_v47 = vmul.f32 %v1551_v54, %v11279_v38  ;;  %v1566_v55 = vmul.f32 %v1558_v63, %v11281_v39  ;;  %v11616_v39 = vld [vmem:[#allocation2 + $0x8] sm:$0xff] }
 0x79c   :  { %v1577_v26 = vadd.f32 %v1576_v1, %v1575_v2 }
 0x79d   :  { %v1578_v52 = vsel %vm155_vm1, %v1565_v47, 0.0  ;;  %v1580_v13 = vsel %vm155_vm1, %v1566_v55, 0.0 }
 0x79e   :  { %v1579_v3 = vadd.f32 %v1578_v52, %v1577_v26 }
 0x7a0   :  { %v1581_v57 = vadd.f32 %v1580_v13, %v1579_v3 }
 0x7a2   :  { %9846 = vmatmul.mubr.msk.f32.vlgmr.msra.gmra.mxu1 %vm155_vm1, %v1581_v57 }
 0x7a3   :  { %9860 = vmatpush3.msra.mxu1 %v11226_v53  ;;  %9867 = vmatprep.mubr.msk.f32.mxu1 %vm155_vm1, %v11605_v14 }
 0x7a4   :  { %9861 = vmatprep.subr.mxu1 %v11292_v10 }
 0x7a5   :  { %9862 = vmatpush3.msra.mxu1 %v11292_v10 }
 0x7a6   :  { %9863 = vmatprep.subr.mxu1 %v11303_v15 }
 0x7a7   :  { %9864 = vmatpush3.msra.mxu1 %v11303_v15  ;;  %v11614_v38 = vpop.permute.xlu1 %1306  ;;  %v11618_v34 = vpop.permute.xlu0 %1312  ;;  %v13953_v15 = vld [vmem:[#allocation24_spill] sm:$0xff] }
 0x7a8   :  { %v1309_v53 = vmul.f32 %v11614_v38, %v11605_v14  ;;  %9865 = vmatprep.subr.mxu1 %v11316_v18  ;;  %v1315_v59 = vmul.f32 %v11618_v34, %v11616_v39 }
 0x7a9   :  { %9866 = vmatpush3.msra.mxu1 %v11316_v18  ;;  %v13954_v18 = vld [vmem:[#allocation25_spill] sm:$0xff] }
 0x7aa   :  { %v1316_v10 = vadd.f32 %v1315_v59, %v1309_v53  ;;  %9868 = vmatmul.mubr.msk.f32.vlgmr.msra.gmra.mxu1 %vm155_vm1, %v11616_v39  ;;  %9881 = vmatprep.subr.mxu1 %v13949_v4 }
 0x7ab   :  { %9889 = vmatprep.mubr.msk.f32.mxu1 %vm10942_vm2, %v13949_v4 }
 0x7ac   :  { %9813 = vmatmul.mubr.msk.f32.vlgmr.msra.gmra.mxu0 %vm155_vm1, %v1316_v10 }
 0x7ad   :  { %9827 = vmatpush3.msra.mxu0 %v11328_v22  ;;  %9834 = vmatprep.mubr.msk.f32.mxu0 %vm10942_vm2, %v13949_v4  ;;  %v13956_v22 = vld [vmem:[#allocation27_spill] sm:$0xff] }
 0x7ae   :  { %9828 = vmatprep.subr.mxu0 %v13949_v4 }
 0x7af   :  { %9829 = vmatpush3.msra.mxu0 %v13953_v15 }
 0x7b0   :  { %9830 = vmatprep.subr.mxu0 %v13949_v4 }
 0x7b1   :  { %9831 = vmatpush3.msra.mxu0 %v13954_v18 }
 0x7b2   :  { %9832 = vmatprep.subr.mxu0 %v13949_v4 }
 0x7b3   :  { %9833 = vmatpush3.msra.mxu0 %v13955_v9 }
 0x7b4   :  { %9835 = vmatmul.mubr.msk.f32.vlgmr.msra.gmra.mxu0 %vm155_vm1, %v11641_v25  ;;  %9848 = vmatprep.subr.mxu0 %v13949_v4 }
 0x7b5   :  { %9849 = vmatpush3.msra.mxu0 %v13956_v22  ;;  %9856 = vmatprep.mubr.msk.f32.mxu0 %vm10942_vm2, %v13949_v4 }
 0x7b6   :  { %9850 = vmatprep.subr.mxu0 %v13949_v4 }
 0x7b7   :  { %9851 = vmatpush3.msra.mxu0 %v13957_v28 }
 0x7b8   :  { %9852 = vmatprep.subr.mxu0 %v13949_v4 }
 0x7b9   :  { %9853 = vmatpush3.msra.mxu0 %v13958_v29 }
 0x7ba   :  { %9854 = vmatprep.subr.mxu0 %v13949_v4 }
 0x7bb   :  { %9855 = vmatpush3.msra.mxu0 %v13959_v37 }
 0x7bc   :  { %9857 = vmatmul.mubr.msk.f32.vlgmr.msra.gmra.mxu0 %vm155_vm1, %v11493_v11  ;;  %9870 = vmatprep.subr.mxu0 %v13949_v4 }
 0x7bd   :  { %9871 = vmatpush3.msra.mxu0 %v11437_v23  ;;  %9878 = vmatprep.mubr.msk.f32.mxu0 %vm10942_vm2, %v13949_v4 }
 0x7be   :  { %9872 = vmatprep.subr.mxu0 %v13949_v4 }
 0x7bf   :  { %9873 = vmatpush3.msra.mxu0 %v11442_v19 }
 0x7c0   :  { %9874 = vmatprep.subr.mxu0 %v13949_v4 }
 0x7c1   :  { %9875 = vmatpush3.msra.mxu0 %v11447_v21 }
 0x7c2   :  { %9876 = vmatprep.subr.mxu0 %v13949_v4 }
 0x7c3   :  { %9877 = vmatpush3.msra.mxu0 %v11450_v7 }
 0x7c4   :  { %9892 = vmatprep.subr.mxu0 %v13949_v4 }
 0x862   :  { %v1942_v11 = vpop.f32.mrf.mxu1 }
 0x864   :  { %v9847_v40 = vpop.f32.mrf.mxu1 }
 0x86a   :  { %v9869_v23 = vpop.f32.mrf.mxu1 }
 0x86b   :  { %v2113_v19 = vadd.f32 %v9869_v23, %v13960_v12 }
 0x86c   :  { %v2107_v45 = vpop.f32.mrf.mxu1  ;;  %v1659_v46 = vpop.f32.mrf.mxu0 }
 0x86d   :  { %v2108_v51 = vadd.f32 %v13960_v12, %v2107_v45  ;;  %v1730_v40 = vadd.f32 %v11586_v6, %v1659_v46 }
 0x86e   :  { %v9814_v16 = vpop.f32.mrf.mxu0 }
 0x86f   :  { %2132 = vrot.lane.b32.xlu1 %v2108_v51, %s10943_s6  ;;  %v1740_v23 = vadd.f32 %v11424_v60, %v1730_v40 }
 0x873   :  { %2134 = vrot.lane.b32.xlu1 %v2113_v19, %s10943_s6 }
 0x874   :  { %v1821_v21 = vpop.f32.mrf.mxu0 }
 0x875   :  { %v1822_v37 = vadd.f32 %v11419_v33, %v1821_v21 }
 0x876   :  { %v9836_v17 = vpop.f32.mrf.mxu0 }
 0x877   :  { %v1825_v45 = vadd.f32 %v1822_v37, %v1740_v23 }
 0x879   :  { %v9173_v12 = vmul.f32 -1.442695, %v1825_v45 }
 0x87c   :  { %v2012_v0 = vpop.f32.mrf.mxu0 }
 0x87d   :  { %v2013_v42 = vadd.f32 %v2012_v0, %v1942_v11 }
 0x87e   :  { %v9858_v7 = vpop.f32.mrf.mxu0 }
 0x87f   :  { %v2023_v20 = vadd.f32 %v11409_v5, %v2013_v42 }
 0x881   :  { %v2116_v58 = vadd.f32 %v2108_v51, %v2023_v20  ;;  %v2117_v41 = vadd.f32 %v2113_v19, %v2023_v20 }
 0x883   :  { %v9180_v2 = vmul.f32 -1.442695, %v2116_v58  ;;  %v9181_v54 = vmul.f32 -1.442695, %v2117_v41 }
 0x885   :  { %10545 = vpow2.f32 %v9180_v2 }
 0x886   :  { %10547 = vpow2.f32 %v9181_v54 }
 0x892   :  { %v10546_v63 = vpop.eup %10545 }
 0x893   :  { %v2124_v1 = vadd.f32 1.0, %v10546_v63  ;;  %v10548_v47 = vpop.eup %10547 }
 0x894   :  { %v2125_v55 = vadd.f32 1.0, %v10548_v47 }
 0x895   :  { %10549 = vrcp.f32 %v2124_v1 }
 0x896   :  { %10551 = vrcp.f32 %v2125_v55 }
 0x8a2   :  { %v10550_v26 = vpop.eup %10549 }
 0x8a3   :  { %v10552_v13 = vpop.eup %10551 }
 0x8e1   :  { %v2133_v52 = vpop.permute.xlu1 %2132 }
 0x8e2   :  { %v2138_v3 = vmul.f32 %v10550_v26, %v2133_v52  ;;  %v9162_v52 = vld [vmem:[#allocation16] ss:$0 sm:$0xff] }
 0x8e4   :  { %2142 = vrot.lane.b32.xlu0 %v2138_v3, %s10943_s6  ;;  %v1254_v3 = vadd.f32 %v9162_v52, %v11524_v24  ;;  %v11773_v52 = vld [vmem:[#allocation3 + $0x10] sm:$0xff] }
 0x8e5   :  { %v2135_v57 = vpop.permute.xlu1 %2134 }
 0x8e6   :  { %v2139_v5 = vmul.f32 %v10552_v13, %v2135_v57 }
 0x8e8   :  { %2144 = vrot.lane.b32.xlu1 %v2139_v5, %s10943_s6 }
 0x956   :  { %v2143_v53 = vpop.permute.xlu0 %2142 }
 0x957   :  { %v2148_v59 = vadd.f32 %v2143_v53, %v2023_v20 }
 0x959   :  { %10553 = vtanh.f32 %v2148_v59 }
 0x95a   :  { %v2145_v10 = vpop.permute.xlu1 %2144 }
 0x95b   :  { %v2149_v15 = vadd.f32 %v2145_v10, %v2023_v20 }
 0x95d   :  { %10555 = vtanh.f32 %v2149_v15 }
 0x95e   :  { %10557 = vpow2.f32 %v9173_v12 }
 0x966   :  { %v10554_v18 = vpop.eup %10553 }
 0x967   :  { %2154 = vrot.lane.b32.xlu0 %v10554_v18, %s10943_s6 }
 0x96a   :  { %v10556_v9 = vpop.eup %10555 }
 0x96b   :  { %2156 = vrot.lane.b32.xlu1 %v10556_v9, %s10943_s6  ;;  %v10558_v51 = vpop.eup %10557 }
 0x96c   :  { %v1829_v16 = vadd.f32 1.0, %v10558_v51 }
 0x96e   :  { %10559 = vrcp.f32 %v1829_v16 }
 0x97b   :  { %v11689_v6 = vpop.eup %10559 }
 0x9d9   :  { %v2155_v22 = vpop.permute.xlu0 %2154 }
 0x9da   :  { %v2160_v28 = vsub.f32 %v11605_v14, %v2155_v22 }
 0x9dc   :  { %2164 = vrot.lane.b32.xlu0 %v2160_v28, %s10944_s0 }
 0x9dd   :  { %v2157_v29 = vpop.permute.xlu1 %2156 }
 0x9de   :  { %v2161_v11 = vsub.f32 %v11616_v39, %v2157_v29  ;;  %v11712_v29 = vld [vmem:[#allocation17 + $0x18] sm:$0xff] }
 0x9e0   :  { %2166 = vrot.lane.b32.xlu1 %v2161_v11, %s10944_s0  ;;  %1833 = vrot.lane.b32.xlu0 %v1822_v37, %s10943_s6  ;;  %v11715_v37 = vld [vmem:[#allocation17 + $0x10] sm:$0xff] }
 0xa4e   :  { %v2165_v19 = vpop.permute.xlu0 %2164 }
 0xa4f   :  { %v2170_v17 = vmul.f32 %v10550_v26, %v2165_v19 }
 0xa51   :  { %2174 = vrot.lane.b32.xlu1 %v2170_v17, %s10944_s0 }
 0xa52   :  { %v2167_v33 = vpop.permute.xlu1 %2166  ;;  %v1834_v0 = vpop.permute.xlu0 %1833 }
 0xa53   :  { %v2171_v21 = vmul.f32 %v10552_v13, %v2167_v33  ;;  %v1836_v60 = vmul.f32 %v11689_v6, %v1834_v0  ;;  %v11702_v13 = vld [vmem:[#allocation14] ss:$0 sm:$0xff] }
 0xa54   :  { %v1170_v57 = vadd.f32 %v11702_v13, %v11528_v32 }
 0xa55   :  { %2176 = vrot.lane.b32.xlu0 %v2171_v21, %s10944_s0  ;;  %2182 = vrot.lane.b32.xlu1 %v11605_v14, %s10943_s6 }
 0xa56   :  { %v1257_v5 = vadd.f32 %v1254_v3, %v1170_v57 }
 0xa58   :  { %v9164_v53 = vmul.f32 -1.442695, %v1257_v5 }
 0xa59   :  { %2194 = vrot.lane.b32.xlu0 %v11616_v39, %s10943_s6  ;;  %1838 = vrot.lane.b32.xlu1 %v1836_v60, %s10943_s6 }
 0xac3   :  { %v2175_v46 = vpop.permute.xlu1 %2174 }
 0xac4   :  { %v2180_v7 = vadd.f32 %v10554_v18, %v2175_v46 }
 0xac7   :  { %v2183_v42 = vpop.permute.xlu1 %2182  ;;  %v2177_v20 = vpop.permute.xlu0 %2176 }
 0xac8   :  { %v2185_v58 = vsub.f32 %v2180_v7, %v2183_v42  ;;  %v2181_v2 = vadd.f32 %v10556_v9, %v2177_v20  ;;  %v11759_v20 = vld [vmem:[#allocation3 + $0x28] sm:$0xff] }
 0xaca   :  { %v2186_v41 = vmul.f32 %v2185_v58, %v11614_v38 }
 0xacb   :  { %v1839_v54 = vpop.permute.xlu1 %1838  ;;  %v2195_v63 = vpop.permute.xlu0 %2194 }
 0xacc   :  { %v1841_v1 = vadd.f32 %v1839_v54, %v1740_v23  ;;  %v2197_v47 = vsub.f32 %v2181_v2, %v2195_v63  ;;  %2188 = vrot.lane.b32.xlu0 %v2186_v41, %s10943_s6  ;;  %v11764_v54 = vld [vmem:[#allocation3 + $0x38] sm:$0xff] }
 0xace   :  { %10561 = vtanh.f32 %v1841_v1  ;;  %v2198_v55 = vmul.f32 %v2197_v47, %v11618_v34 }
 0xacf   :  { %10563 = vpow2.f32 %v9164_v53  ;;  %v11778_v53 = vld [vmem:[#allocation3 + $0x20] sm:$0xff] }
 0xad0   :  { %2200 = vrot.lane.b32.xlu1 %v2198_v55, %s10943_s6 }
 0xadb   :  { %v10562_v26 = vpop.eup %10561 }
 0xadc   :  { %1844 = vrot.lane.b32.xlu0 %v10562_v26, %s10943_s6  ;;  %v10564_v59 = vpop.eup %10563 }
 0xadd   :  { %v1261_v18 = vadd.f32 1.0, %v10564_v59 }
 0xadf   :  { %10565 = vrcp.f32 %v1261_v18 }
 0xae0   :  { %1265 = vrot.lane.b32.xlu0 %v1254_v3, %s10943_s6 }
 0xaec   :  { %v11739_v40 = vpop.eup %10565 }
 0xb3e   :  { %v2189_v10 = vpop.permute.xlu0 %2188 }
 0xb3f   :  { %v2191_v15 = vadd.f32 %v2189_v10, %v11605_v14  ;;  %v11721_v14 = vld [vmem:[#allocation17 + $0x8] sm:$0xff] }
 0xb41   :  { %2206 = vst.msk [vmem:[#allocation2] sm:$0xff] %vm155_vm1, %v2191_v15  ;;  %v2192_v22 = vmul.f32 %v2191_v15, %v11614_v38  ;;  %v11725_v38 = vld [vmem:[#allocation17] sm:$0xff]  ;;  %v11782_v15 = vld [vmem:[#allocation3 + $0x30] sm:$0xff] }
 0xb42   :  { %v2201_v9 = vpop.permute.xlu1 %2200 }
 0xb43   :  { %v2203_v24 = vadd.f32 %v2201_v9, %v11616_v39 }
 0xb45   :  { %v2204_v28 = vmul.f32 %v2203_v24, %v11618_v34  ;;  %2207 = vst.msk [vmem:[#allocation2 + $0x8] sm:$0xff] %vm155_vm1, %v2203_v24  ;;  %v11731_v34 = vld [vmem:[%s13939_s19 + $0x10] sm:$0xff] }
 0xb47   :  { %v2205_v32 = vadd.f32 %v2204_v28, %v2192_v22 }
 0xb49   :  { %9879 = vmatmul.mubr.msk.f32.vlgmr.msra.gmra.mxu0 %vm155_vm1, %v2205_v32 }
 0xb4a   :  { %9893 = vmatpush3.msra.mxu0 %v11712_v29  ;;  %9900 = vmatprep.mubr.msk.f32.mxu0 %vm10942_vm2, %v13949_v4 }
 0xb4b   :  { %9894 = vmatprep.subr.mxu0 %v13949_v4 }
 0xb4c   :  { %9895 = vmatpush3.msra.mxu0 %v11715_v37 }
 0xb4d   :  { %9896 = vmatprep.subr.mxu0 %v13949_v4 }
 0xb4e   :  { %9897 = vmatpush3.msra.mxu0 %v11721_v14  ;;  %v1845_v39 = vpop.permute.xlu0 %1844 }
 0xb4f   :  { %9898 = vmatprep.subr.mxu0 %v13949_v4  ;;  %v1847_v11 = vsub.f32 %v11641_v25, %v1845_v39 }
 0xb50   :  { %9899 = vmatpush3.msra.mxu0 %v11725_v38 }
 0xb51   :  { %9901 = vmatmul.mubr.msk.f32.vlgmr.msra.gmra.mxu0 %vm155_vm1, %v11731_v34  ;;  %1849 = vrot.lane.b32.xlu1 %v1847_v11, %s10944_s0 }
 0xb52   :  { %v1266_v23 = vpop.permute.xlu0 %1265  ;;  %9914 = vmatprep.subr.mxu0 %v13949_v4  ;;  %9922 = vmatprep.mubr.msk.f32.mxu0 %vm10942_vm2, %v13949_v4 }
 0xb53   :  { %v1268_v45 = vmul.f32 %v11739_v40, %v1266_v23 }
 0xb55   :  { %1270 = vrot.lane.b32.xlu0 %v1268_v45, %s10943_s6 }
 0xbc3   :  { %v1850_v25 = vpop.permute.xlu1 %1849 }
 0xbc4   :  { %v1852_v12 = vmul.f32 %v11689_v6, %v1850_v25  ;;  %v11755_v6 = vld [vmem:[#allocation3 + $0x18] sm:$0xff] }
 0xbc6   :  { %1854 = vrot.lane.b32.xlu1 %v1852_v12, %s10944_s0 }
 0xbc7   :  { %v1271_v51 = vpop.permute.xlu0 %1270 }
 0xbc8   :  { %v1273_v16 = vadd.f32 %v1271_v51, %v1170_v57 }
 0xbca   :  { %10567 = vtanh.f32 %v1273_v16 }
 0xbd7   :  { %v11748_v19 = vpop.eup %10567 }
 0xbd8   :  { %1276 = vrot.lane.b32.xlu0 %v11748_v19, %s10943_s6 }
 0xc09   :  { %v11752_v17 = vpop.f32.mrf.mxu0 }
 0xc0b   :  { %v9880_v33 = vpop.f32.mrf.mxu0 }
 0xc11   :  { %v2518_v21 = vpop.f32.mrf.mxu0 }
 0xc12   :  { %v2522_v7 = vmul.f32 %v2518_v21, %v11541_v62  ;;  %v2525_v42 = vmul.f32 %v2518_v21, %v11755_v6  ;;  %v2527_v2 = vmul.f32 %v2518_v21, %v11759_v20  ;;  %v2529_v1 = vmul.f32 %v2518_v21, %v11764_v54 }
 0xc13   :  { %v9902_v0 = vpop.f32.mrf.mxu0  ;;  %v2524_v5 = vmul.f32 %v2518_v21, %v11773_v52  ;;  %v2526_v10 = vmul.f32 %v2518_v21, %v11778_v53  ;;  %v2528_v9 = vmul.f32 %v2518_v21, %v11782_v15 }
 0xc14   :  { %v2530_v58 = vsel %vm155_vm1, %v2522_v7, 0.0  ;;  %v2539_v41 = vsel %vm155_vm1, %v2525_v42, 0.0  ;;  %v2545_v63 = vsel %vm155_vm1, %v2527_v2, 0.0  ;;  %v2551_v47 = vsel %vm155_vm1, %v2529_v1, 0.0 }
 0xc15   :  { %v2536_v59 = vsel %vm155_vm1, %v2524_v5, 0.0  ;;  %v2542_v18 = vsel %vm155_vm1, %v2526_v10, 0.0  ;;  %v2548_v24 = vsel %vm155_vm1, %v2528_v9, 0.0 }
 0xc38   :  { %v1855_v60 = vpop.permute.xlu1 %1854 }
 0xc39   :  { %v1857_v46 = vadd.f32 %v10562_v26, %v1855_v60 }
 0xc3b   :  { %1859 = vrot.lane.b32.xlu1 %v1857_v46, %s10943_s6 }
 0xc4a   :  { %v1277_v22 = vpop.permute.xlu0 %1276 }
 0xc4b   :  { %v1279_v28 = vsub.f32 %v11455_v61, %v1277_v22 }
 0xc5f   :  { %2531 = vadd.xlane.f32.xlu1 %v2530_v58 }
 0xc63   :  { %2540 = vadd.xlane.f32.xlu1 %v2539_v41 }
 0xc67   :  { %2546 = vadd.xlane.f32.xlu1 %v2545_v63 }
 0xc6b   :  { %2552 = vadd.xlane.f32.xlu1 %v2551_v47 }
 0xcad   :  { %v1860_v55 = vpop.permute.xlu1 %1859 }
 0xcae   :  { %1863 = vst.msk [vmem:[#allocation3 + $0x8] sm:$0xff] %vm155_vm1, %v1860_v55  ;;  %1864 = vst.msk [vmem:[#allocation4] sm:$0xff] %vm155_vm1, %v1860_v55 }
 0xcb5   :  { %v11771_v26 = vld [vmem:[#allocation3 + $0x8] sm:$0xff] }
 0xcb6   :  { %v2523_v3 = vmul.f32 %v2518_v21, %v11771_v26 }
 0xcb8   :  { %v2533_v57 = vsel %vm155_vm1, %v2523_v3, 0.0 }
 0xcb9   :  { %2534 = vadd.xlane.f32.xlu0 %v2533_v57 }
 0xcbd   :  { %2537 = vadd.xlane.f32.xlu0 %v2536_v59 }
 0xcc1   :  { %2543 = vadd.xlane.f32.xlu0 %v2542_v18 }
 0xcc5   :  { %2549 = vadd.xlane.f32.xlu0 %v2548_v24 }
 0xcdb   :  { %1281 = vrot.lane.b32.xlu0 %v1279_v28, %s10944_s0 }
 0xce8   :  { %v2532_v32 = vpop.xlane.xlu1 %2531 }
 0xce9   :  { %v2566_v45 = vrot.slane %v2532_v32, %v11553_v8 }
 0xcec   :  { %v2541_v39 = vpop.xlane.xlu1 %2540 }
 0xced   :  { %v2578_v21 = vrot.slane %v2541_v39, %v11553_v8 }
 0xcf0   :  { %v2547_v12 = vpop.xlane.xlu1 %2546 }
 0xcf1   :  { %v2586_v42 = vrot.slane %v2547_v12, %v11553_v8 }
 0xcf4   :  { %v2553_v46 = vpop.xlane.xlu1 %2552 }
 0xcf5   :  { %v2594_v2 = vrot.slane %v2553_v46, %v11553_v8 }
 0xd42   :  { %v2535_v11 = vpop.xlane.xlu0 %2534 }
 0xd43   :  { %v2570_v23 = vrot.slane %v2535_v11, %v11553_v8 }
 0xd45   :  { %v2595_v16 = vsel %vm349_vm3, %v2570_v23, %v2566_v45 }
 0xd46   :  { %v2538_v25 = vpop.xlane.xlu0 %2537 }
 0xd47   :  { %v2574_v51 = vrot.slane %v2538_v25, %v11553_v8 }
 0xd49   :  { %v2596_v33 = vsel %vm351_vm4, %v2574_v51, %v2595_v16  ;;  %v11812_v16 = vld [vmem:[%s13851_s2 + $0x18] sm:$0xff] }
 0xd4a   :  { %v2544_v61 = vpop.xlane.xlu0 %2543  ;;  %v2597_v60 = vsel %vm353_vm5, %v2578_v21, %v2596_v33  ;;  %9915 = vmatpush3.msra.mxu0 %v11812_v16  ;;  %v11819_v33 = vld [vmem:[%s13851_s2 + $0x10] sm:$0xff]  ;;  %v11826_v21 = vld [vmem:[%s13851_s2 + $0x8] sm:$0xff] }
 0xd4b   :  { %v2582_v0 = vrot.slane %v2544_v61, %v11553_v8  ;;  %9916 = vmatprep.subr.mxu0 %v13949_v4 }
 0xd4c   :  { %9917 = vmatpush3.msra.mxu0 %v11819_v33 }
 0xd4d   :  { %v2598_v7 = vsel %vm355_vm6, %v2582_v0, %v2597_v60  ;;  %9918 = vmatprep.subr.mxu0 %v13949_v4  ;;  %v11833_v0 = vld [vmem:[%s13851_s2] sm:$0xff] }
 0xd4e   :  { %v2550_v58 = vpop.xlane.xlu0 %2549  ;;  %v2599_v63 = vsel %vm357_vm7, %v2586_v42, %v2598_v7  ;;  %9919 = vmatpush3.msra.mxu0 %v11826_v21  ;;  %v11844_v42 = vld [vmem:[%s13857_s8 + $0x18] sm:$0xff] }
 0xd4f   :  { %v2590_v41 = vrot.slane %v2550_v58, %v11553_v8  ;;  %9920 = vmatprep.subr.mxu0 %v13949_v4  ;;  %v11852_v58 = vld [vmem:[%s13857_s8 + $0x10] sm:$0xff] }
 0xd50   :  { %9921 = vmatpush3.msra.mxu0 %v11833_v0 }
 0xd51   :  { %v2600_v1 = vsel %vm359_vm8, %v2590_v41, %v2599_v63  ;;  %9923 = vmatmul.mubr.msk.f32.vlgmr.msra.gmra.mxu0 %vm155_vm1, %v11731_v34  ;;  %9936 = vmatprep.subr.mxu0 %v13949_v4  ;;  %v11861_v63 = vld [vmem:[%s13857_s8 + $0x8] sm:$0xff] }
 0xd52   :  { %v2601_v47 = vsel %vm361_vm9, %v2594_v2, %v2600_v1  ;;  %v1282_v55 = vpop.permute.xlu0 %1281  ;;  %9944 = vmatprep.mubr.msk.f32.mxu0 %vm10942_vm2, %v13949_v4  ;;  %9937 = vmatpush3.msra.mxu0 %v11844_v42  ;;  %v11867_v1 = vld [vmem:[%s13857_s8] sm:$0xff] }
 0xd53   :  { %v2603_v3 = vsel %vm2554_vm11, %v2601_v47, -1e+30  ;;  %v1284_v57 = vmul.f32 %v11739_v40, %v1282_v55  ;;  %9938 = vmatprep.subr.mxu0 %v13949_v4 }
 0xd54   :  { %v2604_v5 = vsel %vm365_vm0, %v2603_v3, -inf  ;;  %9939 = vmatpush3.msra.mxu0 %v11852_v58 }
 0xd55   :  { %v2605_v59 = vrot.slane %v2604_v5, 4  ;;  %1286 = vrot.lane.b32.xlu1 %v1284_v57, %s10944_s0  ;;  %9940 = vmatprep.subr.mxu0 %v13949_v4 }
 0xd56   :  { %9941 = vmatpush3.msra.mxu0 %v11861_v63 }
 0xd57   :  { %v2606_v10 = vmax.f32 %v2604_v5, %v2605_v59  ;;  %9942 = vmatprep.subr.mxu0 %v13949_v4  ;;  %v9189_v59 = vld [vmem:[%s13940_s23 + $0x10] sm:$0xff] }
 0xd58   :  { %9943 = vmatpush3.msra.mxu0 %v11867_v1 }
 0xd59   :  { %v2607_v18 = vrot.slane %v2606_v10, 2 }
 0xd5b   :  { %v2608_v9 = vmax.f32 %v2606_v10, %v2607_v18  ;;  %v11886_v10 = vld [vmem:[#allocation13 + $0x18] sm:$0xff]  ;;  %v11888_v18 = vld [vmem:[#allocation13 + $0x10] sm:$0xff] }
 0xd5c   :  { %9882 = vmatpush3.msra.mxu1 %v11886_v10 }
 0xd5d   :  { %v2609_v24 = vrot.slane %v2608_v9, 1  ;;  %9883 = vmatprep.subr.mxu1 %v13949_v4 }
 0xd5e   :  { %9884 = vmatpush3.msra.mxu1 %v11888_v18 }
 0xd5f   :  { %v2610_v22 = vmax.f32 %v2608_v9, %v2609_v24  ;;  %v11892_v9 = vld [vmem:[#allocation13 + $0x8] sm:$0xff]  ;;  %9885 = vmatprep.subr.mxu1 %v13949_v4  ;;  %v11896_v24 = vld [vmem:[#allocation13] sm:$0xff] }
 0xd60   :  { %9886 = vmatpush3.msra.mxu1 %v11892_v9 }
 0xd61   :  { %v2611_v28 = vsub.f32 %v2603_v3, %v2610_v22  ;;  %v11876_v3 = vld [vmem:[%s13858_s9 + $0x18] sm:$0xff]  ;;  %9887 = vmatprep.subr.mxu1 %v13949_v4 }
 0xd62   :  { %9958 = vmatprep.subr.mxu0 %v11876_v3  ;;  %9888 = vmatpush3.msra.mxu1 %v11896_v24 }
 0xd63   :  { %v2612_v32 = vmul.f32 1.442695, %v2611_v28  ;;  %9903 = vmatprep.subr.mxu1 %v13949_v4 }
 0xd65   :  { %10569 = vpow2.f32 %v2612_v32 }
 0xd72   :  { %v10570_v39 = vpop.eup %10569 }
 0xd73   :  { %v2614_v11 = vsel %vm365_vm0, %v10570_v39, 0.0 }
 0xd74   :  { %v2615_v23 = vrot.slane %v2614_v11, 4 }
 0xd76   :  { %v2616_v45 = vadd.f32 %v2615_v23, %v2614_v11 }
 0xd78   :  { %v2617_v25 = vrot.slane %v2616_v45, 2 }
 0xd7a   :  { %v2618_v40 = vadd.f32 %v2617_v25, %v2616_v45 }
 0xd7c   :  { %v2619_v12 = vrot.slane %v2618_v40, 1 }
 0xd7e   :  { %v2620_v51 = vadd.f32 %v2619_v12, %v2618_v40 }
 0xd80   :  { %10571 = vrcp.f32 %v2620_v51 }
 0xd8d   :  { %v10572_v61 = vpop.eup %10571 }
 0xd8e   :  { %v2622_v60 = vmul.f32 %v10572_v61, %v10570_v39 }
 0xd90   :  { %v2633_v46 = vrot.slane %v2622_v60, %v11160_v36  ;;  %v2626_v7 = vrot.slane %v2622_v60, %v11147_v31  ;;  %v2647_v41 = vrot.slane %v2622_v60, %v11157_v35  ;;  %v2640_v2 = vrot.slane %v2622_v60, %v11144_v30 }
 0xd91   :  { %v2661_v47 = vrot.slane %v2622_v60, %v11182_v43  ;;  %v2654_v55 = vrot.slane %v2622_v60, %v11185_v44  ;;  %v2675_v57 = vrot.slane %v2622_v60, %v11205_v49  ;;  %v2668_v5 = vrot.slane %v2622_v60, %v11208_v50 }
 0xd92   :  { %2635 = vbcast.lane.b32.xlu0 %v2633_v46, 256  ;;  %2628 = vbcast.lane.b32.xlu1 %v2626_v7, 256 }
 0xd96   :  { %2649 = vbcast.lane.b32.xlu0 %v2647_v41, 256  ;;  %2642 = vbcast.lane.b32.xlu1 %v2640_v2, 256 }
 0xd9a   :  { %2663 = vbcast.lane.b32.xlu0 %v2661_v47, 256  ;;  %2656 = vbcast.lane.b32.xlu1 %v2654_v55, 256 }
 0xd9e   :  { %2677 = vbcast.lane.b32.xlu0 %v2675_v57, 256  ;;  %2670 = vbcast.lane.b32.xlu1 %v2668_v5, 256 }
 0xda2   :  { %2426 = vperm.xlu0 %10507, %v9189_v59  }
 0xda6   :  { %10510 = vset.pattern.permute.xlu0 %v13952_v56 }
 0xdc7   :  { %v1287_v22 = vpop.permute.xlu1 %1286 }
 0xdc8   :  { %v1289_v28 = vadd.f32 %v11748_v19, %v1287_v22 }
 0xdca   :  { %1291 = vrot.lane.b32.xlu1 %v1289_v28, %s10943_s6 }
 0xdce   :  { %2432 = vperm.xlu1 %10508, %v9189_v59  }
 0xdd2   :  { %10509 = vset.pattern.permute.xlu1 %v13951_v48 }
 0xe04   :  { %v2629_v32 = vpop.permute.xlu1 %2628  ;;  %v2636_v39 = vpop.permute.xlu0 %2635 }
 0xe05   :  { %v2679_v11 = vmul.f32 %v2629_v32, %v11541_v62  ;;  %v2680_v23 = vmul.f32 %v2636_v39, %v11771_v26 }
 0xe07   :  { %v2687_v45 = vsel %vm155_vm1, %v2679_v11, 0.0  ;;  %v2688_v25 = vsel %vm155_vm1, %v2680_v23, 0.0 }
 0xe08   :  { %v2643_v40 = vpop.permute.xlu1 %2642  ;;  %v2650_v12 = vpop.permute.xlu0 %2649  ;;  %v2689_v61 = vadd.f32 %v2688_v25, %v2687_v45 }
 0xe09   :  { %v2681_v51 = vmul.f32 %v2643_v40, %v11773_v52  ;;  %v2682_v19 = vmul.f32 %v2650_v12, %v11755_v6  ;;  %v11924_v40 = vld [vmem:[%s13858_s9 + $0x10] sm:$0xff]  ;;  %v11927_v12 = vld [vmem:[#allocation2] sm:$0xff] }
 0xe0a   :  { %13961 = vst [vmem:[#allocation24_spill] sm:$0xff] %v11924_v40 }
 0xe0b   :  { %v2690_v60 = vsel %vm155_vm1, %v2681_v51, 0.0  ;;  %v2692_v62 = vsel %vm155_vm1, %v2682_v19, 0.0  ;;  %v11935_v51 = vld [vmem:[%s13858_s9 + $0x8] sm:$0xff]  ;;  %v11942_v19 = vld [vmem:[%s13858_s9] sm:$0xff] }
 0xe0c   :  { %v2691_v46 = vadd.f32 %v2690_v60, %v2689_v61  ;;  %v2657_v7 = vpop.permute.xlu1 %2656  ;;  %v2664_v41 = vpop.permute.xlu0 %2663  ;;  %13962 = vst [vmem:[#allocation25_spill] sm:$0xff] %v11935_v51  ;;  %13963 = vst [vmem:[#allocation26_spill] sm:$0xff] %v11942_v19  ;;  %v11948_v61 = vld [vmem:[#allocation2 + $0x8] sm:$0xff] }
 0xe0d   :  { %v2683_v2 = vmul.f32 %v2657_v7, %v11778_v53  ;;  %v2684_v47 = vmul.f32 %v2664_v41, %v11759_v20  ;;  %v12000_v41 = vld [vmem:[%s13852_s3] sm:$0xff] }
 0xe0e   :  { %v2693_v55 = vadd.f32 %v2692_v62, %v2691_v46  ;;  %v11991_v46 = vld [vmem:[%s13852_s3 + $0x8] sm:$0xff]  ;;  %13966 = vst [vmem:[#allocation29_spill] sm:$0xff] %v12000_v41 }
 0xe0f   :  { %v2694_v57 = vsel %vm155_vm1, %v2683_v2, 0.0  ;;  %v2696_v22 = vsel %vm155_vm1, %v2684_v47, 0.0  ;;  %13965 = vst [vmem:[#allocation28_spill] sm:$0xff] %v11991_v46 }
 0xe10   :  { %v2695_v5 = vadd.f32 %v2694_v57, %v2693_v55  ;;  %v2671_v59 = vpop.permute.xlu1 %2670  ;;  %v2678_v52 = vpop.permute.xlu0 %2677  ;;  %v12012_v55 = vld [vmem:[%s13853_s4 + $0x18] sm:$0xff]  ;;  %v12019_v57 = vld [vmem:[%s13853_s4 + $0x10] sm:$0xff] }
 0xe11   :  { %v2685_v28 = vmul.f32 %v2671_v59, %v11782_v15  ;;  %v2686_v32 = vmul.f32 %v2678_v52, %v11764_v54  ;;  %13967 = vst [vmem:[#allocation30_spill] sm:$0xff] %v12012_v55  ;;  %13968 = vst [vmem:[#allocation31_spill] sm:$0xff] %v12019_v57  ;;  %v12030_v59 = vld [vmem:[%s13853_s4 + $0x8] sm:$0xff] }
 0xe12   :  { %v2697_v39 = vadd.f32 %v2696_v22, %v2695_v5  ;;  %v12024_v5 = vpop.f32.mrf.mxu0  ;;  %13969 = vst [vmem:[#allocation32_spill] sm:$0xff] %v12030_v59  ;;  %v12037_v22 = vld [vmem:[%s13853_s4] sm:$0xff] }
 0xe13   :  { %v2698_v11 = vsel %vm155_vm1, %v2685_v28, 0.0  ;;  %v2700_v45 = vsel %vm155_vm1, %v2686_v32, 0.0  ;;  %13970 = vst [vmem:[#allocation33_spill] sm:$0xff] %v12037_v22  ;;  %v12044_v28 = vld [vmem:[%s13856_s7 + $0x18] sm:$0xff]  ;;  %v12047_v32 = vld [vmem:[#allocation4] sm:$0xff] }
 0xe14   :  { %v2699_v23 = vadd.f32 %v2698_v11, %v2697_v39  ;;  %v9924_v52 = vpop.f32.mrf.mxu0  ;;  %13971 = vst [vmem:[#allocation34_spill] sm:$0xff] %v12044_v28  ;;  %v12055_v39 = vld [vmem:[%s13856_s7 + $0x10] sm:$0xff]  ;;  %v12064_v11 = vld [vmem:[%s13856_s7 + $0x8] sm:$0xff] }
 0xe15   :  { %13972 = vst [vmem:[#allocation35_spill] sm:$0xff] %v12055_v39  ;;  %13973 = vst [vmem:[#allocation36_spill] sm:$0xff] %v12064_v11 }
 0xe16   :  { %v2701_v25 = vadd.f32 %v2700_v45, %v2699_v23  ;;  %v12071_v23 = vld [vmem:[%s13856_s7] sm:$0xff] }
 0xe17   :  { %13974 = vst [vmem:[#allocation37_spill] sm:$0xff] %v12071_v23 }
 0xe18   :  { %9945 = vmatmul.mubr.msk.f32.vlgmr.msra.gmra.mxu0 %vm155_vm1, %v2701_v25 }
 0xe19   :  { %9959 = vmatpush3.msra.mxu0 %v11876_v3  ;;  %9966 = vmatprep.mubr.msk.f32.mxu0 %vm155_vm1, %v11927_v12 }
 0xe1a   :  { %9960 = vmatprep.subr.mxu0 %v11924_v40 }
 0xe1b   :  { %9961 = vmatpush3.msra.mxu0 %v11924_v40 }
 0xe1c   :  { %9962 = vmatprep.subr.mxu0 %v11935_v51 }
 0xe1d   :  { %9963 = vmatpush3.msra.mxu0 %v11935_v51 }
 0xe1e   :  { %9964 = vmatprep.subr.mxu0 %v11942_v19 }
 0xe1f   :  { %9965 = vmatpush3.msra.mxu0 %v11942_v19 }
 0xe20   :  { %9967 = vmatmul.mubr.msk.f32.vlgmr.msra.gmra.mxu0 %vm155_vm1, %v11948_v61  ;;  %9980 = vmatprep.subr.mxu0 %v13949_v4 }
 0xe21   :  { %9981 = vmatpush3.msra.mxu0 %v11886_v10  ;;  %9988 = vmatprep.mubr.msk.f32.mxu0 %vm10942_vm2, %v13949_v4  ;;  %v11971_v10 = vld [vmem:[%s13852_s3 + $0x18] sm:$0xff] }
 0xe22   :  { %9982 = vmatprep.subr.mxu0 %v13949_v4 }
 0xe23   :  { %9983 = vmatpush3.msra.mxu0 %v11888_v18 }
 0xe24   :  { %9984 = vmatprep.subr.mxu0 %v13949_v4 }
 0xe25   :  { %9985 = vmatpush3.msra.mxu0 %v11892_v9  ;;  %v11980_v9 = vld [vmem:[%s13852_s3 + $0x10] sm:$0xff] }
 0xe26   :  { %9986 = vmatprep.subr.mxu0 %v13949_v4  ;;  %13964 = vst [vmem:[#allocation27_spill] sm:$0xff] %v11980_v9 }
 0xe27   :  { %9987 = vmatpush3.msra.mxu0 %v11896_v24  ;;  %v11985_v24 = vpop.permute.xlu0 %2426 }
 0xe28   :  { %10002 = vmatprep.subr.mxu0 %v13949_v4  ;;  %v2429_v62 = vmul.f32 %v11985_v24, %v11927_v12 }
 0xe3c   :  { %v1292_v60 = vpop.permute.xlu1 %1291 }
 0xe3d   :  { %1294 = vst.msk [vmem:[#allocation5] sm:$0xff] %vm155_vm1, %v1292_v60  ;;  %1295 = vst.msk [vmem:[%s13866_s17] sm:$0xff] %vm155_vm1, %v1292_v60  ;;  %v12081_v60 = vld [vmem:[#allocation10] ss:$0 sm:$0xff] }
 0xe3e   :  { %13975 = vst [vmem:[#allocation38_spill] sm:$0xff] %v12081_v60 }
 0xe44   :  { %v11973_v18 = vld [vmem:[#allocation5] sm:$0xff] }
 0xe45   :  { %9890 = vmatmul.mubr.msk.f32.vlgmr.msra.gmra.mxu1 %vm155_vm1, %v11973_v18 }
 0xe46   :  { %9904 = vmatpush3.msra.mxu1 %v11971_v10  ;;  %9911 = vmatprep.mubr.msk.f32.mxu1 %vm10942_vm2, %v13949_v4 }
 0xe47   :  { %9905 = vmatprep.subr.mxu1 %v13949_v4 }
 0xe48   :  { %9906 = vmatpush3.msra.mxu1 %v11980_v9 }
 0xe49   :  { %9907 = vmatprep.subr.mxu1 %v13949_v4  ;;  %v11995_v7 = vpop.permute.xlu1 %2432 }
 0xe4a   :  { %v2435_v2 = vmul.f32 %v11995_v7, %v11948_v61  ;;  %9908 = vmatpush3.msra.mxu1 %v11991_v46 }
 0xe4b   :  { %9909 = vmatprep.subr.mxu1 %v13949_v4 }
 0xe4c   :  { %v2436_v47 = vadd.f32 %v2435_v2, %v2429_v62  ;;  %9910 = vmatpush3.msra.mxu1 %v12000_v41 }
 0xe4d   :  { %9925 = vmatprep.subr.mxu1 %v13949_v4 }
 0xe4e   :  { %9912 = vmatmul.mubr.msk.f32.vlgmr.msra.gmra.mxu1 %vm155_vm1, %v2436_v47 }
 0xe4f   :  { %9926 = vmatpush3.msra.mxu1 %v12012_v55  ;;  %9933 = vmatprep.mubr.msk.f32.mxu1 %vm10942_vm2, %v13949_v4 }
 0xe50   :  { %9927 = vmatprep.subr.mxu1 %v13949_v4 }
 0xe51   :  { %9928 = vmatpush3.msra.mxu1 %v12019_v57 }
 0xe52   :  { %9929 = vmatprep.subr.mxu1 %v13949_v4 }
 0xe53   :  { %9930 = vmatpush3.msra.mxu1 %v12030_v59 }
 0xe54   :  { %9931 = vmatprep.subr.mxu1 %v13949_v4 }
 0xe55   :  { %9932 = vmatpush3.msra.mxu1 %v12037_v22 }
 0xe56   :  { %9934 = vmatmul.mubr.msk.f32.vlgmr.msra.gmra.mxu1 %vm155_vm1, %v12047_v32  ;;  %9947 = vmatprep.subr.mxu1 %v13949_v4 }
 0xe57   :  { %9948 = vmatpush3.msra.mxu1 %v12044_v28  ;;  %9955 = vmatprep.mubr.msk.f32.mxu1 %vm10942_vm2, %v13949_v4 }
 0xe58   :  { %9949 = vmatprep.subr.mxu1 %v13949_v4 }
 0xe59   :  { %9950 = vmatpush3.msra.mxu1 %v12055_v39 }
 0xe5a   :  { %9951 = vmatprep.subr.mxu1 %v13949_v4 }
 0xe5b   :  { %9952 = vmatpush3.msra.mxu1 %v12064_v11 }
 0xe5c   :  { %9953 = vmatprep.subr.mxu1 %v13949_v4 }
 0xe5d   :  { %9954 = vmatpush3.msra.mxu1 %v12071_v23 }
 0xe5e   :  { %9956 = vmatmul.mubr.msk.f32.vlgmr.msra.gmra.mxu1 %vm155_vm1, %v11731_v34  ;;  %9969 = vmatprep.subr.mxu1 %v13949_v4 }
 0xe5f   :  { %9977 = vmatprep.mubr.msk.f32.mxu1 %vm10942_vm2, %v13949_v4 }
 0xed8   :  { %v3062_v45 = vpop.f32.mrf.mxu0 }
 0xeda   :  { %v9946_v25 = vpop.f32.mrf.mxu0 }
 0xee0   :  { %v9968_v62 = vpop.f32.mrf.mxu0 }
 0xee1   :  { %v3233_v2 = vadd.f32 %v9968_v62, %v12081_v60  ;;  %v12092_v62 = vld [vmem:[%s13859_s10] ss:$0 sm:$0xff] }
 0xee2   :  { %v3227_v47 = vpop.f32.mrf.mxu0 }
 0xee3   :  { %v3228_v52 = vadd.f32 %v12081_v60, %v3227_v47  ;;  %3254 = vrot.lane.b32.xlu0 %v3233_v2, %s10943_s6 }
 0xee5   :  { %3252 = vrot.lane.b32.xlu1 %v3228_v52, %s10943_s6 }
 0xf05   :  { %v12087_v34 = vpop.f32.mrf.mxu1 }
 0xf07   :  { %v9891_v23 = vpop.f32.mrf.mxu1 }
 0xf0e   :  { %v2779_v11 = vpop.f32.mrf.mxu1 }
 0xf10   :  { %v9913_v39 = vpop.f32.mrf.mxu1 }
 0xf16   :  { %v2941_v28 = vpop.f32.mrf.mxu1 }
 0xf18   :  { %v9935_v22 = vpop.f32.mrf.mxu1 }
 0xf1e   :  { %v3132_v25 = vpop.f32.mrf.mxu1 }
 0xf1f   :  { %v3133_v57 = vadd.f32 %v3132_v25, %v3062_v45 }
 0xf20   :  { %v9957_v59 = vpop.f32.mrf.mxu1 }
 0xf21   :  { %v3143_v47 = vadd.f32 %v12092_v62, %v3133_v57 }
 0xf23   :  { %v3237_v60 = vadd.f32 %v3233_v2, %v3143_v47  ;;  %v3236_v55 = vadd.f32 %v3228_v52, %v3143_v47 }
 0xf25   :  { %v9204_v41 = vmul.f32 -1.442695, %v3237_v60  ;;  %v9203_v19 = vmul.f32 -1.442695, %v3236_v55 }
 0xf27   :  { %10573 = vpow2.f32 %v9204_v41 }
 0xf28   :  { %10575 = vpow2.f32 %v9203_v19 }
 0xf34   :  { %v10574_v23 = vpop.eup %10573 }
 0xf35   :  { %v10576_v39 = vpop.eup %10575  ;;  %v3245_v46 = vadd.f32 1.0, %v10574_v23 }
 0xf36   :  { %v3244_v22 = vadd.f32 1.0, %v10576_v39  ;;  %v2850_v39 = vadd.f32 %v12024_v5, %v2779_v11 }
 0xf37   :  { %10577 = vrcp.f32 %v3245_v46 }
 0xf38   :  { %10579 = vrcp.f32 %v3244_v22  ;;  %v12108_v22 = vld [vmem:[#allocation6] ss:$0 sm:$0xff] }
 0xf39   :  { %13976 = vst [vmem:[#allocation39_spill] sm:$0xff] %v12108_v22 }
 0xf44   :  { %v10578_v59 = vpop.eup %10577 }
 0xf45   :  { %v10580_v51 = vpop.eup %10579 }
 0xf55   :  { %v3255_v45 = vpop.permute.xlu0 %3254 }
 0xf56   :  { %v3259_v25 = vmul.f32 %v10578_v59, %v3255_v45  ;;  %v2860_v45 = vadd.f32 %v12108_v22, %v2850_v39 }
 0xf57   :  { %v3253_v9 = vpop.permute.xlu1 %3252 }
 0xf58   :  { %v3258_v40 = vmul.f32 %v10580_v51, %v3253_v9  ;;  %3264 = vrot.lane.b32.xlu0 %v3259_v25, %s10943_s6 }
 0xf5a   :  { %3262 = vrot.lane.b32.xlu1 %v3258_v40, %s10943_s6  ;;  %v12102_v40 = vld [vmem:[#allocation8] ss:$0 sm:$0xff] }
 0xfca   :  { %v3265_v57 = vpop.permute.xlu0 %3264 }
 0xfcb   :  { %v3269_v55 = vadd.f32 %v3265_v57, %v3143_v47 }
 0xfcc   :  { %v3263_v41 = vpop.permute.xlu1 %3262 }
 0xfcd   :  { %10581 = vtanh.f32 %v3269_v55  ;;  %v3268_v19 = vadd.f32 %v3263_v41, %v3143_v47  ;;  %v2942_v47 = vadd.f32 %v12102_v40, %v2941_v28 }
 0xfcf   :  { %10583 = vtanh.f32 %v3268_v19  ;;  %v2945_v25 = vadd.f32 %v2942_v47, %v2860_v45 }
 0xfd1   :  { %v9196_v57 = vmul.f32 -1.442695, %v2945_v25  ;;  %v12133_v25 = vld [vmem:[#allocation11] sm:$0xff] }
 0xfd3   :  { %10585 = vpow2.f32 %v9196_v57 }
 0xfda   :  { %v10582_v60 = vpop.eup %10581 }
 0xfdb   :  { %3276 = vrot.lane.b32.xlu0 %v10582_v60, %s10943_s6 }
 0xfdc   :  { %v10584_v46 = vpop.eup %10583 }
 0xfdd   :  { %3274 = vrot.lane.b32.xlu1 %v10584_v46, %s10943_s6 }
 0xfe0   :  { %v10586_v55 = vpop.eup %10585 }
 0xfe1   :  { %v2949_v41 = vadd.f32 1.0, %v10586_v55 }
 0xfe3   :  { %10587 = vrcp.f32 %v2949_v41 }
 0xff0   :  { %v12117_v28 = vpop.eup %10587 }
0x104d   :  { %v3277_v2 = vpop.permute.xlu0 %3276 }
0x104e   :  { %v3281_v52 = vsub.f32 %v11948_v61, %v3277_v2 }
0x104f   :  { %v3275_v9 = vpop.permute.xlu1 %3274 }
0x1050   :  { %v3280_v23 = vsub.f32 %v11927_v12, %v3275_v9  ;;  %3286 = vrot.lane.b32.xlu0 %v3281_v52, %s10944_s0 }
0x1052   :  { %3284 = vrot.lane.b32.xlu1 %v3280_v23, %s10944_s0 }
0x1056   :  { %2953 = vrot.lane.b32.xlu1 %v2942_v47, %s10943_s6  ;;  %v12129_v47 = vld [vmem:[#allocation11 + $0x8] sm:$0xff] }
0x10c2   :  { %v3287_v19 = vpop.permute.xlu0 %3286 }
0x10c3   :  { %v3291_v2 = vmul.f32 %v10578_v59, %v3287_v19  ;;  %v12121_v59 = vld [vmem:[#allocation11 + $0x18] sm:$0xff] }
0x10c4   :  { %v3285_v52 = vpop.permute.xlu1 %3284  ;;  %9970 = vmatpush3.msra.mxu1 %v12121_v59 }
0x10c5   :  { %v3290_v9 = vmul.f32 %v10580_v51, %v3285_v52  ;;  %3296 = vrot.lane.b32.xlu1 %v3291_v2, %s10944_s0  ;;  %9971 = vmatprep.subr.mxu1 %v13949_v4  ;;  %v12125_v51 = vld [vmem:[#allocation11 + $0x10] sm:$0xff] }
0x10c6   :  { %9972 = vmatpush3.msra.mxu1 %v12125_v51 }
0x10c7   :  { %3294 = vrot.lane.b32.xlu0 %v3290_v9, %s10944_s0  ;;  %9973 = vmatprep.subr.mxu1 %v13949_v4 }
0x10c8   :  { %v2954_v5 = vpop.permute.xlu1 %2953  ;;  %9974 = vmatpush3.msra.mxu1 %v12129_v47 }
0x10c9   :  { %3314 = vrot.lane.b32.xlu1 %v11948_v61, %s10943_s6  ;;  %v2956_v11 = vmul.f32 %v12117_v28, %v2954_v5  ;;  %9975 = vmatprep.subr.mxu1 %v13949_v4 }
0x10ca   :  { %9976 = vmatpush3.msra.mxu1 %v12133_v25 }
0x10cb   :  { %3302 = vrot.lane.b32.xlu0 %v11927_v12, %s10943_s6  ;;  %9991 = vmatprep.subr.mxu1 %v13949_v4 }
0x10cf   :  { %2958 = vrot.lane.b32.xlu0 %v2956_v11, %s10943_s6 }
0x1137   :  { %v3297_v23 = vpop.permute.xlu1 %3296 }
0x1138   :  { %v3301_v57 = vadd.f32 %v10582_v60, %v3297_v23  ;;  %v12143_v23 = vld [vmem:[#allocation16] ss:$0 sm:$0xff] }
0x1139   :  { %v3295_v39 = vpop.permute.xlu0 %3294 }
0x113a   :  { %v3300_v41 = vadd.f32 %v10584_v46, %v3295_v39  ;;  %v2373_v46 = vadd.f32 %v12143_v23, %v12087_v34  ;;  %v2289_v39 = vadd.f32 %v11702_v13, %v11752_v17  ;;  %v12169_v17 = vld [vmem:[%s13939_s19 + $0x18] sm:$0xff] }
0x113b   :  { %v3315_v55 = vpop.permute.xlu1 %3314 }
0x113c   :  { %v3317_v19 = vsub.f32 %v3301_v57, %v3315_v55  ;;  %v2376_v57 = vadd.f32 %v2373_v46, %v2289_v39 }
0x113d   :  { %v3303_v2 = vpop.permute.xlu0 %3302 }
0x113e   :  { %v3318_v52 = vmul.f32 %v3317_v19, %v11995_v7  ;;  %v3305_v9 = vsub.f32 %v3300_v41, %v3303_v2 }
0x1140   :  { %v3306_v5 = vmul.f32 %v3305_v9, %v11985_v24  ;;  %3320 = vrot.lane.b32.xlu0 %v3318_v52, %s10943_s6 }
0x1141   :  { %v2959_v11 = vpop.permute.xlu0 %2958 }
0x1142   :  { %v2961_v22 = vadd.f32 %v2959_v11, %v2860_v45  ;;  %3308 = vrot.lane.b32.xlu1 %v3306_v5, %s10943_s6  ;;  %v9186_v45 = vmul.f32 -1.442695, %v2376_v57  ;;  %v12222_v57 = vld [vmem:[#allocation3] sm:$0xff] }
0x1144   :  { %10589 = vtanh.f32 %v2961_v22 }
0x1145   :  { %10591 = vpow2.f32 %v9186_v45 }
0x1151   :  { %v12141_v60 = vpop.eup %10589 }
0x1152   :  { %2964 = vrot.lane.b32.xlu1 %v12141_v60, %s10943_s6  ;;  %v10592_v41 = vpop.eup %10591 }
0x1153   :  { %v2380_v52 = vadd.f32 1.0, %v10592_v41 }
0x1155   :  { %10593 = vrcp.f32 %v2380_v52 }
0x1156   :  { %2384 = vrot.lane.b32.xlu1 %v2373_v46, %s10943_s6 }
0x11b2   :  { %v3321_v55 = vpop.permute.xlu0 %3320 }
0x11b3   :  { %v3323_v22 = vadd.f32 %v3321_v55, %v11948_v61 }
0x11b4   :  { %v3309_v19 = vpop.permute.xlu1 %3308 }
0x11b5   :  { %3327 = vst.msk [vmem:[#allocation2 + $0x8] sm:$0xff] %vm155_vm1, %v3323_v22  ;;  %v3311_v2 = vadd.f32 %v3309_v19, %v11927_v12  ;;  %v3324_v34 = vmul.f32 %v3323_v22, %v11995_v7 }
0x11b7   :  { %v3312_v9 = vmul.f32 %v3311_v2, %v11985_v24  ;;  %3326 = vst.msk [vmem:[#allocation2] sm:$0xff] %vm155_vm1, %v3311_v2 }
0x11b9   :  { %v3325_v13 = vadd.f32 %v3324_v34, %v3312_v9 }
0x11bb   :  { %9978 = vmatmul.mubr.msk.f32.vlgmr.msra.gmra.mxu1 %vm155_vm1, %v3325_v13 }
0x11bc   :  { %9992 = vmatpush3.msra.mxu1 %v11712_v29  ;;  %9999 = vmatprep.mubr.msk.f32.mxu1 %vm10942_vm2, %v13949_v4 }
0x11bd   :  { %9993 = vmatprep.subr.mxu1 %v13949_v4 }
0x11be   :  { %9994 = vmatpush3.msra.mxu1 %v11715_v37 }
0x11bf   :  { %9995 = vmatprep.subr.mxu1 %v13949_v4 }
0x11c0   :  { %9996 = vmatpush3.msra.mxu1 %v11721_v14  ;;  %v12184_v14 = vpop.eup %10593 }
0x11c1   :  { %9997 = vmatprep.subr.mxu1 %v13949_v4 }
0x11c2   :  { %9998 = vmatpush3.msra.mxu1 %v11725_v38 }
0x11c3   :  { %10000 = vmatmul.mubr.msk.f32.vlgmr.msra.gmra.mxu1 %vm155_vm1, %v12169_v17  ;;  %10013 = vmatprep.subr.mxu1 %v13949_v4 }
0x11c4   :  { %v2965_v29 = vpop.permute.xlu1 %2964  ;;  %10014 = vmatpush3.msra.mxu1 %v11812_v16  ;;  %10021 = vmatprep.mubr.msk.f32.mxu1 %vm10942_vm2, %v13949_v4 }
0x11c5   :  { %v2967_v37 = vsub.f32 %v12047_v32, %v2965_v29  ;;  %10015 = vmatprep.subr.mxu1 %v13949_v4 }
0x11c6   :  { %10016 = vmatpush3.msra.mxu1 %v11819_v33 }
0x11c7   :  { %2969 = vrot.lane.b32.xlu0 %v2967_v37, %s10944_s0  ;;  %10017 = vmatprep.subr.mxu1 %v13949_v4 }
0x11c8   :  { %v2385_v38 = vpop.permute.xlu1 %2384  ;;  %10018 = vmatpush3.msra.mxu1 %v11826_v21 }
0x11c9   :  { %v2387_v16 = vmul.f32 %v12184_v14, %v2385_v38  ;;  %10019 = vmatprep.subr.mxu1 %v13949_v4 }
0x11ca   :  { %10020 = vmatpush3.msra.mxu1 %v11833_v0 }
0x11cb   :  { %2389 = vrot.lane.b32.xlu1 %v2387_v16, %s10943_s6  ;;  %10022 = vmatmul.mubr.msk.f32.vlgmr.msra.gmra.mxu1 %vm155_vm1, %v12169_v17 }
0x11cc   :  { %10035 = vmatprep.subr.mxu1 %v13949_v4  ;;  %10043 = vmatprep.mubr.msk.f32.mxu1 %vm10942_vm2, %v13949_v4 }
0x11cd   :  { %10036 = vmatpush3.msra.mxu1 %v11844_v42 }
0x11ce   :  { %10037 = vmatprep.subr.mxu1 %v13949_v4 }
0x11cf   :  { %10038 = vmatpush3.msra.mxu1 %v11852_v58 }
0x11d0   :  { %10039 = vmatprep.subr.mxu1 %v13949_v4 }
0x11d1   :  { %10040 = vmatpush3.msra.mxu1 %v11861_v63 }
0x11d2   :  { %10041 = vmatprep.subr.mxu1 %v13949_v4 }
0x11d3   :  { %10042 = vmatpush3.msra.mxu1 %v11867_v1 }
0x11d4   :  { %10057 = vmatprep.subr.mxu1 %v11876_v3 }
0x1239   :  { %v2970_v33 = vpop.permute.xlu0 %2969 }
0x123a   :  { %v2972_v21 = vmul.f32 %v12117_v28, %v2970_v33 }
0x123c   :  { %2974 = vrot.lane.b32.xlu0 %v2972_v21, %s10944_s0 }
0x123d   :  { %v2390_v0 = vpop.permute.xlu1 %2389 }
0x123e   :  { %v2392_v42 = vadd.f32 %v2390_v0, %v2289_v39 }
0x1240   :  { %10595 = vtanh.f32 %v2392_v42 }
0x124d   :  { %v12206_v12 = vpop.eup %10595 }
0x124e   :  { %2395 = vrot.lane.b32.xlu1 %v12206_v12, %s10943_s6 }
0x127b   :  { %v12210_v58 = vpop.f32.mrf.mxu1 }
0x127d   :  { %v9979_v63 = vpop.f32.mrf.mxu1 }
0x1283   :  { %v3638_v61 = vpop.f32.mrf.mxu1 }
0x1284   :  { %v3643_v1 = vmul.f32 %v3638_v61, %v11771_v26  ;;  %v3646_v24 = vmul.f32 %v3638_v61, %v11778_v53  ;;  %v3648_v5 = vmul.f32 %v3638_v61, %v11782_v15  ;;  %v3642_v45 = vmul.f32 %v3638_v61, %v12222_v57 }
0x1285   :  { %v10001_v7 = vpop.f32.mrf.mxu1  ;;  %v3645_v41 = vmul.f32 %v3638_v61, %v11755_v6  ;;  %v3647_v2 = vmul.f32 %v3638_v61, %v11759_v20  ;;  %v3649_v34 = vmul.f32 %v3638_v61, %v11764_v54 }
0x1286   :  { %v3653_v32 = vsel %vm155_vm1, %v3643_v1, 0.0  ;;  %v3662_v28 = vsel %vm155_vm1, %v3646_v24, 0.0  ;;  %v3668_v11 = vsel %vm155_vm1, %v3648_v5, 0.0  ;;  %v3650_v15 = vsel %vm155_vm1, %v3642_v45, 0.0 }
0x1287   :  { %3654 = vadd.xlane.f32.xlu1 %v3653_v32  ;;  %v3659_v19 = vsel %vm155_vm1, %v3645_v41, 0.0  ;;  %v3665_v52 = vsel %vm155_vm1, %v3647_v2, 0.0  ;;  %v3671_v9 = vsel %vm155_vm1, %v3649_v34, 0.0 }
0x128b   :  { %3663 = vadd.xlane.f32.xlu1 %v3662_v28 }
0x128f   :  { %3669 = vadd.xlane.f32.xlu1 %v3668_v11 }
0x12ae   :  { %v2975_v46 = vpop.permute.xlu0 %2974 }
0x12af   :  { %v2977_v39 = vadd.f32 %v12141_v60, %v2975_v46 }
0x12b1   :  { %2979 = vrot.lane.b32.xlu0 %v2977_v39, %s10943_s6 }
0x12c0   :  { %v2396_v26 = vpop.permute.xlu1 %2395 }
0x12c1   :  { %v2398_v53 = vsub.f32 %v11973_v18, %v2396_v26 }
0x12c3   :  { %2400 = vrot.lane.b32.xlu1 %v2398_v53, %s10944_s0 }
0x12d0   :  { %3651 = vadd.xlane.f32.xlu0 %v3650_v15 }
0x1310   :  { %v3655_v13 = vpop.xlane.xlu1 %3654 }
0x1311   :  { %v3690_v54 = vrot.slane %v3655_v13, %v11553_v8 }
0x1314   :  { %v3664_v29 = vpop.xlane.xlu1 %3663 }
0x1318   :  { %v3670_v37 = vpop.xlane.xlu1 %3669 }
0x1319   :  { %v3710_v5 = vrot.slane %v3670_v37, %v11553_v8 }
0x1323   :  { %v2980_v55 = vpop.permute.xlu0 %2979 }
0x1324   :  { %2983 = vst.msk [vmem:[#allocation3 + $0x10] sm:$0xff] %vm155_vm1, %v2980_v55  ;;  %2984 = vst.msk [vmem:[#allocation4] sm:$0xff] %vm155_vm1, %v2980_v55 }
0x132b   :  { %v12228_v60 = vld [vmem:[#allocation3 + $0x10] sm:$0xff] }
0x132c   :  { %v3644_v22 = vmul.f32 %v3638_v61, %v12228_v60 }
0x132e   :  { %v3656_v18 = vsel %vm155_vm1, %v3644_v22, 0.0 }
0x132f   :  { %3657 = vadd.xlane.f32.xlu0 %v3656_v18 }
0x1333   :  { %3660 = vadd.xlane.f32.xlu0 %v3659_v19 }
0x1335   :  { %v2401_v38 = vpop.permute.xlu1 %2400 }
0x1336   :  { %v2403_v6 = vmul.f32 %v12184_v14, %v2401_v38  ;;  %v3702_v14 = vrot.slane %v3664_v29, %v11553_v8 }
0x1337   :  { %3666 = vadd.xlane.f32.xlu0 %v3665_v52 }
0x133b   :  { %3672 = vadd.xlane.f32.xlu0 %v3671_v9 }
0x1351   :  { %2405 = vrot.lane.b32.xlu0 %v2403_v6, %s10944_s0 }
0x1359   :  { %v3652_v16 = vpop.xlane.xlu0 %3651 }
0x135a   :  { %v3686_v20 = vrot.slane %v3652_v16, %v11553_v8 }
0x135c   :  { %v3715_v42 = vsel %vm349_vm3, %v3690_v54, %v3686_v20 }
0x13b8   :  { %v3658_v33 = vpop.xlane.xlu0 %3657 }
0x13b9   :  { %v3694_v21 = vrot.slane %v3658_v33, %v11553_v8 }
0x13bb   :  { %v3716_v61 = vsel %vm351_vm4, %v3694_v21, %v3715_v42 }
0x13bc   :  { %v3661_v0 = vpop.xlane.xlu0 %3660 }
0x13bd   :  { %v3698_v63 = vrot.slane %v3661_v0, %v11553_v8 }
0x13bf   :  { %v3717_v1 = vsel %vm353_vm5, %v3698_v63, %v3716_v61 }
0x13c0   :  { %v3667_v24 = vpop.xlane.xlu0 %3666  ;;  %v3718_v32 = vsel %vm355_vm6, %v3702_v14, %v3717_v1 }
0x13c1   :  { %v3706_v7 = vrot.slane %v3667_v24, %v11553_v8 }
0x13c3   :  { %v3719_v28 = vsel %vm357_vm7, %v3706_v7, %v3718_v32  ;;  %v9212_v7 = vld [vmem:[%s13940_s23 + $0x18] sm:$0xff] }
0x13c4   :  { %v3673_v11 = vpop.xlane.xlu0 %3672  ;;  %v3720_v39 = vsel %vm359_vm8, %v3710_v5, %v3719_v28  ;;  %v12273_v28 = vpop.f32.mrf.mxu1 }
0x13c5   :  { %v3714_v46 = vrot.slane %v3673_v11, %v11553_v8 }
0x13c7   :  { %v3721_v26 = vsel %vm361_vm9, %v3714_v46, %v3720_v39 }
0x13c8   :  { %v3723_v53 = vsel %vm3674_vm12, %v3721_v26, -1e+30  ;;  %v2406_v1 = vpop.permute.xlu0 %2405 }
0x13c9   :  { %v3724_v45 = vsel %vm365_vm0, %v3723_v53, -inf  ;;  %v2408_v14 = vadd.f32 %v12206_v12, %v2406_v1  ;;  %v10023_v12 = vpop.f32.mrf.mxu1 }
0x13ca   :  { %v3725_v15 = vrot.slane %v3724_v45, 4 }
0x13cc   :  { %v3726_v55 = vmax.f32 %v3724_v45, %v3725_v15  ;;  %v10743_v45 = vld [vmem:[#allocation3 + $0x8] sm:$0xff] }
0x13ce   :  { %v3727_v22 = vrot.slane %v3726_v55, 2 }
0x13d0   :  { %v3728_v18 = vmax.f32 %v3726_v55, %v3727_v22 }
0x13d2   :  { %v3729_v41 = vrot.slane %v3728_v18, 1 }
0x13d4   :  { %v3730_v19 = vmax.f32 %v3728_v18, %v3729_v41 }
0x13d6   :  { %v3731_v2 = vsub.f32 %v3723_v53, %v3730_v19 }
0x13d8   :  { %v3732_v52 = vmul.f32 1.442695, %v3731_v2 }
0x13da   :  { %10597 = vpow2.f32 %v3732_v52  ;;  %v10744_v52 = vld [vmem:[#allocation3 + $0x20] sm:$0xff] }
0x13e7   :  { %v10598_v34 = vpop.eup %10597 }
0x13e8   :  { %v3734_v9 = vsel %vm365_vm0, %v10598_v34, 0.0 }
0x13e9   :  { %v3735_v13 = vrot.slane %v3734_v9, 4 }
0x13eb   :  { %v3736_v29 = vadd.f32 %v3735_v13, %v3734_v9  ;;  %v10745_v9 = vld [vmem:[#allocation3 + $0x18] sm:$0xff] }
0x13ed   :  { %v3737_v37 = vrot.slane %v3736_v29, 2 }
0x13ef   :  { %v3738_v38 = vadd.f32 %v3737_v37, %v3736_v29 }
0x13f1   :  { %v3739_v6 = vrot.slane %v3738_v38, 1 }
0x13f3   :  { %v3740_v16 = vadd.f32 %v3739_v6, %v3738_v38 }
0x13f5   :  { %10599 = vrcp.f32 %v3740_v16 }
0x1402   :  { %v10600_v33 = vpop.eup %10599 }
0x1403   :  { %v3742_v20 = vmul.f32 %v10600_v33, %v10598_v34 }
0x1405   :  { %v3760_v21 = vrot.slane %v3742_v20, %v11144_v30  ;;  %v3746_v54 = vrot.slane %v3742_v20, %v11147_v31  ;;  %v3774_v0 = vrot.slane %v3742_v20, %v11185_v44  ;;  %v3753_v42 = vrot.slane %v3742_v20, %v11160_v36 }
0x1406   :  { %v3788_v63 = vrot.slane %v3742_v20, %v11208_v50  ;;  %v3767_v61 = vrot.slane %v3742_v20, %v11157_v35  ;;  %v3781_v24 = vrot.slane %v3742_v20, %v11182_v43  ;;  %v3795_v32 = vrot.slane %v3742_v20, %v11205_v49  ;;  %v10746_v20 = vld [vmem:[#allocation3 + $0x30] sm:$0xff] }
0x1407   :  { %3762 = vbcast.lane.b32.xlu0 %v3760_v21, 256  ;;  %3748 = vbcast.lane.b32.xlu1 %v3746_v54, 256  ;;  %v10747_v54 = vld [vmem:[#allocation3 + $0x28] sm:$0xff] }
0x140b   :  { %3776 = vbcast.lane.b32.xlu0 %v3774_v0, 256  ;;  %3755 = vbcast.lane.b32.xlu1 %v3753_v42, 256 }
0x140f   :  { %3790 = vbcast.lane.b32.xlu0 %v3788_v63, 256  ;;  %3769 = vbcast.lane.b32.xlu1 %v3767_v61, 256 }
0x1413   :  { %3783 = vbcast.lane.b32.xlu1 %v3781_v24, 256  ;;  %2410 = vrot.lane.b32.xlu0 %v2408_v14, %s10943_s6  ;;  %v10748_v24 = vld [vmem:[#allocation3 + $0x38] sm:$0xff] }
0x1417   :  { %3797 = vbcast.lane.b32.xlu1 %v3795_v32, 256  ;;  %3552 = vperm.xlu0 %10510, %v9212_v7  }
0x141b   :  { %3546 = vperm.xlu1 %10509, %v9212_v7   ;;  %10511 = vset.pattern.permute.xlu0 %v13951_v48 }
0x141f   :  { %10512 = vset.pattern.permute.xlu1 %v13952_v56 }
0x1479   :  { %v3749_v5 = vpop.permute.xlu1 %3748  ;;  %v3763_v11 = vpop.permute.xlu0 %3762 }
0x147a   :  { %v3799_v46 = vmul.f32 %v3749_v5, %v12222_v57  ;;  %v3801_v53 = vmul.f32 %v3763_v11, %v12228_v60 }
0x147c   :  { %v3807_v55 = vsel %vm155_vm1, %v3799_v46, 0.0  ;;  %v3810_v2 = vsel %vm155_vm1, %v3801_v53, 0.0  ;;  %v12295_v46 = vld [vmem:[#allocation2] sm:$0xff]  ;;  %v13979_v53 = vld [vmem:[#allocation25_spill] sm:$0xff] }
0x147d   :  { %v3756_v39 = vpop.permute.xlu1 %3755  ;;  %v3777_v26 = vpop.permute.xlu0 %3776 }
0x147e   :  { %v3800_v15 = vmul.f32 %v10743_v45, %v3756_v39  ;;  %v3803_v34 = vmul.f32 %v10744_v52, %v3777_v26  ;;  %v13977_v39 = vld [vmem:[#allocation24_spill] sm:$0xff]  ;;  %v13978_v26 = vld [vmem:[#allocation27_spill] sm:$0xff] }
0x147f   :  { %v13984_v52 = vld [vmem:[#allocation31_spill] sm:$0xff] }
0x1480   :  { %v3808_v22 = vsel %vm155_vm1, %v3800_v15, 0.0  ;;  %v3814_v33 = vsel %vm155_vm1, %v3803_v34, 0.0  ;;  %v12313_v15 = vld [vmem:[#allocation2 + $0x8] sm:$0xff] }
0x1481   :  { %v3809_v18 = vadd.f32 %v3808_v22, %v3807_v55  ;;  %v3770_v41 = vpop.permute.xlu1 %3769  ;;  %v3791_v19 = vpop.permute.xlu0 %3790  ;;  %v13982_v22 = vld [vmem:[#allocation29_spill] sm:$0xff]  ;;  %v13985_v34 = vld [vmem:[#allocation32_spill] sm:$0xff] }
0x1482   :  { %v3802_v13 = vmul.f32 %v10745_v9, %v3770_v41  ;;  %v3805_v21 = vmul.f32 %v10746_v20, %v3791_v19  ;;  %v13986_v9 = vld [vmem:[#allocation33_spill] sm:$0xff] }
0x1483   :  { %v3811_v29 = vadd.f32 %v3810_v2, %v3809_v18  ;;  %v13983_v2 = vld [vmem:[#allocation30_spill] sm:$0xff] }
0x1484   :  { %v3812_v37 = vsel %vm155_vm1, %v3802_v13, 0.0  ;;  %v3818_v14 = vsel %vm155_vm1, %v3805_v21, 0.0  ;;  %v12341_v13 = vld [vmem:[#allocation4] sm:$0xff] }
0x1485   :  { %v3813_v38 = vadd.f32 %v3812_v37, %v3811_v29  ;;  %v3784_v6 = vpop.permute.xlu1 %3783  ;;  %v2411_v16 = vpop.permute.xlu0 %2410  ;;  %v13987_v29 = vld [vmem:[#allocation34_spill] sm:$0xff]  ;;  %v13988_v37 = vld [vmem:[#allocation35_spill] sm:$0xff] }
0x1486   :  { %v3804_v0 = vmul.f32 %v10747_v54, %v3784_v6  ;;  %2413 = vst.msk [vmem:[#allocation5] sm:$0xff] %vm155_vm1, %v2411_v16  ;;  %9187 = vst.msk [vmem:[%s13866_s17 + $0x8] sm:$0xff] %vm155_vm1, %v2411_v16  ;;  %v13990_v6 = vld [vmem:[#allocation37_spill] sm:$0xff]  ;;  %v13991_v54 = vld [vmem:[#allocation38_spill] sm:$0xff] }
0x1487   :  { %v3815_v42 = vadd.f32 %v3814_v33, %v3813_v38  ;;  %v13989_v38 = vld [vmem:[#allocation36_spill] sm:$0xff] }
0x1488   :  { %v3816_v63 = vsel %vm155_vm1, %v3804_v0, 0.0 }
0x1489   :  { %v3817_v61 = vadd.f32 %v3816_v63, %v3815_v42  ;;  %v3798_v1 = vpop.permute.xlu1 %3797 }
0x148a   :  { %v3806_v7 = vmul.f32 %v10748_v24, %v3798_v1 }
0x148b   :  { %v3819_v32 = vadd.f32 %v3818_v14, %v3817_v61 }
0x148c   :  { %v3820_v12 = vsel %vm155_vm1, %v3806_v7, 0.0 }
0x148d   :  { %v3821_v5 = vadd.f32 %v3820_v12, %v3819_v32  ;;  %v12290_v11 = vld [vmem:[#allocation5] sm:$0xff] }
0x148e   :  { %9989 = vmatmul.mubr.msk.f32.vlgmr.msra.gmra.mxu0 %vm155_vm1, %v12290_v11 }
0x148f   :  { %10044 = vmatmul.mubr.msk.f32.vlgmr.msra.gmra.mxu1 %vm155_vm1, %v3821_v5  ;;  %10003 = vmatpush3.msra.mxu0 %v11971_v10  ;;  %v13981_v10 = vld [vmem:[#allocation26_spill] sm:$0xff] }
0x1490   :  { %10058 = vmatpush3.msra.mxu1 %v11876_v3  ;;  %10065 = vmatprep.mubr.msk.f32.mxu1 %vm155_vm1, %v12295_v46  ;;  %v13980_v3 = vld [vmem:[#allocation28_spill] sm:$0xff] }
0x1491   :  { %10059 = vmatprep.subr.mxu1 %v13977_v39  ;;  %10004 = vmatprep.subr.mxu0 %v13949_v4 }
0x1492   :  { %10060 = vmatpush3.msra.mxu1 %v13977_v39  ;;  %10005 = vmatpush3.msra.mxu0 %v13978_v26  ;;  %v12307_v45 = vpop.permute.xlu0 %3552 }
0x1493   :  { %10061 = vmatprep.subr.mxu1 %v13979_v53  ;;  %10006 = vmatprep.subr.mxu0 %v13949_v4  ;;  %v3555_v18 = vmul.f32 %v12307_v45, %v12313_v15 }
0x1494   :  { %10062 = vmatpush3.msra.mxu1 %v13979_v53  ;;  %10007 = vmatpush3.msra.mxu0 %v13980_v3 }
0x1495   :  { %10063 = vmatprep.subr.mxu1 %v13981_v10  ;;  %10008 = vmatprep.subr.mxu0 %v13949_v4 }
0x1496   :  { %10064 = vmatpush3.msra.mxu1 %v13981_v10  ;;  %v12316_v55 = vpop.permute.xlu1 %3546  ;;  %10009 = vmatpush3.msra.mxu0 %v13982_v22 }
0x1497   :  { %v3549_v41 = vmul.f32 %v12316_v55, %v12295_v46  ;;  %10066 = vmatmul.mubr.msk.f32.vlgmr.msra.gmra.mxu1 %vm155_vm1, %v12313_v15  ;;  %10010 = vmatprep.mubr.msk.f32.mxu0 %vm10942_vm2, %v13949_v4 }
0x1498   :  { %10024 = vmatprep.subr.mxu0 %v13949_v4  ;;  %10079 = vmatprep.subr.mxu1 %v13949_v4 }
0x1499   :  { %v3556_v19 = vadd.f32 %v3555_v18, %v3549_v41  ;;  %10087 = vmatprep.mubr.msk.f32.mxu1 %vm10942_vm2, %v13949_v4 }
0x149b   :  { %10011 = vmatmul.mubr.msk.f32.vlgmr.msra.gmra.mxu0 %vm155_vm1, %v3556_v19 }
0x149c   :  { %10025 = vmatpush3.msra.mxu0 %v13983_v2  ;;  %10032 = vmatprep.mubr.msk.f32.mxu0 %vm10942_vm2, %v13949_v4 }
0x149d   :  { %10026 = vmatprep.subr.mxu0 %v13949_v4 }
0x149e   :  { %10027 = vmatpush3.msra.mxu0 %v13984_v52 }
0x149f   :  { %10028 = vmatprep.subr.mxu0 %v13949_v4 }
0x14a0   :  { %10029 = vmatpush3.msra.mxu0 %v13985_v34 }
0x14a1   :  { %10030 = vmatprep.subr.mxu0 %v13949_v4 }
0x14a2   :  { %10031 = vmatpush3.msra.mxu0 %v13986_v9 }
0x14a3   :  { %10033 = vmatmul.mubr.msk.f32.vlgmr.msra.gmra.mxu0 %vm155_vm1, %v12341_v13  ;;  %10046 = vmatprep.subr.mxu0 %v13949_v4 }
0x14a4   :  { %10047 = vmatpush3.msra.mxu0 %v13987_v29  ;;  %10054 = vmatprep.mubr.msk.f32.mxu0 %vm10942_vm2, %v13949_v4 }
0x14a5   :  { %10048 = vmatprep.subr.mxu0 %v13949_v4 }
0x14a6   :  { %10049 = vmatpush3.msra.mxu0 %v13988_v37 }
0x14a7   :  { %10050 = vmatprep.subr.mxu0 %v13949_v4 }
0x14a8   :  { %10051 = vmatpush3.msra.mxu0 %v13989_v38 }
0x14a9   :  { %10052 = vmatprep.subr.mxu0 %v13949_v4 }
0x14aa   :  { %10053 = vmatpush3.msra.mxu0 %v13990_v6 }
0x14ab   :  { %10055 = vmatmul.mubr.msk.f32.vlgmr.msra.gmra.mxu0 %vm155_vm1, %v12169_v17  ;;  %10068 = vmatprep.subr.mxu0 %v13949_v4 }
0x14ac   :  { %10069 = vmatpush3.msra.mxu0 %v12121_v59  ;;  %10076 = vmatprep.mubr.msk.f32.mxu0 %vm10942_vm2, %v13949_v4 }
0x14ad   :  { %10070 = vmatprep.subr.mxu0 %v13949_v4 }
0x14ae   :  { %10071 = vmatpush3.msra.mxu0 %v12125_v51 }
0x14af   :  { %10072 = vmatprep.subr.mxu0 %v13949_v4 }
0x14b0   :  { %10073 = vmatpush3.msra.mxu0 %v12129_v47 }
0x14b1   :  { %10074 = vmatprep.subr.mxu0 %v13949_v4 }
0x14b2   :  { %10075 = vmatpush3.msra.mxu0 %v12133_v25 }
0x14b3   :  { %10090 = vmatprep.subr.mxu0 %v13949_v4 }
0x154e   :  { %v12368_v17 = vpop.f32.mrf.mxu0 }
0x154f   :  { %v4182_v59 = vpop.f32.mrf.mxu1 }
0x1550   :  { %v9990_v16 = vpop.f32.mrf.mxu0 }
0x1551   :  { %v10045_v33 = vpop.f32.mrf.mxu1 }
0x1557   :  { %v10067_v20 = vpop.f32.mrf.mxu1 }
0x1558   :  { %v4353_v47 = vadd.f32 %v10067_v20, %v13991_v54 }
0x1559   :  { %v4347_v21 = vpop.f32.mrf.mxu1 }
0x155a   :  { %v4348_v0 = vadd.f32 %v13991_v54, %v4347_v21  ;;  %v13992_v21 = vld [vmem:[#allocation39_spill] sm:$0xff] }
0x155b   :  { %v3899_v51 = vpop.f32.mrf.mxu0 }
0x155c   :  { %4372 = vrot.lane.b32.xlu1 %v4348_v0, %s10943_s6  ;;  %v3970_v20 = vadd.f32 %v12273_v28, %v3899_v51 }
0x155d   :  { %v10012_v42 = vpop.f32.mrf.mxu0 }
0x155e   :  { %v3980_v54 = vadd.f32 %v13992_v21, %v3970_v20 }
0x1560   :  { %4374 = vrot.lane.b32.xlu1 %v4353_v47, %s10943_s6 }
0x1563   :  { %v4061_v25 = vpop.f32.mrf.mxu0 }
0x1564   :  { %v4062_v16 = vadd.f32 %v12102_v40, %v4061_v25 }
0x1565   :  { %v10034_v63 = vpop.f32.mrf.mxu0 }
0x156b   :  { %v4252_v61 = vpop.f32.mrf.mxu0 }
0x156c   :  { %v4253_v14 = vadd.f32 %v4252_v61, %v4182_v59 }
0x156d   :  { %v10056_v1 = vpop.f32.mrf.mxu0 }
0x156e   :  { %v4263_v24 = vadd.f32 %v12092_v62, %v4253_v14 }
0x1570   :  { %v4356_v7 = vadd.f32 %v4348_v0, %v4263_v24  ;;  %v4357_v32 = vadd.f32 %v4353_v47, %v4263_v24  ;;  %v4065_v0 = vadd.f32 %v4062_v16, %v3980_v54 }
0x1572   :  { %v9226_v12 = vmul.f32 -1.442695, %v4356_v7  ;;  %v9227_v5 = vmul.f32 -1.442695, %v4357_v32  ;;  %v9219_v42 = vmul.f32 -1.442695, %v4065_v0 }
0x1574   :  { %10601 = vpow2.f32 %v9226_v12 }
0x1575   :  { %10603 = vpow2.f32 %v9227_v5 }
0x1581   :  { %v10602_v39 = vpop.eup %10601 }
0x1582   :  { %v4364_v26 = vadd.f32 1.0, %v10602_v39  ;;  %v10604_v53 = vpop.eup %10603 }
0x1583   :  { %v4365_v3 = vadd.f32 1.0, %v10604_v53 }
0x1584   :  { %10605 = vrcp.f32 %v4364_v26 }
0x1585   :  { %10607 = vrcp.f32 %v4365_v3 }
0x1591   :  { %v10606_v10 = vpop.eup %10605 }
0x1592   :  { %v10608_v41 = vpop.eup %10607 }
0x15ce   :  { %v4373_v22 = vpop.permute.xlu1 %4372 }
0x15cf   :  { %v4378_v18 = vmul.f32 %v10606_v10, %v4373_v22 }
0x15d1   :  { %4382 = vrot.lane.b32.xlu0 %v4378_v18, %s10943_s6 }
0x15d2   :  { %v4375_v19 = vpop.permute.xlu1 %4374 }
0x15d3   :  { %v4379_v62 = vmul.f32 %v10608_v41, %v4375_v19  ;;  %v3493_v19 = vadd.f32 %v12143_v23, %v12368_v17 }
0x15d5   :  { %4384 = vrot.lane.b32.xlu1 %v4379_v62, %s10943_s6  ;;  %v12408_v62 = vld [vmem:[#allocation14] ss:$0 sm:$0xff] }
0x1643   :  { %v4383_v2 = vpop.permute.xlu0 %4382 }
0x1644   :  { %v4388_v52 = vadd.f32 %v4383_v2, %v4263_v24  ;;  %v3409_v2 = vadd.f32 %v12408_v62, %v12210_v58 }
0x1646   :  { %10609 = vtanh.f32 %v4388_v52  ;;  %v3496_v52 = vadd.f32 %v3493_v19, %v3409_v2 }
0x1647   :  { %v4385_v34 = vpop.permute.xlu1 %4384 }
0x1648   :  { %v4389_v9 = vadd.f32 %v4385_v34, %v4263_v24  ;;  %v9209_v34 = vmul.f32 -1.442695, %v3496_v52 }
0x164a   :  { %10611 = vtanh.f32 %v4389_v9 }
0x164b   :  { %10613 = vpow2.f32 %v9219_v42 }
0x1653   :  { %v10610_v29 = vpop.eup %10609 }
0x1654   :  { %4394 = vrot.lane.b32.xlu0 %v10610_v29, %s10943_s6 }
0x1657   :  { %v10612_v37 = vpop.eup %10611 }
0x1658   :  { %4396 = vrot.lane.b32.xlu1 %v10612_v37, %s10943_s6  ;;  %v10614_v47 = vpop.eup %10613 }
0x1659   :  { %v4069_v63 = vadd.f32 1.0, %v10614_v47 }
0x165b   :  { %10615 = vrcp.f32 %v4069_v63 }
0x1668   :  { %v12391_v28 = vpop.eup %10615 }
0x16c6   :  { %v4395_v38 = vpop.permute.xlu0 %4394 }
0x16c7   :  { %v4400_v6 = vsub.f32 %v12295_v46, %v4395_v38 }
0x16c9   :  { %4404 = vrot.lane.b32.xlu0 %v4400_v6, %s10944_s0 }
0x16ca   :  { %v4397_v59 = vpop.permute.xlu1 %4396 }
0x16cb   :  { %v4401_v33 = vsub.f32 %v12313_v15, %v4397_v59 }
0x16cd   :  { %4406 = vrot.lane.b32.xlu1 %v4401_v33, %s10944_s0  ;;  %4073 = vrot.lane.b32.xlu0 %v4062_v16, %s10943_s6  ;;  %v12418_v16 = vld [vmem:[#allocation17 + $0x18] sm:$0xff]  ;;  %v12421_v33 = vld [vmem:[#allocation17 + $0x10] sm:$0xff] }
0x173b   :  { %v4405_v61 = vpop.permute.xlu0 %4404 }
0x173c   :  { %v4410_v1 = vmul.f32 %v10606_v10, %v4405_v61 }
0x173e   :  { %4414 = vrot.lane.b32.xlu1 %v4410_v1, %s10944_s0 }
0x173f   :  { %v4407_v40 = vpop.permute.xlu1 %4406  ;;  %v4074_v14 = vpop.permute.xlu0 %4073 }
0x1740   :  { %v4411_v25 = vmul.f32 %v10608_v41, %v4407_v40  ;;  %v4076_v51 = vmul.f32 %v12391_v28, %v4074_v14  ;;  %v12457_v14 = vld [vmem:[#allocation3 + $0x8] sm:$0xff] }
0x1742   :  { %4416 = vrot.lane.b32.xlu0 %v4411_v25, %s10944_s0  ;;  %4422 = vrot.lane.b32.xlu1 %v12295_v46, %s10943_s6 }
0x1746   :  { %4434 = vrot.lane.b32.xlu0 %v12313_v15, %s10943_s6  ;;  %4078 = vrot.lane.b32.xlu1 %v4076_v51, %s10943_s6 }
0x17b0   :  { %v4415_v24 = vpop.permute.xlu1 %4414 }
0x17b1   :  { %v4420_v7 = vadd.f32 %v10610_v29, %v4415_v24  ;;  %v12460_v24 = vld [vmem:[#allocation3 + $0x20] sm:$0xff] }
0x17b4   :  { %v4423_v32 = vpop.permute.xlu1 %4422  ;;  %v4417_v12 = vpop.permute.xlu0 %4416 }
0x17b5   :  { %v4425_v5 = vsub.f32 %v4420_v7, %v4423_v32  ;;  %v4421_v26 = vadd.f32 %v10612_v37, %v4417_v12 }
0x17b7   :  { %v4426_v39 = vmul.f32 %v4425_v5, %v12316_v55  ;;  %v12465_v5 = vld [vmem:[#allocation3 + $0x30] sm:$0xff] }
0x17b8   :  { %v4079_v53 = vpop.permute.xlu1 %4078  ;;  %v4435_v3 = vpop.permute.xlu0 %4434 }
0x17b9   :  { %v4081_v10 = vadd.f32 %v4079_v53, %v3980_v54  ;;  %v4437_v22 = vsub.f32 %v4421_v26, %v4435_v3  ;;  %4428 = vrot.lane.b32.xlu0 %v4426_v39, %s10943_s6 }
0x17bb   :  { %10617 = vtanh.f32 %v4081_v10  ;;  %v4438_v18 = vmul.f32 %v4437_v22, %v12307_v45 }
0x17bc   :  { %10619 = vpow2.f32 %v9209_v34 }
0x17bd   :  { %4440 = vrot.lane.b32.xlu1 %v4438_v18, %s10943_s6 }
0x17c8   :  { %v12401_v41 = vpop.eup %10617 }
0x17c9   :  { %4084 = vrot.lane.b32.xlu0 %v12401_v41, %s10943_s6  ;;  %v10620_v9 = vpop.eup %10619 }
0x17ca   :  { %v3500_v38 = vadd.f32 1.0, %v10620_v9 }
0x17cc   :  { %10621 = vrcp.f32 %v3500_v38 }
0x17cd   :  { %3504 = vrot.lane.b32.xlu0 %v3493_v19, %s10943_s6 }
0x17d9   :  { %v10622_v21 = vpop.eup %10621 }
0x182b   :  { %v4429_v29 = vpop.permute.xlu0 %4428 }
0x182c   :  { %v4431_v37 = vadd.f32 %v4429_v29, %v12295_v46  ;;  %v12427_v46 = vld [vmem:[#allocation17 + $0x8] sm:$0xff] }
0x182e   :  { %4446 = vst.msk [vmem:[#allocation2] sm:$0xff] %vm155_vm1, %v4431_v37  ;;  %v4432_v17 = vmul.f32 %v4431_v37, %v12316_v55  ;;  %v12437_v55 = vld [vmem:[%s13939_s19 + $0x20] sm:$0xff] }
0x182f   :  { %v4441_v6 = vpop.permute.xlu1 %4440 }
0x1830   :  { %v4443_v23 = vadd.f32 %v4441_v6, %v12313_v15  ;;  %v12486_v6 = vld [vmem:[#allocation3 + $0x38] sm:$0xff] }
0x1832   :  { %v4444_v59 = vmul.f32 %v4443_v23, %v12307_v45  ;;  %4447 = vst.msk [vmem:[#allocation2 + $0x8] sm:$0xff] %vm155_vm1, %v4443_v23  ;;  %v12431_v45 = vld [vmem:[#allocation17] sm:$0xff] }
0x1834   :  { %v4445_v58 = vadd.f32 %v4444_v59, %v4432_v17 }
0x1836   :  { %10077 = vmatmul.mubr.msk.f32.vlgmr.msra.gmra.mxu0 %vm155_vm1, %v4445_v58 }
0x1837   :  { %10091 = vmatpush3.msra.mxu0 %v12418_v16  ;;  %10098 = vmatprep.mubr.msk.f32.mxu0 %vm10942_vm2, %v13949_v4 }
0x1838   :  { %10092 = vmatprep.subr.mxu0 %v13949_v4 }
0x1839   :  { %10093 = vmatpush3.msra.mxu0 %v12421_v33 }
0x183a   :  { %10094 = vmatprep.subr.mxu0 %v13949_v4 }
0x183b   :  { %10095 = vmatpush3.msra.mxu0 %v12427_v46  ;;  %v4085_v15 = vpop.permute.xlu0 %4084 }
0x183c   :  { %10096 = vmatprep.subr.mxu0 %v13949_v4  ;;  %v4087_v20 = vsub.f32 %v12341_v13, %v4085_v15 }
0x183d   :  { %10097 = vmatpush3.msra.mxu0 %v12431_v45 }
0x183e   :  { %10099 = vmatmul.mubr.msk.f32.vlgmr.msra.gmra.mxu0 %vm155_vm1, %v12437_v55  ;;  %4089 = vrot.lane.b32.xlu1 %v4087_v20, %s10944_s0 }
0x183f   :  { %v3505_v54 = vpop.permute.xlu0 %3504  ;;  %10112 = vmatprep.subr.mxu0 %v13949_v4  ;;  %10120 = vmatprep.mubr.msk.f32.mxu0 %vm10942_vm2, %v13949_v4 }
0x1840   :  { %v3507_v0 = vmul.f32 %v10622_v21, %v3505_v54 }
0x1842   :  { %3509 = vrot.lane.b32.xlu0 %v3507_v0, %s10943_s6 }
0x18b0   :  { %v4090_v42 = vpop.permute.xlu1 %4089 }
0x18b1   :  { %v4092_v13 = vmul.f32 %v12391_v28, %v4090_v42 }
0x18b3   :  { %4094 = vrot.lane.b32.xlu1 %v4092_v13, %s10944_s0 }
0x18b4   :  { %v3510_v47 = vpop.permute.xlu0 %3509 }
0x18b5   :  { %v3512_v63 = vadd.f32 %v3510_v47, %v3409_v2 }
0x18b7   :  { %10623 = vtanh.f32 %v3512_v63 }
0x18c4   :  { %v12451_v61 = vpop.eup %10623 }
0x18c5   :  { %3515 = vrot.lane.b32.xlu0 %v12451_v61, %s10943_s6 }
0x18f6   :  { %v12455_v1 = vpop.f32.mrf.mxu0 }
0x18f8   :  { %v10078_v40 = vpop.f32.mrf.mxu0 }
0x18fe   :  { %v4758_v25 = vpop.f32.mrf.mxu0 }
0x18ff   :  { %v4763_v51 = vmul.f32 %v4758_v25, %v12457_v14  ;;  %v4764_v32 = vmul.f32 %v4758_v25, %v12228_v60  ;;  %v4766_v12 = vmul.f32 %v4758_v25, %v12460_v24  ;;  %v4768_v53 = vmul.f32 %v4758_v25, %v12465_v5 }
0x1900   :  { %v10100_v28 = vpop.f32.mrf.mxu0  ;;  %v4762_v2 = vmul.f32 %v4758_v25, %v12222_v57  ;;  %v4769_v17 = vmul.f32 %v4758_v25, %v12486_v6 }
0x1901   :  { %v4773_v7 = vsel %vm155_vm1, %v4763_v51, 0.0  ;;  %v4776_v39 = vsel %vm155_vm1, %v4764_v32, 0.0  ;;  %v4782_v26 = vsel %vm155_vm1, %v4766_v12, 0.0  ;;  %v4788_v3 = vsel %vm155_vm1, %v4768_v53, 0.0 }
0x1902   :  { %4774 = vadd.xlane.f32.xlu0 %v4773_v7  ;;  %v4770_v52 = vsel %vm155_vm1, %v4762_v2, 0.0  ;;  %v4791_v58 = vsel %vm155_vm1, %v4769_v17, 0.0 }
0x1906   :  { %4777 = vadd.xlane.f32.xlu0 %v4776_v39 }
0x190a   :  { %4783 = vadd.xlane.f32.xlu0 %v4782_v26 }
0x190e   :  { %4789 = vadd.xlane.f32.xlu0 %v4788_v3 }
0x1925   :  { %v4095_v10 = vpop.permute.xlu1 %4094 }
0x1926   :  { %v4097_v22 = vadd.f32 %v12401_v41, %v4095_v10  ;;  %v12481_v41 = vld [vmem:[#allocation3 + $0x28] sm:$0xff] }
0x1927   :  { %v4767_v38 = vmul.f32 %v4758_v25, %v12481_v41 }
0x1928   :  { %4099 = vrot.lane.b32.xlu1 %v4097_v22, %s10943_s6 }
0x1929   :  { %v4785_v23 = vsel %vm155_vm1, %v4767_v38, 0.0 }
0x1937   :  { %v3516_v18 = vpop.permute.xlu0 %3515 }
0x1938   :  { %v3518_v19 = vsub.f32 %v12290_v11, %v3516_v18 }
0x193a   :  { %3520 = vrot.lane.b32.xlu0 %v3518_v19, %s10944_s0 }
0x194c   :  { %4771 = vadd.xlane.f32.xlu1 %v4770_v52 }
0x198b   :  { %v4775_v37 = vpop.xlane.xlu0 %4774 }
0x198c   :  { %v4810_v47 = vrot.slane %v4775_v37, %v11553_v8 }
0x198f   :  { %v4778_v59 = vpop.xlane.xlu0 %4777 }
0x1990   :  { %v4814_v40 = vrot.slane %v4778_v59, %v11553_v8 }
0x1993   :  { %v4784_v15 = vpop.xlane.xlu0 %4783 }
0x1997   :  { %v4790_v20 = vpop.xlane.xlu0 %4789 }
0x1998   :  { %v4830_v53 = vrot.slane %v4790_v20, %v11553_v8 }
0x199a   :  { %v4100_v34 = vpop.permute.xlu1 %4099 }
0x199b   :  { %4103 = vst.msk [vmem:[#allocation3 + $0x18] sm:$0xff] %vm155_vm1, %v4100_v34  ;;  %4104 = vst.msk [vmem:[#allocation4] sm:$0xff] %vm155_vm1, %v4100_v34 }
0x19a2   :  { %v12479_v9 = vld [vmem:[#allocation3 + $0x18] sm:$0xff] }
0x19a3   :  { %v4765_v29 = vmul.f32 %v4758_v25, %v12479_v9 }
0x19a5   :  { %v4779_v11 = vsel %vm155_vm1, %v4765_v29, 0.0 }
0x19a6   :  { %4780 = vadd.xlane.f32.xlu1 %v4779_v11 }
0x19aa   :  { %4786 = vadd.xlane.f32.xlu1 %v4785_v23 }
0x19ac   :  { %v3521_v54 = vpop.permute.xlu0 %3520 }
0x19ad   :  { %v3523_v0 = vmul.f32 %v10622_v21, %v3521_v54  ;;  %v4822_v21 = vrot.slane %v4784_v15, %v11553_v8 }
0x19ae   :  { %4792 = vadd.xlane.f32.xlu1 %v4791_v58 }
0x19bf   :  { %3525 = vrot.lane.b32.xlu1 %v3523_v0, %s10944_s0 }
0x19d5   :  { %v4772_v42 = vpop.xlane.xlu1 %4771 }
0x19d6   :  { %v4806_v13 = vrot.slane %v4772_v42, %v11553_v8 }
0x19d8   :  { %v4835_v63 = vsel %vm349_vm3, %v4810_v47, %v4806_v13  ;;  %v12513_v47 = vld [vmem:[%s13851_s2 + $0x18] sm:$0xff] }
0x19d9   :  { %v4836_v28 = vsel %vm351_vm4, %v4814_v40, %v4835_v63  ;;  %10113 = vmatpush3.msra.mxu0 %v12513_v47  ;;  %v12520_v63 = vld [vmem:[%s13851_s2 + $0x10] sm:$0xff]  ;;  %v12527_v40 = vld [vmem:[%s13851_s2 + $0x8] sm:$0xff] }
0x19da   :  { %10114 = vmatprep.subr.mxu0 %v13949_v4 }
0x19db   :  { %10115 = vmatpush3.msra.mxu0 %v12520_v63 }
0x19dc   :  { %10116 = vmatprep.subr.mxu0 %v13949_v4 }
0x19dd   :  { %10117 = vmatpush3.msra.mxu0 %v12527_v40 }
0x19de   :  { %10118 = vmatprep.subr.mxu0 %v13949_v4 }
0x1a2f   :  { %v4781_v25 = vpop.xlane.xlu1 %4780 }
0x1a30   :  { %v4818_v51 = vrot.slane %v4781_v25, %v11553_v8 }
0x1a32   :  { %v4837_v7 = vsel %vm353_vm5, %v4818_v51, %v4836_v28  ;;  %v12534_v28 = vld [vmem:[%s13851_s2] sm:$0xff] }
0x1a33   :  { %v4787_v32 = vpop.xlane.xlu1 %4786  ;;  %v4838_v39 = vsel %vm355_vm6, %v4822_v21, %v4837_v7  ;;  %10119 = vmatpush3.msra.mxu0 %v12534_v28 }
0x1a34   :  { %v4826_v12 = vrot.slane %v4787_v32, %v11553_v8  ;;  %10121 = vmatmul.mubr.msk.f32.vlgmr.msra.gmra.mxu0 %vm155_vm1, %v12437_v55  ;;  %v12544_v32 = vld [vmem:[%s13857_s8 + $0x18] sm:$0xff]  ;;  %10134 = vmatprep.subr.mxu0 %v13949_v4 }
0x1a35   :  { %10135 = vmatpush3.msra.mxu0 %v12544_v32  ;;  %10142 = vmatprep.mubr.msk.f32.mxu0 %vm10942_vm2, %v13949_v4 }
0x1a36   :  { %v4839_v26 = vsel %vm357_vm7, %v4826_v12, %v4838_v39  ;;  %v12551_v12 = vld [vmem:[%s13857_s8 + $0x10] sm:$0xff]  ;;  %10136 = vmatprep.subr.mxu0 %v13949_v4 }
0x1a37   :  { %v4793_v3 = vpop.xlane.xlu1 %4792  ;;  %v4840_v22 = vsel %vm359_vm8, %v4830_v53, %v4839_v26  ;;  %10137 = vmatpush3.msra.mxu0 %v12551_v12  ;;  %v12562_v53 = vld [vmem:[%s13857_s8 + $0x8] sm:$0xff] }
0x1a38   :  { %v4834_v10 = vrot.slane %v4793_v3, %v11553_v8  ;;  %v12564_v3 = vld [vmem:[#allocation13 + $0x18] sm:$0xff]  ;;  %10138 = vmatprep.subr.mxu0 %v13949_v4 }
0x1a39   :  { %10080 = vmatpush3.msra.mxu1 %v12564_v3  ;;  %10139 = vmatpush3.msra.mxu0 %v12562_v53 }
0x1a3a   :  { %v4841_v18 = vsel %vm361_vm9, %v4834_v10, %v4840_v22  ;;  %v12568_v10 = vld [vmem:[#allocation13 + $0x10] sm:$0xff]  ;;  %10081 = vmatprep.subr.mxu1 %v13949_v4  ;;  %10140 = vmatprep.subr.mxu0 %v13949_v4 }
0x1a3b   :  { %v4843_v19 = vsel %vm4794_vm13, %v4841_v18, -1e+30  ;;  %10082 = vmatpush3.msra.mxu1 %v12568_v10 }
0x1a3c   :  { %v4844_v2 = vsel %vm365_vm0, %v4843_v19, -inf  ;;  %10083 = vmatprep.subr.mxu1 %v13949_v4 }
0x1a3d   :  { %v4845_v52 = vrot.slane %v4844_v2, 4 }
0x1a3f   :  { %v4846_v34 = vmax.f32 %v4844_v2, %v4845_v52  ;;  %v12583_v2 = vld [vmem:[%s13858_s9 + $0x18] sm:$0xff]  ;;  %v12586_v52 = vld [vmem:[#allocation13 + $0x8] sm:$0xff] }
0x1a40   :  { %10084 = vmatpush3.msra.mxu1 %v12586_v52 }
0x1a41   :  { %v4847_v29 = vrot.slane %v4846_v34, 2  ;;  %10085 = vmatprep.subr.mxu1 %v13949_v4 }
0x1a43   :  { %v4848_v37 = vmax.f32 %v4846_v34, %v4847_v29 }
0x1a45   :  { %v4849_v11 = vrot.slane %v4848_v37, 1 }
0x1a47   :  { %v4850_v38 = vmax.f32 %v4848_v37, %v4849_v11  ;;  %v12594_v37 = vld [vmem:[#allocation13] sm:$0xff]  ;;  %v3526_v11 = vpop.permute.xlu1 %3525 }
0x1a48   :  { %10086 = vmatpush3.msra.mxu1 %v12594_v37 }
0x1a49   :  { %v4851_v23 = vsub.f32 %v4843_v19, %v4850_v38  ;;  %v12576_v19 = vld [vmem:[%s13857_s8] sm:$0xff]  ;;  %10101 = vmatprep.subr.mxu1 %v13949_v4 }
0x1a4a   :  { %10141 = vmatpush3.msra.mxu0 %v12576_v19  ;;  %v9235_v38 = vld [vmem:[%s13940_s23 + $0x20] sm:$0xff] }
0x1a4b   :  { %v4852_v17 = vmul.f32 1.442695, %v4851_v23  ;;  %10156 = vmatprep.subr.mxu0 %v12583_v2  ;;  %v3528_v23 = vadd.f32 %v12451_v61, %v3526_v11 }
0x1a4d   :  { %10625 = vpow2.f32 %v4852_v17 }
0x1a5a   :  { %v10626_v59 = vpop.eup %10625 }
0x1a5b   :  { %v4854_v58 = vsel %vm365_vm0, %v10626_v59, 0.0 }
0x1a5c   :  { %v4855_v15 = vrot.slane %v4854_v58, 4 }
0x1a5e   :  { %v4856_v20 = vadd.f32 %v4855_v15, %v4854_v58 }
0x1a60   :  { %v4857_v54 = vrot.slane %v4856_v20, 2 }
0x1a62   :  { %v4858_v0 = vadd.f32 %v4857_v54, %v4856_v20 }
0x1a64   :  { %v4859_v42 = vrot.slane %v4858_v0, 1 }
0x1a66   :  { %v4860_v13 = vadd.f32 %v4859_v42, %v4858_v0 }
0x1a68   :  { %10627 = vrcp.f32 %v4860_v13 }
0x1a75   :  { %v10628_v25 = vpop.eup %10627 }
0x1a76   :  { %v4862_v51 = vmul.f32 %v10628_v25, %v10626_v59 }
0x1a78   :  { %v4873_v7 = vrot.slane %v4862_v51, %v11160_v36  ;;  %v4866_v21 = vrot.slane %v4862_v51, %v11147_v31  ;;  %v4887_v39 = vrot.slane %v4862_v51, %v11157_v35  ;;  %v4880_v26 = vrot.slane %v4862_v51, %v11144_v30 }
0x1a79   :  { %v4901_v22 = vrot.slane %v4862_v51, %v11182_v43  ;;  %v4894_v18 = vrot.slane %v4862_v51, %v11185_v44  ;;  %v4915_v34 = vrot.slane %v4862_v51, %v11205_v49  ;;  %v4908_v29 = vrot.slane %v4862_v51, %v11208_v50 }
0x1a7a   :  { %4875 = vbcast.lane.b32.xlu0 %v4873_v7, 256  ;;  %4868 = vbcast.lane.b32.xlu1 %v4866_v21, 256 }
0x1a7e   :  { %4889 = vbcast.lane.b32.xlu0 %v4887_v39, 256  ;;  %4882 = vbcast.lane.b32.xlu1 %v4880_v26, 256 }
0x1a82   :  { %4903 = vbcast.lane.b32.xlu0 %v4901_v22, 256  ;;  %4896 = vbcast.lane.b32.xlu1 %v4894_v18, 256 }
0x1a86   :  { %4917 = vbcast.lane.b32.xlu0 %v4915_v34, 256  ;;  %4910 = vbcast.lane.b32.xlu1 %v4908_v29, 256 }
0x1a8a   :  { %4666 = vperm.xlu0 %10511, %v9235_v38   ;;  %3530 = vrot.lane.b32.xlu1 %v3528_v23, %s10943_s6 }
0x1a8e   :  { %4672 = vperm.xlu1 %10512, %v9235_v38   ;;  %10514 = vset.pattern.permute.xlu0 %v13952_v56 }
0x1a92   :  { %10513 = vset.pattern.permute.xlu1 %v13951_v48 }
0x1aec   :  { %v4876_v17 = vpop.permute.xlu0 %4875  ;;  %v4869_v59 = vpop.permute.xlu1 %4868 }
0x1aed   :  { %v4920_v58 = vmul.f32 %v4876_v17, %v12457_v14  ;;  %v4919_v15 = vmul.f32 %v4869_v59, %v12222_v57 }
0x1aef   :  { %v4928_v20 = vsel %vm155_vm1, %v4920_v58, 0.0  ;;  %v4927_v61 = vsel %vm155_vm1, %v4919_v15, 0.0 }
0x1af0   :  { %v4890_v54 = vpop.permute.xlu0 %4889  ;;  %v4883_v0 = vpop.permute.xlu1 %4882  ;;  %v4929_v25 = vadd.f32 %v4928_v20, %v4927_v61 }
0x1af1   :  { %v4922_v42 = vmul.f32 %v4890_v54, %v12479_v9  ;;  %v4921_v13 = vmul.f32 %v4883_v0, %v12228_v60  ;;  %v12630_v54 = vld [vmem:[%s13858_s9 + $0x10] sm:$0xff]  ;;  %v12633_v0 = vld [vmem:[#allocation2] sm:$0xff] }
0x1af3   :  { %v4930_v51 = vsel %vm155_vm1, %v4921_v13, 0.0  ;;  %v4932_v26 = vsel %vm155_vm1, %v4922_v42, 0.0  ;;  %v12641_v42 = vld [vmem:[%s13858_s9 + $0x8] sm:$0xff]  ;;  %v12648_v13 = vld [vmem:[%s13858_s9] sm:$0xff] }
0x1af4   :  { %v4931_v7 = vadd.f32 %v4930_v51, %v4929_v25  ;;  %v4904_v21 = vpop.permute.xlu0 %4903  ;;  %v4897_v39 = vpop.permute.xlu1 %4896  ;;  %13993 = vst [vmem:[#allocation24_spill] sm:$0xff] %v12648_v13  ;;  %v12653_v25 = vld [vmem:[%s13852_s3 + $0x18] sm:$0xff] }
0x1af5   :  { %v4924_v57 = vmul.f32 %v4904_v21, %v12481_v41  ;;  %v4923_v22 = vmul.f32 %v4897_v39, %v12460_v24  ;;  %13994 = vst [vmem:[#allocation27_spill] sm:$0xff] %v12653_v25  ;;  %v12672_v39 = vld [vmem:[#allocation2 + $0x8] sm:$0xff] }
0x1af6   :  { %v4933_v18 = vadd.f32 %v4932_v26, %v4931_v7  ;;  %v12664_v7 = vld [vmem:[%s13852_s3 + $0x10] sm:$0xff]  ;;  %v12677_v26 = vld [vmem:[%s13852_s3 + $0x8] sm:$0xff] }
0x1af7   :  { %v4934_v34 = vsel %vm155_vm1, %v4923_v22, 0.0  ;;  %v4936_v60 = vsel %vm155_vm1, %v4924_v57, 0.0  ;;  %13995 = vst [vmem:[#allocation25_spill] sm:$0xff] %v12664_v7  ;;  %13996 = vst [vmem:[#allocation28_spill] sm:$0xff] %v12677_v26  ;;  %v12688_v22 = vld [vmem:[%s13852_s3] sm:$0xff] }
0x1af8   :  { %v4935_v29 = vadd.f32 %v4934_v34, %v4933_v18  ;;  %v4918_v11 = vpop.permute.xlu0 %4917  ;;  %v4911_v38 = vpop.permute.xlu1 %4910  ;;  %13997 = vst [vmem:[#allocation26_spill] sm:$0xff] %v12688_v22 }
0x1af9   :  { %v4926_v23 = vmul.f32 %v4918_v11, %v12486_v6  ;;  %v4925_v17 = vmul.f32 %v4911_v38, %v12465_v5  ;;  %v12704_v11 = vld [vmem:[%s13853_s4 + $0x18] sm:$0xff]  ;;  %v12732_v38 = vld [vmem:[%s13853_s4] sm:$0xff] }
0x1afa   :  { %v4937_v59 = vadd.f32 %v4936_v60, %v4935_v29  ;;  %13998 = vst [vmem:[#allocation29_spill] sm:$0xff] %v12704_v11  ;;  %14001 = vst [vmem:[#allocation32_spill] sm:$0xff] %v12732_v38  ;;  %v12746_v60 = vld [vmem:[#allocation4] sm:$0xff] }
0x1afb   :  { %v4938_v58 = vsel %vm155_vm1, %v4925_v17, 0.0  ;;  %v4940_v61 = vsel %vm155_vm1, %v4926_v23, 0.0  ;;  %v12763_v23 = vld [vmem:[%s13856_s7 + $0x8] sm:$0xff]  ;;  %v12770_v17 = vld [vmem:[%s13856_s7] sm:$0xff] }
0x1afc   :  { %v4939_v15 = vadd.f32 %v4938_v58, %v4937_v59  ;;  %v3531_v20 = vpop.permute.xlu1 %3530  ;;  %14004 = vst [vmem:[#allocation35_spill] sm:$0xff] %v12763_v23  ;;  %14005 = vst [vmem:[#allocation36_spill] sm:$0xff] %v12770_v17  ;;  %v5089_v59 = vpop.f32.mrf.mxu0 }
0x1afd   :  { %3533 = vst.msk [vmem:[#allocation5] sm:$0xff] %vm155_vm1, %v3531_v20  ;;  %9210 = vst.msk [vmem:[%s13866_s17 + $0x10] sm:$0xff] %vm155_vm1, %v3531_v20 }
0x1afe   :  { %v4941_v24 = vadd.f32 %v4940_v61, %v4939_v15  ;;  %v10122_v58 = vpop.f32.mrf.mxu0 }
0x1b00   :  { %10143 = vmatmul.mubr.msk.f32.vlgmr.msra.gmra.mxu0 %vm155_vm1, %v4941_v24  ;;  %v12782_v24 = vld [vmem:[#allocation10] ss:$0 sm:$0xff] }
0x1b01   :  { %10157 = vmatpush3.msra.mxu0 %v12583_v2  ;;  %10164 = vmatprep.mubr.msk.f32.mxu0 %vm155_vm1, %v12633_v0  ;;  %14006 = vst [vmem:[#allocation37_spill] sm:$0xff] %v12782_v24 }
0x1b02   :  { %10158 = vmatprep.subr.mxu0 %v12630_v54 }
0x1b03   :  { %10159 = vmatpush3.msra.mxu0 %v12630_v54 }
0x1b04   :  { %10160 = vmatprep.subr.mxu0 %v12641_v42  ;;  %v12656_v51 = vld [vmem:[#allocation5] sm:$0xff] }
0x1b05   :  { %10161 = vmatpush3.msra.mxu0 %v12641_v42  ;;  %10088 = vmatmul.mubr.msk.f32.vlgmr.msra.gmra.mxu1 %vm155_vm1, %v12656_v51  ;;  %v12668_v21 = vpop.permute.xlu0 %4666 }
0x1b06   :  { %10162 = vmatprep.subr.mxu0 %v12648_v13  ;;  %10102 = vmatpush3.msra.mxu1 %v12653_v25  ;;  %v4669_v18 = vmul.f32 %v12668_v21, %v12633_v0 }
0x1b07   :  { %10163 = vmatpush3.msra.mxu0 %v12648_v13  ;;  %10103 = vmatprep.subr.mxu1 %v13949_v4 }
0x1b08   :  { %10165 = vmatmul.mubr.msk.f32.vlgmr.msra.gmra.mxu0 %vm155_vm1, %v12672_v39  ;;  %10104 = vmatpush3.msra.mxu1 %v12664_v7 }
0x1b09   :  { %10105 = vmatprep.subr.mxu1 %v13949_v4  ;;  %v12683_v57 = vpop.permute.xlu1 %4672  ;;  %10109 = vmatprep.mubr.msk.f32.mxu1 %vm10942_vm2, %v13949_v4 }
0x1b0a   :  { %v4675_v34 = vmul.f32 %v12683_v57, %v12672_v39  ;;  %10106 = vmatpush3.msra.mxu1 %v12677_v26  ;;  %10178 = vmatprep.subr.mxu0 %v13949_v4 }
0x1b0b   :  { %10107 = vmatprep.subr.mxu1 %v13949_v4  ;;  %10179 = vmatpush3.msra.mxu0 %v12564_v3  ;;  %v12713_v3 = vld [vmem:[%s13853_s4 + $0x10] sm:$0xff] }
0x1b0c   :  { %v4676_v29 = vadd.f32 %v4675_v34, %v4669_v18  ;;  %10108 = vmatpush3.msra.mxu1 %v12688_v22  ;;  %10180 = vmatprep.subr.mxu0 %v13949_v4  ;;  %13999 = vst [vmem:[#allocation30_spill] sm:$0xff] %v12713_v3 }
0x1b0d   :  { %10123 = vmatprep.subr.mxu1 %v13949_v4  ;;  %10181 = vmatpush3.msra.mxu0 %v12568_v10  ;;  %v12723_v10 = vld [vmem:[%s13853_s4 + $0x8] sm:$0xff] }
0x1b0e   :  { %10110 = vmatmul.mubr.msk.f32.vlgmr.msra.gmra.mxu1 %vm155_vm1, %v4676_v29  ;;  %10182 = vmatprep.subr.mxu0 %v13949_v4  ;;  %14000 = vst [vmem:[#allocation31_spill] sm:$0xff] %v12723_v10 }
0x1b0f   :  { %10124 = vmatpush3.msra.mxu1 %v12704_v11  ;;  %10131 = vmatprep.mubr.msk.f32.mxu1 %vm10942_vm2, %v13949_v4 }
0x1b10   :  { %10125 = vmatprep.subr.mxu1 %v13949_v4  ;;  %10183 = vmatpush3.msra.mxu0 %v12586_v52  ;;  %v12742_v52 = vld [vmem:[%s13856_s7 + $0x18] sm:$0xff] }
0x1b11   :  { %10126 = vmatpush3.msra.mxu1 %v12713_v3  ;;  %10184 = vmatprep.subr.mxu0 %v13949_v4  ;;  %14002 = vst [vmem:[#allocation33_spill] sm:$0xff] %v12742_v52 }
0x1b12   :  { %10127 = vmatprep.subr.mxu1 %v13949_v4  ;;  %10185 = vmatpush3.msra.mxu0 %v12594_v37  ;;  %v12754_v37 = vld [vmem:[%s13856_s7 + $0x10] sm:$0xff] }
0x1b13   :  { %10128 = vmatpush3.msra.mxu1 %v12723_v10  ;;  %10186 = vmatprep.mubr.msk.f32.mxu0 %vm10942_vm2, %v13949_v4  ;;  %14003 = vst [vmem:[#allocation34_spill] sm:$0xff] %v12754_v37 }
0x1b14   :  { %10129 = vmatprep.subr.mxu1 %v13949_v4  ;;  %10200 = vmatprep.subr.mxu0 %v13949_v4 }
0x1b15   :  { %10130 = vmatpush3.msra.mxu1 %v12732_v38 }
0x1b16   :  { %10132 = vmatmul.mubr.msk.f32.vlgmr.msra.gmra.mxu1 %vm155_vm1, %v12746_v60  ;;  %10145 = vmatprep.subr.mxu1 %v13949_v4 }
0x1b17   :  { %10146 = vmatpush3.msra.mxu1 %v12742_v52  ;;  %10153 = vmatprep.mubr.msk.f32.mxu1 %vm10942_vm2, %v13949_v4 }
0x1b18   :  { %10147 = vmatprep.subr.mxu1 %v13949_v4 }
0x1b19   :  { %10148 = vmatpush3.msra.mxu1 %v12754_v37 }
0x1b1a   :  { %10149 = vmatprep.subr.mxu1 %v13949_v4 }
0x1b1b   :  { %10150 = vmatpush3.msra.mxu1 %v12763_v23 }
0x1b1c   :  { %10151 = vmatprep.subr.mxu1 %v13949_v4 }
0x1b1d   :  { %10152 = vmatpush3.msra.mxu1 %v12770_v17 }
0x1b1e   :  { %10154 = vmatmul.mubr.msk.f32.vlgmr.msra.gmra.mxu1 %vm155_vm1, %v12437_v55  ;;  %10167 = vmatprep.subr.mxu1 %v13949_v4 }
0x1b1f   :  { %10175 = vmatprep.mubr.msk.f32.mxu1 %vm10942_vm2, %v13949_v4 }
0x1bc0   :  { %v5302_v15 = vpop.f32.mrf.mxu0 }
0x1bc2   :  { %v10144_v20 = vpop.f32.mrf.mxu0 }
0x1bc5   :  { %v12780_v61 = vpop.f32.mrf.mxu1 }
0x1bc7   :  { %v10089_v18 = vpop.f32.mrf.mxu1 }
0x1bc8   :  { %v10166_v34 = vpop.f32.mrf.mxu0  ;;  %v12791_v18 = vld [vmem:[%s13859_s10] ss:$0 sm:$0xff] }
0x1bc9   :  { %v5473_v29 = vadd.f32 %v10166_v34, %v12782_v24 }
0x1bca   :  { %v5467_v17 = vpop.f32.mrf.mxu0 }
0x1bcb   :  { %v5468_v55 = vadd.f32 %v12782_v24, %v5467_v17  ;;  %5494 = vrot.lane.b32.xlu0 %v5473_v29, %s10943_s6 }
0x1bcd   :  { %5492 = vrot.lane.b32.xlu1 %v5468_v55, %s10943_s6 }
0x1bce   :  { %v5019_v23 = vpop.f32.mrf.mxu1 }
0x1bd0   :  { %v10111_v37 = vpop.f32.mrf.mxu1 }
0x1bd6   :  { %v5181_v58 = vpop.f32.mrf.mxu1 }
0x1bd8   :  { %v10133_v52 = vpop.f32.mrf.mxu1 }
0x1bde   :  { %v5372_v20 = vpop.f32.mrf.mxu1 }
0x1bdf   :  { %v5373_v10 = vadd.f32 %v5372_v20, %v5302_v15 }
0x1be0   :  { %v10155_v38 = vpop.f32.mrf.mxu1 }
0x1be1   :  { %v5383_v34 = vadd.f32 %v12791_v18, %v5373_v10 }
0x1be3   :  { %v5477_v3 = vadd.f32 %v5473_v29, %v5383_v34  ;;  %v5476_v17 = vadd.f32 %v5468_v55, %v5383_v34 }
0x1be5   :  { %v9250_v24 = vmul.f32 -1.442695, %v5477_v3  ;;  %v9249_v11 = vmul.f32 -1.442695, %v5476_v17 }
0x1be7   :  { %10629 = vpow2.f32 %v9250_v24 }
0x1be8   :  { %10631 = vpow2.f32 %v9249_v11 }
0x1bf4   :  { %v10630_v22 = vpop.eup %10629 }
0x1bf5   :  { %v10632_v37 = vpop.eup %10631  ;;  %v5485_v26 = vadd.f32 1.0, %v10630_v22 }
0x1bf6   :  { %v5484_v52 = vadd.f32 1.0, %v10632_v37  ;;  %v5090_v37 = vadd.f32 %v5089_v59, %v5019_v23 }
0x1bf7   :  { %10633 = vrcp.f32 %v5485_v26 }
0x1bf8   :  { %10635 = vrcp.f32 %v5484_v52  ;;  %v12806_v52 = vld [vmem:[#allocation6] ss:$0 sm:$0xff] }
0x1bf9   :  { %14007 = vst [vmem:[#allocation38_spill] sm:$0xff] %v12806_v52 }
0x1c04   :  { %v10634_v38 = vpop.eup %10633 }
0x1c05   :  { %v10636_v7 = vpop.eup %10635 }
0x1c3d   :  { %v5495_v15 = vpop.permute.xlu0 %5494 }
0x1c3e   :  { %v5499_v20 = vmul.f32 %v10634_v38, %v5495_v15  ;;  %v5100_v15 = vadd.f32 %v12806_v52, %v5090_v37 }
0x1c3f   :  { %v5493_v25 = vpop.permute.xlu1 %5492 }
0x1c40   :  { %v5498_v13 = vmul.f32 %v10636_v7, %v5493_v25  ;;  %5504 = vrot.lane.b32.xlu0 %v5499_v20, %s10943_s6 }
0x1c42   :  { %5502 = vrot.lane.b32.xlu1 %v5498_v13, %s10943_s6  ;;  %v12801_v13 = vld [vmem:[#allocation8] ss:$0 sm:$0xff] }
0x1cb2   :  { %v5505_v3 = vpop.permute.xlu0 %5504 }
0x1cb3   :  { %v5509_v10 = vadd.f32 %v5505_v3, %v5383_v34 }
0x1cb4   :  { %v5503_v24 = vpop.permute.xlu1 %5502 }
0x1cb5   :  { %10637 = vtanh.f32 %v5509_v10  ;;  %v5508_v11 = vadd.f32 %v5503_v24, %v5383_v34  ;;  %v5182_v34 = vadd.f32 %v12801_v13, %v5181_v58 }
0x1cb7   :  { %10639 = vtanh.f32 %v5508_v11  ;;  %v5185_v20 = vadd.f32 %v5182_v34, %v5100_v15 }
0x1cb9   :  { %v9242_v3 = vmul.f32 -1.442695, %v5185_v20  ;;  %v12831_v20 = vld [vmem:[#allocation11] sm:$0xff] }
0x1cbb   :  { %10641 = vpow2.f32 %v9242_v3 }
0x1cc2   :  { %v10638_v22 = vpop.eup %10637 }
0x1cc3   :  { %5516 = vrot.lane.b32.xlu0 %v10638_v22, %s10943_s6 }
0x1cc4   :  { %v10640_v26 = vpop.eup %10639 }
0x1cc5   :  { %5514 = vrot.lane.b32.xlu1 %v10640_v26, %s10943_s6 }
0x1cc8   :  { %v10642_v10 = vpop.eup %10641 }
0x1cc9   :  { %v5189_v24 = vadd.f32 1.0, %v10642_v10 }
0x1ccb   :  { %10643 = vrcp.f32 %v5189_v24 }
0x1cd8   :  { %v12815_v59 = vpop.eup %10643 }
0x1d35   :  { %v5517_v29 = vpop.permute.xlu0 %5516 }
0x1d36   :  { %v5521_v55 = vsub.f32 %v12672_v39, %v5517_v29 }
0x1d37   :  { %v5515_v25 = vpop.permute.xlu1 %5514 }
0x1d38   :  { %v5520_v17 = vsub.f32 %v12633_v0, %v5515_v25  ;;  %5526 = vrot.lane.b32.xlu0 %v5521_v55, %s10944_s0 }
0x1d3a   :  { %5524 = vrot.lane.b32.xlu1 %v5520_v17, %s10944_s0 }
0x1d3e   :  { %5193 = vrot.lane.b32.xlu1 %v5182_v34, %s10943_s6  ;;  %v12827_v34 = vld [vmem:[#allocation11 + $0x8] sm:$0xff] }
0x1daa   :  { %v5527_v11 = vpop.permute.xlu0 %5526 }
0x1dab   :  { %v5531_v29 = vmul.f32 %v10634_v38, %v5527_v11  ;;  %v12819_v38 = vld [vmem:[#allocation11 + $0x18] sm:$0xff] }
0x1dac   :  { %v5525_v55 = vpop.permute.xlu1 %5524  ;;  %10168 = vmatpush3.msra.mxu1 %v12819_v38 }
0x1dad   :  { %v5530_v25 = vmul.f32 %v10636_v7, %v5525_v55  ;;  %5536 = vrot.lane.b32.xlu1 %v5531_v29, %s10944_s0  ;;  %10169 = vmatprep.subr.mxu1 %v13949_v4  ;;  %v12823_v7 = vld [vmem:[#allocation11 + $0x10] sm:$0xff] }
0x1dae   :  { %10170 = vmatpush3.msra.mxu1 %v12823_v7 }
0x1daf   :  { %5534 = vrot.lane.b32.xlu0 %v5530_v25, %s10944_s0  ;;  %10171 = vmatprep.subr.mxu1 %v13949_v4 }
0x1db0   :  { %v5194_v23 = vpop.permute.xlu1 %5193  ;;  %10172 = vmatpush3.msra.mxu1 %v12827_v34 }
0x1db1   :  { %5554 = vrot.lane.b32.xlu1 %v12672_v39, %s10943_s6  ;;  %v5196_v58 = vmul.f32 %v12815_v59, %v5194_v23  ;;  %10173 = vmatprep.subr.mxu1 %v13949_v4 }
0x1db2   :  { %10174 = vmatpush3.msra.mxu1 %v12831_v20 }
0x1db3   :  { %5542 = vrot.lane.b32.xlu0 %v12633_v0, %s10943_s6  ;;  %10189 = vmatprep.subr.mxu1 %v13949_v4 }
0x1db7   :  { %5198 = vrot.lane.b32.xlu0 %v5196_v58, %s10943_s6 }
0x1e1f   :  { %v5537_v17 = vpop.permute.xlu1 %5536 }
0x1e20   :  { %v5541_v3 = vadd.f32 %v10638_v22, %v5537_v17  ;;  %v12841_v17 = vld [vmem:[#allocation16] ss:$0 sm:$0xff] }
0x1e21   :  { %v5535_v37 = vpop.permute.xlu0 %5534 }
0x1e22   :  { %v5540_v24 = vadd.f32 %v10640_v26, %v5535_v37  ;;  %v4613_v26 = vadd.f32 %v12841_v17, %v12780_v61  ;;  %v4529_v37 = vadd.f32 %v12408_v62, %v12455_v1  ;;  %v12867_v1 = vld [vmem:[%s13939_s19 + $0x28] sm:$0xff] }
0x1e23   :  { %v5555_v10 = vpop.permute.xlu1 %5554 }
0x1e24   :  { %v5557_v11 = vsub.f32 %v5541_v3, %v5555_v10  ;;  %v4616_v3 = vadd.f32 %v4613_v26, %v4529_v37 }
0x1e25   :  { %v5543_v29 = vpop.permute.xlu0 %5542 }
0x1e26   :  { %v5558_v55 = vmul.f32 %v5557_v11, %v12683_v57  ;;  %v5545_v25 = vsub.f32 %v5540_v24, %v5543_v29 }
0x1e28   :  { %v5546_v23 = vmul.f32 %v5545_v25, %v12668_v21  ;;  %5560 = vrot.lane.b32.xlu0 %v5558_v55, %s10943_s6 }
0x1e29   :  { %v5199_v58 = vpop.permute.xlu0 %5198 }
0x1e2a   :  { %v5201_v52 = vadd.f32 %v5199_v58, %v5100_v15  ;;  %5548 = vrot.lane.b32.xlu1 %v5546_v23, %s10943_s6  ;;  %v9232_v15 = vmul.f32 -1.442695, %v4616_v3  ;;  %v12914_v23 = vld [vmem:[#allocation3] sm:$0xff] }
0x1e2c   :  { %10645 = vtanh.f32 %v5201_v52 }
0x1e2d   :  { %10647 = vpow2.f32 %v9232_v15 }
0x1e39   :  { %v12839_v22 = vpop.eup %10645 }
0x1e3a   :  { %5204 = vrot.lane.b32.xlu1 %v12839_v22, %s10943_s6  ;;  %v10648_v24 = vpop.eup %10647 }
0x1e3b   :  { %v4620_v55 = vadd.f32 1.0, %v10648_v24 }
0x1e3d   :  { %10649 = vrcp.f32 %v4620_v55 }
0x1e3e   :  { %4624 = vrot.lane.b32.xlu1 %v4613_v26, %s10943_s6  ;;  %v12917_v26 = vld [vmem:[#allocation3 + $0x10] sm:$0xff] }
0x1e9a   :  { %v5561_v10 = vpop.permute.xlu0 %5560 }
0x1e9b   :  { %v5563_v52 = vadd.f32 %v5561_v10, %v12672_v39 }
0x1e9c   :  { %v5549_v11 = vpop.permute.xlu1 %5548 }
0x1e9d   :  { %5567 = vst.msk [vmem:[#allocation2 + $0x8] sm:$0xff] %vm155_vm1, %v5563_v52  ;;  %v5551_v29 = vadd.f32 %v5549_v11, %v12633_v0  ;;  %v5564_v61 = vmul.f32 %v5563_v52, %v12683_v57 }
0x1e9f   :  { %v5552_v25 = vmul.f32 %v5551_v29, %v12668_v21  ;;  %5566 = vst.msk [vmem:[#allocation2] sm:$0xff] %vm155_vm1, %v5551_v29 }
0x1ea1   :  { %v5565_v62 = vadd.f32 %v5564_v61, %v5552_v25 }
0x1ea3   :  { %10176 = vmatmul.mubr.msk.f32.vlgmr.msra.gmra.mxu1 %vm155_vm1, %v5565_v62 }
0x1ea4   :  { %10190 = vmatpush3.msra.mxu1 %v12418_v16  ;;  %10197 = vmatprep.mubr.msk.f32.mxu1 %vm10942_vm2, %v13949_v4 }
0x1ea5   :  { %10191 = vmatprep.subr.mxu1 %v13949_v4 }
0x1ea6   :  { %10192 = vmatpush3.msra.mxu1 %v12421_v33 }
0x1ea7   :  { %10193 = vmatprep.subr.mxu1 %v13949_v4 }
0x1ea8   :  { %10194 = vmatpush3.msra.mxu1 %v12427_v46  ;;  %v12882_v46 = vpop.eup %10649 }
0x1ea9   :  { %10195 = vmatprep.subr.mxu1 %v13949_v4 }
0x1eaa   :  { %10196 = vmatpush3.msra.mxu1 %v12431_v45 }
0x1eab   :  { %10198 = vmatmul.mubr.msk.f32.vlgmr.msra.gmra.mxu1 %vm155_vm1, %v12867_v1  ;;  %10211 = vmatprep.subr.mxu1 %v13949_v4 }
0x1eac   :  { %v5205_v16 = vpop.permute.xlu1 %5204  ;;  %10212 = vmatpush3.msra.mxu1 %v12513_v47  ;;  %10219 = vmatprep.mubr.msk.f32.mxu1 %vm10942_vm2, %v13949_v4 }
0x1ead   :  { %v5207_v33 = vsub.f32 %v12746_v60, %v5205_v16  ;;  %10213 = vmatprep.subr.mxu1 %v13949_v4 }
0x1eae   :  { %10214 = vmatpush3.msra.mxu1 %v12520_v63 }
0x1eaf   :  { %5209 = vrot.lane.b32.xlu0 %v5207_v33, %s10944_s0  ;;  %10215 = vmatprep.subr.mxu1 %v13949_v4 }
0x1eb0   :  { %v4625_v45 = vpop.permute.xlu1 %4624  ;;  %10216 = vmatpush3.msra.mxu1 %v12527_v40 }
0x1eb1   :  { %v4627_v47 = vmul.f32 %v12882_v46, %v4625_v45  ;;  %10217 = vmatprep.subr.mxu1 %v13949_v4 }
0x1eb2   :  { %10218 = vmatpush3.msra.mxu1 %v12534_v28 }
0x1eb3   :  { %4629 = vrot.lane.b32.xlu1 %v4627_v47, %s10943_s6  ;;  %10220 = vmatmul.mubr.msk.f32.vlgmr.msra.gmra.mxu1 %vm155_vm1, %v12867_v1 }
0x1eb4   :  { %10233 = vmatprep.subr.mxu1 %v13949_v4  ;;  %10241 = vmatprep.mubr.msk.f32.mxu1 %vm10942_vm2, %v13949_v4 }
0x1eb5   :  { %10234 = vmatpush3.msra.mxu1 %v12544_v32 }
0x1eb6   :  { %10235 = vmatprep.subr.mxu1 %v13949_v4 }
0x1eb7   :  { %10236 = vmatpush3.msra.mxu1 %v12551_v12 }
0x1eb8   :  { %10237 = vmatprep.subr.mxu1 %v13949_v4 }
0x1eb9   :  { %10238 = vmatpush3.msra.mxu1 %v12562_v53 }
0x1eba   :  { %10239 = vmatprep.subr.mxu1 %v13949_v4 }
0x1ebb   :  { %10240 = vmatpush3.msra.mxu1 %v12576_v19 }
0x1ebc   :  { %10255 = vmatprep.subr.mxu1 %v12583_v2 }
0x1f21   :  { %v5210_v63 = vpop.permute.xlu0 %5209 }
0x1f22   :  { %v5212_v40 = vmul.f32 %v12815_v59, %v5210_v63 }
0x1f24   :  { %5214 = vrot.lane.b32.xlu0 %v5212_v40, %s10944_s0 }
0x1f25   :  { %v4630_v28 = vpop.permute.xlu1 %4629 }
0x1f26   :  { %v4632_v32 = vadd.f32 %v4630_v28, %v4529_v37 }
0x1f28   :  { %10651 = vtanh.f32 %v4632_v32 }
0x1f35   :  { %v12904_v0 = vpop.eup %10651 }
0x1f36   :  { %4635 = vrot.lane.b32.xlu1 %v12904_v0, %s10943_s6 }
0x1f63   :  { %v12908_v12 = vpop.f32.mrf.mxu1 }
0x1f65   :  { %v10177_v53 = vpop.f32.mrf.mxu1 }
0x1f6b   :  { %v5878_v21 = vpop.f32.mrf.mxu1 }
0x1f6c   :  { %v5883_v19 = vmul.f32 %v5878_v21, %v12457_v14  ;;  %v5882_v58 = vmul.f32 %v5878_v21, %v12914_v23  ;;  %v5884_v3 = vmul.f32 %v5878_v21, %v12917_v26  ;;  %v5885_v15 = vmul.f32 %v5878_v21, %v12479_v9 }
0x1f6d   :  { %v10199_v39 = vpop.f32.mrf.mxu1  ;;  %v5889_v24 = vmul.f32 %v5878_v21, %v12486_v6  ;;  %v5888_v61 = vmul.f32 %v5878_v21, %v12465_v5 }
0x1f6e   :  { %v5893_v57 = vsel %vm155_vm1, %v5883_v19, 0.0  ;;  %v5890_v37 = vsel %vm155_vm1, %v5882_v58, 0.0  ;;  %v5896_v14 = vsel %vm155_vm1, %v5884_v3, 0.0  ;;  %v5899_v10 = vsel %vm155_vm1, %v5885_v15, 0.0 }
0x1f6f   :  { %5894 = vadd.xlane.f32.xlu1 %v5893_v57  ;;  %v5911_v11 = vsel %vm155_vm1, %v5889_v24, 0.0  ;;  %v5908_v6 = vsel %vm155_vm1, %v5888_v61, 0.0 }
0x1f96   :  { %v5215_v60 = vpop.permute.xlu0 %5214 }
0x1f97   :  { %v5217_v59 = vadd.f32 %v12839_v22, %v5215_v60  ;;  %v5887_v22 = vmul.f32 %v5878_v21, %v12481_v41 }
0x1f99   :  { %5219 = vrot.lane.b32.xlu0 %v5217_v59, %s10943_s6  ;;  %v5905_v52 = vsel %vm155_vm1, %v5887_v22, 0.0 }
0x1fa8   :  { %v4636_v25 = vpop.permute.xlu1 %4635 }
0x1fa9   :  { %v4638_v62 = vsub.f32 %v12656_v51, %v4636_v25 }
0x1fb8   :  { %5891 = vadd.xlane.f32.xlu0 %v5890_v37 }
0x1fbc   :  { %5897 = vadd.xlane.f32.xlu0 %v5896_v14 }
0x1fc0   :  { %5900 = vadd.xlane.f32.xlu0 %v5899_v10 }
0x1fc4   :  { %5906 = vadd.xlane.f32.xlu0 %v5905_v52 }
0x1fc8   :  { %5912 = vadd.xlane.f32.xlu0 %v5911_v11 }
0x1ff8   :  { %v5895_v47 = vpop.xlane.xlu1 %5894 }
0x1ff9   :  { %v5930_v5 = vrot.slane %v5895_v47, %v11553_v8 }
0x200b   :  { %v5220_v29 = vpop.permute.xlu0 %5219 }
0x200c   :  { %5223 = vst.msk [vmem:[#allocation3 + $0x20] sm:$0xff] %vm155_vm1, %v5220_v29  ;;  %5224 = vst.msk [vmem:[#allocation4] sm:$0xff] %vm155_vm1, %v5220_v29 }
0x2013   :  { %v12930_v9 = vld [vmem:[#allocation3 + $0x20] sm:$0xff] }
0x2014   :  { %v5886_v41 = vmul.f32 %v5878_v21, %v12930_v9 }
0x2016   :  { %v5902_v55 = vsel %vm155_vm1, %v5886_v41, 0.0 }
0x2017   :  { %5903 = vadd.xlane.f32.xlu1 %v5902_v55 }
0x201b   :  { %5909 = vadd.xlane.f32.xlu1 %v5908_v6 }
0x202c   :  { %4640 = vrot.lane.b32.xlu1 %v4638_v62, %s10944_s0 }
0x2041   :  { %v5892_v16 = vpop.xlane.xlu0 %5891 }
0x2042   :  { %v5926_v63 = vrot.slane %v5892_v16, %v11553_v8 }
0x2044   :  { %v5955_v53 = vsel %vm349_vm3, %v5930_v5, %v5926_v63 }
0x2045   :  { %v5898_v33 = vpop.xlane.xlu0 %5897 }
0x2046   :  { %v5934_v40 = vrot.slane %v5898_v33, %v11553_v8 }
0x2048   :  { %v5956_v51 = vsel %vm351_vm4, %v5934_v40, %v5955_v53 }
0x2049   :  { %v5901_v45 = vpop.xlane.xlu0 %5900 }
0x204a   :  { %v5938_v32 = vrot.slane %v5901_v45, %v11553_v8 }
0x204c   :  { %v5957_v39 = vsel %vm353_vm5, %v5938_v32, %v5956_v51 }
0x204d   :  { %v5907_v28 = vpop.xlane.xlu0 %5906 }
0x204e   :  { %v5946_v59 = vrot.slane %v5907_v28, %v11553_v8 }
0x2051   :  { %v5913_v57 = vpop.xlane.xlu0 %5912 }
0x2052   :  { %v5954_v3 = vrot.slane %v5913_v57, %v11553_v8 }
0x20a0   :  { %v5904_v21 = vpop.xlane.xlu1 %5903 }
0x20a1   :  { %v5942_v19 = vrot.slane %v5904_v21, %v11553_v8 }
0x20a3   :  { %v5958_v60 = vsel %vm355_vm6, %v5942_v19, %v5957_v39 }
0x20a4   :  { %v5910_v58 = vpop.xlane.xlu1 %5909  ;;  %v5959_v14 = vsel %vm357_vm7, %v5946_v59, %v5958_v60 }
0x20a5   :  { %v5950_v37 = vrot.slane %v5910_v58, %v11553_v8 }
0x20a7   :  { %v5960_v15 = vsel %vm359_vm8, %v5950_v37, %v5959_v14  ;;  %v9258_v37 = vld [vmem:[%s13940_s23 + $0x28] sm:$0xff] }
0x20a8   :  { %v5961_v22 = vsel %vm361_vm9, %v5954_v3, %v5960_v15  ;;  %v4641_v10 = vpop.permute.xlu1 %4640  ;;  %v12973_v15 = vpop.f32.mrf.mxu1 }
0x20a9   :  { %v5963_v52 = vsel %vm5914_vm14, %v5961_v22, -1e+30  ;;  %v4643_v24 = vmul.f32 %v12882_v46, %v4641_v10 }
0x20aa   :  { %v5964_v11 = vsel %vm365_vm0, %v5963_v52, -inf  ;;  %v10221_v22 = vpop.f32.mrf.mxu1 }
0x20ab   :  { %v5965_v29 = vrot.slane %v5964_v11, 4  ;;  %4645 = vrot.lane.b32.xlu0 %v4643_v24, %s10944_s0 }
0x20ad   :  { %v5966_v41 = vmax.f32 %v5964_v11, %v5965_v29 }
0x20af   :  { %v5967_v55 = vrot.slane %v5966_v41, 2 }
0x20b1   :  { %v5968_v61 = vmax.f32 %v5966_v41, %v5967_v55  ;;  %v10749_v55 = vld [vmem:[#allocation3 + $0x8] sm:$0xff] }
0x20b3   :  { %v5969_v6 = vrot.slane %v5968_v61, 1 }
0x20b5   :  { %v5970_v25 = vmax.f32 %v5968_v61, %v5969_v6 }
0x20b7   :  { %v5971_v62 = vsub.f32 %v5963_v52, %v5970_v25 }
0x20b9   :  { %v5972_v16 = vmul.f32 1.442695, %v5971_v62 }
0x20bb   :  { %10653 = vpow2.f32 %v5972_v16 }
0x20c8   :  { %v10654_v33 = vpop.eup %10653 }
0x20c9   :  { %v5974_v45 = vsel %vm365_vm0, %v10654_v33, 0.0 }
0x20ca   :  { %v5975_v47 = vrot.slane %v5974_v45, 4 }
0x20cc   :  { %v5976_v63 = vadd.f32 %v5975_v47, %v5974_v45  ;;  %v10750_v45 = vld [vmem:[#allocation3 + $0x18] sm:$0xff] }
0x20ce   :  { %v5977_v40 = vrot.slane %v5976_v63, 2 }
0x20d0   :  { %v5978_v46 = vadd.f32 %v5977_v40, %v5976_v63 }
0x20d2   :  { %v5979_v28 = vrot.slane %v5978_v46, 1 }
0x20d4   :  { %v5980_v5 = vadd.f32 %v5979_v28, %v5978_v46 }
0x20d6   :  { %10655 = vrcp.f32 %v5980_v5 }
0x20e3   :  { %v10656_v32 = vpop.eup %10655 }
0x20e4   :  { %v5982_v53 = vmul.f32 %v10656_v32, %v10654_v33 }
0x20e6   :  { %v5986_v21 = vrot.slane %v5982_v53, %v11147_v31  ;;  %v6000_v51 = vrot.slane %v5982_v53, %v11144_v30  ;;  %v5993_v19 = vrot.slane %v5982_v53, %v11160_v36  ;;  %v6014_v39 = vrot.slane %v5982_v53, %v11185_v44 }
0x20e7   :  { %v6007_v57 = vrot.slane %v5982_v53, %v11157_v35  ;;  %v6028_v60 = vrot.slane %v5982_v53, %v11208_v50  ;;  %v6021_v59 = vrot.slane %v5982_v53, %v11182_v43  ;;  %v6035_v58 = vrot.slane %v5982_v53, %v11205_v49  ;;  %v10751_v53 = vld [vmem:[#allocation3 + $0x30] sm:$0xff] }
0x20e8   :  { %5988 = vbcast.lane.b32.xlu1 %v5986_v21, 256  ;;  %6002 = vbcast.lane.b32.xlu0 %v6000_v51, 256  ;;  %v10752_v51 = vld [vmem:[#allocation3 + $0x28] sm:$0xff] }
0x20ec   :  { %5995 = vbcast.lane.b32.xlu1 %v5993_v19, 256  ;;  %6016 = vbcast.lane.b32.xlu0 %v6014_v39, 256 }
0x20f0   :  { %6009 = vbcast.lane.b32.xlu1 %v6007_v57, 256  ;;  %6030 = vbcast.lane.b32.xlu0 %v6028_v60, 256 }
0x20f4   :  { %6023 = vbcast.lane.b32.xlu1 %v6021_v59, 256 }
0x20f8   :  { %6037 = vbcast.lane.b32.xlu1 %v6035_v58, 256 }
0x20fc   :  { %5786 = vperm.xlu1 %10513, %v9258_v37  }
0x2100   :  { %10516 = vset.pattern.permute.xlu1 %v13952_v56 }
0x211d   :  { %v4646_v3 = vpop.permute.xlu0 %4645 }
0x211e   :  { %v4648_v14 = vadd.f32 %v12904_v0, %v4646_v3 }
0x2120   :  { %4650 = vrot.lane.b32.xlu0 %v4648_v14, %s10943_s6 }
0x2124   :  { %5792 = vperm.xlu0 %10514, %v9258_v37   ;;  %v10753_v37 = vld [vmem:[#allocation3 + $0x38] sm:$0xff] }
0x2128   :  { %10515 = vset.pattern.permute.xlu0 %v13951_v48 }
0x215a   :  { %v6003_v10 = vpop.permute.xlu0 %6002  ;;  %v5989_v52 = vpop.permute.xlu1 %5988 }
0x215b   :  { %v6039_v24 = vmul.f32 %v5989_v52, %v12914_v23  ;;  %v6041_v41 = vmul.f32 %v6003_v10, %v12917_v26  ;;  %v12987_v52 = vld [vmem:[#allocation2] sm:$0xff] }
0x215d   :  { %v6047_v0 = vsel %vm155_vm1, %v6039_v24, 0.0  ;;  %v6050_v16 = vsel %vm155_vm1, %v6041_v41, 0.0  ;;  %v14008_v24 = vld [vmem:[#allocation24_spill] sm:$0xff]  ;;  %v14010_v41 = vld [vmem:[#allocation25_spill] sm:$0xff] }
0x215e   :  { %v6017_v11 = vpop.permute.xlu0 %6016  ;;  %v5996_v29 = vpop.permute.xlu1 %5995 }
0x215f   :  { %v6040_v61 = vmul.f32 %v10749_v55, %v5996_v29  ;;  %v6043_v33 = vmul.f32 %v6017_v11, %v12930_v9  ;;  %v12998_v11 = vld [vmem:[#allocation2 + $0x8] sm:$0xff] }
0x2161   :  { %v6048_v6 = vsel %vm155_vm1, %v6040_v61, 0.0  ;;  %v6054_v32 = vsel %vm155_vm1, %v6043_v33, 0.0  ;;  %v14014_v33 = vld [vmem:[#allocation30_spill] sm:$0xff] }
0x2162   :  { %v6049_v25 = vadd.f32 %v6048_v6, %v6047_v0  ;;  %v6010_v62 = vpop.permute.xlu1 %6009  ;;  %v6031_v63 = vpop.permute.xlu0 %6030  ;;  %v14011_v6 = vld [vmem:[#allocation28_spill] sm:$0xff] }
0x2163   :  { %v6042_v47 = vmul.f32 %v10750_v45, %v6010_v62  ;;  %v6045_v21 = vmul.f32 %v10751_v53, %v6031_v63  ;;  %v14012_v62 = vld [vmem:[#allocation26_spill] sm:$0xff]  ;;  %v14015_v45 = vld [vmem:[#allocation31_spill] sm:$0xff]  ;;  %v13042_v63 = vld [vmem:[#allocation4] sm:$0xff] }
0x2164   :  { %v6051_v40 = vadd.f32 %v6050_v16, %v6049_v25  ;;  %v14013_v16 = vld [vmem:[#allocation29_spill] sm:$0xff] }
0x2165   :  { %v6052_v46 = vsel %vm155_vm1, %v6042_v47, 0.0  ;;  %v6058_v58 = vsel %vm155_vm1, %v6045_v21, 0.0  ;;  %v14016_v47 = vld [vmem:[#allocation32_spill] sm:$0xff]  ;;  %v14021_v21 = vld [vmem:[#allocation37_spill] sm:$0xff] }
0x2166   :  { %v6053_v28 = vadd.f32 %v6052_v46, %v6051_v40  ;;  %v6024_v5 = vpop.permute.xlu1 %6023  ;;  %v14017_v40 = vld [vmem:[#allocation33_spill] sm:$0xff]  ;;  %v14018_v46 = vld [vmem:[#allocation34_spill] sm:$0xff] }
0x2167   :  { %v6044_v19 = vmul.f32 %v10752_v51, %v6024_v5  ;;  %v14020_v5 = vld [vmem:[#allocation36_spill] sm:$0xff] }
0x2168   :  { %v6055_v39 = vadd.f32 %v6054_v32, %v6053_v28  ;;  %v14019_v28 = vld [vmem:[#allocation35_spill] sm:$0xff] }
0x2169   :  { %v6056_v57 = vsel %vm155_vm1, %v6044_v19, 0.0 }
0x216a   :  { %v6057_v60 = vadd.f32 %v6056_v57, %v6055_v39  ;;  %v6038_v59 = vpop.permute.xlu1 %6037 }
0x216b   :  { %v6046_v3 = vmul.f32 %v10753_v37, %v6038_v59 }
0x216c   :  { %v6059_v14 = vadd.f32 %v6058_v58, %v6057_v60 }
0x216d   :  { %v6060_v22 = vsel %vm155_vm1, %v6046_v3, 0.0 }
0x216e   :  { %v6061_v10 = vadd.f32 %v6060_v22, %v6059_v14 }
0x2170   :  { %10242 = vmatmul.mubr.msk.f32.vlgmr.msra.gmra.mxu1 %vm155_vm1, %v6061_v10 }
0x2171   :  { %10256 = vmatpush3.msra.mxu1 %v12583_v2  ;;  %10263 = vmatprep.mubr.msk.f32.mxu1 %vm155_vm1, %v12987_v52 }
0x2172   :  { %10257 = vmatprep.subr.mxu1 %v12630_v54 }
0x2173   :  { %10258 = vmatpush3.msra.mxu1 %v12630_v54 }
0x2174   :  { %10259 = vmatprep.subr.mxu1 %v12641_v42 }
0x2175   :  { %10260 = vmatpush3.msra.mxu1 %v12641_v42  ;;  %v14009_v42 = vld [vmem:[#allocation27_spill] sm:$0xff] }
0x2176   :  { %10261 = vmatprep.subr.mxu1 %v14008_v24 }
0x2177   :  { %10262 = vmatpush3.msra.mxu1 %v14008_v24  ;;  %v13017_v29 = vpop.permute.xlu1 %5786 }
0x2178   :  { %10264 = vmatmul.mubr.msk.f32.vlgmr.msra.gmra.mxu1 %vm155_vm1, %v12998_v11  ;;  %10277 = vmatprep.subr.mxu1 %v13949_v4  ;;  %v5789_v61 = vmul.f32 %v13017_v29, %v12987_v52 }
0x2179   :  { %10285 = vmatprep.mubr.msk.f32.mxu1 %vm10942_vm2, %v13949_v4 }
0x2192   :  { %v4651_v2 = vpop.permute.xlu0 %4650 }
0x2193   :  { %4653 = vst.msk [vmem:[#allocation5] sm:$0xff] %vm155_vm1, %v4651_v2  ;;  %9233 = vst.msk [vmem:[%s13866_s17 + $0x18] sm:$0xff] %vm155_vm1, %v4651_v2 }
0x219a   :  { %v13010_v54 = vld [vmem:[#allocation5] sm:$0xff] }
0x219b   :  { %10187 = vmatmul.mubr.msk.f32.vlgmr.msra.gmra.mxu0 %vm155_vm1, %v13010_v54 }
0x219c   :  { %10201 = vmatpush3.msra.mxu0 %v14009_v42  ;;  %10208 = vmatprep.mubr.msk.f32.mxu0 %vm10942_vm2, %v13949_v4 }
0x219d   :  { %10202 = vmatprep.subr.mxu0 %v13949_v4 }
0x219e   :  { %10203 = vmatpush3.msra.mxu0 %v14010_v41 }
0x219f   :  { %10204 = vmatprep.subr.mxu0 %v13949_v4  ;;  %v13022_v55 = vpop.permute.xlu0 %5792 }
0x21a0   :  { %v5795_v0 = vmul.f32 %v13022_v55, %v12998_v11  ;;  %10205 = vmatpush3.msra.mxu0 %v14011_v6 }
0x21a1   :  { %10206 = vmatprep.subr.mxu0 %v13949_v4 }
0x21a2   :  { %v5796_v25 = vadd.f32 %v5795_v0, %v5789_v61  ;;  %10207 = vmatpush3.msra.mxu0 %v14012_v62 }
0x21a3   :  { %10222 = vmatprep.subr.mxu0 %v13949_v4 }
0x21a4   :  { %10209 = vmatmul.mubr.msk.f32.vlgmr.msra.gmra.mxu0 %vm155_vm1, %v5796_v25 }
0x21a5   :  { %10223 = vmatpush3.msra.mxu0 %v14013_v16  ;;  %10230 = vmatprep.mubr.msk.f32.mxu0 %vm10942_vm2, %v13949_v4 }
0x21a6   :  { %10224 = vmatprep.subr.mxu0 %v13949_v4 }
0x21a7   :  { %10225 = vmatpush3.msra.mxu0 %v14014_v33 }
0x21a8   :  { %10226 = vmatprep.subr.mxu0 %v13949_v4 }
0x21a9   :  { %10227 = vmatpush3.msra.mxu0 %v14015_v45 }
0x21aa   :  { %10228 = vmatprep.subr.mxu0 %v13949_v4 }
0x21ab   :  { %10229 = vmatpush3.msra.mxu0 %v14016_v47 }
0x21ac   :  { %10231 = vmatmul.mubr.msk.f32.vlgmr.msra.gmra.mxu0 %vm155_vm1, %v13042_v63  ;;  %10244 = vmatprep.subr.mxu0 %v13949_v4 }
0x21ad   :  { %10245 = vmatpush3.msra.mxu0 %v14017_v40  ;;  %10252 = vmatprep.mubr.msk.f32.mxu0 %vm10942_vm2, %v13949_v4 }
0x21ae   :  { %10246 = vmatprep.subr.mxu0 %v13949_v4 }
0x21af   :  { %10247 = vmatpush3.msra.mxu0 %v14018_v46 }
0x21b0   :  { %10248 = vmatprep.subr.mxu0 %v13949_v4 }
0x21b1   :  { %10249 = vmatpush3.msra.mxu0 %v14019_v28 }
0x21b2   :  { %10250 = vmatprep.subr.mxu0 %v13949_v4 }
0x21b3   :  { %10251 = vmatpush3.msra.mxu0 %v14020_v5 }
0x21b4   :  { %10253 = vmatmul.mubr.msk.f32.vlgmr.msra.gmra.mxu0 %vm155_vm1, %v12867_v1  ;;  %10266 = vmatprep.subr.mxu0 %v13949_v4 }
0x21b5   :  { %10267 = vmatpush3.msra.mxu0 %v12819_v38  ;;  %10274 = vmatprep.mubr.msk.f32.mxu0 %vm10942_vm2, %v13949_v4 }
0x21b6   :  { %10268 = vmatprep.subr.mxu0 %v13949_v4 }
0x21b7   :  { %10269 = vmatpush3.msra.mxu0 %v12823_v7 }
0x21b8   :  { %10270 = vmatprep.subr.mxu0 %v13949_v4 }
0x21b9   :  { %10271 = vmatpush3.msra.mxu0 %v12827_v34 }
0x21ba   :  { %10272 = vmatprep.subr.mxu0 %v13949_v4 }
0x21bb   :  { %10273 = vmatpush3.msra.mxu0 %v12831_v20 }
0x21bc   :  { %10288 = vmatprep.subr.mxu0 %v13949_v4 }
0x2230   :  { %v6422_v1 = vpop.f32.mrf.mxu1 }
0x2232   :  { %v10243_v32 = vpop.f32.mrf.mxu1 }
0x2238   :  { %v10265_v38 = vpop.f32.mrf.mxu1 }
0x2239   :  { %v6593_v7 = vadd.f32 %v10265_v38, %v14021_v21 }
0x223a   :  { %v6587_v53 = vpop.f32.mrf.mxu1 }
0x223b   :  { %v6588_v51 = vadd.f32 %v14021_v21, %v6587_v53 }
0x223d   :  { %6612 = vrot.lane.b32.xlu1 %v6588_v51, %s10943_s6 }
0x2241   :  { %6614 = vrot.lane.b32.xlu1 %v6593_v7, %s10943_s6 }
0x225b   :  { %v13073_v19 = vpop.f32.mrf.mxu0 }
0x225d   :  { %v10188_v34 = vpop.f32.mrf.mxu0 }
0x2264   :  { %v6139_v39 = vpop.f32.mrf.mxu0 }
0x2265   :  { %v6210_v21 = vadd.f32 %v12973_v15, %v6139_v39 }
0x2266   :  { %v10210_v57 = vpop.f32.mrf.mxu0 }
0x226c   :  { %v6301_v20 = vpop.f32.mrf.mxu0 }
0x226d   :  { %v6302_v38 = vadd.f32 %v12801_v13, %v6301_v20 }
0x226e   :  { %v10232_v60 = vpop.f32.mrf.mxu0 }
0x2274   :  { %v6492_v59 = vpop.f32.mrf.mxu0 }
0x2275   :  { %v6493_v37 = vadd.f32 %v6492_v59, %v6422_v1 }
0x2276   :  { %v10254_v58 = vpop.f32.mrf.mxu0 }
0x2277   :  { %v6503_v3 = vadd.f32 %v12791_v18, %v6493_v37 }
0x2279   :  { %v6596_v14 = vadd.f32 %v6588_v51, %v6503_v3  ;;  %v6597_v22 = vadd.f32 %v6593_v7, %v6503_v3  ;;  %v14022_v51 = vld [vmem:[#allocation38_spill] sm:$0xff] }
0x227a   :  { %v6220_v7 = vadd.f32 %v14022_v51, %v6210_v21  ;;  %v13122_v21 = vld [vmem:[#allocation17 + $0x10] sm:$0xff] }
0x227b   :  { %v9272_v10 = vmul.f32 -1.442695, %v6596_v14  ;;  %v9273_v24 = vmul.f32 -1.442695, %v6597_v22 }
0x227c   :  { %v6305_v34 = vadd.f32 %v6302_v38, %v6220_v7 }
0x227d   :  { %10657 = vpow2.f32 %v9272_v10 }
0x227e   :  { %10659 = vpow2.f32 %v9273_v24  ;;  %v9265_v57 = vmul.f32 -1.442695, %v6305_v34 }
0x228a   :  { %v10658_v2 = vpop.eup %10657 }
0x228b   :  { %v6604_v42 = vadd.f32 1.0, %v10658_v2  ;;  %v10660_v41 = vpop.eup %10659 }
0x228c   :  { %v6605_v61 = vadd.f32 1.0, %v10660_v41 }
0x228d   :  { %10661 = vrcp.f32 %v6604_v42 }
0x228e   :  { %10663 = vrcp.f32 %v6605_v61 }
0x229a   :  { %v10662_v0 = vpop.eup %10661 }
0x229b   :  { %v10664_v62 = vpop.eup %10663 }
0x22af   :  { %v6613_v6 = vpop.permute.xlu1 %6612 }
0x22b0   :  { %v6618_v25 = vmul.f32 %v10662_v0, %v6613_v6 }
0x22b2   :  { %6622 = vrot.lane.b32.xlu0 %v6618_v25, %s10943_s6 }
0x22b3   :  { %v6615_v16 = vpop.permute.xlu1 %6614 }
0x22b4   :  { %v6619_v18 = vmul.f32 %v10664_v62, %v6615_v16 }
0x22b6   :  { %6624 = vrot.lane.b32.xlu1 %v6619_v18, %s10943_s6  ;;  %v5733_v18 = vadd.f32 %v12841_v17, %v13073_v19 }
0x2324   :  { %v6623_v33 = vpop.permute.xlu0 %6622 }
0x2325   :  { %v6628_v45 = vadd.f32 %v6623_v33, %v6503_v3  ;;  %v13109_v33 = vld [vmem:[#allocation14] ss:$0 sm:$0xff] }
0x2327   :  { %10665 = vtanh.f32 %v6628_v45  ;;  %v5649_v45 = vadd.f32 %v13109_v33, %v12908_v12 }
0x2328   :  { %v6625_v47 = vpop.permute.xlu1 %6624 }
0x2329   :  { %v6629_v40 = vadd.f32 %v6625_v47, %v6503_v3  ;;  %v5736_v47 = vadd.f32 %v5733_v18, %v5649_v45 }
0x232b   :  { %10667 = vtanh.f32 %v6629_v40  ;;  %v9255_v40 = vmul.f32 -1.442695, %v5736_v47  ;;  %v13175_v47 = vld [vmem:[#allocation3 + $0x18] sm:$0xff] }
0x232c   :  { %10669 = vpow2.f32 %v9265_v57 }
0x2334   :  { %v10666_v46 = vpop.eup %10665 }
0x2335   :  { %6634 = vrot.lane.b32.xlu0 %v10666_v46, %s10943_s6 }
0x2338   :  { %v10668_v28 = vpop.eup %10667 }
0x2339   :  { %6636 = vrot.lane.b32.xlu1 %v10668_v28, %s10943_s6  ;;  %v10670_v60 = vpop.eup %10669 }
0x233a   :  { %v6309_v59 = vadd.f32 1.0, %v10670_v60 }
0x233c   :  { %10671 = vrcp.f32 %v6309_v59 }
0x2349   :  { %v13092_v15 = vpop.eup %10671 }
0x23a7   :  { %v6635_v5 = vpop.permute.xlu0 %6634 }
0x23a8   :  { %v6640_v1 = vsub.f32 %v12987_v52, %v6635_v5 }
0x23aa   :  { %6644 = vrot.lane.b32.xlu0 %v6640_v1, %s10944_s0 }
0x23ab   :  { %v6637_v32 = vpop.permute.xlu1 %6636 }
0x23ac   :  { %v6641_v53 = vsub.f32 %v12998_v11, %v6637_v32 }
0x23ae   :  { %6313 = vrot.lane.b32.xlu0 %v6302_v38, %s10943_s6  ;;  %6646 = vrot.lane.b32.xlu1 %v6641_v53, %s10944_s0  ;;  %v13119_v53 = vld [vmem:[#allocation17 + $0x18] sm:$0xff] }
0x241c   :  { %v6645_v58 = vpop.permute.xlu0 %6644 }
0x241d   :  { %v6650_v37 = vmul.f32 %v10662_v0, %v6645_v58 }
0x241f   :  { %6654 = vrot.lane.b32.xlu1 %v6650_v37, %s10944_s0 }
0x2420   :  { %v6647_v13 = vpop.permute.xlu1 %6646  ;;  %v6314_v3 = vpop.permute.xlu0 %6313 }
0x2421   :  { %v6651_v20 = vmul.f32 %v10664_v62, %v6647_v13  ;;  %v6316_v39 = vmul.f32 %v13092_v15, %v6314_v3 }
0x2423   :  { %6662 = vrot.lane.b32.xlu1 %v12987_v52, %s10943_s6  ;;  %6656 = vrot.lane.b32.xlu0 %v6651_v20, %s10944_s0 }
0x2427   :  { %6318 = vrot.lane.b32.xlu1 %v6316_v39, %s10943_s6  ;;  %6674 = vrot.lane.b32.xlu0 %v12998_v11, %s10943_s6  ;;  %v13158_v39 = vld [vmem:[#allocation3 + $0x8] sm:$0xff] }
0x2491   :  { %v6655_v14 = vpop.permute.xlu1 %6654 }
0x2492   :  { %v6660_v22 = vadd.f32 %v10666_v46, %v6655_v14 }
0x2495   :  { %v6657_v10 = vpop.permute.xlu0 %6656  ;;  %v6663_v24 = vpop.permute.xlu1 %6662 }
0x2496   :  { %v6665_v2 = vsub.f32 %v6660_v22, %v6663_v24  ;;  %v6661_v42 = vadd.f32 %v10668_v28, %v6657_v10  ;;  %v13163_v24 = vld [vmem:[#allocation3 + $0x30] sm:$0xff] }
0x2498   :  { %v6666_v41 = vmul.f32 %v6665_v2, %v13017_v29 }
0x2499   :  { %v6675_v61 = vpop.permute.xlu0 %6674  ;;  %v6319_v0 = vpop.permute.xlu1 %6318 }
0x249a   :  { %v6677_v6 = vsub.f32 %v6661_v42, %v6675_v61  ;;  %v6321_v25 = vadd.f32 %v6319_v0, %v6220_v7  ;;  %6668 = vrot.lane.b32.xlu0 %v6666_v41, %s10943_s6 }
0x249c   :  { %v6678_v62 = vmul.f32 %v6677_v6, %v13022_v55  ;;  %10673 = vtanh.f32 %v6321_v25 }
0x249d   :  { %10675 = vpow2.f32 %v9255_v40 }
0x249e   :  { %6680 = vrot.lane.b32.xlu1 %v6678_v62, %s10943_s6 }
0x24a9   :  { %v13102_v16 = vpop.eup %10673 }
0x24aa   :  { %6324 = vrot.lane.b32.xlu0 %v13102_v16, %s10943_s6  ;;  %v10676_v46 = vpop.eup %10675 }
0x24ab   :  { %v5740_v1 = vadd.f32 1.0, %v10676_v46 }
0x24ad   :  { %10677 = vrcp.f32 %v5740_v1  ;;  %v13184_v1 = vld [vmem:[#allocation3 + $0x38] sm:$0xff] }
0x24ae   :  { %5744 = vrot.lane.b32.xlu0 %v5733_v18, %s10943_s6 }
0x24ba   :  { %v10678_v7 = vpop.eup %10677 }
0x250c   :  { %v6669_v28 = vpop.permute.xlu0 %6668 }
0x250d   :  { %v6671_v5 = vadd.f32 %v6669_v28, %v12987_v52  ;;  %v13128_v52 = vld [vmem:[#allocation17 + $0x8] sm:$0xff] }
0x250f   :  { %6686 = vst.msk [vmem:[#allocation2] sm:$0xff] %vm155_vm1, %v6671_v5  ;;  %v6672_v19 = vmul.f32 %v6671_v5, %v13017_v29 }
0x2510   :  { %v6681_v32 = vpop.permute.xlu1 %6680 }
0x2511   :  { %v6683_v17 = vadd.f32 %v6681_v32, %v12998_v11  ;;  %v13132_v11 = vld [vmem:[#allocation17] sm:$0xff] }
0x2513   :  { %v6684_v38 = vmul.f32 %v6683_v17, %v13022_v55  ;;  %6687 = vst.msk [vmem:[#allocation2 + $0x8] sm:$0xff] %vm155_vm1, %v6683_v17  ;;  %v13138_v55 = vld [vmem:[%s13939_s19 + $0x30] sm:$0xff] }
0x2515   :  { %v6685_v12 = vadd.f32 %v6684_v38, %v6672_v19 }
0x2517   :  { %10275 = vmatmul.mubr.msk.f32.vlgmr.msra.gmra.mxu0 %vm155_vm1, %v6685_v12 }
0x2518   :  { %10289 = vmatpush3.msra.mxu0 %v13119_v53  ;;  %10296 = vmatprep.mubr.msk.f32.mxu0 %vm10942_vm2, %v13949_v4 }
0x2519   :  { %10290 = vmatprep.subr.mxu0 %v13949_v4 }
0x251a   :  { %10291 = vmatpush3.msra.mxu0 %v13122_v21 }
0x251b   :  { %10292 = vmatprep.subr.mxu0 %v13949_v4 }
0x251c   :  { %10293 = vmatpush3.msra.mxu0 %v13128_v52  ;;  %v6325_v29 = vpop.permute.xlu0 %6324 }
0x251d   :  { %v6327_v51 = vsub.f32 %v13042_v63, %v6325_v29  ;;  %10294 = vmatprep.subr.mxu0 %v13949_v4 }
0x251e   :  { %10295 = vmatpush3.msra.mxu0 %v13132_v11 }
0x251f   :  { %10297 = vmatmul.mubr.msk.f32.vlgmr.msra.gmra.mxu0 %vm155_vm1, %v13138_v55  ;;  %6329 = vrot.lane.b32.xlu1 %v6327_v51, %s10944_s0 }
0x2520   :  { %v5745_v34 = vpop.permute.xlu0 %5744  ;;  %10310 = vmatprep.subr.mxu0 %v13949_v4  ;;  %10318 = vmatprep.mubr.msk.f32.mxu0 %vm10942_vm2, %v13949_v4 }
0x2521   :  { %v5747_v57 = vmul.f32 %v10678_v7, %v5745_v34 }
0x2523   :  { %5749 = vrot.lane.b32.xlu0 %v5747_v57, %s10943_s6 }
0x2591   :  { %v6330_v63 = vpop.permute.xlu1 %6329 }
0x2592   :  { %v6332_v60 = vmul.f32 %v13092_v15, %v6330_v63 }
0x2594   :  { %6334 = vrot.lane.b32.xlu1 %v6332_v60, %s10944_s0 }
0x2595   :  { %v5750_v59 = vpop.permute.xlu0 %5749 }
0x2596   :  { %v5752_v58 = vadd.f32 %v5750_v59, %v5649_v45 }
0x2598   :  { %10679 = vtanh.f32 %v5752_v58 }
0x25a5   :  { %v13152_v37 = vpop.eup %10679 }
0x25a6   :  { %5755 = vrot.lane.b32.xlu0 %v13152_v37, %s10943_s6 }
0x25d7   :  { %v13156_v13 = vpop.f32.mrf.mxu0 }
0x25d9   :  { %v10276_v20 = vpop.f32.mrf.mxu0 }
0x25df   :  { %v6998_v3 = vpop.f32.mrf.mxu0 }
0x25e0   :  { %v7003_v14 = vmul.f32 %v6998_v3, %v13158_v39  ;;  %v7004_v10 = vmul.f32 %v6998_v3, %v12917_v26  ;;  %v7006_v42 = vmul.f32 %v6998_v3, %v12930_v9  ;;  %v7008_v41 = vmul.f32 %v6998_v3, %v13163_v24 }
0x25e1   :  { %v10298_v22 = vpop.f32.mrf.mxu0  ;;  %v7002_v45 = vmul.f32 %v6998_v3, %v12914_v23  ;;  %v7005_v46 = vmul.f32 %v6998_v3, %v13175_v47  ;;  %v7009_v19 = vmul.f32 %v6998_v3, %v13184_v1 }
0x25e2   :  { %v7013_v15 = vsel %vm155_vm1, %v7003_v14, 0.0  ;;  %v7016_v2 = vsel %vm155_vm1, %v7004_v10, 0.0  ;;  %v7022_v61 = vsel %vm155_vm1, %v7006_v42, 0.0  ;;  %v7028_v0 = vsel %vm155_vm1, %v7008_v41, 0.0 }
0x25e3   :  { %7014 = vadd.xlane.f32.xlu0 %v7013_v15  ;;  %v7010_v40 = vsel %vm155_vm1, %v7002_v45, 0.0  ;;  %v7019_v28 = vsel %vm155_vm1, %v7005_v46, 0.0  ;;  %v7031_v12 = vsel %vm155_vm1, %v7009_v19, 0.0 }
0x25e7   :  { %7017 = vadd.xlane.f32.xlu0 %v7016_v2 }
0x25eb   :  { %7023 = vadd.xlane.f32.xlu0 %v7022_v61 }
0x25ef   :  { %7029 = vadd.xlane.f32.xlu0 %v7028_v0 }
0x2606   :  { %v6335_v6 = vpop.permute.xlu1 %6334 }
0x2607   :  { %v6337_v25 = vadd.f32 %v13102_v16, %v6335_v6 }
0x2609   :  { %6339 = vrot.lane.b32.xlu1 %v6337_v25, %s10943_s6 }
0x2618   :  { %v5756_v62 = vpop.permute.xlu0 %5755 }
0x2619   :  { %v5758_v18 = vsub.f32 %v13010_v54, %v5756_v62 }
0x261b   :  { %5760 = vrot.lane.b32.xlu0 %v5758_v18, %s10944_s0 }
0x262d   :  { %7011 = vadd.xlane.f32.xlu1 %v7010_v40 }
0x2631   :  { %7020 = vadd.xlane.f32.xlu1 %v7019_v28 }
0x266c   :  { %v7015_v54 = vpop.xlane.xlu0 %7014 }
0x266d   :  { %v7050_v60 = vrot.slane %v7015_v54, %v11553_v8 }
0x2670   :  { %v7018_v38 = vpop.xlane.xlu0 %7017 }
0x2671   :  { %v7054_v58 = vrot.slane %v7018_v38, %v11553_v8 }
0x2674   :  { %v7024_v29 = vpop.xlane.xlu0 %7023 }
0x2675   :  { %v7062_v15 = vrot.slane %v7024_v29, %v11553_v8 }
0x2678   :  { %v7030_v51 = vpop.xlane.xlu0 %7029 }
0x2679   :  { %v7070_v41 = vrot.slane %v7030_v51, %v11553_v8 }
0x267b   :  { %v6340_v16 = vpop.permute.xlu1 %6339 }
0x267c   :  { %6343 = vst.msk [vmem:[#allocation3 + $0x28] sm:$0xff] %vm155_vm1, %v6340_v16  ;;  %6344 = vst.msk [vmem:[#allocation4] sm:$0xff] %vm155_vm1, %v6340_v16 }
0x2683   :  { %v13182_v5 = vld [vmem:[#allocation3 + $0x28] sm:$0xff] }
0x2684   :  { %v7007_v32 = vmul.f32 %v6998_v3, %v13182_v5 }
0x2686   :  { %v7025_v17 = vsel %vm155_vm1, %v7007_v32, 0.0 }
0x2687   :  { %7026 = vadd.xlane.f32.xlu1 %v7025_v17 }
0x268b   :  { %7032 = vadd.xlane.f32.xlu1 %v7031_v12 }
0x268d   :  { %v5761_v34 = vpop.permute.xlu0 %5760 }
0x268e   :  { %v5763_v57 = vmul.f32 %v10678_v7, %v5761_v34 }
0x269c   :  { %5765 = vrot.lane.b32.xlu1 %v5763_v57, %s10944_s0 }
0x26b6   :  { %v7012_v63 = vpop.xlane.xlu1 %7011 }
0x26b7   :  { %v7046_v59 = vrot.slane %v7012_v63, %v11553_v8 }
0x26b9   :  { %v7075_v20 = vsel %vm349_vm3, %v7050_v60, %v7046_v59  ;;  %v13212_v59 = vld [vmem:[%s13851_s2 + $0x18] sm:$0xff] }
0x26ba   :  { %v7076_v3 = vsel %vm351_vm4, %v7054_v58, %v7075_v20  ;;  %v7021_v14 = vpop.xlane.xlu1 %7020  ;;  %10311 = vmatpush3.msra.mxu0 %v13212_v59  ;;  %v13219_v58 = vld [vmem:[%s13851_s2 + $0x10] sm:$0xff]  ;;  %v13226_v20 = vld [vmem:[%s13851_s2 + $0x8] sm:$0xff] }
0x26bb   :  { %v7058_v22 = vrot.slane %v7021_v14, %v11553_v8  ;;  %10312 = vmatprep.subr.mxu0 %v13949_v4 }
0x26bc   :  { %10313 = vmatpush3.msra.mxu0 %v13219_v58 }
0x26bd   :  { %v7077_v7 = vsel %vm353_vm5, %v7058_v22, %v7076_v3  ;;  %10314 = vmatprep.subr.mxu0 %v13949_v4  ;;  %v13233_v22 = vld [vmem:[%s13851_s2] sm:$0xff] }
0x26be   :  { %v7078_v10 = vsel %vm355_vm6, %v7062_v15, %v7077_v7  ;;  %10315 = vmatpush3.msra.mxu0 %v13226_v20 }
0x26bf   :  { %10316 = vmatprep.subr.mxu0 %v13949_v4 }
0x26c0   :  { %10317 = vmatpush3.msra.mxu0 %v13233_v22 }
0x26c1   :  { %10319 = vmatmul.mubr.msk.f32.vlgmr.msra.gmra.mxu0 %vm155_vm1, %v13138_v55  ;;  %10332 = vmatprep.subr.mxu0 %v13949_v4 }
0x26c2   :  { %10340 = vmatprep.mubr.msk.f32.mxu0 %vm10942_vm2, %v13949_v4 }
0x2710   :  { %v7027_v2 = vpop.xlane.xlu1 %7026 }
0x2711   :  { %v7066_v42 = vrot.slane %v7027_v2, %v11553_v8  ;;  %v13250_v2 = vld [vmem:[%s13857_s8 + $0x10] sm:$0xff] }
0x2713   :  { %v7079_v61 = vsel %vm357_vm7, %v7066_v42, %v7078_v10  ;;  %v13243_v10 = vld [vmem:[%s13857_s8 + $0x18] sm:$0xff] }
0x2714   :  { %v7080_v0 = vsel %vm359_vm8, %v7070_v41, %v7079_v61  ;;  %v7033_v6 = vpop.xlane.xlu1 %7032  ;;  %10333 = vmatpush3.msra.mxu0 %v13243_v10  ;;  %v13261_v61 = vld [vmem:[%s13857_s8 + $0x8] sm:$0xff] }
0x2715   :  { %v7074_v25 = vrot.slane %v7033_v6, %v11553_v8  ;;  %10334 = vmatprep.subr.mxu0 %v13949_v4  ;;  %v13267_v6 = vld [vmem:[#allocation13 + $0x10] sm:$0xff] }
0x2716   :  { %10335 = vmatpush3.msra.mxu0 %v13250_v2 }
0x2717   :  { %v7081_v62 = vsel %vm361_vm9, %v7074_v25, %v7080_v0  ;;  %v13263_v0 = vld [vmem:[#allocation13 + $0x18] sm:$0xff]  ;;  %10336 = vmatprep.subr.mxu0 %v13949_v4 }
0x2718   :  { %v7083_v18 = vsel %vm7034_vm15, %v7081_v62, -1e+30  ;;  %10278 = vmatpush3.msra.mxu1 %v13263_v0  ;;  %10337 = vmatpush3.msra.mxu0 %v13261_v61 }
0x2719   :  { %v7084_v45 = vsel %vm365_vm0, %v7083_v18, -inf  ;;  %10279 = vmatprep.subr.mxu1 %v13949_v4  ;;  %10338 = vmatprep.subr.mxu0 %v13949_v4 }
0x271a   :  { %v7085_v40 = vrot.slane %v7084_v45, 4  ;;  %10280 = vmatpush3.msra.mxu1 %v13267_v6 }
0x271b   :  { %10281 = vmatprep.subr.mxu1 %v13949_v4 }
0x271c   :  { %v7086_v46 = vmax.f32 %v7084_v45, %v7085_v40  ;;  %v13282_v45 = vld [vmem:[%s13858_s9 + $0x18] sm:$0xff]  ;;  %v13285_v40 = vld [vmem:[#allocation13 + $0x8] sm:$0xff] }
0x271d   :  { %10282 = vmatpush3.msra.mxu1 %v13285_v40 }
0x271e   :  { %v7087_v28 = vrot.slane %v7086_v46, 2  ;;  %10283 = vmatprep.subr.mxu1 %v13949_v4 }
0x2720   :  { %v7088_v16 = vmax.f32 %v7086_v46, %v7087_v28 }
0x2722   :  { %v7089_v54 = vrot.slane %v7088_v16, 1 }
0x2724   :  { %v7090_v32 = vmax.f32 %v7088_v16, %v7089_v54  ;;  %v13293_v16 = vld [vmem:[#allocation13] sm:$0xff]  ;;  %v5766_v54 = vpop.permute.xlu1 %5765 }
0x2725   :  { %10284 = vmatpush3.msra.mxu1 %v13293_v16 }
0x2726   :  { %v7091_v17 = vsub.f32 %v7083_v18, %v7090_v32  ;;  %v13275_v18 = vld [vmem:[%s13857_s8] sm:$0xff]  ;;  %v9281_v32 = vld [vmem:[%s13940_s23 + $0x30] sm:$0xff]  ;;  %10299 = vmatprep.subr.mxu1 %v13949_v4 }
0x2727   :  { %10339 = vmatpush3.msra.mxu0 %v13275_v18 }
0x2728   :  { %v7092_v19 = vmul.f32 1.442695, %v7091_v17  ;;  %10354 = vmatprep.subr.mxu0 %v13282_v45  ;;  %v5768_v17 = vadd.f32 %v13152_v37, %v5766_v54 }
0x272a   :  { %10681 = vpow2.f32 %v7092_v19 }
0x2737   :  { %v10682_v38 = vpop.eup %10681 }
0x2738   :  { %v7094_v12 = vsel %vm365_vm0, %v10682_v38, 0.0 }
0x2739   :  { %v7095_v29 = vrot.slane %v7094_v12, 4 }
0x273b   :  { %v7096_v51 = vadd.f32 %v7095_v29, %v7094_v12 }
0x273d   :  { %v7097_v34 = vrot.slane %v7096_v51, 2 }
0x273f   :  { %v7098_v57 = vadd.f32 %v7097_v34, %v7096_v51 }
0x2741   :  { %v7099_v63 = vrot.slane %v7098_v57, 1 }
0x2743   :  { %v7100_v60 = vadd.f32 %v7099_v63, %v7098_v57 }
0x2745   :  { %10683 = vrcp.f32 %v7100_v60 }
0x2752   :  { %v10684_v3 = vpop.eup %10683 }
0x2753   :  { %v7102_v14 = vmul.f32 %v10684_v3, %v10682_v38 }
0x2755   :  { %v7113_v15 = vrot.slane %v7102_v14, %v11160_v36  ;;  %v7106_v7 = vrot.slane %v7102_v14, %v11147_v31  ;;  %v7127_v42 = vrot.slane %v7102_v14, %v11157_v35  ;;  %v7120_v41 = vrot.slane %v7102_v14, %v11144_v30 }
0x2756   :  { %v7141_v25 = vrot.slane %v7102_v14, %v11182_v43  ;;  %v7134_v62 = vrot.slane %v7102_v14, %v11185_v44  ;;  %v7155_v46 = vrot.slane %v7102_v14, %v11205_v49  ;;  %v7148_v28 = vrot.slane %v7102_v14, %v11208_v50 }
0x2757   :  { %7115 = vbcast.lane.b32.xlu0 %v7113_v15, 256  ;;  %7108 = vbcast.lane.b32.xlu1 %v7106_v7, 256 }
0x275b   :  { %7129 = vbcast.lane.b32.xlu0 %v7127_v42, 256  ;;  %7122 = vbcast.lane.b32.xlu1 %v7120_v41, 256 }
0x275f   :  { %7143 = vbcast.lane.b32.xlu0 %v7141_v25, 256  ;;  %7136 = vbcast.lane.b32.xlu1 %v7134_v62, 256 }
0x2763   :  { %7157 = vbcast.lane.b32.xlu0 %v7155_v46, 256  ;;  %7150 = vbcast.lane.b32.xlu1 %v7148_v28, 256 }
0x2767   :  { %6906 = vperm.xlu0 %10515, %v9281_v32   ;;  %5770 = vrot.lane.b32.xlu1 %v5768_v17, %s10943_s6 }
0x276b   :  { %6912 = vperm.xlu1 %10516, %v9281_v32   ;;  %10518 = vset.pattern.permute.xlu0 %v13952_v56 }
0x276f   :  { %10517 = vset.pattern.permute.xlu1 %v13951_v48 }
0x27c9   :  { %v7116_v19 = vpop.permute.xlu0 %7115  ;;  %v7109_v38 = vpop.permute.xlu1 %7108 }
0x27ca   :  { %v7160_v12 = vmul.f32 %v7116_v19, %v13158_v39  ;;  %v7159_v29 = vmul.f32 %v7109_v38, %v12914_v23 }
0x27cc   :  { %v7168_v51 = vsel %vm155_vm1, %v7160_v12, 0.0  ;;  %v7167_v37 = vsel %vm155_vm1, %v7159_v29, 0.0 }
0x27cd   :  { %v7130_v34 = vpop.permute.xlu0 %7129  ;;  %v7123_v57 = vpop.permute.xlu1 %7122  ;;  %v7169_v3 = vadd.f32 %v7168_v51, %v7167_v37  ;;  %v13329_v51 = vld [vmem:[%s13858_s9 + $0x10] sm:$0xff]  ;;  %v13340_v37 = vld [vmem:[%s13858_s9 + $0x8] sm:$0xff] }
0x27ce   :  { %v7162_v63 = vmul.f32 %v7130_v34, %v13175_v47  ;;  %v7161_v60 = vmul.f32 %v7123_v57, %v12917_v26  ;;  %14023 = vst [vmem:[#allocation39_spill] sm:$0xff] %v13340_v37  ;;  %v13347_v34 = vld [vmem:[%s13858_s9] sm:$0xff]  ;;  %v13352_v57 = vld [vmem:[%s13852_s3 + $0x18] sm:$0xff] }
0x27cf   :  { %14024 = vst [vmem:[#allocation24_spill] sm:$0xff] %v13347_v34 }
0x27d0   :  { %v7170_v56 = vsel %vm155_vm1, %v7161_v60, 0.0  ;;  %v7172_v7 = vsel %vm155_vm1, %v7162_v63, 0.0  ;;  %v13363_v60 = vld [vmem:[%s13852_s3 + $0x10] sm:$0xff] }
0x27d1   :  { %v7171_v48 = vadd.f32 %v7170_v56, %v7169_v3  ;;  %v7144_v14 = vpop.permute.xlu0 %7143  ;;  %v7137_v15 = vpop.permute.xlu1 %7136  ;;  %v13371_v56 = vld [vmem:[#allocation2 + $0x8] sm:$0xff] }
0x27d2   :  { %v7164_v23 = vmul.f32 %v7144_v14, %v13182_v5  ;;  %v7163_v42 = vmul.f32 %v7137_v15, %v12930_v9  ;;  %v13387_v15 = vld [vmem:[%s13852_s3] sm:$0xff] }
0x27d3   :  { %v7173_v41 = vadd.f32 %v7172_v7, %v7171_v48  ;;  %v13376_v48 = vld [vmem:[%s13852_s3 + $0x8] sm:$0xff] }
0x27d4   :  { %v7174_v25 = vsel %vm155_vm1, %v7163_v42, 0.0  ;;  %v7176_v26 = vsel %vm155_vm1, %v7164_v23, 0.0 }
0x27d5   :  { %v7175_v62 = vadd.f32 %v7174_v25, %v7173_v41  ;;  %v7158_v46 = vpop.permute.xlu0 %7157  ;;  %v7151_v28 = vpop.permute.xlu1 %7150  ;;  %v13403_v41 = vld [vmem:[%s13853_s4 + $0x18] sm:$0xff]  ;;  %v13431_v25 = vld [vmem:[%s13853_s4] sm:$0xff] }
0x27d6   :  { %v7166_v54 = vmul.f32 %v7158_v46, %v13184_v1  ;;  %v7165_v32 = vmul.f32 %v7151_v28, %v13163_v24  ;;  %v13332_v24 = vld [vmem:[#allocation2] sm:$0xff]  ;;  %14025 = vst [vmem:[#allocation27_spill] sm:$0xff] %v13403_v41  ;;  %14028 = vst [vmem:[#allocation26_spill] sm:$0xff] %v13431_v25  ;;  %v13462_v46 = vld [vmem:[%s13856_s7 + $0x8] sm:$0xff] }
0x27d7   :  { %v7177_v17 = vadd.f32 %v7176_v26, %v7175_v62  ;;  %v13445_v62 = vld [vmem:[#allocation4] sm:$0xff]  ;;  %14031 = vst [vmem:[#allocation31_spill] sm:$0xff] %v13462_v46  ;;  %v13469_v28 = vld [vmem:[%s13856_s7] sm:$0xff]  ;;  %v7329_v26 = vpop.f32.mrf.mxu0 }
0x27d8   :  { %v7178_v19 = vsel %vm155_vm1, %v7165_v32, 0.0  ;;  %v7180_v29 = vsel %vm155_vm1, %v7166_v54, 0.0  ;;  %14032 = vst [vmem:[#allocation32_spill] sm:$0xff] %v13469_v28 }
0x27d9   :  { %v7179_v38 = vadd.f32 %v7178_v19, %v7177_v17  ;;  %v5771_v12 = vpop.permute.xlu1 %5770  ;;  %v10320_v54 = vpop.f32.mrf.mxu0 }
0x27da   :  { %5773 = vst.msk [vmem:[#allocation5] sm:$0xff] %vm155_vm1, %v5771_v12  ;;  %9256 = vst.msk [vmem:[%s13866_s17 + $0x20] sm:$0xff] %vm155_vm1, %v5771_v12 }
0x27db   :  { %v7181_v9 = vadd.f32 %v7180_v29, %v7179_v38  ;;  %v13481_v38 = vld [vmem:[#allocation10] ss:$0 sm:$0xff] }
0x27dc   :  { %14033 = vst [vmem:[#allocation33_spill] sm:$0xff] %v13481_v38 }
0x27dd   :  { %10341 = vmatmul.mubr.msk.f32.vlgmr.msra.gmra.mxu0 %vm155_vm1, %v7181_v9 }
0x27de   :  { %10355 = vmatpush3.msra.mxu0 %v13282_v45  ;;  %10362 = vmatprep.mubr.msk.f32.mxu0 %vm155_vm1, %v13332_v24 }
0x27df   :  { %10356 = vmatprep.subr.mxu0 %v13329_v51 }
0x27e0   :  { %10357 = vmatpush3.msra.mxu0 %v13329_v51 }
0x27e1   :  { %10358 = vmatprep.subr.mxu0 %v13340_v37  ;;  %v13355_v63 = vld [vmem:[#allocation5] sm:$0xff] }
0x27e2   :  { %10359 = vmatpush3.msra.mxu0 %v13340_v37  ;;  %10286 = vmatmul.mubr.msk.f32.vlgmr.msra.gmra.mxu1 %vm155_vm1, %v13355_v63  ;;  %v13367_v3 = vpop.permute.xlu0 %6906 }
0x27e3   :  { %10360 = vmatprep.subr.mxu0 %v13347_v34  ;;  %10300 = vmatpush3.msra.mxu1 %v13352_v57  ;;  %v6909_v7 = vmul.f32 %v13367_v3, %v13332_v24 }
0x27e4   :  { %10361 = vmatpush3.msra.mxu0 %v13347_v34  ;;  %10301 = vmatprep.subr.mxu1 %v13949_v4 }
0x27e5   :  { %10363 = vmatmul.mubr.msk.f32.vlgmr.msra.gmra.mxu0 %vm155_vm1, %v13371_v56  ;;  %10302 = vmatpush3.msra.mxu1 %v13363_v60 }
0x27e6   :  { %10303 = vmatprep.subr.mxu1 %v13949_v4  ;;  %v13382_v14 = vpop.permute.xlu1 %6912  ;;  %10307 = vmatprep.mubr.msk.f32.mxu1 %vm10942_vm2, %v13949_v4 }
0x27e7   :  { %v6915_v23 = vmul.f32 %v13382_v14, %v13371_v56  ;;  %10304 = vmatpush3.msra.mxu1 %v13376_v48  ;;  %10376 = vmatprep.subr.mxu0 %v13949_v4 }
0x27e8   :  { %10305 = vmatprep.subr.mxu1 %v13949_v4  ;;  %10377 = vmatpush3.msra.mxu0 %v13263_v0  ;;  %v13412_v0 = vld [vmem:[%s13853_s4 + $0x10] sm:$0xff] }
0x27e9   :  { %v6916_v42 = vadd.f32 %v6915_v23, %v6909_v7  ;;  %10306 = vmatpush3.msra.mxu1 %v13387_v15  ;;  %10378 = vmatprep.subr.mxu0 %v13949_v4  ;;  %14026 = vst [vmem:[#allocation25_spill] sm:$0xff] %v13412_v0 }
0x27ea   :  { %10321 = vmatprep.subr.mxu1 %v13949_v4  ;;  %10379 = vmatpush3.msra.mxu0 %v13267_v6  ;;  %v13422_v6 = vld [vmem:[%s13853_s4 + $0x8] sm:$0xff] }
0x27eb   :  { %10308 = vmatmul.mubr.msk.f32.vlgmr.msra.gmra.mxu1 %vm155_vm1, %v6916_v42  ;;  %10380 = vmatprep.subr.mxu0 %v13949_v4  ;;  %14027 = vst [vmem:[#allocation28_spill] sm:$0xff] %v13422_v6 }
0x27ec   :  { %10322 = vmatpush3.msra.mxu1 %v13403_v41  ;;  %10329 = vmatprep.mubr.msk.f32.mxu1 %vm10942_vm2, %v13949_v4 }
0x27ed   :  { %10323 = vmatprep.subr.mxu1 %v13949_v4  ;;  %10381 = vmatpush3.msra.mxu0 %v13285_v40  ;;  %v13441_v40 = vld [vmem:[%s13856_s7 + $0x18] sm:$0xff] }
0x27ee   :  { %10324 = vmatpush3.msra.mxu1 %v13412_v0  ;;  %10382 = vmatprep.subr.mxu0 %v13949_v4  ;;  %14029 = vst [vmem:[#allocation29_spill] sm:$0xff] %v13441_v40 }
0x27ef   :  { %10325 = vmatprep.subr.mxu1 %v13949_v4  ;;  %10383 = vmatpush3.msra.mxu0 %v13293_v16  ;;  %v13453_v16 = vld [vmem:[%s13856_s7 + $0x10] sm:$0xff] }
0x27f0   :  { %10326 = vmatpush3.msra.mxu1 %v13422_v6  ;;  %10384 = vmatprep.mubr.msk.f32.mxu0 %vm10942_vm2, %v13949_v4  ;;  %14030 = vst [vmem:[#allocation30_spill] sm:$0xff] %v13453_v16 }
0x27f1   :  { %10327 = vmatprep.subr.mxu1 %v13949_v4  ;;  %10398 = vmatprep.subr.mxu0 %v13949_v4 }
0x27f2   :  { %10328 = vmatpush3.msra.mxu1 %v13431_v25 }
0x27f3   :  { %10330 = vmatmul.mubr.msk.f32.vlgmr.msra.gmra.mxu1 %vm155_vm1, %v13445_v62  ;;  %10343 = vmatprep.subr.mxu1 %v13949_v4 }
0x27f4   :  { %10344 = vmatpush3.msra.mxu1 %v13441_v40  ;;  %10351 = vmatprep.mubr.msk.f32.mxu1 %vm10942_vm2, %v13949_v4 }
0x27f5   :  { %10345 = vmatprep.subr.mxu1 %v13949_v4 }
0x27f6   :  { %10346 = vmatpush3.msra.mxu1 %v13453_v16 }
0x27f7   :  { %10347 = vmatprep.subr.mxu1 %v13949_v4 }
0x27f8   :  { %10348 = vmatpush3.msra.mxu1 %v13462_v46 }
0x27f9   :  { %10349 = vmatprep.subr.mxu1 %v13949_v4 }
0x27fa   :  { %10350 = vmatpush3.msra.mxu1 %v13469_v28 }
0x27fb   :  { %10352 = vmatmul.mubr.msk.f32.vlgmr.msra.gmra.mxu1 %vm155_vm1, %v13138_v55  ;;  %10365 = vmatprep.subr.mxu1 %v13949_v4 }
0x27fc   :  { %10373 = vmatprep.mubr.msk.f32.mxu1 %vm10942_vm2, %v13949_v4 }
0x289d   :  { %v7542_v32 = vpop.f32.mrf.mxu0 }
0x289f   :  { %v10342_v17 = vpop.f32.mrf.mxu0 }
0x28a2   :  { %v13479_v19 = vpop.f32.mrf.mxu1 }
0x28a4   :  { %v10287_v12 = vpop.f32.mrf.mxu1 }
0x28a5   :  { %v10364_v29 = vpop.f32.mrf.mxu0  ;;  %v13490_v12 = vld [vmem:[%s13859_s10] ss:$0 sm:$0xff] }
0x28a6   :  { %v7713_v9 = vadd.f32 %v10364_v29, %v13481_v38 }
0x28a7   :  { %v7707_v7 = vpop.f32.mrf.mxu0 }
0x28a8   :  { %v7708_v55 = vadd.f32 %v13481_v38, %v7707_v7  ;;  %7734 = vrot.lane.b32.xlu0 %v7713_v9, %s10943_s6 }
0x28aa   :  { %7732 = vrot.lane.b32.xlu1 %v7708_v55, %s10943_s6 }
0x28ab   :  { %v7259_v23 = vpop.f32.mrf.mxu1 }
0x28ad   :  { %v10309_v42 = vpop.f32.mrf.mxu1 }
0x28b3   :  { %v7421_v54 = vpop.f32.mrf.mxu1 }
0x28b5   :  { %v10331_v28 = vpop.f32.mrf.mxu1 }
0x28bb   :  { %v7612_v17 = vpop.f32.mrf.mxu1 }
0x28bc   :  { %v7613_v16 = vadd.f32 %v7612_v17, %v7542_v32 }
0x28bd   :  { %v10353_v46 = vpop.f32.mrf.mxu1 }
0x28be   :  { %v7623_v29 = vadd.f32 %v13490_v12, %v7613_v16 }
0x28c0   :  { %v7717_v40 = vadd.f32 %v7713_v9, %v7623_v29  ;;  %v7716_v7 = vadd.f32 %v7708_v55, %v7623_v29 }
0x28c2   :  { %v9296_v38 = vmul.f32 -1.442695, %v7717_v40  ;;  %v9295_v25 = vmul.f32 -1.442695, %v7716_v7 }
0x28c4   :  { %10685 = vpow2.f32 %v9296_v38 }
0x28c5   :  { %10687 = vpow2.f32 %v9295_v25 }
0x28d1   :  { %v10686_v6 = vpop.eup %10685 }
0x28d2   :  { %v10688_v42 = vpop.eup %10687  ;;  %v7725_v0 = vadd.f32 1.0, %v10686_v6 }
0x28d3   :  { %v7724_v28 = vadd.f32 1.0, %v10688_v42  ;;  %v7330_v42 = vadd.f32 %v7329_v26, %v7259_v23 }
0x28d4   :  { %10689 = vrcp.f32 %v7725_v0 }
0x28d5   :  { %10691 = vrcp.f32 %v7724_v28  ;;  %v13505_v28 = vld [vmem:[#allocation6] ss:$0 sm:$0xff] }
0x28d6   :  { %14034 = vst [vmem:[#allocation34_spill] sm:$0xff] %v13505_v28 }
0x28e1   :  { %v10690_v46 = vpop.eup %10689 }
0x28e2   :  { %v10692_v41 = vpop.eup %10691 }
0x291a   :  { %v7735_v32 = vpop.permute.xlu0 %7734 }
0x291b   :  { %v7739_v17 = vmul.f32 %v10690_v46, %v7735_v32  ;;  %v7340_v32 = vadd.f32 %v13505_v28, %v7330_v42 }
0x291c   :  { %v7733_v34 = vpop.permute.xlu1 %7732 }
0x291d   :  { %v7738_v37 = vmul.f32 %v10692_v41, %v7733_v34  ;;  %7744 = vrot.lane.b32.xlu0 %v7739_v17, %s10943_s6 }
0x291f   :  { %7742 = vrot.lane.b32.xlu1 %v7738_v37, %s10943_s6  ;;  %v13500_v37 = vld [vmem:[#allocation8] ss:$0 sm:$0xff] }
0x298f   :  { %v7745_v40 = vpop.permute.xlu0 %7744 }
0x2990   :  { %v7749_v16 = vadd.f32 %v7745_v40, %v7623_v29 }
0x2991   :  { %v7743_v38 = vpop.permute.xlu1 %7742 }
0x2992   :  { %10693 = vtanh.f32 %v7749_v16  ;;  %v7748_v25 = vadd.f32 %v7743_v38, %v7623_v29  ;;  %v7422_v29 = vadd.f32 %v13500_v37, %v7421_v54 }
0x2994   :  { %10695 = vtanh.f32 %v7748_v25  ;;  %v7425_v17 = vadd.f32 %v7422_v29, %v7340_v32 }
0x2996   :  { %v9288_v40 = vmul.f32 -1.442695, %v7425_v17  ;;  %v13530_v17 = vld [vmem:[#allocation11] sm:$0xff] }
0x2998   :  { %10697 = vpow2.f32 %v9288_v40 }
0x299f   :  { %v10694_v6 = vpop.eup %10693 }
0x29a0   :  { %7756 = vrot.lane.b32.xlu0 %v10694_v6, %s10943_s6 }
0x29a1   :  { %v10696_v0 = vpop.eup %10695 }
0x29a2   :  { %7754 = vrot.lane.b32.xlu1 %v10696_v0, %s10943_s6 }
0x29a5   :  { %v10698_v16 = vpop.eup %10697 }
0x29a6   :  { %v7429_v38 = vadd.f32 1.0, %v10698_v16 }
0x29a8   :  { %10699 = vrcp.f32 %v7429_v38 }
0x29b5   :  { %v13514_v23 = vpop.eup %10699 }
0x2a12   :  { %v7757_v9 = vpop.permute.xlu0 %7756 }
0x2a13   :  { %v7761_v55 = vsub.f32 %v13371_v56, %v7757_v9 }
0x2a14   :  { %v7755_v34 = vpop.permute.xlu1 %7754 }
0x2a15   :  { %v7760_v7 = vsub.f32 %v13332_v24, %v7755_v34  ;;  %7766 = vrot.lane.b32.xlu0 %v7761_v55, %s10944_s0 }
0x2a17   :  { %7764 = vrot.lane.b32.xlu1 %v7760_v7, %s10944_s0 }
0x2a1b   :  { %7433 = vrot.lane.b32.xlu1 %v7422_v29, %s10943_s6  ;;  %v13526_v29 = vld [vmem:[#allocation11 + $0x8] sm:$0xff] }
0x2a87   :  { %v7767_v25 = vpop.permute.xlu0 %7766 }
0x2a88   :  { %v7771_v9 = vmul.f32 %v10690_v46, %v7767_v25  ;;  %v13518_v46 = vld [vmem:[#allocation11 + $0x18] sm:$0xff] }
0x2a89   :  { %v7765_v55 = vpop.permute.xlu1 %7764  ;;  %10366 = vmatpush3.msra.mxu1 %v13518_v46 }
0x2a8a   :  { %v7770_v34 = vmul.f32 %v10692_v41, %v7765_v55  ;;  %7776 = vrot.lane.b32.xlu1 %v7771_v9, %s10944_s0  ;;  %10367 = vmatprep.subr.mxu1 %v13949_v4  ;;  %v13522_v41 = vld [vmem:[#allocation11 + $0x10] sm:$0xff] }
0x2a8b   :  { %10368 = vmatpush3.msra.mxu1 %v13522_v41 }
0x2a8c   :  { %7774 = vrot.lane.b32.xlu0 %v7770_v34, %s10944_s0  ;;  %10369 = vmatprep.subr.mxu1 %v13949_v4 }
0x2a8d   :  { %v7434_v26 = vpop.permute.xlu1 %7433  ;;  %10370 = vmatpush3.msra.mxu1 %v13526_v29 }
0x2a8e   :  { %7794 = vrot.lane.b32.xlu1 %v13371_v56, %s10943_s6  ;;  %v7436_v54 = vmul.f32 %v13514_v23, %v7434_v26  ;;  %10371 = vmatprep.subr.mxu1 %v13949_v4 }
0x2a8f   :  { %10372 = vmatpush3.msra.mxu1 %v13530_v17 }
0x2a90   :  { %7782 = vrot.lane.b32.xlu0 %v13332_v24, %s10943_s6  ;;  %10387 = vmatprep.subr.mxu1 %v13949_v4 }
0x2a94   :  { %7438 = vrot.lane.b32.xlu0 %v7436_v54, %s10943_s6 }
0x2afc   :  { %v7777_v7 = vpop.permute.xlu1 %7776 }
0x2afd   :  { %v7781_v40 = vadd.f32 %v10694_v6, %v7777_v7  ;;  %v13540_v7 = vld [vmem:[#allocation16] ss:$0 sm:$0xff] }
0x2afe   :  { %v7775_v42 = vpop.permute.xlu0 %7774 }
0x2aff   :  { %v7780_v38 = vadd.f32 %v10696_v0, %v7775_v42  ;;  %v6853_v0 = vadd.f32 %v13540_v7, %v13479_v19  ;;  %v6769_v42 = vadd.f32 %v13109_v33, %v13156_v13  ;;  %v13566_v13 = vld [vmem:[%s13939_s19 + $0x38] sm:$0xff] }
0x2b00   :  { %v7795_v16 = vpop.permute.xlu1 %7794 }
0x2b01   :  { %v7797_v25 = vsub.f32 %v7781_v40, %v7795_v16  ;;  %v6856_v40 = vadd.f32 %v6853_v0, %v6769_v42 }
0x2b02   :  { %v7783_v9 = vpop.permute.xlu0 %7782 }
0x2b03   :  { %v7798_v55 = vmul.f32 %v7797_v25, %v13382_v14  ;;  %v7785_v34 = vsub.f32 %v7780_v38, %v7783_v9 }
0x2b05   :  { %v7786_v26 = vmul.f32 %v7785_v34, %v13367_v3  ;;  %7800 = vrot.lane.b32.xlu0 %v7798_v55, %s10943_s6 }
0x2b06   :  { %v7439_v54 = vpop.permute.xlu0 %7438 }
0x2b07   :  { %v7441_v28 = vadd.f32 %v7439_v54, %v7340_v32  ;;  %7788 = vrot.lane.b32.xlu1 %v7786_v26, %s10943_s6  ;;  %v9278_v32 = vmul.f32 -1.442695, %v6856_v40  ;;  %v13620_v40 = vld [vmem:[#allocation3 + $0x10] sm:$0xff] }
0x2b09   :  { %10701 = vtanh.f32 %v7441_v28 }
0x2b0a   :  { %10703 = vpow2.f32 %v9278_v32 }
0x2b16   :  { %v13538_v6 = vpop.eup %10701 }
0x2b17   :  { %7444 = vrot.lane.b32.xlu1 %v13538_v6, %s10943_s6  ;;  %v10704_v38 = vpop.eup %10703 }
0x2b18   :  { %v6860_v55 = vadd.f32 1.0, %v10704_v38 }
0x2b1a   :  { %10705 = vrcp.f32 %v6860_v55 }
0x2b1b   :  { %6864 = vrot.lane.b32.xlu1 %v6853_v0, %s10943_s6 }
0x2b77   :  { %v7801_v16 = vpop.permute.xlu0 %7800 }
0x2b78   :  { %v7803_v28 = vadd.f32 %v7801_v16, %v13371_v56  ;;  %v13610_v56 = vld [vmem:[#allocation3 + $0x20] sm:$0xff] }
0x2b79   :  { %v7789_v25 = vpop.permute.xlu1 %7788 }
0x2b7a   :  { %7807 = vst.msk [vmem:[#allocation2 + $0x8] sm:$0xff] %vm155_vm1, %v7803_v28  ;;  %v7791_v9 = vadd.f32 %v7789_v25, %v13332_v24  ;;  %v7804_v19 = vmul.f32 %v7803_v28, %v13382_v14 }
0x2b7c   :  { %v7792_v34 = vmul.f32 %v7791_v9, %v13367_v3  ;;  %7806 = vst.msk [vmem:[#allocation2] sm:$0xff] %vm155_vm1, %v7791_v9 }
0x2b7e   :  { %v7805_v33 = vadd.f32 %v7804_v19, %v7792_v34 }
0x2b80   :  { %10374 = vmatmul.mubr.msk.f32.vlgmr.msra.gmra.mxu1 %vm155_vm1, %v7805_v33 }
0x2b81   :  { %10388 = vmatpush3.msra.mxu1 %v13119_v53  ;;  %10395 = vmatprep.mubr.msk.f32.mxu1 %vm10942_vm2, %v13949_v4 }
0x2b82   :  { %10389 = vmatprep.subr.mxu1 %v13949_v4 }
0x2b83   :  { %10390 = vmatpush3.msra.mxu1 %v13122_v21 }
0x2b84   :  { %10391 = vmatprep.subr.mxu1 %v13949_v4 }
0x2b85   :  { %10392 = vmatpush3.msra.mxu1 %v13128_v52  ;;  %v13581_v52 = vpop.eup %10705 }
0x2b86   :  { %10393 = vmatprep.subr.mxu1 %v13949_v4 }
0x2b87   :  { %10394 = vmatpush3.msra.mxu1 %v13132_v11 }
0x2b88   :  { %10396 = vmatmul.mubr.msk.f32.vlgmr.msra.gmra.mxu1 %vm155_vm1, %v13566_v13  ;;  %10409 = vmatprep.subr.mxu1 %v13949_v4 }
0x2b89   :  { %v7445_v53 = vpop.permute.xlu1 %7444  ;;  %10410 = vmatpush3.msra.mxu1 %v13212_v59  ;;  %10417 = vmatprep.mubr.msk.f32.mxu1 %vm10942_vm2, %v13949_v4 }
0x2b8a   :  { %v7447_v21 = vsub.f32 %v13445_v62, %v7445_v53  ;;  %10411 = vmatprep.subr.mxu1 %v13949_v4 }
0x2b8b   :  { %10412 = vmatpush3.msra.mxu1 %v13219_v58 }
0x2b8c   :  { %7449 = vrot.lane.b32.xlu0 %v7447_v21, %s10944_s0  ;;  %10413 = vmatprep.subr.mxu1 %v13949_v4 }
0x2b8d   :  { %v6865_v11 = vpop.permute.xlu1 %6864  ;;  %10414 = vmatpush3.msra.mxu1 %v13226_v20 }
0x2b8e   :  { %v6867_v59 = vmul.f32 %v13581_v52, %v6865_v11  ;;  %10415 = vmatprep.subr.mxu1 %v13949_v4 }
0x2b8f   :  { %10416 = vmatpush3.msra.mxu1 %v13233_v22 }
0x2b90   :  { %6869 = vrot.lane.b32.xlu1 %v6867_v59, %s10943_s6  ;;  %10431 = vmatprep.subr.mxu1 %v13949_v4 }
0x2b91   :  { %10418 = vmatmul.mubr.msk.f32.vlgmr.msra.gmra.mxu1 %vm155_vm1, %v13566_v13 }
0x2b92   :  { %10432 = vmatpush3.msra.mxu1 %v13243_v10  ;;  %10439 = vmatprep.mubr.msk.f32.mxu1 %vm10942_vm2, %v13949_v4 }
0x2b93   :  { %10433 = vmatprep.subr.mxu1 %v13949_v4 }
0x2b94   :  { %10434 = vmatpush3.msra.mxu1 %v13250_v2 }
0x2b95   :  { %10435 = vmatprep.subr.mxu1 %v13949_v4 }
0x2b96   :  { %10436 = vmatpush3.msra.mxu1 %v13261_v61 }
0x2b97   :  { %10437 = vmatprep.subr.mxu1 %v13949_v4 }
0x2b98   :  { %10438 = vmatpush3.msra.mxu1 %v13275_v18 }
0x2b99   :  { %10453 = vmatprep.subr.mxu1 %v13282_v45 }
0x2bfe   :  { %v7450_v58 = vpop.permute.xlu0 %7449 }
0x2bff   :  { %v7452_v20 = vmul.f32 %v13514_v23, %v7450_v58 }
0x2c01   :  { %7454 = vrot.lane.b32.xlu0 %v7452_v20, %s10944_s0 }
0x2c02   :  { %v6870_v22 = vpop.permute.xlu1 %6869 }
0x2c03   :  { %v6872_v10 = vadd.f32 %v6870_v22, %v6769_v42  ;;  %v13617_v42 = vld [vmem:[#allocation3] sm:$0xff] }
0x2c05   :  { %10707 = vtanh.f32 %v6872_v10 }
0x2c12   :  { %v13603_v24 = vpop.eup %10707 }
0x2c13   :  { %6875 = vrot.lane.b32.xlu1 %v13603_v24, %s10943_s6 }
0x2c40   :  { %v13607_v2 = vpop.f32.mrf.mxu1 }
0x2c42   :  { %v10375_v61 = vpop.f32.mrf.mxu1 }
0x2c48   :  { %v8118_v3 = vpop.f32.mrf.mxu1 }
0x2c49   :  { %v8123_v18 = vmul.f32 %v8118_v3, %v13158_v39  ;;  %v8126_v23 = vmul.f32 %v8118_v3, %v13610_v56  ;;  %v8122_v39 = vmul.f32 %v8118_v3, %v13617_v42  ;;  %v8124_v16 = vmul.f32 %v8118_v3, %v13620_v40 }
0x2c4a   :  { %v10397_v14 = vpop.f32.mrf.mxu1  ;;  %v8125_v38 = vmul.f32 %v8118_v3, %v13175_v47  ;;  %v8127_v25 = vmul.f32 %v8118_v3, %v13182_v5  ;;  %v8129_v9 = vmul.f32 %v8118_v3, %v13184_v1 }
0x2c4b   :  { %v8133_v62 = vsel %vm155_vm1, %v8123_v18, 0.0  ;;  %v8142_v26 = vsel %vm155_vm1, %v8126_v23, 0.0  ;;  %v8130_v32 = vsel %vm155_vm1, %v8122_v39, 0.0  ;;  %v8136_v28 = vsel %vm155_vm1, %v8124_v16, 0.0 }
0x2c4c   :  { %8134 = vadd.xlane.f32.xlu1 %v8133_v62  ;;  %v8145_v55 = vsel %vm155_vm1, %v8127_v25, 0.0  ;;  %v8151_v19 = vsel %vm155_vm1, %v8129_v9, 0.0 }
0x2c50   :  { %8143 = vadd.xlane.f32.xlu1 %v8142_v26 }
0x2c73   :  { %v7455_v54 = vpop.permute.xlu0 %7454 }
0x2c74   :  { %v7457_v0 = vadd.f32 %v13538_v6, %v7455_v54  ;;  %v8139_v6 = vsel %vm155_vm1, %v8125_v38, 0.0 }
0x2c76   :  { %7459 = vrot.lane.b32.xlu0 %v7457_v0, %s10943_s6 }
0x2c85   :  { %v6876_v53 = vpop.permute.xlu1 %6875 }
0x2c86   :  { %v6878_v1 = vsub.f32 %v13355_v63, %v6876_v53 }
0x2c95   :  { %8131 = vadd.xlane.f32.xlu0 %v8130_v32 }
0x2c99   :  { %8137 = vadd.xlane.f32.xlu0 %v8136_v28 }
0x2c9d   :  { %8140 = vadd.xlane.f32.xlu0 %v8139_v6 }
0x2ca1   :  { %8146 = vadd.xlane.f32.xlu0 %v8145_v55 }
0x2ca5   :  { %8152 = vadd.xlane.f32.xlu0 %v8151_v19 }
0x2cd5   :  { %v8135_v58 = vpop.xlane.xlu1 %8134 }
0x2cd6   :  { %v8170_v10 = vrot.slane %v8135_v58, %v11553_v8 }
0x2cd9   :  { %v8144_v18 = vpop.xlane.xlu1 %8143 }
0x2cda   :  { %v8182_v26 = vrot.slane %v8144_v18, %v11553_v8 }
0x2ce8   :  { %v7460_v34 = vpop.permute.xlu0 %7459 }
0x2ce9   :  { %7463 = vst.msk [vmem:[#allocation3 + $0x30] sm:$0xff] %vm155_vm1, %v7460_v34  ;;  %7464 = vst.msk [vmem:[#allocation4] sm:$0xff] %vm155_vm1, %v7460_v34 }
0x2cf0   :  { %v13633_v47 = vld [vmem:[#allocation3 + $0x30] sm:$0xff] }
0x2cf1   :  { %v8128_v33 = vmul.f32 %v8118_v3, %v13633_v47 }
0x2cf3   :  { %v8148_v5 = vsel %vm155_vm1, %v8128_v33, 0.0 }
0x2cf4   :  { %8149 = vadd.xlane.f32.xlu1 %v8148_v5 }
0x2d05   :  { %6880 = vrot.lane.b32.xlu1 %v6878_v1, %s10944_s0 }
0x2d1e   :  { %v8132_v21 = vpop.xlane.xlu0 %8131 }
0x2d1f   :  { %v8166_v20 = vrot.slane %v8132_v21, %v11553_v8 }
0x2d21   :  { %v8195_v14 = vsel %vm349_vm3, %v8170_v10, %v8166_v20  ;;  %vm8154_vm3 = vcmp.lt.s32.totalorder %v11121_v27, 7 }
0x2d22   :  { %v8138_v11 = vpop.xlane.xlu0 %8137 }
0x2d23   :  { %v8174_v22 = vrot.slane %v8138_v11, %v11553_v8 }
0x2d25   :  { %v8196_v63 = vsel %vm351_vm4, %v8174_v22, %v8195_v14 }
0x2d26   :  { %v8141_v59 = vpop.xlane.xlu0 %8140 }
0x2d27   :  { %v8178_v61 = vrot.slane %v8141_v59, %v11553_v8 }
0x2d29   :  { %v8197_v62 = vsel %vm353_vm5, %v8178_v61, %v8196_v63 }
0x2d2a   :  { %v8147_v3 = vpop.xlane.xlu0 %8146  ;;  %v8198_v39 = vsel %vm355_vm6, %v8182_v26, %v8197_v62  ;;  %v9304_v26 = vld [vmem:[%s13940_s23 + $0x38] sm:$0xff] }
0x2d2b   :  { %v8186_v23 = vrot.slane %v8147_v3, %v11553_v8 }
0x2d2d   :  { %v8199_v16 = vsel %vm357_vm7, %v8186_v23, %v8198_v39 }
0x2d2e   :  { %v8153_v54 = vpop.xlane.xlu0 %8152 }
0x2d2f   :  { %v8194_v28 = vrot.slane %v8153_v54, %v11553_v8 }
0x2d7d   :  { %v8150_v0 = vpop.xlane.xlu1 %8149 }
0x2d7e   :  { %v8190_v32 = vrot.slane %v8150_v0, %v11553_v8 }
0x2d80   :  { %v8200_v38 = vsel %vm359_vm8, %v8190_v32, %v8199_v16 }
0x2d81   :  { %v8201_v6 = vsel %vm361_vm9, %v8194_v28, %v8200_v38  ;;  %v6881_v25 = vpop.permute.xlu1 %6880 }
0x2d82   :  { %v8203_v9 = vsel %vm8154_vm3, %v8201_v6, -1e+30  ;;  %v6883_v55 = vmul.f32 %v13581_v52, %v6881_v25 }
0x2d83   :  { %v8204_v19 = vsel %vm365_vm0, %v8203_v9, -inf }
0x2d84   :  { %v8205_v34 = vrot.slane %v8204_v19, 4  ;;  %6885 = vrot.lane.b32.xlu0 %v6883_v55, %s10944_s0 }
0x2d86   :  { %v8206_v33 = vmax.f32 %v8204_v19, %v8205_v34 }
0x2d88   :  { %v8207_v5 = vrot.slane %v8206_v33, 2 }
0x2d8a   :  { %v8208_v53 = vmax.f32 %v8206_v33, %v8207_v5 }
0x2d8c   :  { %v8209_v1 = vrot.slane %v8208_v53, 1 }
0x2d8e   :  { %v8210_v8 = vmax.f32 %v8208_v53, %v8209_v1 }
0x2d90   :  { %v8211_v21 = vsub.f32 %v8203_v9, %v8210_v8  ;;  %v10755_v9 = vld [vmem:[#allocation3 + $0x18] sm:$0xff] }
0x2d92   :  { %v8212_v27 = vmul.f32 1.442695, %v8211_v21 }
0x2d94   :  { %10709 = vpow2.f32 %v8212_v27 }
0x2da1   :  { %v10710_v11 = vpop.eup %10709 }
0x2da2   :  { %v8214_v59 = vsel %vm365_vm0, %v10710_v11, 0.0 }
0x2da3   :  { %v8215_v58 = vrot.slane %v8214_v59, 4 }
0x2da5   :  { %v8216_v20 = vadd.f32 %v8215_v58, %v8214_v59  ;;  %v10757_v58 = vld [vmem:[#allocation3 + $0x38] sm:$0xff] }
0x2da7   :  { %v8217_v22 = vrot.slane %v8216_v20, 2 }
0x2da9   :  { %v8218_v52 = vadd.f32 %v8217_v22, %v8216_v20 }
0x2dab   :  { %v8219_v10 = vrot.slane %v8218_v52, 1 }
0x2dad   :  { %v8220_v61 = vadd.f32 %v8219_v10, %v8218_v52 }
0x2daf   :  { %10711 = vrcp.f32 %v8220_v61 }
0x2dbc   :  { %v10712_v3 = vpop.eup %10711 }
0x2dbd   :  { %v8222_v18 = vmul.f32 %v10712_v3, %v10710_v11  ;;  %v13704_v3 = vld [vmem:[#allocation2] sm:$0xff] }
0x2dbf   :  { %v8233_v14 = vrot.slane %v8222_v18, %v11160_v36  ;;  %v8247_v63 = vrot.slane %v8222_v18, %v11157_v35  ;;  %v8261_v62 = vrot.slane %v8222_v18, %v11182_v43  ;;  %v8275_v23 = vrot.slane %v8222_v18, %v11205_v49 }
0x2dc0   :  { %v8226_v36 = vrot.slane %v8222_v18, %v11147_v31  ;;  %v8240_v35 = vrot.slane %v8222_v18, %v11144_v30  ;;  %v8254_v43 = vrot.slane %v8222_v18, %v11185_v44  ;;  %v8268_v49 = vrot.slane %v8222_v18, %v11208_v50  ;;  %v10754_v30 = vld [vmem:[#allocation3 + $0x8] sm:$0xff]  ;;  %v13714_v18 = vld [vmem:[#allocation2 + $0x8] sm:$0xff] }
0x2dc1   :  { %8235 = vbcast.lane.b32.xlu0 %v8233_v14, 256 }
0x2dc5   :  { %8249 = vbcast.lane.b32.xlu0 %v8247_v63, 256 }
0x2dc9   :  { %8263 = vbcast.lane.b32.xlu0 %v8261_v62, 256  ;;  %v14036_v62 = vld [vmem:[#allocation24_spill] sm:$0xff] }
0x2dcd   :  { %8277 = vbcast.lane.b32.xlu0 %v8275_v23, 256 }
0x2dd1   :  { %8032 = vperm.xlu0 %10518, %v9304_v26  }
0x2df6   :  { %v6886_v54 = vpop.permute.xlu0 %6885 }
0x2df7   :  { %v6888_v0 = vadd.f32 %v13603_v24, %v6886_v54  ;;  %v14039_v54 = vld [vmem:[#allocation28_spill] sm:$0xff] }
0x2df9   :  { %6890 = vrot.lane.b32.xlu1 %v6888_v0, %s10943_s6  ;;  %v14040_v0 = vld [vmem:[#allocation26_spill] sm:$0xff] }
0x2dfd   :  { %8228 = vbcast.lane.b32.xlu1 %v8226_v36, 256  ;;  %v13740_v36 = vld [vmem:[#allocation4] sm:$0xff] }
0x2e01   :  { %8242 = vbcast.lane.b32.xlu1 %v8240_v35, 256  ;;  %v14041_v35 = vld [vmem:[#allocation29_spill] sm:$0xff] }
0x2e05   :  { %8256 = vbcast.lane.b32.xlu1 %v8254_v43, 256  ;;  %v14042_v43 = vld [vmem:[#allocation30_spill] sm:$0xff] }
0x2e09   :  { %8270 = vbcast.lane.b32.xlu1 %v8268_v49, 256  ;;  %v14043_v49 = vld [vmem:[#allocation31_spill] sm:$0xff] }
0x2e0d   :  { %8026 = vperm.xlu1 %10517, %v9304_v26   ;;  %v14038_v26 = vld [vmem:[#allocation25_spill] sm:$0xff] }
0x2e33   :  { %v8236_v39 = vpop.permute.xlu0 %8235 }
0x2e34   :  { %v8280_v16 = vmul.f32 %v10754_v30, %v8236_v39  ;;  %v14044_v39 = vld [vmem:[#allocation32_spill] sm:$0xff] }
0x2e36   :  { %v8288_v25 = vsel %vm155_vm1, %v8280_v16, 0.0 }
0x2e37   :  { %v8250_v31 = vpop.permute.xlu0 %8249 }
0x2e38   :  { %v8282_v55 = vmul.f32 %v10755_v9, %v8250_v31 }
0x2e3a   :  { %v8292_v53 = vsel %vm155_vm1, %v8282_v55, 0.0 }
0x2e3b   :  { %v8264_v50 = vpop.permute.xlu0 %8263 }
0x2e6b   :  { %v6891_v32 = vpop.permute.xlu1 %6890 }
0x2e6c   :  { %6893 = vst.msk [vmem:[#allocation5] sm:$0xff] %vm155_vm1, %v6891_v32  ;;  %9279 = vst.msk [vmem:[%s13866_s17 + $0x28] sm:$0xff] %vm155_vm1, %v6891_v32 }
0x2e6f   :  { %v8229_v24 = vpop.permute.xlu1 %8228 }
0x2e70   :  { %v8279_v44 = vmul.f32 %v8229_v24, %v13617_v42 }
0x2e72   :  { %v8287_v28 = vsel %vm155_vm1, %v8279_v44, 0.0  ;;  %v14045_v44 = vld [vmem:[#allocation33_spill] sm:$0xff] }
0x2e73   :  { %v8243_v38 = vpop.permute.xlu1 %8242  ;;  %v13679_v6 = vld [vmem:[#allocation5] sm:$0xff]  ;;  %v8289_v34 = vadd.f32 %v8288_v25, %v8287_v28 }
0x2e74   :  { %v8281_v19 = vmul.f32 %v8243_v38, %v13620_v40  ;;  %10385 = vmatmul.mubr.msk.f32.vlgmr.msra.gmra.mxu0 %vm155_vm1, %v13679_v6  ;;  %v10756_v40 = vld [vmem:[#allocation3 + $0x28] sm:$0xff] }
0x2e75   :  { %10399 = vmatpush3.msra.mxu0 %v13352_v57  ;;  %10406 = vmatprep.mubr.msk.f32.mxu0 %vm10942_vm2, %v13949_v4  ;;  %v8284_v1 = vmul.f32 %v10756_v40, %v8264_v50  ;;  %v8278_v57 = vpop.permute.xlu0 %8277 }
0x2e76   :  { %v8290_v42 = vsel %vm155_vm1, %v8281_v19, 0.0  ;;  %10400 = vmatprep.subr.mxu0 %v13949_v4  ;;  %v8286_v20 = vmul.f32 %v10757_v58, %v8278_v57  ;;  %v13778_v19 = vld [vmem:[#allocation14] ss:$0 sm:$0xff] }
0x2e77   :  { %v8291_v33 = vadd.f32 %v8290_v42, %v8289_v34  ;;  %v8257_v5 = vpop.permute.xlu1 %8256  ;;  %10401 = vmatpush3.msra.mxu0 %v13363_v60  ;;  %v8296_v60 = vsel %vm155_vm1, %v8284_v1, 0.0  ;;  %v7889_v34 = vadd.f32 %v13778_v19, %v13607_v2 }
0x2e78   :  { %v8283_v8 = vmul.f32 %v8257_v5, %v13610_v56  ;;  %10402 = vmatprep.subr.mxu0 %v13949_v4  ;;  %v8300_v10 = vsel %vm155_vm1, %v8286_v20, 0.0 }
0x2e79   :  { %v8293_v21 = vadd.f32 %v8292_v53, %v8291_v33  ;;  %10403 = vmatpush3.msra.mxu0 %v13376_v48 }
0x2e7a   :  { %v8294_v27 = vsel %vm155_vm1, %v8283_v8, 0.0  ;;  %10404 = vmatprep.subr.mxu0 %v13949_v4 }
0x2e7b   :  { %v8295_v11 = vadd.f32 %v8294_v27, %v8293_v21  ;;  %v8271_v59 = vpop.permute.xlu1 %8270  ;;  %10405 = vmatpush3.msra.mxu0 %v13387_v15  ;;  %v13710_v15 = vpop.permute.xlu0 %8032 }
0x2e7c   :  { %v8285_v56 = vmul.f32 %v8271_v59, %v13633_v47  ;;  %10420 = vmatprep.subr.mxu0 %v13949_v4  ;;  %v14035_v47 = vld [vmem:[#allocation39_spill] sm:$0xff] }
0x2e7d   :  { %v8297_v22 = vadd.f32 %v8296_v60, %v8295_v11 }
0x2e7e   :  { %v8298_v52 = vsel %vm155_vm1, %v8285_v56, 0.0 }
0x2e7f   :  { %v8299_v48 = vadd.f32 %v8298_v52, %v8297_v22 }
0x2e81   :  { %v8301_v61 = vadd.f32 %v8300_v10, %v8299_v48 }
0x2e83   :  { %10440 = vmatmul.mubr.msk.f32.vlgmr.msra.gmra.mxu1 %vm155_vm1, %v8301_v61 }
0x2e84   :  { %10454 = vmatpush3.msra.mxu1 %v13282_v45  ;;  %10461 = vmatprep.mubr.msk.f32.mxu1 %vm155_vm1, %v13704_v3  ;;  %v8035_v45 = vmul.f32 %v13710_v15, %v13714_v18 }
0x2e85   :  { %10455 = vmatprep.subr.mxu1 %v13329_v51 }
0x2e86   :  { %10456 = vmatpush3.msra.mxu1 %v13329_v51  ;;  %v14037_v51 = vld [vmem:[#allocation27_spill] sm:$0xff] }
0x2e87   :  { %10457 = vmatprep.subr.mxu1 %v14035_v47 }
0x2e88   :  { %10458 = vmatpush3.msra.mxu1 %v14035_v47  ;;  %v13717_v14 = vpop.permute.xlu1 %8026 }
0x2e89   :  { %v8029_v63 = vmul.f32 %v13717_v14, %v13704_v3  ;;  %10459 = vmatprep.subr.mxu1 %v14036_v62 }
0x2e8a   :  { %10460 = vmatpush3.msra.mxu1 %v14036_v62 }
0x2e8b   :  { %v8036_v23 = vadd.f32 %v8035_v45, %v8029_v63  ;;  %10462 = vmatmul.mubr.msk.f32.vlgmr.msra.gmra.mxu1 %vm155_vm1, %v13714_v18  ;;  %10475 = vmatprep.subr.mxu1 %v13949_v4 }
0x2e8c   :  { %10483 = vmatprep.mubr.msk.f32.mxu1 %vm10942_vm2, %v13949_v4 }
0x2e8d   :  { %10407 = vmatmul.mubr.msk.f32.vlgmr.msra.gmra.mxu0 %vm155_vm1, %v8036_v23 }
0x2e8e   :  { %10421 = vmatpush3.msra.mxu0 %v14037_v51  ;;  %10428 = vmatprep.mubr.msk.f32.mxu0 %vm10942_vm2, %v13949_v4 }
0x2e8f   :  { %10422 = vmatprep.subr.mxu0 %v13949_v4 }
0x2e90   :  { %10423 = vmatpush3.msra.mxu0 %v14038_v26 }
0x2e91   :  { %10424 = vmatprep.subr.mxu0 %v13949_v4 }
0x2e92   :  { %10425 = vmatpush3.msra.mxu0 %v14039_v54 }
0x2e93   :  { %10426 = vmatprep.subr.mxu0 %v13949_v4 }
0x2e94   :  { %10427 = vmatpush3.msra.mxu0 %v14040_v0 }
0x2e95   :  { %10429 = vmatmul.mubr.msk.f32.vlgmr.msra.gmra.mxu0 %vm155_vm1, %v13740_v36  ;;  %10442 = vmatprep.subr.mxu0 %v13949_v4 }
0x2e96   :  { %10443 = vmatpush3.msra.mxu0 %v14041_v35  ;;  %10450 = vmatprep.mubr.msk.f32.mxu0 %vm10942_vm2, %v13949_v4 }
0x2e97   :  { %10444 = vmatprep.subr.mxu0 %v13949_v4 }
0x2e98   :  { %10445 = vmatpush3.msra.mxu0 %v14042_v43 }
0x2e99   :  { %10446 = vmatprep.subr.mxu0 %v13949_v4 }
0x2e9a   :  { %10447 = vmatpush3.msra.mxu0 %v14043_v49 }
0x2e9b   :  { %10448 = vmatprep.subr.mxu0 %v13949_v4 }
0x2e9c   :  { %10449 = vmatpush3.msra.mxu0 %v14044_v39 }
0x2e9d   :  { %10451 = vmatmul.mubr.msk.f32.vlgmr.msra.gmra.mxu0 %vm155_vm1, %v13566_v13  ;;  %10464 = vmatprep.subr.mxu0 %v13949_v4  ;;  %v13766_v13 = vpop.f32.mrf.mxu1 }
0x2e9e   :  { %10465 = vmatpush3.msra.mxu0 %v13518_v46  ;;  %10472 = vmatprep.mubr.msk.f32.mxu0 %vm10942_vm2, %v13949_v4 }
0x2e9f   :  { %10466 = vmatprep.subr.mxu0 %v13949_v4  ;;  %v10419_v32 = vpop.f32.mrf.mxu1 }
0x2ea0   :  { %10467 = vmatpush3.msra.mxu0 %v13522_v41 }
0x2ea1   :  { %10468 = vmatprep.subr.mxu0 %v13949_v4 }
0x2ea2   :  { %10469 = vmatpush3.msra.mxu0 %v13526_v29 }
0x2ea3   :  { %10470 = vmatprep.subr.mxu0 %v13949_v4 }
0x2ea4   :  { %10471 = vmatpush3.msra.mxu0 %v13530_v17 }
0x2f34   :  { %v7972_v31 = vpop.f32.mrf.mxu0 }
0x2f35   :  { %v7973_v46 = vadd.f32 %v13540_v7, %v7972_v31 }
0x2f36   :  { %v10386_v24 = vpop.f32.mrf.mxu0 }
0x2f37   :  { %7984 = vrot.lane.b32.xlu1 %v7973_v46, %s10943_s6  ;;  %v7976_v42 = vadd.f32 %v7973_v46, %v7889_v34 }
0x2f39   :  { %v9301_v33 = vmul.f32 -1.442695, %v7976_v42 }
0x2f3b   :  { %10713 = vpow2.f32 %v9301_v33 }
0x2f43   :  { %v8662_v30 = vpop.f32.mrf.mxu1 }
0x2f45   :  { %v10441_v16 = vpop.f32.mrf.mxu1 }
0x2f48   :  { %v10714_v40 = vpop.eup %10713 }
0x2f49   :  { %v7980_v8 = vadd.f32 1.0, %v10714_v40 }
0x2f4b   :  { %v10463_v41 = vpop.f32.mrf.mxu1  ;;  %10715 = vrcp.f32 %v7980_v8 }
0x2f4c   :  { %v8833_v28 = vadd.f32 %v10463_v41, %v14045_v44 }
0x2f4d   :  { %v8827_v50 = vpop.f32.mrf.mxu1  ;;  %v13771_v29 = vpop.f32.mrf.mxu0 }
0x2f4e   :  { %v8828_v38 = vadd.f32 %v14045_v44, %v8827_v50  ;;  %8854 = vrot.lane.b32.xlu0 %v8833_v28, %s10943_s6  ;;  %v9015_v44 = vld [vmem:[#allocation13 + $0x18] sm:$0xff]  ;;  %v9013_v50 = vld [vmem:[#allocation13 + $0x8] sm:$0xff] }
0x2f4f   :  { %v10408_v17 = vpop.f32.mrf.mxu0  ;;  %10476 = vmatpush3.msra.mxu1 %v9015_v44 }
0x2f50   :  { %8852 = vrot.lane.b32.xlu1 %v8828_v38, %s10943_s6  ;;  %10477 = vmatprep.subr.mxu1 %v13949_v4 }
0x2f55   :  { %v13776_v25 = vpop.f32.mrf.mxu0 }
0x2f57   :  { %v10430_v7 = vpop.f32.mrf.mxu0 }
0x2f58   :  { %v10716_v11 = vpop.eup %10715 }
0x2f5d   :  { %v8732_v9 = vpop.f32.mrf.mxu0 }
0x2f5e   :  { %v8733_v5 = vadd.f32 %v8732_v9, %v8662_v30 }
0x2f5f   :  { %v10452_v55 = vpop.f32.mrf.mxu0 }
0x2f60   :  { %v8743_v53 = vadd.f32 %v13490_v12, %v8733_v5 }
0x2f62   :  { %v8837_v1 = vadd.f32 %v8833_v28, %v8743_v53  ;;  %v8836_v57 = vadd.f32 %v8828_v38, %v8743_v53  ;;  %v9014_v28 = vld [vmem:[#allocation13 + $0x10] sm:$0xff]  ;;  %v9012_v38 = vld [vmem:[#allocation13] sm:$0xff] }
0x2f63   :  { %10478 = vmatpush3.msra.mxu1 %v9014_v28 }
0x2f64   :  { %v9319_v21 = vmul.f32 -1.442695, %v8837_v1  ;;  %v9318_v27 = vmul.f32 -1.442695, %v8836_v57  ;;  %10479 = vmatprep.subr.mxu1 %v13949_v4  ;;  %v8450_v57 = vadd.f32 %v13766_v13, %v13771_v29 }
0x2f65   :  { %10480 = vmatpush3.msra.mxu1 %v9013_v50 }
0x2f66   :  { %10717 = vpow2.f32 %v9319_v21  ;;  %10481 = vmatprep.subr.mxu1 %v13949_v4  ;;  %v8542_v4 = vadd.f32 %v13500_v37, %v13776_v25  ;;  %v14046_v21 = vld [vmem:[#allocation34_spill] sm:$0xff] }
0x2f67   :  { %10719 = vpow2.f32 %v9318_v27  ;;  %10482 = vmatpush3.msra.mxu1 %v9012_v38  ;;  %v8460_v27 = vadd.f32 %v14046_v21, %v8450_v57 }
0x2f73   :  { %v10718_v58 = vpop.eup %10717 }
0x2f74   :  { %v10720_v2 = vpop.eup %10719  ;;  %v8845_v20 = vadd.f32 1.0, %v10718_v58 }
0x2f75   :  { %v8844_v56 = vadd.f32 1.0, %v10720_v2 }
0x2f76   :  { %10721 = vrcp.f32 %v8845_v20 }
0x2f77   :  { %10723 = vrcp.f32 %v8844_v56 }
0x2f83   :  { %v10722_v12 = vpop.eup %10721 }
0x2f84   :  { %v10724_v48 = vpop.eup %10723 }
0x2fa9   :  { %v7985_v59 = vpop.permute.xlu1 %7984 }
0x2faa   :  { %v7987_v60 = vmul.f32 %v10716_v11, %v7985_v59 }
0x2fac   :  { %7989 = vrot.lane.b32.xlu1 %v7987_v60, %s10943_s6 }
0x2fc0   :  { %v8855_v22 = vpop.permute.xlu0 %8854 }
0x2fc1   :  { %v8859_v52 = vmul.f32 %v10722_v12, %v8855_v22 }
0x2fc2   :  { %v8853_v10 = vpop.permute.xlu1 %8852 }
0x2fc3   :  { %v8858_v61 = vmul.f32 %v10724_v48, %v8853_v10  ;;  %8864 = vrot.lane.b32.xlu1 %v8859_v52, %s10943_s6 }
0x2fc5   :  { %8862 = vrot.lane.b32.xlu0 %v8858_v61, %s10943_s6 }
0x301e   :  { %v7990_v47 = vpop.permute.xlu1 %7989 }
0x301f   :  { %v7992_v45 = vadd.f32 %v7990_v47, %v7889_v34 }
0x3021   :  { %10725 = vtanh.f32 %v7992_v45 }
0x302e   :  { %v10726_v63 = vpop.eup %10725 }
0x302f   :  { %7995 = vrot.lane.b32.xlu0 %v10726_v63, %s10943_s6 }
0x3035   :  { %v8865_v62 = vpop.permute.xlu1 %8864 }
0x3036   :  { %v8869_v23 = vadd.f32 %v8865_v62, %v8743_v53 }
0x3037   :  { %v8863_v51 = vpop.permute.xlu0 %8862 }
0x3038   :  { %10727 = vtanh.f32 %v8869_v23  ;;  %v8868_v26 = vadd.f32 %v8863_v51, %v8743_v53 }
0x303a   :  { %10729 = vtanh.f32 %v8868_v26 }
0x3045   :  { %v10728_v54 = vpop.eup %10727 }
0x3046   :  { %8876 = vrot.lane.b32.xlu0 %v10728_v54, %s10943_s6 }
0x3047   :  { %v10730_v0 = vpop.eup %10729 }
0x3048   :  { %8874 = vrot.lane.b32.xlu1 %v10730_v0, %s10943_s6 }
0x30a1   :  { %v7996_v35 = vpop.permute.xlu0 %7995 }
0x30a2   :  { %v7998_v43 = vsub.f32 %v13679_v6, %v7996_v35 }
0x30a4   :  { %8000 = vrot.lane.b32.xlu1 %v7998_v43, %s10944_s0 }
0x30b8   :  { %v8877_v49 = vpop.permute.xlu0 %8876 }
0x30b9   :  { %v8881_v39 = vsub.f32 %v13714_v18, %v8877_v49 }
0x30ba   :  { %v8875_v32 = vpop.permute.xlu1 %8874 }
0x30bb   :  { %v8880_v31 = vsub.f32 %v13704_v3, %v8875_v32  ;;  %8886 = vrot.lane.b32.xlu1 %v8881_v39, %s10944_s0 }
0x30bd   :  { %8884 = vrot.lane.b32.xlu0 %v8880_v31, %s10944_s0 }
0x3116   :  { %v8001_v46 = vpop.permute.xlu1 %8000 }
0x3117   :  { %v8003_v24 = vmul.f32 %v10716_v11, %v8001_v46  ;;  %v8545_v11 = vadd.f32 %v8542_v4, %v8460_v27 }
0x3119   :  { %8005 = vrot.lane.b32.xlu0 %v8003_v24, %s10944_s0  ;;  %v9311_v59 = vmul.f32 -1.442695, %v8545_v11 }
0x311b   :  { %10731 = vpow2.f32 %v9311_v59 }
0x3128   :  { %v10732_v37 = vpop.eup %10731 }
0x3129   :  { %v8549_v25 = vadd.f32 1.0, %v10732_v37 }
0x312b   :  { %10733 = vrcp.f32 %v8549_v25 }
0x312d   :  { %v8887_v30 = vpop.permute.xlu1 %8886 }
0x312e   :  { %v8891_v16 = vmul.f32 %v10722_v12, %v8887_v30 }
0x312f   :  { %v8885_v41 = vpop.permute.xlu0 %8884 }
0x3130   :  { %v8890_v6 = vmul.f32 %v10724_v48, %v8885_v41  ;;  %8896 = vrot.lane.b32.xlu0 %v8891_v16, %s10944_s0 }
0x3132   :  { %8894 = vrot.lane.b32.xlu1 %v8890_v6, %s10944_s0 }
0x3134   :  { %8914 = vrot.lane.b32.xlu0 %v13714_v18, %s10943_s6 }
0x3136   :  { %8902 = vrot.lane.b32.xlu1 %v13704_v3, %s10943_s6 }
0x3138   :  { %v10734_v22 = vpop.eup %10733 }
0x318b   :  { %v8006_v17 = vpop.permute.xlu0 %8005 }
0x318c   :  { %v8008_v7 = vadd.f32 %v10726_v63, %v8006_v17 }
0x318e   :  { %8010 = vrot.lane.b32.xlu1 %v8008_v7, %s10943_s6 }
0x31a2   :  { %v8897_v9 = vpop.permute.xlu0 %8896 }
0x31a3   :  { %v8901_v34 = vadd.f32 %v10728_v54, %v8897_v9 }
0x31a4   :  { %v8895_v55 = vpop.permute.xlu1 %8894 }
0x31a5   :  { %v8900_v33 = vadd.f32 %v10730_v0, %v8895_v55 }
0x31a6   :  { %v8915_v42 = vpop.permute.xlu0 %8914 }
0x31a7   :  { %v8917_v5 = vsub.f32 %v8901_v34, %v8915_v42 }
0x31a8   :  { %v8903_v53 = vpop.permute.xlu1 %8902 }
0x31a9   :  { %v8918_v40 = vmul.f32 %v8917_v5, %v13710_v15  ;;  %v8905_v1 = vsub.f32 %v8900_v33, %v8903_v53 }
0x31ab   :  { %v8906_v8 = vmul.f32 %v8905_v1, %v13717_v14  ;;  %8920 = vrot.lane.b32.xlu1 %v8918_v40, %s10943_s6 }
0x31ad   :  { %8908 = vrot.lane.b32.xlu0 %v8906_v8, %s10943_s6 }
0x31b1   :  { %8553 = vrot.lane.b32.xlu0 %v8542_v4, %s10943_s6 }
0x3200   :  { %v8011_v60 = vpop.permute.xlu1 %8010 }
0x3201   :  { %8013 = vst.msk [vmem:[#allocation5] sm:$0xff] %vm155_vm1, %v8011_v60  ;;  %9302 = vst.msk [vmem:[%s13866_s17 + $0x30] sm:$0xff] %vm155_vm1, %v8011_v60 }
0x3208   :  { %v8023_v58 = vld [vmem:[#allocation5] sm:$0xff] }
0x3209   :  { %10484 = vmatmul.mubr.msk.f32.vlgmr.msra.gmra.mxu1 %vm155_vm1, %v8023_v58 }
0x321d   :  { %v8921_v13 = vpop.permute.xlu1 %8920 }
0x321e   :  { %v8923_v29 = vadd.f32 %v8921_v13, %v13714_v18 }
0x321f   :  { %v8909_v2 = vpop.permute.xlu0 %8908 }
0x3220   :  { %8927 = vst.msk [vmem:[#allocation2 + $0x8] sm:$0xff] %vm155_vm1, %v8923_v29  ;;  %v8911_v20 = vadd.f32 %v8909_v2, %v13704_v3  ;;  %v8924_v56 = vmul.f32 %v8923_v29, %v13710_v15  ;;  %v9322_v3 = vld [vmem:[#allocation16] ss:$0 sm:$0xff] }
0x3222   :  { %v8912_v12 = vmul.f32 %v8911_v20, %v13717_v14  ;;  %8926 = vst.msk [vmem:[#allocation2] sm:$0xff] %vm155_vm1, %v8911_v20 }
0x3223   :  { %v8554_v52 = vpop.permute.xlu0 %8553 }
0x3224   :  { %v8925_v48 = vadd.f32 %v8924_v56, %v8912_v12  ;;  %v8556_v10 = vmul.f32 %v10734_v22, %v8554_v52 }
0x3226   :  { %10473 = vmatmul.mubr.msk.f32.vlgmr.msra.gmra.mxu0 %vm155_vm1, %v8925_v48  ;;  %8558 = vrot.lane.b32.xlu0 %v8556_v10, %s10943_s6 }
0x3298   :  { %v8559_v18 = vpop.permute.xlu0 %8558 }
0x3299   :  { %v8561_v61 = vadd.f32 %v8559_v18, %v8460_v27 }
0x329b   :  { %10735 = vtanh.f32 %v8561_v61 }
0x32a8   :  { %v10736_v47 = vpop.eup %10735 }
0x32a9   :  { %8564 = vrot.lane.b32.xlu0 %v10736_v47, %s10943_s6 }
0x32c9   :  { %v9092_v15 = vpop.f32.mrf.mxu1 }
0x32ca   :  { %v9093_v45 = vadd.f32 %v9322_v3, %v9092_v15 }
0x32cb   :  { %v10485_v14 = vpop.f32.mrf.mxu1 }
0x32cc   :  { %9104 = vrot.lane.b32.xlu1 %v9093_v45, %s10943_s6 }
0x32e6   :  { %v9008_v63 = vpop.f32.mrf.mxu0 }
0x32e7   :  { %v9009_v23 = vadd.f32 %v13778_v19, %v9008_v63 }
0x32e8   :  { %v10474_v62 = vpop.f32.mrf.mxu0 }
0x32e9   :  { %v9096_v51 = vadd.f32 %v9093_v45, %v9009_v23 }
0x32eb   :  { %v9324_v26 = vmul.f32 -1.442695, %v9096_v51 }
0x32ed   :  { %10737 = vpow2.f32 %v9324_v26 }
0x32fa   :  { %v10738_v35 = vpop.eup %10737 }
0x32fb   :  { %v9100_v43 = vadd.f32 1.0, %v10738_v35 }
0x32fd   :  { %10739 = vrcp.f32 %v9100_v43 }
0x330a   :  { %v10740_v49 = vpop.eup %10739 }
0x331b   :  { %v8565_v54 = vpop.permute.xlu0 %8564 }
0x331c   :  { %v8567_v0 = vsub.f32 %v13740_v36, %v8565_v54 }
0x331e   :  { %8569 = vrot.lane.b32.xlu0 %v8567_v0, %s10944_s0 }
0x333e   :  { %v9105_v39 = vpop.permute.xlu1 %9104 }
0x333f   :  { %v9107_v32 = vmul.f32 %v10740_v49, %v9105_v39 }
0x3341   :  { %9109 = vrot.lane.b32.xlu1 %v9107_v32, %s10943_s6 }
0x3390   :  { %v8570_v31 = vpop.permute.xlu0 %8569 }
0x3391   :  { %v8572_v46 = vmul.f32 %v10734_v22, %v8570_v31 }
0x3393   :  { %8574 = vrot.lane.b32.xlu0 %v8572_v46, %s10944_s0 }
0x33b3   :  { %v9110_v19 = vpop.permute.xlu1 %9109 }
0x33b4   :  { %v9112_v24 = vadd.f32 %v9110_v19, %v9009_v23 }
0x33b6   :  { %10741 = vtanh.f32 %v9112_v24 }
0x33c3   :  { %v10742_v30 = vpop.eup %10741 }
0x33c4   :  { %9115 = vrot.lane.b32.xlu1 %v10742_v30, %s10943_s6 }
0x3405   :  { %v8575_v36 = vpop.permute.xlu0 %8574 }
0x3406   :  { %v8577_v16 = vadd.f32 %v10736_v47, %v8575_v36 }
0x3408   :  { %8579 = vrot.lane.b32.xlu0 %v8577_v16, %s10943_s6 }
0x3436   :  { %v9116_v41 = vpop.permute.xlu1 %9115 }
0x3437   :  { %v9118_v6 = vsub.f32 %v8023_v58, %v9116_v41 }
0x3439   :  { %9120 = vrot.lane.b32.xlu1 %v9118_v6, %s10944_s0 }
0x347a   :  { %v8580_v44 = vpop.permute.xlu0 %8579 }
0x347b   :  { %8583 = vst.msk [vmem:[#allocation3 + $0x38] sm:$0xff] %vm155_vm1, %v8580_v44  ;;  %8584 = vst.msk [vmem:[#allocation4] sm:$0xff] %vm155_vm1, %v8580_v44 }
0x34ab   :  { %v9121_v28 = vpop.permute.xlu1 %9120 }
0x34ac   :  { %v9123_v50 = vmul.f32 %v10740_v49, %v9121_v28 }
0x34ae   :  { %9125 = vrot.lane.b32.xlu1 %v9123_v50, %s10944_s0 }
0x3520   :  { %v9126_v38 = vpop.permute.xlu1 %9125 }
0x3521   :  { %v9128_v17 = vadd.f32 %v10742_v30, %v9126_v38 }
0x3523   :  { %9130 = vrot.lane.b32.xlu1 %v9128_v17, %s10943_s6 }
0x3595   :  { %v9131_v7 = vpop.permute.xlu1 %9130 }
0x3596   :  { %9133 = vst.msk [vmem:[#allocation5] sm:$0xff] %vm155_vm1, %v9131_v7  ;;  %9325 = vst.msk [vmem:[%s13866_s17 + $0x38] sm:$0xff] %vm155_vm1, %v9131_v7 }
0x3597   :  { %9140 = vsyncpa [#allocation7], 1 }
0x3598   :  { %9141 = vsyncpa [#allocation9], 1 }
0x3599   :  { %9142 = vsyncpa [#allocation12], 1 }
0x359a   :  { %9143 = vsyncpa [#allocation15], 1 }
0x359b   :  { %9144 = vsyncpa [#allocation18], 1 }

</bundles_post_ra>
